<compile_context>
chip_gen: v7x
topology: tpu7x:2x2x1
jax: 0.10.0
libtpu: 0.0.40
codegen_flags: <defaults>
</compile_context>

<pallas_src>
import functools

import numpy as np
import jax
import jax.numpy as jnp
from jax.experimental import pallas as pl
from jax.experimental.pallas import tpu as pltpu

BN_EPS = 1e-5
LEAKY_SLOPE = 0.2


def _leaky(x):
    return jnp.where(x > 0, x, LEAKY_SLOPE * x)


# ----------------------- kernel 1: conv1 + LeakyReLU -----------------------

def _conv1_kernel(p_ref, w_ref, o_ref):
    # p_ref: (1, Cin*k*k, M) im2col patches of one batch element.
    # w_ref: (Cout, Cin*k*k).  Single lane-dense MXU matmul, f32 accumulate.
    y = jnp.dot(w_ref[...], p_ref[0], preferred_element_type=jnp.float32)
    o_ref[0] = _leaky(y)


def conv1_pallas(patches, w2d):
    b, kk, m = patches.shape
    cout = w2d.shape[0]
    return pl.pallas_call(
        _conv1_kernel,
        out_shape=jax.ShapeDtypeStruct((b, cout, m), jnp.float32),
        grid=(b,),
        in_specs=[pl.BlockSpec((1, kk, m), lambda i: (i, 0, 0)),
                  pl.BlockSpec((cout, kk), lambda i: (0, 0))],
        out_specs=pl.BlockSpec((1, cout, m), lambda i: (i, 0, 0)),
        compiler_params=pltpu.CompilerParams(
            dimension_semantics=("parallel",)),
    )(patches, w2d)


# -------------- kernel 2: fused conv2 ... sigmoid ("tail") -----------------

def _tail_kernel(p2_ref, w2_ref, g2_ref, b2_ref,
                 s3_ref, w3_ref, g3_ref, b3_ref,
                 s4_ref, w4_ref, g4_ref, b4_ref,
                 wlin_ref, capt_ref,
                 s5_ref, w5_ref, g5_ref, b5_ref,
                 w6_ref, o_ref, *, batch):
    f32 = jnp.float32

    def bn_leaky(ys, g, b):
        # PyTorch training-mode BatchNorm2d: batch mean, biased batch variance,
        # eps=1e-5.  One pass: sum and sum-of-squares per channel over (B, M).
        inv_m = 1.0 / (len(ys) * ys[0].shape[1])
        s1 = jnp.zeros((ys[0].shape[0], 1), f32)
        s2 = jnp.zeros((ys[0].shape[0], 1), f32)
        for y in ys:
            s1 = s1 + jnp.sum(y, axis=1, keepdims=True)
            s2 = s2 + jnp.sum(y * y, axis=1, keepdims=True)
        mean = s1 * inv_m
        var = jnp.maximum(s2 * inv_m - mean * mean, 0.0)
        scale = g * jax.lax.rsqrt(var + BN_EPS)
        shift = b - mean * scale
        return [_leaky(y * scale + shift) for y in ys]

    def gather(h, s_ref):
        # Build the (k*k*Cin, Mo) im2col patch matrix via 0/1 selection matmuls
        # (stride + zero-padding folded into the constant matrices).
        cols = [jnp.dot(h, s_ref[t], preferred_element_type=f32)
                for t in range(s_ref.shape[0])]
        return jnp.concatenate(cols, axis=0)

    # ---- c_block 2: conv(4x4, s2, p1) + BN + LeakyReLU (XLA-side patches) --
    y2 = [jnp.dot(w2_ref[...], p2_ref[bb], preferred_element_type=f32)
          for bb in range(batch)]
    h2 = bn_leaky(y2, g2_ref[...], b2_ref[...])                  # (C2, 256) each

    # ---- c_block 3 --------------------------------------------------------
    y3 = [jnp.dot(w3_ref[...], gather(h2[bb], s3_ref),
                  preferred_element_type=f32) for bb in range(batch)]
    h3 = bn_leaky(y3, g3_ref[...], b3_ref[...])                  # (C3, 64) each

    # ---- c_block 4 --------------------------------------------------------
    y4 = [jnp.dot(w4_ref[...], gather(h3[bb], s4_ref),
                  preferred_element_type=f32) for bb in range(batch)]
    h4 = bn_leaky(y4, g4_ref[...], b4_ref[...])                  # (C4, 16) each

    # ---- caption branch: ReLU(Linear), spatially-constant 4x4 map ----------
    cap = jnp.maximum(
        jnp.dot(wlin_ref[...], capt_ref[...], preferred_element_type=f32), 0.0)
    nz = cap.shape[0]                                            # (nz, B)
    lane = jax.lax.broadcasted_iota(jnp.int32, (nz, batch), 1)

    # ---- c_block 5 on concat([h4, cap_map]); cond stays in VMEM ------------
    y5 = []
    for bb in range(batch):
        cap_b = jnp.sum(jnp.where(lane == bb, cap, 0.0),
                        axis=1, keepdims=True)                   # (nz, 1)
        cap_map = jnp.broadcast_to(cap_b, (nz, h4[bb].shape[1])) # (nz, 16)
        cond = jnp.concatenate([h4[bb], cap_map], axis=0)        # (C4+nz, 16)
        y5.append(jnp.dot(w5_ref[...], gather(cond, s5_ref),
                          preferred_element_type=f32))
    h5 = bn_leaky(y5, g5_ref[...], b5_ref[...])                  # (C5, 16) each

    # ---- final 4x4 valid conv + overflow-safe sigmoid ----------------------
    out_lane = jax.lax.broadcasted_iota(jnp.int32, (1, batch), 1)
    acc = jnp.zeros((1, batch), f32)
    for bb in range(batch):
        v = jnp.sum(jnp.sum(w6_ref[...] * h5[bb], axis=1, keepdims=True),
                    axis=0, keepdims=True)                       # (1, 1)
        e = jnp.exp(-jnp.abs(v))
        sig = jnp.where(v >= 0, 1.0 / (1.0 + e), e / (1.0 + e))
        acc = acc + jnp.where(out_lane == bb, sig, 0.0)
    o_ref[...] = acc                                             # (1, B)


def _fullspec(shape):
    nd = len(shape)
    return pl.BlockSpec(tuple(shape), lambda i, _n=nd: (0,) * _n)


def tail_pallas(p2, prep, cap_t):
    b = p2.shape[0]
    args = (p2,
            prep["w2_2d"], prep["g2"], prep["b2"],
            prep["s3"], prep["w3_2d"], prep["g3"], prep["b3"],
            prep["s4"], prep["w4_2d"], prep["g4"], prep["b4"],
            prep["w_lin"], cap_t,
            prep["s5"], prep["w5_2d"], prep["g5"], prep["b5"],
            prep["w6_mat"])
    return pl.pallas_call(
        functools.partial(_tail_kernel, batch=b),
        out_shape=jax.ShapeDtypeStruct((1, b), jnp.float32),
        grid=(1,),
        in_specs=[_fullspec(a.shape) for a in args],
        out_specs=pl.BlockSpec((1, b), lambda i: (0, 0)),
        compiler_params=pltpu.CompilerParams(
            dimension_semantics=("arbitrary",)),
    )(*args)


# ------------------------------ host plumbing -------------------------------

def im2col_nchw(x, k, stride, pad):
    """(B, C, H, W) -> (B, C*k*k, Ho*Wo); row order (c, ki, kj) matches
    torch weight.reshape(cout, -1)."""
    b, c, h, w = x.shape
    if pad:
        x = jnp.pad(x, ((0, 0), (0, 0), (pad, pad), (pad, pad)))
    ho = (h + 2 * pad - k) // stride + 1
    wo = (w + 2 * pad - k) // stride + 1
    cols = []
    for i in range(k):
        for j in range(k):
            cols.append(x[:, :, i:i + stride * ho:stride,
                              j:j + stride * wo:stride])
    p = jnp.stack(cols, axis=2)                      # (B, C, k*k, Ho, Wo)
    return p.reshape(b, c * k * k, ho * wo), (ho, wo)


def make_selection(k, stride, pad, hi, wi, ho, wo):
    """0/1 selection matrices (k*k, hi*wi, ho*wo) implementing padded/strided
    patch extraction as matmuls; out-of-range taps contribute zero rows."""
    s = np.zeros((k * k, hi * wi, ho * wo), np.float32)
    for ki in range(k):
        for kj in range(k):
            t = ki * k + kj
            for oh in range(ho):
                ih = stride * oh + ki - pad
                if not 0 <= ih < hi:
                    continue
                for ow in range(wo):
                    iw = stride * ow + kj - pad
                    if not 0 <= iw < wi:
                        continue
                    s[t, ih * wi + iw, oh * wo + ow] = 1.0
    return jnp.asarray(s)


def prepare_params(params, img_hw=64):
    """One-time weight layout prep (done outside the per-call path)."""
    f32 = jnp.float32

    def tapmajor(w):        # (Cout, Cin, k, k) -> (Cout, k*k*Cin), tap-major
        co, ci, k, _ = w.shape
        return jnp.transpose(w, (0, 2, 3, 1)).reshape(co, k * k * ci).astype(f32)

    def col(v):
        return v.reshape(-1, 1).astype(f32)

    s1 = img_hw // 2   # 32 after conv1
    s2 = s1 // 2       # 16 after conv2
    s3 = s2 // 2       # 8  after conv3
    s4 = s3 // 2       # 4  after conv4

    c6 = params["w6"].shape[1]
    return {
        "w_lin": params["w_lin"].astype(f32),
        "w1_2d": params["w1"].reshape(params["w1"].shape[0], -1).astype(f32),
        "w2_2d": params["w2"].reshape(params["w2"].shape[0], -1).astype(f32),
        "g2": col(params["g2"]), "b2": col(params["b2"]),
        "w3_2d": tapmajor(params["w3"]),
        "g3": col(params["g3"]), "b3": col(params["b3"]),
        "w4_2d": tapmajor(params["w4"]),
        "g4": col(params["g4"]), "b4": col(params["b4"]),
        "w5_2d": tapmajor(params["w5"]),
        "g5": col(params["g5"]), "b5": col(params["b5"]),
        "w6_mat": params["w6"].reshape(c6, -1).astype(f32),
        "s3": make_selection(4, 2, 1, s2, s2, s3, s3),
        "s4": make_selection(4, 2, 1, s3, s3, s4, s4),
        "s5": make_selection(3, 1, 1, s4, s4, s4, s4),
    }


# ------------------------------ NetD forward --------------------------------

def netd_forward(prep, img, caption_vec):
    b = img.shape[0]
    # conv1 (+ LeakyReLU): Pallas matmul fed by XLA-side 64x64 im2col.
    p1, (h1h, h1w) = im2col_nchw(img.astype(jnp.float32), 4, 2, 1)  # (B,48,1024)
    h1 = conv1_pallas(p1, prep["w1_2d"])                            # (B,ndf,1024)
    h1 = h1.reshape(b, h1.shape[1], h1h, h1w)
    # conv2 patches (32x32 -> 16x16) XLA-side; the rest of the network is one
    # fused Pallas call that never writes intermediates to HBM.
    p2, _ = im2col_nchw(h1, 4, 2, 1)                                # (B,128,256)
    out = tail_pallas(p2, prep, caption_vec.T.astype(jnp.float32))  # (1, B)
    return out.reshape(b, 1, 1, 1)


# ------------------------------ params / main -------------------------------

def init_params(key, nz, ndf, cimg, edim):
    ks = jax.random.split(key, 15)
    n = lambda k, s: 0.05 * jax.random.normal(k, s, jnp.float32)
    g = lambda k, s: 1.0 + 0.1 * jax.random.normal(k, s, jnp.float32)
    bb = lambda k, s: 0.1 * jax.random.normal(k, s, jnp.float32)
    return {
        "w_lin": n(ks[0], (nz, edim)),
        "w1": n(ks[1], (ndf, cimg, 4, 4)),
        "w2": n(ks[2], (ndf * 2, ndf, 4, 4)),
        "g2": g(ks[3], (ndf * 2,)), "b2": bb(ks[4], (ndf * 2,)),
        "w3": n(ks[5], (ndf * 4, ndf * 2, 4, 4)),
        "g3": g(ks[6], (ndf * 4,)), "b3": bb(ks[7], (ndf * 4,)),
        "w4": n(ks[8], (ndf * 8, ndf * 4, 4, 4)),
        "g4": g(ks[9], (ndf * 8,)), "b4": bb(ks[10], (ndf * 8,)),
        "w5": n(ks[11], (ndf * 2, ndf * 8 + nz, 3, 3)),
        "g5": g(ks[12], (ndf * 2,)), "b5": bb(ks[13], (ndf * 2,)),
        "w6": n(ks[14], (1, ndf * 2, 4, 4)),
    }


if __name__ == "__main__":
    nz, ndf, channels_img, embedding_dim = 16, 8, 3, 32
    B = 2
    # img must be 64x64 so four stride-2 convs give the 4x4 map that matches
    # the hard-coded 4x4 caption tiling and the 4x4 valid output conv.
    key = jax.random.PRNGKey(0)
    kp, ki, kc = jax.random.split(key, 3)
    params = init_params(kp, nz, ndf, channels_img, embedding_dim)
    prep = prepare_params(params, img_hw=64)           # one-time weight prep
    img = jax.random.normal(ki, (B, channels_img, 64, 64), jnp.float32)
    caption_vec = jax.random.normal(kc, (B, embedding_dim), jnp.float32)

    out = jax.jit(netd_forward)(prep, img, caption_vec)
    out = jax.block_until_ready(out)

    assert out.shape == (B, 1, 1, 1), out.shape
    assert bool(jnp.all(jnp.isfinite(out)))
    assert bool(jnp.all((out > 0.0) & (out < 1.0)))
    print("KERNEL_OK")
</pallas_src>

<mosaic_0001>
module attributes {stable_mosaic.version = 11 : i64} {
  func.func @_conv1_kernel(%arg0: i32, %arg1: memref<1x48x1024xf32, #tpu.memory_space<vmem>>, %arg2: memref<8x48xf32, #tpu.memory_space<vmem>>, %arg3: memref<1x8x1024xf32, #tpu.memory_space<vmem>>) attributes {dimension_semantics = [#tpu.dimension_semantics<parallel>], iteration_bounds = array<i64: 2>, scalar_prefetch = 0 : i64, scratch_operands = 0 : i64, tpu.core_type = #tpu.core_type<tc>, window_params = [{transform_indices = @transform_0, window_bounds = array<i64: 1, 48, 1024>}, {pipeline_mode = #tpu.pipeline_mode<synchronous>, transform_indices = @transform_1, window_bounds = array<i64: 8, 48>}, {transform_indices = @transform_2, window_bounds = array<i64: 1, 8, 1024>}]} {
    %c0 = arith.constant 0 : index
    %c0_0 = arith.constant 0 : index
    %0 = vector.load %arg2[%c0, %c0_0] : memref<8x48xf32, #tpu.memory_space<vmem>>, vector<8x48xf32>
    %c0_1 = arith.constant 0 : index
    %c0_2 = arith.constant 0 : index
    %c0_3 = arith.constant 0 : index
    %1 = vector.load %arg1[%c0_1, %c0_2, %c0_3] : memref<1x48x1024xf32, #tpu.memory_space<vmem>>, vector<1x48x1024xf32>
    %2 = vector.shape_cast %1 : vector<1x48x1024xf32> to vector<48x1024xf32>
    %cst = arith.constant dense<0.000000e+00> : vector<8x1024xf32>
    %3 = tpu.matmul %0, %2, %cst {dimension_numbers = #tpu.dot_dimension_numbers<[1], [0], [0], [1], [0, 0, 1, 1], [], []>} : vector<8x48xf32>, vector<48x1024xf32>, vector<8x1024xf32> -> vector<8x1024xf32>
    %cst_4 = arith.constant 0.000000e+00 : f32
    %4 = vector.broadcast %cst_4 : f32 to vector<8x1024xf32>
    %5 = arith.cmpf ogt, %3, %4 : vector<8x1024xf32>
    %cst_5 = arith.constant 2.000000e-01 : f32
    %6 = vector.broadcast %cst_5 : f32 to vector<8x1024xf32>
    %7 = arith.mulf %6, %3 : vector<8x1024xf32>
    %8 = arith.select %5, %3, %7 : vector<8x1024xi1>, vector<8x1024xf32>
    %c0_6 = arith.constant 0 : index
    %c0_7 = arith.constant 0 : index
    %c0_8 = arith.constant 0 : index
    %9 = vector.load %arg3[%c0_6, %c0_7, %c0_8] : memref<1x8x1024xf32, #tpu.memory_space<vmem>>, vector<1x8x1024xf32>
    %10 = vector.shape_cast %9 : vector<1x8x1024xf32> to vector<8x1024xf32>
    %11 = vector.shape_cast %8 : vector<8x1024xf32> to vector<1x8x1024xf32>
    tpu.vector_store %arg3[%c0_6, %c0_7, %c0_8], %11 {strides = array<i32>} : memref<1x8x1024xf32, #tpu.memory_space<vmem>>, vector<1x8x1024xf32>,
    return
  }
  func.func @transform_0(%arg0: i32) -> (i32, i32, i32) {
    %c0_i32 = arith.constant 0 : i32
    %c0_i32_0 = arith.constant 0 : i32
    %c0_i32_1 = arith.constant 0 : i32
    return %arg0, %c0_i32, %c0_i32_0 : i32, i32, i32
  }
  func.func @transform_1(%arg0: i32) -> (i32, i32) {
    %c0_i32 = arith.constant 0 : i32
    %c0_i32_0 = arith.constant 0 : i32
    %c0_i32_1 = arith.constant 0 : i32
    return %c0_i32, %c0_i32_0 : i32, i32
  }
  func.func @transform_2(%arg0: i32) -> (i32, i32, i32) {
    %c0_i32 = arith.constant 0 : i32
    %c0_i32_0 = arith.constant 0 : i32
    %c0_i32_1 = arith.constant 0 : i32
    return %arg0, %c0_i32, %c0_i32_0 : i32, i32, i32
  }
}

module attributes {stable_mosaic.version = 11 : i64} {
  func.func @_tail_kernel(%arg0: i32, %arg1: memref<2x128x256xf32, #tpu.memory_space<vmem>>, %arg2: memref<16x128xf32, #tpu.memory_space<vmem>>, %arg3: memref<16x1xf32, #tpu.memory_space<vmem>>, %arg4: memref<16x1xf32, #tpu.memory_space<vmem>>, %arg5: memref<16x256x64xf32, #tpu.memory_space<vmem>>, %arg6: memref<32x256xf32, #tpu.memory_space<vmem>>, %arg7: memref<32x1xf32, #tpu.memory_space<vmem>>, %arg8: memref<32x1xf32, #tpu.memory_space<vmem>>, %arg9: memref<16x64x16xf32, #tpu.memory_space<vmem>>, %arg10: memref<64x512xf32, #tpu.memory_space<vmem>>, %arg11: memref<64x1xf32, #tpu.memory_space<vmem>>, %arg12: memref<64x1xf32, #tpu.memory_space<vmem>>, %arg13: memref<16x32xf32, #tpu.memory_space<vmem>>, %arg14: memref<32x2xf32, #tpu.memory_space<vmem>>, %arg15: memref<9x16x16xf32, #tpu.memory_space<vmem>>, %arg16: memref<16x720xf32, #tpu.memory_space<vmem>>, %arg17: memref<16x1xf32, #tpu.memory_space<vmem>>, %arg18: memref<16x1xf32, #tpu.memory_space<vmem>>, %arg19: memref<16x16xf32, #tpu.memory_space<vmem>>, %arg20: memref<1x2xf32, #tpu.memory_space<vmem>>) attributes {dimension_semantics = [#tpu.dimension_semantics<arbitrary>], iteration_bounds = array<i64: 1>, scalar_prefetch = 0 : i64, scratch_operands = 0 : i64, tpu.core_type = #tpu.core_type<tc>, window_params = [{pipeline_mode = #tpu.pipeline_mode<synchronous>, transform_indices = @transform_0, window_bounds = array<i64: 2, 128, 256>}, {pipeline_mode = #tpu.pipeline_mode<synchronous>, transform_indices = @transform_1, window_bounds = array<i64: 16, 128>}, {pipeline_mode = #tpu.pipeline_mode<synchronous>, transform_indices = @transform_2, window_bounds = array<i64: 16, 1>}, {pipeline_mode = #tpu.pipeline_mode<synchronous>, transform_indices = @transform_3, window_bounds = array<i64: 16, 1>}, {pipeline_mode = #tpu.pipeline_mode<synchronous>, transform_indices = @transform_4, window_bounds = array<i64: 16, 256, 64>}, {pipeline_mode = #tpu.pipeline_mode<synchronous>, transform_indices = @transform_5, window_bounds = array<i64: 32, 256>}, {pipeline_mode = #tpu.pipeline_mode<synchronous>, transform_indices = @transform_6, window_bounds = array<i64: 32, 1>}, {pipeline_mode = #tpu.pipeline_mode<synchronous>, transform_indices = @transform_7, window_bounds = array<i64: 32, 1>}, {pipeline_mode = #tpu.pipeline_mode<synchronous>, transform_indices = @transform_8, window_bounds = array<i64: 16, 64, 16>}, {pipeline_mode = #tpu.pipeline_mode<synchronous>, transform_indices = @transform_9, window_bounds = array<i64: 64, 512>}, {pipeline_mode = #tpu.pipeline_mode<synchronous>, transform_indices = @transform_10, window_bounds = array<i64: 64, 1>}, {pipeline_mode = #tpu.pipeline_mode<synchronous>, transform_indices = @transform_11, window_bounds = array<i64: 64, 1>}, {pipeline_mode = #tpu.pipeline_mode<synchronous>, transform_indices = @transform_12, window_bounds = array<i64: 16, 32>}, {pipeline_mode = #tpu.pipeline_mode<synchronous>, transform_indices = @transform_13, window_bounds = array<i64: 32, 2>}, {pipeline_mode = #tpu.pipeline_mode<synchronous>, transform_indices = @transform_14, window_bounds = array<i64: 9, 16, 16>}, {pipeline_mode = #tpu.pipeline_mode<synchronous>, transform_indices = @transform_15, window_bounds = array<i64: 16, 720>}, {pipeline_mode = #tpu.pipeline_mode<synchronous>, transform_indices = @transform_16, window_bounds = array<i64: 16, 1>}, {pipeline_mode = #tpu.pipeline_mode<synchronous>, transform_indices = @transform_17, window_bounds = array<i64: 16, 1>}, {pipeline_mode = #tpu.pipeline_mode<synchronous>, transform_indices = @transform_18, window_bounds = array<i64: 16, 16>}, {pipeline_mode = #tpu.pipeline_mode<synchronous>, transform_indices = @transform_19, window_bounds = array<i64: 1, 2>}]} {
    %c0 = arith.constant 0 : index
    %c0_0 = arith.constant 0 : index
    %0 = vector.load %arg2[%c0, %c0_0] : memref<16x128xf32, #tpu.memory_space<vmem>>, vector<16x128xf32>
    %c0_1 = arith.constant 0 : index
    %c0_2 = arith.constant 0 : index
    %c0_3 = arith.constant 0 : index
    %1 = vector.load %arg1[%c0_1, %c0_2, %c0_3] : memref<2x128x256xf32, #tpu.memory_space<vmem>>, vector<1x128x256xf32>
    %2 = vector.shape_cast %1 : vector<1x128x256xf32> to vector<128x256xf32>
    %cst = arith.constant dense<0.000000e+00> : vector<16x256xf32>
    %3 = tpu.matmul %0, %2, %cst {dimension_numbers = #tpu.dot_dimension_numbers<[1], [0], [0], [1], [0, 0, 1, 1], [], []>} : vector<16x128xf32>, vector<128x256xf32>, vector<16x256xf32> -> vector<16x256xf32>
    %c0_4 = arith.constant 0 : index
    %c0_5 = arith.constant 0 : index
    %4 = vector.load %arg2[%c0_4, %c0_5] : memref<16x128xf32, #tpu.memory_space<vmem>>, vector<16x128xf32>
    %c1 = arith.constant 1 : index
    %c0_6 = arith.constant 0 : index
    %c0_7 = arith.constant 0 : index
    %5 = vector.load %arg1[%c1, %c0_6, %c0_7] : memref<2x128x256xf32, #tpu.memory_space<vmem>>, vector<1x128x256xf32>
    %6 = vector.shape_cast %5 : vector<1x128x256xf32> to vector<128x256xf32>
    %cst_8 = arith.constant dense<0.000000e+00> : vector<16x256xf32>
    %7 = tpu.matmul %4, %6, %cst_8 {dimension_numbers = #tpu.dot_dimension_numbers<[1], [0], [0], [1], [0, 0, 1, 1], [], []>} : vector<16x128xf32>, vector<128x256xf32>, vector<16x256xf32> -> vector<16x256xf32>
    %c0_9 = arith.constant 0 : index
    %c0_10 = arith.constant 0 : index
    %8 = vector.load %arg3[%c0_9, %c0_10] : memref<16x1xf32, #tpu.memory_space<vmem>>, vector<16x1xf32>
    %c0_11 = arith.constant 0 : index
    %c0_12 = arith.constant 0 : index
    %9 = vector.load %arg4[%c0_11, %c0_12] : memref<16x1xf32, #tpu.memory_space<vmem>>, vector<16x1xf32>
    %cst_13 = arith.constant 0.000000e+00 : f32
    %10 = vector.broadcast %cst_13 : f32 to vector<16x1xf32>
    %cst_14 = arith.constant 0.000000e+00 : f32
    %11 = vector.broadcast %cst_14 : f32 to vector<16x1xf32>
    %cst_15 = arith.constant dense<0.000000e+00> : vector<16xf32>
    %12 = vector.multi_reduction <add>, %3, %cst_15 [1] : vector<16x256xf32> to vector<16xf32>
    %13 = vector.shape_cast %12 : vector<16xf32> to vector<16x1xf32>
    %14 = arith.addf %10, %13 : vector<16x1xf32>
    %15 = arith.mulf %3, %3 : vector<16x256xf32>
    %cst_16 = arith.constant dense<0.000000e+00> : vector<16xf32>
    %16 = vector.multi_reduction <add>, %15, %cst_16 [1] : vector<16x256xf32> to vector<16xf32>
    %17 = vector.shape_cast %16 : vector<16xf32> to vector<16x1xf32>
    %18 = arith.addf %11, %17 : vector<16x1xf32>
    %cst_17 = arith.constant dense<0.000000e+00> : vector<16xf32>
    %19 = vector.multi_reduction <add>, %7, %cst_17 [1] : vector<16x256xf32> to vector<16xf32>
    %20 = vector.shape_cast %19 : vector<16xf32> to vector<16x1xf32>
    %21 = arith.addf %14, %20 : vector<16x1xf32>
    %22 = arith.mulf %7, %7 : vector<16x256xf32>
    %cst_18 = arith.constant dense<0.000000e+00> : vector<16xf32>
    %23 = vector.multi_reduction <add>, %22, %cst_18 [1] : vector<16x256xf32> to vector<16xf32>
    %24 = vector.shape_cast %23 : vector<16xf32> to vector<16x1xf32>
    %25 = arith.addf %18, %24 : vector<16x1xf32>
    %cst_19 = arith.constant 0.001953125 : f32
    %26 = vector.broadcast %cst_19 : f32 to vector<16x1xf32>
    %27 = arith.mulf %21, %26 : vector<16x1xf32>
    %cst_20 = arith.constant 0.001953125 : f32
    %28 = vector.broadcast %cst_20 : f32 to vector<16x1xf32>
    %29 = arith.mulf %25, %28 : vector<16x1xf32>
    %30 = arith.mulf %27, %27 : vector<16x1xf32>
    %31 = arith.subf %29, %30 : vector<16x1xf32>
    %cst_21 = arith.constant 0.000000e+00 : f32
    %32 = vector.broadcast %cst_21 : f32 to vector<16x1xf32>
    %33 = arith.maximumf %31, %32 : vector<16x1xf32>
    %cst_22 = arith.constant 9.99999974E-6 : f32
    %34 = vector.broadcast %cst_22 : f32 to vector<16x1xf32>
    %35 = arith.addf %33, %34 : vector<16x1xf32>
    %36 = math.rsqrt %35 : vector<16x1xf32>
    %37 = arith.mulf %8, %36 : vector<16x1xf32>
    %38 = arith.mulf %27, %37 : vector<16x1xf32>
    %39 = arith.subf %9, %38 : vector<16x1xf32>
    %40 = vector.broadcast %37 : vector<16x1xf32> to vector<16x256xf32>
    %41 = arith.mulf %3, %40 : vector<16x256xf32>
    %42 = vector.broadcast %39 : vector<16x1xf32> to vector<16x256xf32>
    %43 = arith.addf %41, %42 : vector<16x256xf32>
    %cst_23 = arith.constant 0.000000e+00 : f32
    %44 = vector.broadcast %cst_23 : f32 to vector<16x256xf32>
    %45 = arith.cmpf ogt, %43, %44 : vector<16x256xf32>
    %cst_24 = arith.constant 2.000000e-01 : f32
    %46 = vector.broadcast %cst_24 : f32 to vector<16x256xf32>
    %47 = arith.mulf %46, %43 : vector<16x256xf32>
    %48 = arith.select %45, %43, %47 : vector<16x256xi1>, vector<16x256xf32>
    %49 = vector.broadcast %37 : vector<16x1xf32> to vector<16x256xf32>
    %50 = arith.mulf %7, %49 : vector<16x256xf32>
    %51 = vector.broadcast %39 : vector<16x1xf32> to vector<16x256xf32>
    %52 = arith.addf %50, %51 : vector<16x256xf32>
    %cst_25 = arith.constant 0.000000e+00 : f32
    %53 = vector.broadcast %cst_25 : f32 to vector<16x256xf32>
    %54 = arith.cmpf ogt, %52, %53 : vector<16x256xf32>
    %cst_26 = arith.constant 2.000000e-01 : f32
    %55 = vector.broadcast %cst_26 : f32 to vector<16x256xf32>
    %56 = arith.mulf %55, %52 : vector<16x256xf32>
    %57 = arith.select %54, %52, %56 : vector<16x256xi1>, vector<16x256xf32>
    %c0_27 = arith.constant 0 : index
    %c0_28 = arith.constant 0 : index
    %58 = vector.load %arg6[%c0_27, %c0_28] : memref<32x256xf32, #tpu.memory_space<vmem>>, vector<32x256xf32>
    %c0_29 = arith.constant 0 : index
    %c0_30 = arith.constant 0 : index
    %c0_31 = arith.constant 0 : index
    %59 = vector.load %arg5[%c0_29, %c0_30, %c0_31] : memref<16x256x64xf32, #tpu.memory_space<vmem>>, vector<1x256x64xf32>
    %60 = vector.shape_cast %59 : vector<1x256x64xf32> to vector<256x64xf32>
    %cst_32 = arith.constant dense<0.000000e+00> : vector<16x64xf32>
    %61 = tpu.matmul %48, %60, %cst_32 {dimension_numbers = #tpu.dot_dimension_numbers<[1], [0], [0], [1], [0, 0, 1, 1], [], []>} : vector<16x256xf32>, vector<256x64xf32>, vector<16x64xf32> -> vector<16x64xf32>
    %c1_33 = arith.constant 1 : index
    %c0_34 = arith.constant 0 : index
    %c0_35 = arith.constant 0 : index
    %62 = vector.load %arg5[%c1_33, %c0_34, %c0_35] : memref<16x256x64xf32, #tpu.memory_space<vmem>>, vector<1x256x64xf32>
    %63 = vector.shape_cast %62 : vector<1x256x64xf32> to vector<256x64xf32>
    %cst_36 = arith.constant dense<0.000000e+00> : vector<16x64xf32>
    %64 = tpu.matmul %48, %63, %cst_36 {dimension_numbers = #tpu.dot_dimension_numbers<[1], [0], [0], [1], [0, 0, 1, 1], [], []>} : vector<16x256xf32>, vector<256x64xf32>, vector<16x64xf32> -> vector<16x64xf32>
    %c2 = arith.constant 2 : index
    %c0_37 = arith.constant 0 : index
    %c0_38 = arith.constant 0 : index
    %65 = vector.load %arg5[%c2, %c0_37, %c0_38] : memref<16x256x64xf32, #tpu.memory_space<vmem>>, vector<1x256x64xf32>
    %66 = vector.shape_cast %65 : vector<1x256x64xf32> to vector<256x64xf32>
    %cst_39 = arith.constant dense<0.000000e+00> : vector<16x64xf32>
    %67 = tpu.matmul %48, %66, %cst_39 {dimension_numbers = #tpu.dot_dimension_numbers<[1], [0], [0], [1], [0, 0, 1, 1], [], []>} : vector<16x256xf32>, vector<256x64xf32>, vector<16x64xf32> -> vector<16x64xf32>
    %c3 = arith.constant 3 : index
    %c0_40 = arith.constant 0 : index
    %c0_41 = arith.constant 0 : index
    %68 = vector.load %arg5[%c3, %c0_40, %c0_41] : memref<16x256x64xf32, #tpu.memory_space<vmem>>, vector<1x256x64xf32>
    %69 = vector.shape_cast %68 : vector<1x256x64xf32> to vector<256x64xf32>
    %cst_42 = arith.constant dense<0.000000e+00> : vector<16x64xf32>
    %70 = tpu.matmul %48, %69, %cst_42 {dimension_numbers = #tpu.dot_dimension_numbers<[1], [0], [0], [1], [0, 0, 1, 1], [], []>} : vector<16x256xf32>, vector<256x64xf32>, vector<16x64xf32> -> vector<16x64xf32>
    %c4 = arith.constant 4 : index
    %c0_43 = arith.constant 0 : index
    %c0_44 = arith.constant 0 : index
    %71 = vector.load %arg5[%c4, %c0_43, %c0_44] : memref<16x256x64xf32, #tpu.memory_space<vmem>>, vector<1x256x64xf32>
    %72 = vector.shape_cast %71 : vector<1x256x64xf32> to vector<256x64xf32>
    %cst_45 = arith.constant dense<0.000000e+00> : vector<16x64xf32>
    %73 = tpu.matmul %48, %72, %cst_45 {dimension_numbers = #tpu.dot_dimension_numbers<[1], [0], [0], [1], [0, 0, 1, 1], [], []>} : vector<16x256xf32>, vector<256x64xf32>, vector<16x64xf32> -> vector<16x64xf32>
    %c5 = arith.constant 5 : index
    %c0_46 = arith.constant 0 : index
    %c0_47 = arith.constant 0 : index
    %74 = vector.load %arg5[%c5, %c0_46, %c0_47] : memref<16x256x64xf32, #tpu.memory_space<vmem>>, vector<1x256x64xf32>
    %75 = vector.shape_cast %74 : vector<1x256x64xf32> to vector<256x64xf32>
    %cst_48 = arith.constant dense<0.000000e+00> : vector<16x64xf32>
    %76 = tpu.matmul %48, %75, %cst_48 {dimension_numbers = #tpu.dot_dimension_numbers<[1], [0], [0], [1], [0, 0, 1, 1], [], []>} : vector<16x256xf32>, vector<256x64xf32>, vector<16x64xf32> -> vector<16x64xf32>
    %c6 = arith.constant 6 : index
    %c0_49 = arith.constant 0 : index
    %c0_50 = arith.constant 0 : index
    %77 = vector.load %arg5[%c6, %c0_49, %c0_50] : memref<16x256x64xf32, #tpu.memory_space<vmem>>, vector<1x256x64xf32>
    %78 = vector.shape_cast %77 : vector<1x256x64xf32> to vector<256x64xf32>
    %cst_51 = arith.constant dense<0.000000e+00> : vector<16x64xf32>
    %79 = tpu.matmul %48, %78, %cst_51 {dimension_numbers = #tpu.dot_dimension_numbers<[1], [0], [0], [1], [0, 0, 1, 1], [], []>} : vector<16x256xf32>, vector<256x64xf32>, vector<16x64xf32> -> vector<16x64xf32>
    %c7 = arith.constant 7 : index
    %c0_52 = arith.constant 0 : index
    %c0_53 = arith.constant 0 : index
    %80 = vector.load %arg5[%c7, %c0_52, %c0_53] : memref<16x256x64xf32, #tpu.memory_space<vmem>>, vector<1x256x64xf32>
    %81 = vector.shape_cast %80 : vector<1x256x64xf32> to vector<256x64xf32>
    %cst_54 = arith.constant dense<0.000000e+00> : vector<16x64xf32>
    %82 = tpu.matmul %48, %81, %cst_54 {dimension_numbers = #tpu.dot_dimension_numbers<[1], [0], [0], [1], [0, 0, 1, 1], [], []>} : vector<16x256xf32>, vector<256x64xf32>, vector<16x64xf32> -> vector<16x64xf32>
    %c8 = arith.constant 8 : index
    %c0_55 = arith.constant 0 : index
    %c0_56 = arith.constant 0 : index
    %83 = vector.load %arg5[%c8, %c0_55, %c0_56] : memref<16x256x64xf32, #tpu.memory_space<vmem>>, vector<1x256x64xf32>
    %84 = vector.shape_cast %83 : vector<1x256x64xf32> to vector<256x64xf32>
    %cst_57 = arith.constant dense<0.000000e+00> : vector<16x64xf32>
    %85 = tpu.matmul %48, %84, %cst_57 {dimension_numbers = #tpu.dot_dimension_numbers<[1], [0], [0], [1], [0, 0, 1, 1], [], []>} : vector<16x256xf32>, vector<256x64xf32>, vector<16x64xf32> -> vector<16x64xf32>
    %c9 = arith.constant 9 : index
    %c0_58 = arith.constant 0 : index
    %c0_59 = arith.constant 0 : index
    %86 = vector.load %arg5[%c9, %c0_58, %c0_59] : memref<16x256x64xf32, #tpu.memory_space<vmem>>, vector<1x256x64xf32>
    %87 = vector.shape_cast %86 : vector<1x256x64xf32> to vector<256x64xf32>
    %cst_60 = arith.constant dense<0.000000e+00> : vector<16x64xf32>
    %88 = tpu.matmul %48, %87, %cst_60 {dimension_numbers = #tpu.dot_dimension_numbers<[1], [0], [0], [1], [0, 0, 1, 1], [], []>} : vector<16x256xf32>, vector<256x64xf32>, vector<16x64xf32> -> vector<16x64xf32>
    %c10 = arith.constant 10 : index
    %c0_61 = arith.constant 0 : index
    %c0_62 = arith.constant 0 : index
    %89 = vector.load %arg5[%c10, %c0_61, %c0_62] : memref<16x256x64xf32, #tpu.memory_space<vmem>>, vector<1x256x64xf32>
    %90 = vector.shape_cast %89 : vector<1x256x64xf32> to vector<256x64xf32>
    %cst_63 = arith.constant dense<0.000000e+00> : vector<16x64xf32>
    %91 = tpu.matmul %48, %90, %cst_63 {dimension_numbers = #tpu.dot_dimension_numbers<[1], [0], [0], [1], [0, 0, 1, 1], [], []>} : vector<16x256xf32>, vector<256x64xf32>, vector<16x64xf32> -> vector<16x64xf32>
    %c11 = arith.constant 11 : index
    %c0_64 = arith.constant 0 : index
    %c0_65 = arith.constant 0 : index
    %92 = vector.load %arg5[%c11, %c0_64, %c0_65] : memref<16x256x64xf32, #tpu.memory_space<vmem>>, vector<1x256x64xf32>
    %93 = vector.shape_cast %92 : vector<1x256x64xf32> to vector<256x64xf32>
    %cst_66 = arith.constant dense<0.000000e+00> : vector<16x64xf32>
    %94 = tpu.matmul %48, %93, %cst_66 {dimension_numbers = #tpu.dot_dimension_numbers<[1], [0], [0], [1], [0, 0, 1, 1], [], []>} : vector<16x256xf32>, vector<256x64xf32>, vector<16x64xf32> -> vector<16x64xf32>
    %c12 = arith.constant 12 : index
    %c0_67 = arith.constant 0 : index
    %c0_68 = arith.constant 0 : index
    %95 = vector.load %arg5[%c12, %c0_67, %c0_68] : memref<16x256x64xf32, #tpu.memory_space<vmem>>, vector<1x256x64xf32>
    %96 = vector.shape_cast %95 : vector<1x256x64xf32> to vector<256x64xf32>
    %cst_69 = arith.constant dense<0.000000e+00> : vector<16x64xf32>
    %97 = tpu.matmul %48, %96, %cst_69 {dimension_numbers = #tpu.dot_dimension_numbers<[1], [0], [0], [1], [0, 0, 1, 1], [], []>} : vector<16x256xf32>, vector<256x64xf32>, vector<16x64xf32> -> vector<16x64xf32>
    %c13 = arith.constant 13 : index
    %c0_70 = arith.constant 0 : index
    %c0_71 = arith.constant 0 : index
    %98 = vector.load %arg5[%c13, %c0_70, %c0_71] : memref<16x256x64xf32, #tpu.memory_space<vmem>>, vector<1x256x64xf32>
    %99 = vector.shape_cast %98 : vector<1x256x64xf32> to vector<256x64xf32>
    %cst_72 = arith.constant dense<0.000000e+00> : vector<16x64xf32>
    %100 = tpu.matmul %48, %99, %cst_72 {dimension_numbers = #tpu.dot_dimension_numbers<[1], [0], [0], [1], [0, 0, 1, 1], [], []>} : vector<16x256xf32>, vector<256x64xf32>, vector<16x64xf32> -> vector<16x64xf32>
    %c14 = arith.constant 14 : index
    %c0_73 = arith.constant 0 : index
    %c0_74 = arith.constant 0 : index
    %101 = vector.load %arg5[%c14, %c0_73, %c0_74] : memref<16x256x64xf32, #tpu.memory_space<vmem>>, vector<1x256x64xf32>
    %102 = vector.shape_cast %101 : vector<1x256x64xf32> to vector<256x64xf32>
    %cst_75 = arith.constant dense<0.000000e+00> : vector<16x64xf32>
    %103 = tpu.matmul %48, %102, %cst_75 {dimension_numbers = #tpu.dot_dimension_numbers<[1], [0], [0], [1], [0, 0, 1, 1], [], []>} : vector<16x256xf32>, vector<256x64xf32>, vector<16x64xf32> -> vector<16x64xf32>
    %c15 = arith.constant 15 : index
    %c0_76 = arith.constant 0 : index
    %c0_77 = arith.constant 0 : index
    %104 = vector.load %arg5[%c15, %c0_76, %c0_77] : memref<16x256x64xf32, #tpu.memory_space<vmem>>, vector<1x256x64xf32>
    %105 = vector.shape_cast %104 : vector<1x256x64xf32> to vector<256x64xf32>
    %cst_78 = arith.constant dense<0.000000e+00> : vector<16x64xf32>
    %106 = tpu.matmul %48, %105, %cst_78 {dimension_numbers = #tpu.dot_dimension_numbers<[1], [0], [0], [1], [0, 0, 1, 1], [], []>} : vector<16x256xf32>, vector<256x64xf32>, vector<16x64xf32> -> vector<16x64xf32>
    %107 = tpu.concatenate %61, %64, %67, %70, %73, %76, %79, %82, %85, %88, %91, %94, %97, %100, %103, %106 in 0 : vector<16x64xf32>, vector<16x64xf32>, vector<16x64xf32>, vector<16x64xf32>, vector<16x64xf32>, vector<16x64xf32>, vector<16x64xf32>, vector<16x64xf32>, vector<16x64xf32>, vector<16x64xf32>, vector<16x64xf32>, vector<16x64xf32>, vector<16x64xf32>, vector<16x64xf32>, vector<16x64xf32>, vector<16x64xf32> -> vector<256x64xf32>
    %cst_79 = arith.constant dense<0.000000e+00> : vector<32x64xf32>
    %108 = tpu.matmul %58, %107, %cst_79 {dimension_numbers = #tpu.dot_dimension_numbers<[1], [0], [0], [1], [0, 0, 1, 1], [], []>} : vector<32x256xf32>, vector<256x64xf32>, vector<32x64xf32> -> vector<32x64xf32>
    %c0_80 = arith.constant 0 : index
    %c0_81 = arith.constant 0 : index
    %109 = vector.load %arg6[%c0_80, %c0_81] : memref<32x256xf32, #tpu.memory_space<vmem>>, vector<32x256xf32>
    %c0_82 = arith.constant 0 : index
    %c0_83 = arith.constant 0 : index
    %c0_84 = arith.constant 0 : index
    %110 = vector.load %arg5[%c0_82, %c0_83, %c0_84] : memref<16x256x64xf32, #tpu.memory_space<vmem>>, vector<1x256x64xf32>
    %111 = vector.shape_cast %110 : vector<1x256x64xf32> to vector<256x64xf32>
    %cst_85 = arith.constant dense<0.000000e+00> : vector<16x64xf32>
    %112 = tpu.matmul %57, %111, %cst_85 {dimension_numbers = #tpu.dot_dimension_numbers<[1], [0], [0], [1], [0, 0, 1, 1], [], []>} : vector<16x256xf32>, vector<256x64xf32>, vector<16x64xf32> -> vector<16x64xf32>
    %c1_86 = arith.constant 1 : index
    %c0_87 = arith.constant 0 : index
    %c0_88 = arith.constant 0 : index
    %113 = vector.load %arg5[%c1_86, %c0_87, %c0_88] : memref<16x256x64xf32, #tpu.memory_space<vmem>>, vector<1x256x64xf32>
    %114 = vector.shape_cast %113 : vector<1x256x64xf32> to vector<256x64xf32>
    %cst_89 = arith.constant dense<0.000000e+00> : vector<16x64xf32>
    %115 = tpu.matmul %57, %114, %cst_89 {dimension_numbers = #tpu.dot_dimension_numbers<[1], [0], [0], [1], [0, 0, 1, 1], [], []>} : vector<16x256xf32>, vector<256x64xf32>, vector<16x64xf32> -> vector<16x64xf32>
    %c2_90 = arith.constant 2 : index
    %c0_91 = arith.constant 0 : index
    %c0_92 = arith.constant 0 : index
    %116 = vector.load %arg5[%c2_90, %c0_91, %c0_92] : memref<16x256x64xf32, #tpu.memory_space<vmem>>, vector<1x256x64xf32>
    %117 = vector.shape_cast %116 : vector<1x256x64xf32> to vector<256x64xf32>
    %cst_93 = arith.constant dense<0.000000e+00> : vector<16x64xf32>
    %118 = tpu.matmul %57, %117, %cst_93 {dimension_numbers = #tpu.dot_dimension_numbers<[1], [0], [0], [1], [0, 0, 1, 1], [], []>} : vector<16x256xf32>, vector<256x64xf32>, vector<16x64xf32> -> vector<16x64xf32>
    %c3_94 = arith.constant 3 : index
    %c0_95 = arith.constant 0 : index
    %c0_96 = arith.constant 0 : index
    %119 = vector.load %arg5[%c3_94, %c0_95, %c0_96] : memref<16x256x64xf32, #tpu.memory_space<vmem>>, vector<1x256x64xf32>
    %120 = vector.shape_cast %119 : vector<1x256x64xf32> to vector<256x64xf32>
    %cst_97 = arith.constant dense<0.000000e+00> : vector<16x64xf32>
    %121 = tpu.matmul %57, %120, %cst_97 {dimension_numbers = #tpu.dot_dimension_numbers<[1], [0], [0], [1], [0, 0, 1, 1], [], []>} : vector<16x256xf32>, vector<256x64xf32>, vector<16x64xf32> -> vector<16x64xf32>
    %c4_98 = arith.constant 4 : index
    %c0_99 = arith.constant 0 : index
    %c0_100 = arith.constant 0 : index
    %122 = vector.load %arg5[%c4_98, %c0_99, %c0_100] : memref<16x256x64xf32, #tpu.memory_space<vmem>>, vector<1x256x64xf32>
    %123 = vector.shape_cast %122 : vector<1x256x64xf32> to vector<256x64xf32>
    %cst_101 = arith.constant dense<0.000000e+00> : vector<16x64xf32>
    %124 = tpu.matmul %57, %123, %cst_101 {dimension_numbers = #tpu.dot_dimension_numbers<[1], [0], [0], [1], [0, 0, 1, 1], [], []>} : vector<16x256xf32>, vector<256x64xf32>, vector<16x64xf32> -> vector<16x64xf32>
    %c5_102 = arith.constant 5 : index
    %c0_103 = arith.constant 0 : index
    %c0_104 = arith.constant 0 : index
    %125 = vector.load %arg5[%c5_102, %c0_103, %c0_104] : memref<16x256x64xf32, #tpu.memory_space<vmem>>, vector<1x256x64xf32>
    %126 = vector.shape_cast %125 : vector<1x256x64xf32> to vector<256x64xf32>
    %cst_105 = arith.constant dense<0.000000e+00> : vector<16x64xf32>
    %127 = tpu.matmul %57, %126, %cst_105 {dimension_numbers = #tpu.dot_dimension_numbers<[1], [0], [0], [1], [0, 0, 1, 1], [], []>} : vector<16x256xf32>, vector<256x64xf32>, vector<16x64xf32> -> vector<16x64xf32>
    %c6_106 = arith.constant 6 : index
    %c0_107 = arith.constant 0 : index
    %c0_108 = arith.constant 0 : index
    %128 = vector.load %arg5[%c6_106, %c0_107, %c0_108] : memref<16x256x64xf32, #tpu.memory_space<vmem>>, vector<1x256x64xf32>
    %129 = vector.shape_cast %128 : vector<1x256x64xf32> to vector<256x64xf32>
    %cst_109 = arith.constant dense<0.000000e+00> : vector<16x64xf32>
    %130 = tpu.matmul %57, %129, %cst_109 {dimension_numbers = #tpu.dot_dimension_numbers<[1], [0], [0], [1], [0, 0, 1, 1], [], []>} : vector<16x256xf32>, vector<256x64xf32>, vector<16x64xf32> -> vector<16x64xf32>
    %c7_110 = arith.constant 7 : index
    %c0_111 = arith.constant 0 : index
    %c0_112 = arith.constant 0 : index
    %131 = vector.load %arg5[%c7_110, %c0_111, %c0_112] : memref<16x256x64xf32, #tpu.memory_space<vmem>>, vector<1x256x64xf32>
    %132 = vector.shape_cast %131 : vector<1x256x64xf32> to vector<256x64xf32>
    %cst_113 = arith.constant dense<0.000000e+00> : vector<16x64xf32>
    %133 = tpu.matmul %57, %132, %cst_113 {dimension_numbers = #tpu.dot_dimension_numbers<[1], [0], [0], [1], [0, 0, 1, 1], [], []>} : vector<16x256xf32>, vector<256x64xf32>, vector<16x64xf32> -> vector<16x64xf32>
    %c8_114 = arith.constant 8 : index
    %c0_115 = arith.constant 0 : index
    %c0_116 = arith.constant 0 : index
    %134 = vector.load %arg5[%c8_114, %c0_115, %c0_116] : memref<16x256x64xf32, #tpu.memory_space<vmem>>, vector<1x256x64xf32>
    %135 = vector.shape_cast %134 : vector<1x256x64xf32> to vector<256x64xf32>
    %cst_117 = arith.constant dense<0.000000e+00> : vector<16x64xf32>
    %136 = tpu.matmul %57, %135, %cst_117 {dimension_numbers = #tpu.dot_dimension_numbers<[1], [0], [0], [1], [0, 0, 1, 1], [], []>} : vector<16x256xf32>, vector<256x64xf32>, vector<16x64xf32> -> vector<16x64xf32>
    %c9_118 = arith.constant 9 : index
    %c0_119 = arith.constant 0 : index
    %c0_120 = arith.constant 0 : index
    %137 = vector.load %arg5[%c9_118, %c0_119, %c0_120] : memref<16x256x64xf32, #tpu.memory_space<vmem>>, vector<1x256x64xf32>
    %138 = vector.shape_cast %137 : vector<1x256x64xf32> to vector<256x64xf32>
    %cst_121 = arith.constant dense<0.000000e+00> : vector<16x64xf32>
    %139 = tpu.matmul %57, %138, %cst_121 {dimension_numbers = #tpu.dot_dimension_numbers<[1], [0], [0], [1], [0, 0, 1, 1], [], []>} : vector<16x256xf32>, vector<256x64xf32>, vector<16x64xf32> -> vector<16x64xf32>
    %c10_122 = arith.constant 10 : index
    %c0_123 = arith.constant 0 : index
    %c0_124 = arith.constant 0 : index
    %140 = vector.load %arg5[%c10_122, %c0_123, %c0_124] : memref<16x256x64xf32, #tpu.memory_space<vmem>>, vector<1x256x64xf32>
    %141 = vector.shape_cast %140 : vector<1x256x64xf32> to vector<256x64xf32>
    %cst_125 = arith.constant dense<0.000000e+00> : vector<16x64xf32>
    %142 = tpu.matmul %57, %141, %cst_125 {dimension_numbers = #tpu.dot_dimension_numbers<[1], [0], [0], [1], [0, 0, 1, 1], [], []>} : vector<16x256xf32>, vector<256x64xf32>, vector<16x64xf32> -> vector<16x64xf32>
    %c11_126 = arith.constant 11 : index
    %c0_127 = arith.constant 0 : index
    %c0_128 = arith.constant 0 : index
    %143 = vector.load %arg5[%c11_126, %c0_127, %c0_128] : memref<16x256x64xf32, #tpu.memory_space<vmem>>, vector<1x256x64xf32>
    %144 = vector.shape_cast %143 : vector<1x256x64xf32> to vector<256x64xf32>
    %cst_129 = arith.constant dense<0.000000e+00> : vector<16x64xf32>
    %145 = tpu.matmul %57, %144, %cst_129 {dimension_numbers = #tpu.dot_dimension_numbers<[1], [0], [0], [1], [0, 0, 1, 1], [], []>} : vector<16x256xf32>, vector<256x64xf32>, vector<16x64xf32> -> vector<16x64xf32>
    %c12_130 = arith.constant 12 : index
    %c0_131 = arith.constant 0 : index
    %c0_132 = arith.constant 0 : index
    %146 = vector.load %arg5[%c12_130, %c0_131, %c0_132] : memref<16x256x64xf32, #tpu.memory_space<vmem>>, vector<1x256x64xf32>
    %147 = vector.shape_cast %146 : vector<1x256x64xf32> to vector<256x64xf32>
    %cst_133 = arith.constant dense<0.000000e+00> : vector<16x64xf32>
    %148 = tpu.matmul %57, %147, %cst_133 {dimension_numbers = #tpu.dot_dimension_numbers<[1], [0], [0], [1], [0, 0, 1, 1], [], []>} : vector<16x256xf32>, vector<256x64xf32>, vector<16x64xf32> -> vector<16x64xf32>
    %c13_134 = arith.constant 13 : index
    %c0_135 = arith.constant 0 : index
    %c0_136 = arith.constant 0 : index
    %149 = vector.load %arg5[%c13_134, %c0_135, %c0_136] : memref<16x256x64xf32, #tpu.memory_space<vmem>>, vector<1x256x64xf32>
    %150 = vector.shape_cast %149 : vector<1x256x64xf32> to vector<256x64xf32>
    %cst_137 = arith.constant dense<0.000000e+00> : vector<16x64xf32>
    %151 = tpu.matmul %57, %150, %cst_137 {dimension_numbers = #tpu.dot_dimension_numbers<[1], [0], [0], [1], [0, 0, 1, 1], [], []>} : vector<16x256xf32>, vector<256x64xf32>, vector<16x64xf32> -> vector<16x64xf32>
    %c14_138 = arith.constant 14 : index
    %c0_139 = arith.constant 0 : index
    %c0_140 = arith.constant 0 : index
    %152 = vector.load %arg5[%c14_138, %c0_139, %c0_140] : memref<16x256x64xf32, #tpu.memory_space<vmem>>, vector<1x256x64xf32>
    %153 = vector.shape_cast %152 : vector<1x256x64xf32> to vector<256x64xf32>
    %cst_141 = arith.constant dense<0.000000e+00> : vector<16x64xf32>
    %154 = tpu.matmul %57, %153, %cst_141 {dimension_numbers = #tpu.dot_dimension_numbers<[1], [0], [0], [1], [0, 0, 1, 1], [], []>} : vector<16x256xf32>, vector<256x64xf32>, vector<16x64xf32> -> vector<16x64xf32>
    %c15_142 = arith.constant 15 : index
    %c0_143 = arith.constant 0 : index
    %c0_144 = arith.constant 0 : index
    %155 = vector.load %arg5[%c15_142, %c0_143, %c0_144] : memref<16x256x64xf32, #tpu.memory_space<vmem>>, vector<1x256x64xf32>
    %156 = vector.shape_cast %155 : vector<1x256x64xf32> to vector<256x64xf32>
    %cst_145 = arith.constant dense<0.000000e+00> : vector<16x64xf32>
    %157 = tpu.matmul %57, %156, %cst_145 {dimension_numbers = #tpu.dot_dimension_numbers<[1], [0], [0], [1], [0, 0, 1, 1], [], []>} : vector<16x256xf32>, vector<256x64xf32>, vector<16x64xf32> -> vector<16x64xf32>
    %158 = tpu.concatenate %112, %115, %118, %121, %124, %127, %130, %133, %136, %139, %142, %145, %148, %151, %154, %157 in 0 : vector<16x64xf32>, vector<16x64xf32>, vector<16x64xf32>, vector<16x64xf32>, vector<16x64xf32>, vector<16x64xf32>, vector<16x64xf32>, vector<16x64xf32>, vector<16x64xf32>, vector<16x64xf32>, vector<16x64xf32>, vector<16x64xf32>, vector<16x64xf32>, vector<16x64xf32>, vector<16x64xf32>, vector<16x64xf32> -> vector<256x64xf32>
    %cst_146 = arith.constant dense<0.000000e+00> : vector<32x64xf32>
    %159 = tpu.matmul %109, %158, %cst_146 {dimension_numbers = #tpu.dot_dimension_numbers<[1], [0], [0], [1], [0, 0, 1, 1], [], []>} : vector<32x256xf32>, vector<256x64xf32>, vector<32x64xf32> -> vector<32x64xf32>
    %c0_147 = arith.constant 0 : index
    %c0_148 = arith.constant 0 : index
    %160 = vector.load %arg7[%c0_147, %c0_148] : memref<32x1xf32, #tpu.memory_space<vmem>>, vector<32x1xf32>
    %c0_149 = arith.constant 0 : index
    %c0_150 = arith.constant 0 : index
    %161 = vector.load %arg8[%c0_149, %c0_150] : memref<32x1xf32, #tpu.memory_space<vmem>>, vector<32x1xf32>
    %cst_151 = arith.constant 0.000000e+00 : f32
    %162 = vector.broadcast %cst_151 : f32 to vector<32x1xf32>
    %cst_152 = arith.constant 0.000000e+00 : f32
    %163 = vector.broadcast %cst_152 : f32 to vector<32x1xf32>
    %cst_153 = arith.constant dense<0.000000e+00> : vector<32xf32>
    %164 = vector.multi_reduction <add>, %108, %cst_153 [1] : vector<32x64xf32> to vector<32xf32>
    %165 = vector.shape_cast %164 : vector<32xf32> to vector<32x1xf32>
    %166 = arith.addf %162, %165 : vector<32x1xf32>
    %167 = arith.mulf %108, %108 : vector<32x64xf32>
    %cst_154 = arith.constant dense<0.000000e+00> : vector<32xf32>
    %168 = vector.multi_reduction <add>, %167, %cst_154 [1] : vector<32x64xf32> to vector<32xf32>
    %169 = vector.shape_cast %168 : vector<32xf32> to vector<32x1xf32>
    %170 = arith.addf %163, %169 : vector<32x1xf32>
    %cst_155 = arith.constant dense<0.000000e+00> : vector<32xf32>
    %171 = vector.multi_reduction <add>, %159, %cst_155 [1] : vector<32x64xf32> to vector<32xf32>
    %172 = vector.shape_cast %171 : vector<32xf32> to vector<32x1xf32>
    %173 = arith.addf %166, %172 : vector<32x1xf32>
    %174 = arith.mulf %159, %159 : vector<32x64xf32>
    %cst_156 = arith.constant dense<0.000000e+00> : vector<32xf32>
    %175 = vector.multi_reduction <add>, %174, %cst_156 [1] : vector<32x64xf32> to vector<32xf32>
    %176 = vector.shape_cast %175 : vector<32xf32> to vector<32x1xf32>
    %177 = arith.addf %170, %176 : vector<32x1xf32>
    %cst_157 = arith.constant 7.812500e-03 : f32
    %178 = vector.broadcast %cst_157 : f32 to vector<32x1xf32>
    %179 = arith.mulf %173, %178 : vector<32x1xf32>
    %cst_158 = arith.constant 7.812500e-03 : f32
    %180 = vector.broadcast %cst_158 : f32 to vector<32x1xf32>
    %181 = arith.mulf %177, %180 : vector<32x1xf32>
    %182 = arith.mulf %179, %179 : vector<32x1xf32>
    %183 = arith.subf %181, %182 : vector<32x1xf32>
    %cst_159 = arith.constant 0.000000e+00 : f32
    %184 = vector.broadcast %cst_159 : f32 to vector<32x1xf32>
    %185 = arith.maximumf %183, %184 : vector<32x1xf32>
    %cst_160 = arith.constant 9.99999974E-6 : f32
    %186 = vector.broadcast %cst_160 : f32 to vector<32x1xf32>
    %187 = arith.addf %185, %186 : vector<32x1xf32>
    %188 = math.rsqrt %187 : vector<32x1xf32>
    %189 = arith.mulf %160, %188 : vector<32x1xf32>
    %190 = arith.mulf %179, %189 : vector<32x1xf32>
    %191 = arith.subf %161, %190 : vector<32x1xf32>
    %192 = vector.broadcast %189 : vector<32x1xf32> to vector<32x64xf32>
    %193 = arith.mulf %108, %192 : vector<32x64xf32>
    %194 = vector.broadcast %191 : vector<32x1xf32> to vector<32x64xf32>
    %195 = arith.addf %193, %194 : vector<32x64xf32>
    %cst_161 = arith.constant 0.000000e+00 : f32
    %196 = vector.broadcast %cst_161 : f32 to vector<32x64xf32>
    %197 = arith.cmpf ogt, %195, %196 : vector<32x64xf32>
    %cst_162 = arith.constant 2.000000e-01 : f32
    %198 = vector.broadcast %cst_162 : f32 to vector<32x64xf32>
    %199 = arith.mulf %198, %195 : vector<32x64xf32>
    %200 = arith.select %197, %195, %199 : vector<32x64xi1>, vector<32x64xf32>
    %201 = vector.broadcast %189 : vector<32x1xf32> to vector<32x64xf32>
    %202 = arith.mulf %159, %201 : vector<32x64xf32>
    %203 = vector.broadcast %191 : vector<32x1xf32> to vector<32x64xf32>
    %204 = arith.addf %202, %203 : vector<32x64xf32>
    %cst_163 = arith.constant 0.000000e+00 : f32
    %205 = vector.broadcast %cst_163 : f32 to vector<32x64xf32>
    %206 = arith.cmpf ogt, %204, %205 : vector<32x64xf32>
    %cst_164 = arith.constant 2.000000e-01 : f32
    %207 = vector.broadcast %cst_164 : f32 to vector<32x64xf32>
    %208 = arith.mulf %207, %204 : vector<32x64xf32>
    %209 = arith.select %206, %204, %208 : vector<32x64xi1>, vector<32x64xf32>
    %c0_165 = arith.constant 0 : index
    %c0_166 = arith.constant 0 : index
    %210 = vector.load %arg10[%c0_165, %c0_166] : memref<64x512xf32, #tpu.memory_space<vmem>>, vector<64x512xf32>
    %c0_167 = arith.constant 0 : index
    %c0_168 = arith.constant 0 : index
    %c0_169 = arith.constant 0 : index
    %211 = vector.load %arg9[%c0_167, %c0_168, %c0_169] : memref<16x64x16xf32, #tpu.memory_space<vmem>>, vector<1x64x16xf32>
    %212 = vector.shape_cast %211 : vector<1x64x16xf32> to vector<64x16xf32>
    %cst_170 = arith.constant dense<0.000000e+00> : vector<32x16xf32>
    %213 = tpu.matmul %200, %212, %cst_170 {dimension_numbers = #tpu.dot_dimension_numbers<[1], [0], [0], [1], [0, 0, 1, 1], [], []>} : vector<32x64xf32>, vector<64x16xf32>, vector<32x16xf32> -> vector<32x16xf32>
    %c1_171 = arith.constant 1 : index
    %c0_172 = arith.constant 0 : index
    %c0_173 = arith.constant 0 : index
    %214 = vector.load %arg9[%c1_171, %c0_172, %c0_173] : memref<16x64x16xf32, #tpu.memory_space<vmem>>, vector<1x64x16xf32>
    %215 = vector.shape_cast %214 : vector<1x64x16xf32> to vector<64x16xf32>
    %cst_174 = arith.constant dense<0.000000e+00> : vector<32x16xf32>
    %216 = tpu.matmul %200, %215, %cst_174 {dimension_numbers = #tpu.dot_dimension_numbers<[1], [0], [0], [1], [0, 0, 1, 1], [], []>} : vector<32x64xf32>, vector<64x16xf32>, vector<32x16xf32> -> vector<32x16xf32>
    %c2_175 = arith.constant 2 : index
    %c0_176 = arith.constant 0 : index
    %c0_177 = arith.constant 0 : index
    %217 = vector.load %arg9[%c2_175, %c0_176, %c0_177] : memref<16x64x16xf32, #tpu.memory_space<vmem>>, vector<1x64x16xf32>
    %218 = vector.shape_cast %217 : vector<1x64x16xf32> to vector<64x16xf32>
    %cst_178 = arith.constant dense<0.000000e+00> : vector<32x16xf32>
    %219 = tpu.matmul %200, %218, %cst_178 {dimension_numbers = #tpu.dot_dimension_numbers<[1], [0], [0], [1], [0, 0, 1, 1], [], []>} : vector<32x64xf32>, vector<64x16xf32>, vector<32x16xf32> -> vector<32x16xf32>
    %c3_179 = arith.constant 3 : index
    %c0_180 = arith.constant 0 : index
    %c0_181 = arith.constant 0 : index
    %220 = vector.load %arg9[%c3_179, %c0_180, %c0_181] : memref<16x64x16xf32, #tpu.memory_space<vmem>>, vector<1x64x16xf32>
    %221 = vector.shape_cast %220 : vector<1x64x16xf32> to vector<64x16xf32>
    %cst_182 = arith.constant dense<0.000000e+00> : vector<32x16xf32>
    %222 = tpu.matmul %200, %221, %cst_182 {dimension_numbers = #tpu.dot_dimension_numbers<[1], [0], [0], [1], [0, 0, 1, 1], [], []>} : vector<32x64xf32>, vector<64x16xf32>, vector<32x16xf32> -> vector<32x16xf32>
    %c4_183 = arith.constant 4 : index
    %c0_184 = arith.constant 0 : index
    %c0_185 = arith.constant 0 : index
    %223 = vector.load %arg9[%c4_183, %c0_184, %c0_185] : memref<16x64x16xf32, #tpu.memory_space<vmem>>, vector<1x64x16xf32>
    %224 = vector.shape_cast %223 : vector<1x64x16xf32> to vector<64x16xf32>
    %cst_186 = arith.constant dense<0.000000e+00> : vector<32x16xf32>
    %225 = tpu.matmul %200, %224, %cst_186 {dimension_numbers = #tpu.dot_dimension_numbers<[1], [0], [0], [1], [0, 0, 1, 1], [], []>} : vector<32x64xf32>, vector<64x16xf32>, vector<32x16xf32> -> vector<32x16xf32>
    %c5_187 = arith.constant 5 : index
    %c0_188 = arith.constant 0 : index
    %c0_189 = arith.constant 0 : index
    %226 = vector.load %arg9[%c5_187, %c0_188, %c0_189] : memref<16x64x16xf32, #tpu.memory_space<vmem>>, vector<1x64x16xf32>
    %227 = vector.shape_cast %226 : vector<1x64x16xf32> to vector<64x16xf32>
    %cst_190 = arith.constant dense<0.000000e+00> : vector<32x16xf32>
    %228 = tpu.matmul %200, %227, %cst_190 {dimension_numbers = #tpu.dot_dimension_numbers<[1], [0], [0], [1], [0, 0, 1, 1], [], []>} : vector<32x64xf32>, vector<64x16xf32>, vector<32x16xf32> -> vector<32x16xf32>
    %c6_191 = arith.constant 6 : index
    %c0_192 = arith.constant 0 : index
    %c0_193 = arith.constant 0 : index
    %229 = vector.load %arg9[%c6_191, %c0_192, %c0_193] : memref<16x64x16xf32, #tpu.memory_space<vmem>>, vector<1x64x16xf32>
    %230 = vector.shape_cast %229 : vector<1x64x16xf32> to vector<64x16xf32>
    %cst_194 = arith.constant dense<0.000000e+00> : vector<32x16xf32>
    %231 = tpu.matmul %200, %230, %cst_194 {dimension_numbers = #tpu.dot_dimension_numbers<[1], [0], [0], [1], [0, 0, 1, 1], [], []>} : vector<32x64xf32>, vector<64x16xf32>, vector<32x16xf32> -> vector<32x16xf32>
    %c7_195 = arith.constant 7 : index
    %c0_196 = arith.constant 0 : index
    %c0_197 = arith.constant 0 : index
    %232 = vector.load %arg9[%c7_195, %c0_196, %c0_197] : memref<16x64x16xf32, #tpu.memory_space<vmem>>, vector<1x64x16xf32>
    %233 = vector.shape_cast %232 : vector<1x64x16xf32> to vector<64x16xf32>
    %cst_198 = arith.constant dense<0.000000e+00> : vector<32x16xf32>
    %234 = tpu.matmul %200, %233, %cst_198 {dimension_numbers = #tpu.dot_dimension_numbers<[1], [0], [0], [1], [0, 0, 1, 1], [], []>} : vector<32x64xf32>, vector<64x16xf32>, vector<32x16xf32> -> vector<32x16xf32>
    %c8_199 = arith.constant 8 : index
    %c0_200 = arith.constant 0 : index
    %c0_201 = arith.constant 0 : index
    %235 = vector.load %arg9[%c8_199, %c0_200, %c0_201] : memref<16x64x16xf32, #tpu.memory_space<vmem>>, vector<1x64x16xf32>
    %236 = vector.shape_cast %235 : vector<1x64x16xf32> to vector<64x16xf32>
    %cst_202 = arith.constant dense<0.000000e+00> : vector<32x16xf32>
    %237 = tpu.matmul %200, %236, %cst_202 {dimension_numbers = #tpu.dot_dimension_numbers<[1], [0], [0], [1], [0, 0, 1, 1], [], []>} : vector<32x64xf32>, vector<64x16xf32>, vector<32x16xf32> -> vector<32x16xf32>
    %c9_203 = arith.constant 9 : index
    %c0_204 = arith.constant 0 : index
    %c0_205 = arith.constant 0 : index
    %238 = vector.load %arg9[%c9_203, %c0_204, %c0_205] : memref<16x64x16xf32, #tpu.memory_space<vmem>>, vector<1x64x16xf32>
    %239 = vector.shape_cast %238 : vector<1x64x16xf32> to vector<64x16xf32>
    %cst_206 = arith.constant dense<0.000000e+00> : vector<32x16xf32>
    %240 = tpu.matmul %200, %239, %cst_206 {dimension_numbers = #tpu.dot_dimension_numbers<[1], [0], [0], [1], [0, 0, 1, 1], [], []>} : vector<32x64xf32>, vector<64x16xf32>, vector<32x16xf32> -> vector<32x16xf32>
    %c10_207 = arith.constant 10 : index
    %c0_208 = arith.constant 0 : index
    %c0_209 = arith.constant 0 : index
    %241 = vector.load %arg9[%c10_207, %c0_208, %c0_209] : memref<16x64x16xf32, #tpu.memory_space<vmem>>, vector<1x64x16xf32>
    %242 = vector.shape_cast %241 : vector<1x64x16xf32> to vector<64x16xf32>
    %cst_210 = arith.constant dense<0.000000e+00> : vector<32x16xf32>
    %243 = tpu.matmul %200, %242, %cst_210 {dimension_numbers = #tpu.dot_dimension_numbers<[1], [0], [0], [1], [0, 0, 1, 1], [], []>} : vector<32x64xf32>, vector<64x16xf32>, vector<32x16xf32> -> vector<32x16xf32>
    %c11_211 = arith.constant 11 : index
    %c0_212 = arith.constant 0 : index
    %c0_213 = arith.constant 0 : index
    %244 = vector.load %arg9[%c11_211, %c0_212, %c0_213] : memref<16x64x16xf32, #tpu.memory_space<vmem>>, vector<1x64x16xf32>
    %245 = vector.shape_cast %244 : vector<1x64x16xf32> to vector<64x16xf32>
    %cst_214 = arith.constant dense<0.000000e+00> : vector<32x16xf32>
    %246 = tpu.matmul %200, %245, %cst_214 {dimension_numbers = #tpu.dot_dimension_numbers<[1], [0], [0], [1], [0, 0, 1, 1], [], []>} : vector<32x64xf32>, vector<64x16xf32>, vector<32x16xf32> -> vector<32x16xf32>
    %c12_215 = arith.constant 12 : index
    %c0_216 = arith.constant 0 : index
    %c0_217 = arith.constant 0 : index
    %247 = vector.load %arg9[%c12_215, %c0_216, %c0_217] : memref<16x64x16xf32, #tpu.memory_space<vmem>>, vector<1x64x16xf32>
    %248 = vector.shape_cast %247 : vector<1x64x16xf32> to vector<64x16xf32>
    %cst_218 = arith.constant dense<0.000000e+00> : vector<32x16xf32>
    %249 = tpu.matmul %200, %248, %cst_218 {dimension_numbers = #tpu.dot_dimension_numbers<[1], [0], [0], [1], [0, 0, 1, 1], [], []>} : vector<32x64xf32>, vector<64x16xf32>, vector<32x16xf32> -> vector<32x16xf32>
    %c13_219 = arith.constant 13 : index
    %c0_220 = arith.constant 0 : index
    %c0_221 = arith.constant 0 : index
    %250 = vector.load %arg9[%c13_219, %c0_220, %c0_221] : memref<16x64x16xf32, #tpu.memory_space<vmem>>, vector<1x64x16xf32>
    %251 = vector.shape_cast %250 : vector<1x64x16xf32> to vector<64x16xf32>
    %cst_222 = arith.constant dense<0.000000e+00> : vector<32x16xf32>
    %252 = tpu.matmul %200, %251, %cst_222 {dimension_numbers = #tpu.dot_dimension_numbers<[1], [0], [0], [1], [0, 0, 1, 1], [], []>} : vector<32x64xf32>, vector<64x16xf32>, vector<32x16xf32> -> vector<32x16xf32>
    %c14_223 = arith.constant 14 : index
    %c0_224 = arith.constant 0 : index
    %c0_225 = arith.constant 0 : index
    %253 = vector.load %arg9[%c14_223, %c0_224, %c0_225] : memref<16x64x16xf32, #tpu.memory_space<vmem>>, vector<1x64x16xf32>
    %254 = vector.shape_cast %253 : vector<1x64x16xf32> to vector<64x16xf32>
    %cst_226 = arith.constant dense<0.000000e+00> : vector<32x16xf32>
    %255 = tpu.matmul %200, %254, %cst_226 {dimension_numbers = #tpu.dot_dimension_numbers<[1], [0], [0], [1], [0, 0, 1, 1], [], []>} : vector<32x64xf32>, vector<64x16xf32>, vector<32x16xf32> -> vector<32x16xf32>
    %c15_227 = arith.constant 15 : index
    %c0_228 = arith.constant 0 : index
    %c0_229 = arith.constant 0 : index
    %256 = vector.load %arg9[%c15_227, %c0_228, %c0_229] : memref<16x64x16xf32, #tpu.memory_space<vmem>>, vector<1x64x16xf32>
    %257 = vector.shape_cast %256 : vector<1x64x16xf32> to vector<64x16xf32>
    %cst_230 = arith.constant dense<0.000000e+00> : vector<32x16xf32>
    %258 = tpu.matmul %200, %257, %cst_230 {dimension_numbers = #tpu.dot_dimension_numbers<[1], [0], [0], [1], [0, 0, 1, 1], [], []>} : vector<32x64xf32>, vector<64x16xf32>, vector<32x16xf32> -> vector<32x16xf32>
    %259 = tpu.concatenate %213, %216, %219, %222, %225, %228, %231, %234, %237, %240, %243, %246, %249, %252, %255, %258 in 0 : vector<32x16xf32>, vector<32x16xf32>, vector<32x16xf32>, vector<32x16xf32>, vector<32x16xf32>, vector<32x16xf32>, vector<32x16xf32>, vector<32x16xf32>, vector<32x16xf32>, vector<32x16xf32>, vector<32x16xf32>, vector<32x16xf32>, vector<32x16xf32>, vector<32x16xf32>, vector<32x16xf32>, vector<32x16xf32> -> vector<512x16xf32>
    %cst_231 = arith.constant dense<0.000000e+00> : vector<64x16xf32>
    %260 = tpu.matmul %210, %259, %cst_231 {dimension_numbers = #tpu.dot_dimension_numbers<[1], [0], [0], [1], [0, 0, 1, 1], [], []>} : vector<64x512xf32>, vector<512x16xf32>, vector<64x16xf32> -> vector<64x16xf32>
    %c0_232 = arith.constant 0 : index
    %c0_233 = arith.constant 0 : index
    %261 = vector.load %arg10[%c0_232, %c0_233] : memref<64x512xf32, #tpu.memory_space<vmem>>, vector<64x512xf32>
    %c0_234 = arith.constant 0 : index
    %c0_235 = arith.constant 0 : index
    %c0_236 = arith.constant 0 : index
    %262 = vector.load %arg9[%c0_234, %c0_235, %c0_236] : memref<16x64x16xf32, #tpu.memory_space<vmem>>, vector<1x64x16xf32>
    %263 = vector.shape_cast %262 : vector<1x64x16xf32> to vector<64x16xf32>
    %cst_237 = arith.constant dense<0.000000e+00> : vector<32x16xf32>
    %264 = tpu.matmul %209, %263, %cst_237 {dimension_numbers = #tpu.dot_dimension_numbers<[1], [0], [0], [1], [0, 0, 1, 1], [], []>} : vector<32x64xf32>, vector<64x16xf32>, vector<32x16xf32> -> vector<32x16xf32>
    %c1_238 = arith.constant 1 : index
    %c0_239 = arith.constant 0 : index
    %c0_240 = arith.constant 0 : index
    %265 = vector.load %arg9[%c1_238, %c0_239, %c0_240] : memref<16x64x16xf32, #tpu.memory_space<vmem>>, vector<1x64x16xf32>
    %266 = vector.shape_cast %265 : vector<1x64x16xf32> to vector<64x16xf32>
    %cst_241 = arith.constant dense<0.000000e+00> : vector<32x16xf32>
    %267 = tpu.matmul %209, %266, %cst_241 {dimension_numbers = #tpu.dot_dimension_numbers<[1], [0], [0], [1], [0, 0, 1, 1], [], []>} : vector<32x64xf32>, vector<64x16xf32>, vector<32x16xf32> -> vector<32x16xf32>
    %c2_242 = arith.constant 2 : index
    %c0_243 = arith.constant 0 : index
    %c0_244 = arith.constant 0 : index
    %268 = vector.load %arg9[%c2_242, %c0_243, %c0_244] : memref<16x64x16xf32, #tpu.memory_space<vmem>>, vector<1x64x16xf32>
    %269 = vector.shape_cast %268 : vector<1x64x16xf32> to vector<64x16xf32>
    %cst_245 = arith.constant dense<0.000000e+00> : vector<32x16xf32>
    %270 = tpu.matmul %209, %269, %cst_245 {dimension_numbers = #tpu.dot_dimension_numbers<[1], [0], [0], [1], [0, 0, 1, 1], [], []>} : vector<32x64xf32>, vector<64x16xf32>, vector<32x16xf32> -> vector<32x16xf32>
    %c3_246 = arith.constant 3 : index
    %c0_247 = arith.constant 0 : index
    %c0_248 = arith.constant 0 : index
    %271 = vector.load %arg9[%c3_246, %c0_247, %c0_248] : memref<16x64x16xf32, #tpu.memory_space<vmem>>, vector<1x64x16xf32>
    %272 = vector.shape_cast %271 : vector<1x64x16xf32> to vector<64x16xf32>
    %cst_249 = arith.constant dense<0.000000e+00> : vector<32x16xf32>
    %273 = tpu.matmul %209, %272, %cst_249 {dimension_numbers = #tpu.dot_dimension_numbers<[1], [0], [0], [1], [0, 0, 1, 1], [], []>} : vector<32x64xf32>, vector<64x16xf32>, vector<32x16xf32> -> vector<32x16xf32>
    %c4_250 = arith.constant 4 : index
    %c0_251 = arith.constant 0 : index
    %c0_252 = arith.constant 0 : index
    %274 = vector.load %arg9[%c4_250, %c0_251, %c0_252] : memref<16x64x16xf32, #tpu.memory_space<vmem>>, vector<1x64x16xf32>
    %275 = vector.shape_cast %274 : vector<1x64x16xf32> to vector<64x16xf32>
    %cst_253 = arith.constant dense<0.000000e+00> : vector<32x16xf32>
    %276 = tpu.matmul %209, %275, %cst_253 {dimension_numbers = #tpu.dot_dimension_numbers<[1], [0], [0], [1], [0, 0, 1, 1], [], []>} : vector<32x64xf32>, vector<64x16xf32>, vector<32x16xf32> -> vector<32x16xf32>
    %c5_254 = arith.constant 5 : index
    %c0_255 = arith.constant 0 : index
    %c0_256 = arith.constant 0 : index
    %277 = vector.load %arg9[%c5_254, %c0_255, %c0_256] : memref<16x64x16xf32, #tpu.memory_space<vmem>>, vector<1x64x16xf32>
    %278 = vector.shape_cast %277 : vector<1x64x16xf32> to vector<64x16xf32>
    %cst_257 = arith.constant dense<0.000000e+00> : vector<32x16xf32>
    %279 = tpu.matmul %209, %278, %cst_257 {dimension_numbers = #tpu.dot_dimension_numbers<[1], [0], [0], [1], [0, 0, 1, 1], [], []>} : vector<32x64xf32>, vector<64x16xf32>, vector<32x16xf32> -> vector<32x16xf32>
    %c6_258 = arith.constant 6 : index
    %c0_259 = arith.constant 0 : index
    %c0_260 = arith.constant 0 : index
    %280 = vector.load %arg9[%c6_258, %c0_259, %c0_260] : memref<16x64x16xf32, #tpu.memory_space<vmem>>, vector<1x64x16xf32>
    %281 = vector.shape_cast %280 : vector<1x64x16xf32> to vector<64x16xf32>
    %cst_261 = arith.constant dense<0.000000e+00> : vector<32x16xf32>
    %282 = tpu.matmul %209, %281, %cst_261 {dimension_numbers = #tpu.dot_dimension_numbers<[1], [0], [0], [1], [0, 0, 1, 1], [], []>} : vector<32x64xf32>, vector<64x16xf32>, vector<32x16xf32> -> vector<32x16xf32>
    %c7_262 = arith.constant 7 : index
    %c0_263 = arith.constant 0 : index
    %c0_264 = arith.constant 0 : index
    %283 = vector.load %arg9[%c7_262, %c0_263, %c0_264] : memref<16x64x16xf32, #tpu.memory_space<vmem>>, vector<1x64x16xf32>
    %284 = vector.shape_cast %283 : vector<1x64x16xf32> to vector<64x16xf32>
    %cst_265 = arith.constant dense<0.000000e+00> : vector<32x16xf32>
    %285 = tpu.matmul %209, %284, %cst_265 {dimension_numbers = #tpu.dot_dimension_numbers<[1], [0], [0], [1], [0, 0, 1, 1], [], []>} : vector<32x64xf32>, vector<64x16xf32>, vector<32x16xf32> -> vector<32x16xf32>
    %c8_266 = arith.constant 8 : index
    %c0_267 = arith.constant 0 : index
    %c0_268 = arith.constant 0 : index
    %286 = vector.load %arg9[%c8_266, %c0_267, %c0_268] : memref<16x64x16xf32, #tpu.memory_space<vmem>>, vector<1x64x16xf32>
    %287 = vector.shape_cast %286 : vector<1x64x16xf32> to vector<64x16xf32>
    %cst_269 = arith.constant dense<0.000000e+00> : vector<32x16xf32>
    %288 = tpu.matmul %209, %287, %cst_269 {dimension_numbers = #tpu.dot_dimension_numbers<[1], [0], [0], [1], [0, 0, 1, 1], [], []>} : vector<32x64xf32>, vector<64x16xf32>, vector<32x16xf32> -> vector<32x16xf32>
    %c9_270 = arith.constant 9 : index
    %c0_271 = arith.constant 0 : index
    %c0_272 = arith.constant 0 : index
    %289 = vector.load %arg9[%c9_270, %c0_271, %c0_272] : memref<16x64x16xf32, #tpu.memory_space<vmem>>, vector<1x64x16xf32>
    %290 = vector.shape_cast %289 : vector<1x64x16xf32> to vector<64x16xf32>
    %cst_273 = arith.constant dense<0.000000e+00> : vector<32x16xf32>
    %291 = tpu.matmul %209, %290, %cst_273 {dimension_numbers = #tpu.dot_dimension_numbers<[1], [0], [0], [1], [0, 0, 1, 1], [], []>} : vector<32x64xf32>, vector<64x16xf32>, vector<32x16xf32> -> vector<32x16xf32>
    %c10_274 = arith.constant 10 : index
    %c0_275 = arith.constant 0 : index
    %c0_276 = arith.constant 0 : index
    %292 = vector.load %arg9[%c10_274, %c0_275, %c0_276] : memref<16x64x16xf32, #tpu.memory_space<vmem>>, vector<1x64x16xf32>
    %293 = vector.shape_cast %292 : vector<1x64x16xf32> to vector<64x16xf32>
    %cst_277 = arith.constant dense<0.000000e+00> : vector<32x16xf32>
    %294 = tpu.matmul %209, %293, %cst_277 {dimension_numbers = #tpu.dot_dimension_numbers<[1], [0], [0], [1], [0, 0, 1, 1], [], []>} : vector<32x64xf32>, vector<64x16xf32>, vector<32x16xf32> -> vector<32x16xf32>
    %c11_278 = arith.constant 11 : index
    %c0_279 = arith.constant 0 : index
    %c0_280 = arith.constant 0 : index
    %295 = vector.load %arg9[%c11_278, %c0_279, %c0_280] : memref<16x64x16xf32, #tpu.memory_space<vmem>>, vector<1x64x16xf32>
    %296 = vector.shape_cast %295 : vector<1x64x16xf32> to vector<64x16xf32>
    %cst_281 = arith.constant dense<0.000000e+00> : vector<32x16xf32>
    %297 = tpu.matmul %209, %296, %cst_281 {dimension_numbers = #tpu.dot_dimension_numbers<[1], [0], [0], [1], [0, 0, 1, 1], [], []>} : vector<32x64xf32>, vector<64x16xf32>, vector<32x16xf32> -> vector<32x16xf32>
    %c12_282 = arith.constant 12 : index
    %c0_283 = arith.constant 0 : index
    %c0_284 = arith.constant 0 : index
    %298 = vector.load %arg9[%c12_282, %c0_283, %c0_284] : memref<16x64x16xf32, #tpu.memory_space<vmem>>, vector<1x64x16xf32>
    %299 = vector.shape_cast %298 : vector<1x64x16xf32> to vector<64x16xf32>
    %cst_285 = arith.constant dense<0.000000e+00> : vector<32x16xf32>
    %300 = tpu.matmul %209, %299, %cst_285 {dimension_numbers = #tpu.dot_dimension_numbers<[1], [0], [0], [1], [0, 0, 1, 1], [], []>} : vector<32x64xf32>, vector<64x16xf32>, vector<32x16xf32> -> vector<32x16xf32>
    %c13_286 = arith.constant 13 : index
    %c0_287 = arith.constant 0 : index
    %c0_288 = arith.constant 0 : index
    %301 = vector.load %arg9[%c13_286, %c0_287, %c0_288] : memref<16x64x16xf32, #tpu.memory_space<vmem>>, vector<1x64x16xf32>
    %302 = vector.shape_cast %301 : vector<1x64x16xf32> to vector<64x16xf32>
    %cst_289 = arith.constant dense<0.000000e+00> : vector<32x16xf32>
    %303 = tpu.matmul %209, %302, %cst_289 {dimension_numbers = #tpu.dot_dimension_numbers<[1], [0], [0], [1], [0, 0, 1, 1], [], []>} : vector<32x64xf32>, vector<64x16xf32>, vector<32x16xf32> -> vector<32x16xf32>
    %c14_290 = arith.constant 14 : index
    %c0_291 = arith.constant 0 : index
    %c0_292 = arith.constant 0 : index
    %304 = vector.load %arg9[%c14_290, %c0_291, %c0_292] : memref<16x64x16xf32, #tpu.memory_space<vmem>>, vector<1x64x16xf32>
    %305 = vector.shape_cast %304 : vector<1x64x16xf32> to vector<64x16xf32>
    %cst_293 = arith.constant dense<0.000000e+00> : vector<32x16xf32>
    %306 = tpu.matmul %209, %305, %cst_293 {dimension_numbers = #tpu.dot_dimension_numbers<[1], [0], [0], [1], [0, 0, 1, 1], [], []>} : vector<32x64xf32>, vector<64x16xf32>, vector<32x16xf32> -> vector<32x16xf32>
    %c15_294 = arith.constant 15 : index
    %c0_295 = arith.constant 0 : index
    %c0_296 = arith.constant 0 : index
    %307 = vector.load %arg9[%c15_294, %c0_295, %c0_296] : memref<16x64x16xf32, #tpu.memory_space<vmem>>, vector<1x64x16xf32>
    %308 = vector.shape_cast %307 : vector<1x64x16xf32> to vector<64x16xf32>
    %cst_297 = arith.constant dense<0.000000e+00> : vector<32x16xf32>
    %309 = tpu.matmul %209, %308, %cst_297 {dimension_numbers = #tpu.dot_dimension_numbers<[1], [0], [0], [1], [0, 0, 1, 1], [], []>} : vector<32x64xf32>, vector<64x16xf32>, vector<32x16xf32> -> vector<32x16xf32>
    %310 = tpu.concatenate %264, %267, %270, %273, %276, %279, %282, %285, %288, %291, %294, %297, %300, %303, %306, %309 in 0 : vector<32x16xf32>, vector<32x16xf32>, vector<32x16xf32>, vector<32x16xf32>, vector<32x16xf32>, vector<32x16xf32>, vector<32x16xf32>, vector<32x16xf32>, vector<32x16xf32>, vector<32x16xf32>, vector<32x16xf32>, vector<32x16xf32>, vector<32x16xf32>, vector<32x16xf32>, vector<32x16xf32>, vector<32x16xf32> -> vector<512x16xf32>
    %cst_298 = arith.constant dense<0.000000e+00> : vector<64x16xf32>
    %311 = tpu.matmul %261, %310, %cst_298 {dimension_numbers = #tpu.dot_dimension_numbers<[1], [0], [0], [1], [0, 0, 1, 1], [], []>} : vector<64x512xf32>, vector<512x16xf32>, vector<64x16xf32> -> vector<64x16xf32>
    %c0_299 = arith.constant 0 : index
    %c0_300 = arith.constant 0 : index
    %312 = vector.load %arg11[%c0_299, %c0_300] : memref<64x1xf32, #tpu.memory_space<vmem>>, vector<64x1xf32>
    %c0_301 = arith.constant 0 : index
    %c0_302 = arith.constant 0 : index
    %313 = vector.load %arg12[%c0_301, %c0_302] : memref<64x1xf32, #tpu.memory_space<vmem>>, vector<64x1xf32>
    %cst_303 = arith.constant 0.000000e+00 : f32
    %314 = vector.broadcast %cst_303 : f32 to vector<64x1xf32>
    %cst_304 = arith.constant 0.000000e+00 : f32
    %315 = vector.broadcast %cst_304 : f32 to vector<64x1xf32>
    %cst_305 = arith.constant dense<0.000000e+00> : vector<64xf32>
    %316 = vector.multi_reduction <add>, %260, %cst_305 [1] : vector<64x16xf32> to vector<64xf32>
    %317 = vector.shape_cast %316 : vector<64xf32> to vector<64x1xf32>
    %318 = arith.addf %314, %317 : vector<64x1xf32>
    %319 = arith.mulf %260, %260 : vector<64x16xf32>
    %cst_306 = arith.constant dense<0.000000e+00> : vector<64xf32>
    %320 = vector.multi_reduction <add>, %319, %cst_306 [1] : vector<64x16xf32> to vector<64xf32>
    %321 = vector.shape_cast %320 : vector<64xf32> to vector<64x1xf32>
    %322 = arith.addf %315, %321 : vector<64x1xf32>
    %cst_307 = arith.constant dense<0.000000e+00> : vector<64xf32>
    %323 = vector.multi_reduction <add>, %311, %cst_307 [1] : vector<64x16xf32> to vector<64xf32>
    %324 = vector.shape_cast %323 : vector<64xf32> to vector<64x1xf32>
    %325 = arith.addf %318, %324 : vector<64x1xf32>
    %326 = arith.mulf %311, %311 : vector<64x16xf32>
    %cst_308 = arith.constant dense<0.000000e+00> : vector<64xf32>
    %327 = vector.multi_reduction <add>, %326, %cst_308 [1] : vector<64x16xf32> to vector<64xf32>
    %328 = vector.shape_cast %327 : vector<64xf32> to vector<64x1xf32>
    %329 = arith.addf %322, %328 : vector<64x1xf32>
    %cst_309 = arith.constant 3.125000e-02 : f32
    %330 = vector.broadcast %cst_309 : f32 to vector<64x1xf32>
    %331 = arith.mulf %325, %330 : vector<64x1xf32>
    %cst_310 = arith.constant 3.125000e-02 : f32
    %332 = vector.broadcast %cst_310 : f32 to vector<64x1xf32>
    %333 = arith.mulf %329, %332 : vector<64x1xf32>
    %334 = arith.mulf %331, %331 : vector<64x1xf32>
    %335 = arith.subf %333, %334 : vector<64x1xf32>
    %cst_311 = arith.constant 0.000000e+00 : f32
    %336 = vector.broadcast %cst_311 : f32 to vector<64x1xf32>
    %337 = arith.maximumf %335, %336 : vector<64x1xf32>
    %cst_312 = arith.constant 9.99999974E-6 : f32
    %338 = vector.broadcast %cst_312 : f32 to vector<64x1xf32>
    %339 = arith.addf %337, %338 : vector<64x1xf32>
    %340 = math.rsqrt %339 : vector<64x1xf32>
    %341 = arith.mulf %312, %340 : vector<64x1xf32>
    %342 = arith.mulf %331, %341 : vector<64x1xf32>
    %343 = arith.subf %313, %342 : vector<64x1xf32>
    %344 = vector.broadcast %341 : vector<64x1xf32> to vector<64x16xf32>
    %345 = arith.mulf %260, %344 : vector<64x16xf32>
    %346 = vector.broadcast %343 : vector<64x1xf32> to vector<64x16xf32>
    %347 = arith.addf %345, %346 : vector<64x16xf32>
    %cst_313 = arith.constant 0.000000e+00 : f32
    %348 = vector.broadcast %cst_313 : f32 to vector<64x16xf32>
    %349 = arith.cmpf ogt, %347, %348 : vector<64x16xf32>
    %cst_314 = arith.constant 2.000000e-01 : f32
    %350 = vector.broadcast %cst_314 : f32 to vector<64x16xf32>
    %351 = arith.mulf %350, %347 : vector<64x16xf32>
    %352 = arith.select %349, %347, %351 : vector<64x16xi1>, vector<64x16xf32>
    %353 = vector.broadcast %341 : vector<64x1xf32> to vector<64x16xf32>
    %354 = arith.mulf %311, %353 : vector<64x16xf32>
    %355 = vector.broadcast %343 : vector<64x1xf32> to vector<64x16xf32>
    %356 = arith.addf %354, %355 : vector<64x16xf32>
    %cst_315 = arith.constant 0.000000e+00 : f32
    %357 = vector.broadcast %cst_315 : f32 to vector<64x16xf32>
    %358 = arith.cmpf ogt, %356, %357 : vector<64x16xf32>
    %cst_316 = arith.constant 2.000000e-01 : f32
    %359 = vector.broadcast %cst_316 : f32 to vector<64x16xf32>
    %360 = arith.mulf %359, %356 : vector<64x16xf32>
    %361 = arith.select %358, %356, %360 : vector<64x16xi1>, vector<64x16xf32>
    %c0_317 = arith.constant 0 : index
    %c0_318 = arith.constant 0 : index
    %362 = vector.load %arg13[%c0_317, %c0_318] : memref<16x32xf32, #tpu.memory_space<vmem>>, vector<16x32xf32>
    %c0_319 = arith.constant 0 : index
    %c0_320 = arith.constant 0 : index
    %363 = vector.load %arg14[%c0_319, %c0_320] : memref<32x2xf32, #tpu.memory_space<vmem>>, vector<32x2xf32>
    %cst_321 = arith.constant dense<0.000000e+00> : vector<16x2xf32>
    %364 = tpu.matmul %362, %363, %cst_321 {dimension_numbers = #tpu.dot_dimension_numbers<[1], [0], [0], [1], [0, 0, 1, 1], [], []>} : vector<16x32xf32>, vector<32x2xf32>, vector<16x2xf32> -> vector<16x2xf32>
    %cst_322 = arith.constant 0.000000e+00 : f32
    %365 = vector.broadcast %cst_322 : f32 to vector<16x2xf32>
    %366 = arith.maximumf %364, %365 : vector<16x2xf32>
    %367 = tpu.iota {dimensions = array<i32: 1>} : vector<16x2xi32>
    %c0_i32 = arith.constant 0 : i32
    %368 = vector.broadcast %c0_i32 : i32 to vector<16x2xi32>
    %369 = arith.cmpi eq, %367, %368 : vector<16x2xi32>
    %cst_323 = arith.constant 0.000000e+00 : f32
    %370 = vector.broadcast %cst_323 : f32 to vector<16x2xf32>
    %371 = arith.select %369, %366, %370 : vector<16x2xi1>, vector<16x2xf32>
    %cst_324 = arith.constant dense<0.000000e+00> : vector<16xf32>
    %372 = vector.multi_reduction <add>, %371, %cst_324 [1] : vector<16x2xf32> to vector<16xf32>
    %373 = vector.shape_cast %372 : vector<16xf32> to vector<16x1xf32>
    %374 = vector.shape_cast %373 : vector<16x1xf32> to vector<16x1xf32>
    %375 = vector.broadcast %374 : vector<16x1xf32> to vector<16x16xf32>
    %376 = tpu.concatenate %352, %375 in 0 : vector<64x16xf32>, vector<16x16xf32> -> vector<80x16xf32>
    %c0_325 = arith.constant 0 : index
    %c0_326 = arith.constant 0 : index
    %377 = vector.load %arg16[%c0_325, %c0_326] : memref<16x720xf32, #tpu.memory_space<vmem>>, vector<16x720xf32>
    %c0_327 = arith.constant 0 : index
    %c0_328 = arith.constant 0 : index
    %c0_329 = arith.constant 0 : index
    %378 = vector.load %arg15[%c0_327, %c0_328, %c0_329] : memref<9x16x16xf32, #tpu.memory_space<vmem>>, vector<1x16x16xf32>
    %379 = vector.shape_cast %378 : vector<1x16x16xf32> to vector<16x16xf32>
    %cst_330 = arith.constant dense<0.000000e+00> : vector<80x16xf32>
    %380 = tpu.matmul %376, %379, %cst_330 {dimension_numbers = #tpu.dot_dimension_numbers<[1], [0], [0], [1], [0, 0, 1, 1], [], []>} : vector<80x16xf32>, vector<16x16xf32>, vector<80x16xf32> -> vector<80x16xf32>
    %c1_331 = arith.constant 1 : index
    %c0_332 = arith.constant 0 : index
    %c0_333 = arith.constant 0 : index
    %381 = vector.load %arg15[%c1_331, %c0_332, %c0_333] : memref<9x16x16xf32, #tpu.memory_space<vmem>>, vector<1x16x16xf32>
    %382 = vector.shape_cast %381 : vector<1x16x16xf32> to vector<16x16xf32>
    %cst_334 = arith.constant dense<0.000000e+00> : vector<80x16xf32>
    %383 = tpu.matmul %376, %382, %cst_334 {dimension_numbers = #tpu.dot_dimension_numbers<[1], [0], [0], [1], [0, 0, 1, 1], [], []>} : vector<80x16xf32>, vector<16x16xf32>, vector<80x16xf32> -> vector<80x16xf32>
    %c2_335 = arith.constant 2 : index
    %c0_336 = arith.constant 0 : index
    %c0_337 = arith.constant 0 : index
    %384 = vector.load %arg15[%c2_335, %c0_336, %c0_337] : memref<9x16x16xf32, #tpu.memory_space<vmem>>, vector<1x16x16xf32>
    %385 = vector.shape_cast %384 : vector<1x16x16xf32> to vector<16x16xf32>
    %cst_338 = arith.constant dense<0.000000e+00> : vector<80x16xf32>
    %386 = tpu.matmul %376, %385, %cst_338 {dimension_numbers = #tpu.dot_dimension_numbers<[1], [0], [0], [1], [0, 0, 1, 1], [], []>} : vector<80x16xf32>, vector<16x16xf32>, vector<80x16xf32> -> vector<80x16xf32>
    %c3_339 = arith.constant 3 : index
    %c0_340 = arith.constant 0 : index
    %c0_341 = arith.constant 0 : index
    %387 = vector.load %arg15[%c3_339, %c0_340, %c0_341] : memref<9x16x16xf32, #tpu.memory_space<vmem>>, vector<1x16x16xf32>
    %388 = vector.shape_cast %387 : vector<1x16x16xf32> to vector<16x16xf32>
    %cst_342 = arith.constant dense<0.000000e+00> : vector<80x16xf32>
    %389 = tpu.matmul %376, %388, %cst_342 {dimension_numbers = #tpu.dot_dimension_numbers<[1], [0], [0], [1], [0, 0, 1, 1], [], []>} : vector<80x16xf32>, vector<16x16xf32>, vector<80x16xf32> -> vector<80x16xf32>
    %c4_343 = arith.constant 4 : index
    %c0_344 = arith.constant 0 : index
    %c0_345 = arith.constant 0 : index
    %390 = vector.load %arg15[%c4_343, %c0_344, %c0_345] : memref<9x16x16xf32, #tpu.memory_space<vmem>>, vector<1x16x16xf32>
    %391 = vector.shape_cast %390 : vector<1x16x16xf32> to vector<16x16xf32>
    %cst_346 = arith.constant dense<0.000000e+00> : vector<80x16xf32>
    %392 = tpu.matmul %376, %391, %cst_346 {dimension_numbers = #tpu.dot_dimension_numbers<[1], [0], [0], [1], [0, 0, 1, 1], [], []>} : vector<80x16xf32>, vector<16x16xf32>, vector<80x16xf32> -> vector<80x16xf32>
    %c5_347 = arith.constant 5 : index
    %c0_348 = arith.constant 0 : index
    %c0_349 = arith.constant 0 : index
    %393 = vector.load %arg15[%c5_347, %c0_348, %c0_349] : memref<9x16x16xf32, #tpu.memory_space<vmem>>, vector<1x16x16xf32>
    %394 = vector.shape_cast %393 : vector<1x16x16xf32> to vector<16x16xf32>
    %cst_350 = arith.constant dense<0.000000e+00> : vector<80x16xf32>
    %395 = tpu.matmul %376, %394, %cst_350 {dimension_numbers = #tpu.dot_dimension_numbers<[1], [0], [0], [1], [0, 0, 1, 1], [], []>} : vector<80x16xf32>, vector<16x16xf32>, vector<80x16xf32> -> vector<80x16xf32>
    %c6_351 = arith.constant 6 : index
    %c0_352 = arith.constant 0 : index
    %c0_353 = arith.constant 0 : index
    %396 = vector.load %arg15[%c6_351, %c0_352, %c0_353] : memref<9x16x16xf32, #tpu.memory_space<vmem>>, vector<1x16x16xf32>
    %397 = vector.shape_cast %396 : vector<1x16x16xf32> to vector<16x16xf32>
    %cst_354 = arith.constant dense<0.000000e+00> : vector<80x16xf32>
    %398 = tpu.matmul %376, %397, %cst_354 {dimension_numbers = #tpu.dot_dimension_numbers<[1], [0], [0], [1], [0, 0, 1, 1], [], []>} : vector<80x16xf32>, vector<16x16xf32>, vector<80x16xf32> -> vector<80x16xf32>
    %c7_355 = arith.constant 7 : index
    %c0_356 = arith.constant 0 : index
    %c0_357 = arith.constant 0 : index
    %399 = vector.load %arg15[%c7_355, %c0_356, %c0_357] : memref<9x16x16xf32, #tpu.memory_space<vmem>>, vector<1x16x16xf32>
    %400 = vector.shape_cast %399 : vector<1x16x16xf32> to vector<16x16xf32>
    %cst_358 = arith.constant dense<0.000000e+00> : vector<80x16xf32>
    %401 = tpu.matmul %376, %400, %cst_358 {dimension_numbers = #tpu.dot_dimension_numbers<[1], [0], [0], [1], [0, 0, 1, 1], [], []>} : vector<80x16xf32>, vector<16x16xf32>, vector<80x16xf32> -> vector<80x16xf32>
    %c8_359 = arith.constant 8 : index
    %c0_360 = arith.constant 0 : index
    %c0_361 = arith.constant 0 : index
    %402 = vector.load %arg15[%c8_359, %c0_360, %c0_361] : memref<9x16x16xf32, #tpu.memory_space<vmem>>, vector<1x16x16xf32>
    %403 = vector.shape_cast %402 : vector<1x16x16xf32> to vector<16x16xf32>
    %cst_362 = arith.constant dense<0.000000e+00> : vector<80x16xf32>
    %404 = tpu.matmul %376, %403, %cst_362 {dimension_numbers = #tpu.dot_dimension_numbers<[1], [0], [0], [1], [0, 0, 1, 1], [], []>} : vector<80x16xf32>, vector<16x16xf32>, vector<80x16xf32> -> vector<80x16xf32>
    %405 = tpu.concatenate %380, %383, %386, %389, %392, %395, %398, %401, %404 in 0 : vector<80x16xf32>, vector<80x16xf32>, vector<80x16xf32>, vector<80x16xf32>, vector<80x16xf32>, vector<80x16xf32>, vector<80x16xf32>, vector<80x16xf32>, vector<80x16xf32> -> vector<720x16xf32>
    %cst_363 = arith.constant dense<0.000000e+00> : vector<16x16xf32>
    %406 = tpu.matmul %377, %405, %cst_363 {dimension_numbers = #tpu.dot_dimension_numbers<[1], [0], [0], [1], [0, 0, 1, 1], [], []>} : vector<16x720xf32>, vector<720x16xf32>, vector<16x16xf32> -> vector<16x16xf32>
    %c1_i32 = arith.constant 1 : i32
    %407 = vector.broadcast %c1_i32 : i32 to vector<16x2xi32>
    %408 = arith.cmpi eq, %367, %407 : vector<16x2xi32>
    %cst_364 = arith.constant 0.000000e+00 : f32
    %409 = vector.broadcast %cst_364 : f32 to vector<16x2xf32>
    %410 = arith.select %408, %366, %409 : vector<16x2xi1>, vector<16x2xf32>
    %cst_365 = arith.constant dense<0.000000e+00> : vector<16xf32>
    %411 = vector.multi_reduction <add>, %410, %cst_365 [1] : vector<16x2xf32> to vector<16xf32>
    %412 = vector.shape_cast %411 : vector<16xf32> to vector<16x1xf32>
    %413 = vector.shape_cast %412 : vector<16x1xf32> to vector<16x1xf32>
    %414 = vector.broadcast %413 : vector<16x1xf32> to vector<16x16xf32>
    %415 = tpu.concatenate %361, %414 in 0 : vector<64x16xf32>, vector<16x16xf32> -> vector<80x16xf32>
    %c0_366 = arith.constant 0 : index
    %c0_367 = arith.constant 0 : index
    %416 = vector.load %arg16[%c0_366, %c0_367] : memref<16x720xf32, #tpu.memory_space<vmem>>, vector<16x720xf32>
    %c0_368 = arith.constant 0 : index
    %c0_369 = arith.constant 0 : index
    %c0_370 = arith.constant 0 : index
    %417 = vector.load %arg15[%c0_368, %c0_369, %c0_370] : memref<9x16x16xf32, #tpu.memory_space<vmem>>, vector<1x16x16xf32>
    %418 = vector.shape_cast %417 : vector<1x16x16xf32> to vector<16x16xf32>
    %cst_371 = arith.constant dense<0.000000e+00> : vector<80x16xf32>
    %419 = tpu.matmul %415, %418, %cst_371 {dimension_numbers = #tpu.dot_dimension_numbers<[1], [0], [0], [1], [0, 0, 1, 1], [], []>} : vector<80x16xf32>, vector<16x16xf32>, vector<80x16xf32> -> vector<80x16xf32>
    %c1_372 = arith.constant 1 : index
    %c0_373 = arith.constant 0 : index
    %c0_374 = arith.constant 0 : index
    %420 = vector.load %arg15[%c1_372, %c0_373, %c0_374] : memref<9x16x16xf32, #tpu.memory_space<vmem>>, vector<1x16x16xf32>
    %421 = vector.shape_cast %420 : vector<1x16x16xf32> to vector<16x16xf32>
    %cst_375 = arith.constant dense<0.000000e+00> : vector<80x16xf32>
    %422 = tpu.matmul %415, %421, %cst_375 {dimension_numbers = #tpu.dot_dimension_numbers<[1], [0], [0], [1], [0, 0, 1, 1], [], []>} : vector<80x16xf32>, vector<16x16xf32>, vector<80x16xf32> -> vector<80x16xf32>
    %c2_376 = arith.constant 2 : index
    %c0_377 = arith.constant 0 : index
    %c0_378 = arith.constant 0 : index
    %423 = vector.load %arg15[%c2_376, %c0_377, %c0_378] : memref<9x16x16xf32, #tpu.memory_space<vmem>>, vector<1x16x16xf32>
    %424 = vector.shape_cast %423 : vector<1x16x16xf32> to vector<16x16xf32>
    %cst_379 = arith.constant dense<0.000000e+00> : vector<80x16xf32>
    %425 = tpu.matmul %415, %424, %cst_379 {dimension_numbers = #tpu.dot_dimension_numbers<[1], [0], [0], [1], [0, 0, 1, 1], [], []>} : vector<80x16xf32>, vector<16x16xf32>, vector<80x16xf32> -> vector<80x16xf32>
    %c3_380 = arith.constant 3 : index
    %c0_381 = arith.constant 0 : index
    %c0_382 = arith.constant 0 : index
    %426 = vector.load %arg15[%c3_380, %c0_381, %c0_382] : memref<9x16x16xf32, #tpu.memory_space<vmem>>, vector<1x16x16xf32>
    %427 = vector.shape_cast %426 : vector<1x16x16xf32> to vector<16x16xf32>
    %cst_383 = arith.constant dense<0.000000e+00> : vector<80x16xf32>
    %428 = tpu.matmul %415, %427, %cst_383 {dimension_numbers = #tpu.dot_dimension_numbers<[1], [0], [0], [1], [0, 0, 1, 1], [], []>} : vector<80x16xf32>, vector<16x16xf32>, vector<80x16xf32> -> vector<80x16xf32>
    %c4_384 = arith.constant 4 : index
    %c0_385 = arith.constant 0 : index
    %c0_386 = arith.constant 0 : index
    %429 = vector.load %arg15[%c4_384, %c0_385, %c0_386] : memref<9x16x16xf32, #tpu.memory_space<vmem>>, vector<1x16x16xf32>
    %430 = vector.shape_cast %429 : vector<1x16x16xf32> to vector<16x16xf32>
    %cst_387 = arith.constant dense<0.000000e+00> : vector<80x16xf32>
    %431 = tpu.matmul %415, %430, %cst_387 {dimension_numbers = #tpu.dot_dimension_numbers<[1], [0], [0], [1], [0, 0, 1, 1], [], []>} : vector<80x16xf32>, vector<16x16xf32>, vector<80x16xf32> -> vector<80x16xf32>
    %c5_388 = arith.constant 5 : index
    %c0_389 = arith.constant 0 : index
    %c0_390 = arith.constant 0 : index
    %432 = vector.load %arg15[%c5_388, %c0_389, %c0_390] : memref<9x16x16xf32, #tpu.memory_space<vmem>>, vector<1x16x16xf32>
    %433 = vector.shape_cast %432 : vector<1x16x16xf32> to vector<16x16xf32>
    %cst_391 = arith.constant dense<0.000000e+00> : vector<80x16xf32>
    %434 = tpu.matmul %415, %433, %cst_391 {dimension_numbers = #tpu.dot_dimension_numbers<[1], [0], [0], [1], [0, 0, 1, 1], [], []>} : vector<80x16xf32>, vector<16x16xf32>, vector<80x16xf32> -> vector<80x16xf32>
    %c6_392 = arith.constant 6 : index
    %c0_393 = arith.constant 0 : index
    %c0_394 = arith.constant 0 : index
    %435 = vector.load %arg15[%c6_392, %c0_393, %c0_394] : memref<9x16x16xf32, #tpu.memory_space<vmem>>, vector<1x16x16xf32>
    %436 = vector.shape_cast %435 : vector<1x16x16xf32> to vector<16x16xf32>
    %cst_395 = arith.constant dense<0.000000e+00> : vector<80x16xf32>
    %437 = tpu.matmul %415, %436, %cst_395 {dimension_numbers = #tpu.dot_dimension_numbers<[1], [0], [0], [1], [0, 0, 1, 1], [], []>} : vector<80x16xf32>, vector<16x16xf32>, vector<80x16xf32> -> vector<80x16xf32>
    %c7_396 = arith.constant 7 : index
    %c0_397 = arith.constant 0 : index
    %c0_398 = arith.constant 0 : index
    %438 = vector.load %arg15[%c7_396, %c0_397, %c0_398] : memref<9x16x16xf32, #tpu.memory_space<vmem>>, vector<1x16x16xf32>
    %439 = vector.shape_cast %438 : vector<1x16x16xf32> to vector<16x16xf32>
    %cst_399 = arith.constant dense<0.000000e+00> : vector<80x16xf32>
    %440 = tpu.matmul %415, %439, %cst_399 {dimension_numbers = #tpu.dot_dimension_numbers<[1], [0], [0], [1], [0, 0, 1, 1], [], []>} : vector<80x16xf32>, vector<16x16xf32>, vector<80x16xf32> -> vector<80x16xf32>
    %c8_400 = arith.constant 8 : index
    %c0_401 = arith.constant 0 : index
    %c0_402 = arith.constant 0 : index
    %441 = vector.load %arg15[%c8_400, %c0_401, %c0_402] : memref<9x16x16xf32, #tpu.memory_space<vmem>>, vector<1x16x16xf32>
    %442 = vector.shape_cast %441 : vector<1x16x16xf32> to vector<16x16xf32>
    %cst_403 = arith.constant dense<0.000000e+00> : vector<80x16xf32>
    %443 = tpu.matmul %415, %442, %cst_403 {dimension_numbers = #tpu.dot_dimension_numbers<[1], [0], [0], [1], [0, 0, 1, 1], [], []>} : vector<80x16xf32>, vector<16x16xf32>, vector<80x16xf32> -> vector<80x16xf32>
    %444 = tpu.concatenate %419, %422, %425, %428, %431, %434, %437, %440, %443 in 0 : vector<80x16xf32>, vector<80x16xf32>, vector<80x16xf32>, vector<80x16xf32>, vector<80x16xf32>, vector<80x16xf32>, vector<80x16xf32>, vector<80x16xf32>, vector<80x16xf32> -> vector<720x16xf32>
    %cst_404 = arith.constant dense<0.000000e+00> : vector<16x16xf32>
    %445 = tpu.matmul %416, %444, %cst_404 {dimension_numbers = #tpu.dot_dimension_numbers<[1], [0], [0], [1], [0, 0, 1, 1], [], []>} : vector<16x720xf32>, vector<720x16xf32>, vector<16x16xf32> -> vector<16x16xf32>
    %c0_405 = arith.constant 0 : index
    %c0_406 = arith.constant 0 : index
    %446 = vector.load %arg17[%c0_405, %c0_406] : memref<16x1xf32, #tpu.memory_space<vmem>>, vector<16x1xf32>
    %c0_407 = arith.constant 0 : index
    %c0_408 = arith.constant 0 : index
    %447 = vector.load %arg18[%c0_407, %c0_408] : memref<16x1xf32, #tpu.memory_space<vmem>>, vector<16x1xf32>
    %cst_409 = arith.constant 0.000000e+00 : f32
    %448 = vector.broadcast %cst_409 : f32 to vector<16x1xf32>
    %cst_410 = arith.constant 0.000000e+00 : f32
    %449 = vector.broadcast %cst_410 : f32 to vector<16x1xf32>
    %cst_411 = arith.constant dense<0.000000e+00> : vector<16xf32>
    %450 = vector.multi_reduction <add>, %406, %cst_411 [1] : vector<16x16xf32> to vector<16xf32>
    %451 = vector.shape_cast %450 : vector<16xf32> to vector<16x1xf32>
    %452 = arith.addf %448, %451 : vector<16x1xf32>
    %453 = arith.mulf %406, %406 : vector<16x16xf32>
    %cst_412 = arith.constant dense<0.000000e+00> : vector<16xf32>
    %454 = vector.multi_reduction <add>, %453, %cst_412 [1] : vector<16x16xf32> to vector<16xf32>
    %455 = vector.shape_cast %454 : vector<16xf32> to vector<16x1xf32>
    %456 = arith.addf %449, %455 : vector<16x1xf32>
    %cst_413 = arith.constant dense<0.000000e+00> : vector<16xf32>
    %457 = vector.multi_reduction <add>, %445, %cst_413 [1] : vector<16x16xf32> to vector<16xf32>
    %458 = vector.shape_cast %457 : vector<16xf32> to vector<16x1xf32>
    %459 = arith.addf %452, %458 : vector<16x1xf32>
    %460 = arith.mulf %445, %445 : vector<16x16xf32>
    %cst_414 = arith.constant dense<0.000000e+00> : vector<16xf32>
    %461 = vector.multi_reduction <add>, %460, %cst_414 [1] : vector<16x16xf32> to vector<16xf32>
    %462 = vector.shape_cast %461 : vector<16xf32> to vector<16x1xf32>
    %463 = arith.addf %456, %462 : vector<16x1xf32>
    %cst_415 = arith.constant 3.125000e-02 : f32
    %464 = vector.broadcast %cst_415 : f32 to vector<16x1xf32>
    %465 = arith.mulf %459, %464 : vector<16x1xf32>
    %cst_416 = arith.constant 3.125000e-02 : f32
    %466 = vector.broadcast %cst_416 : f32 to vector<16x1xf32>
    %467 = arith.mulf %463, %466 : vector<16x1xf32>
    %468 = arith.mulf %465, %465 : vector<16x1xf32>
    %469 = arith.subf %467, %468 : vector<16x1xf32>
    %cst_417 = arith.constant 0.000000e+00 : f32
    %470 = vector.broadcast %cst_417 : f32 to vector<16x1xf32>
    %471 = arith.maximumf %469, %470 : vector<16x1xf32>
    %cst_418 = arith.constant 9.99999974E-6 : f32
    %472 = vector.broadcast %cst_418 : f32 to vector<16x1xf32>
    %473 = arith.addf %471, %472 : vector<16x1xf32>
    %474 = math.rsqrt %473 : vector<16x1xf32>
    %475 = arith.mulf %446, %474 : vector<16x1xf32>
    %476 = arith.mulf %465, %475 : vector<16x1xf32>
    %477 = arith.subf %447, %476 : vector<16x1xf32>
    %478 = vector.broadcast %475 : vector<16x1xf32> to vector<16x16xf32>
    %479 = arith.mulf %406, %478 : vector<16x16xf32>
    %480 = vector.broadcast %477 : vector<16x1xf32> to vector<16x16xf32>
    %481 = arith.addf %479, %480 : vector<16x16xf32>
    %cst_419 = arith.constant 0.000000e+00 : f32
    %482 = vector.broadcast %cst_419 : f32 to vector<16x16xf32>
    %483 = arith.cmpf ogt, %481, %482 : vector<16x16xf32>
    %cst_420 = arith.constant 2.000000e-01 : f32
    %484 = vector.broadcast %cst_420 : f32 to vector<16x16xf32>
    %485 = arith.mulf %484, %481 : vector<16x16xf32>
    %486 = arith.select %483, %481, %485 : vector<16x16xi1>, vector<16x16xf32>
    %487 = vector.broadcast %475 : vector<16x1xf32> to vector<16x16xf32>
    %488 = arith.mulf %445, %487 : vector<16x16xf32>
    %489 = vector.broadcast %477 : vector<16x1xf32> to vector<16x16xf32>
    %490 = arith.addf %488, %489 : vector<16x16xf32>
    %cst_421 = arith.constant 0.000000e+00 : f32
    %491 = vector.broadcast %cst_421 : f32 to vector<16x16xf32>
    %492 = arith.cmpf ogt, %490, %491 : vector<16x16xf32>
    %cst_422 = arith.constant 2.000000e-01 : f32
    %493 = vector.broadcast %cst_422 : f32 to vector<16x16xf32>
    %494 = arith.mulf %493, %490 : vector<16x16xf32>
    %495 = arith.select %492, %490, %494 : vector<16x16xi1>, vector<16x16xf32>
    %496 = tpu.iota {dimensions = array<i32: 1>} : vector<1x2xi32>
    %cst_423 = arith.constant 0.000000e+00 : f32
    %497 = vector.broadcast %cst_423 : f32 to vector<1x2xf32>
    %c0_424 = arith.constant 0 : index
    %c0_425 = arith.constant 0 : index
    %498 = vector.load %arg19[%c0_424, %c0_425] : memref<16x16xf32, #tpu.memory_space<vmem>>, vector<16x16xf32>
    %499 = arith.mulf %498, %486 : vector<16x16xf32>
    %cst_426 = arith.constant dense<0.000000e+00> : vector<16xf32>
    %500 = vector.multi_reduction <add>, %499, %cst_426 [1] : vector<16x16xf32> to vector<16xf32>
    %501 = vector.shape_cast %500 : vector<16xf32> to vector<16x1xf32>
    %cst_427 = arith.constant dense<0.000000e+00> : vector<1xf32>
    %502 = vector.multi_reduction <add>, %501, %cst_427 [0] : vector<16x1xf32> to vector<1xf32>
    %503 = vector.shape_cast %502 : vector<1xf32> to vector<1x1xf32>
    %504 = math.absf %503 : vector<1x1xf32>
    %cst_428 = arith.constant 0.000000e+00 : f32
    %505 = vector.broadcast %cst_428 : f32 to vector<1x1xf32>
    %506 = arith.subf %505, %504 : vector<1x1xf32>
    %507 = math.exp %506 : vector<1x1xf32>
    %cst_429 = arith.constant 0.000000e+00 : f32
    %508 = vector.broadcast %cst_429 : f32 to vector<1x1xf32>
    %509 = arith.cmpf oge, %503, %508 : vector<1x1xf32>
    %cst_430 = arith.constant 1.000000e+00 : f32
    %510 = vector.broadcast %cst_430 : f32 to vector<1x1xf32>
    %511 = arith.addf %510, %507 : vector<1x1xf32>
    %cst_431 = arith.constant 1.000000e+00 : f32
    %512 = vector.broadcast %cst_431 : f32 to vector<1x1xf32>
    %513 = arith.divf %512, %511 : vector<1x1xf32>
    %cst_432 = arith.constant 1.000000e+00 : f32
    %514 = vector.broadcast %cst_432 : f32 to vector<1x1xf32>
    %515 = arith.addf %514, %507 : vector<1x1xf32>
    %516 = arith.divf %507, %515 : vector<1x1xf32>
    %517 = arith.select %509, %513, %516 : vector<1x1xi1>, vector<1x1xf32>
    %c0_i32_433 = arith.constant 0 : i32
    %518 = vector.broadcast %c0_i32_433 : i32 to vector<1x2xi32>
    %519 = arith.cmpi eq, %496, %518 : vector<1x2xi32>
    %cst_434 = arith.constant 0.000000e+00 : f32
    %520 = vector.shape_cast %517 : vector<1x1xf32> to vector<1x1xf32>
    %521 = vector.broadcast %520 : vector<1x1xf32> to vector<1x2xf32>
    %522 = vector.broadcast %cst_434 : f32 to vector<1x2xf32>
    %523 = arith.select %519, %521, %522 : vector<1x2xi1>, vector<1x2xf32>
    %524 = arith.addf %497, %523 : vector<1x2xf32>
    %c0_435 = arith.constant 0 : index
    %c0_436 = arith.constant 0 : index
    %525 = vector.load %arg19[%c0_435, %c0_436] : memref<16x16xf32, #tpu.memory_space<vmem>>, vector<16x16xf32>
    %526 = arith.mulf %525, %495 : vector<16x16xf32>
    %cst_437 = arith.constant dense<0.000000e+00> : vector<16xf32>
    %527 = vector.multi_reduction <add>, %526, %cst_437 [1] : vector<16x16xf32> to vector<16xf32>
    %528 = vector.shape_cast %527 : vector<16xf32> to vector<16x1xf32>
    %cst_438 = arith.constant dense<0.000000e+00> : vector<1xf32>
    %529 = vector.multi_reduction <add>, %528, %cst_438 [0] : vector<16x1xf32> to vector<1xf32>
    %530 = vector.shape_cast %529 : vector<1xf32> to vector<1x1xf32>
    %531 = math.absf %530 : vector<1x1xf32>
    %cst_439 = arith.constant 0.000000e+00 : f32
    %532 = vector.broadcast %cst_439 : f32 to vector<1x1xf32>
    %533 = arith.subf %532, %531 : vector<1x1xf32>
    %534 = math.exp %533 : vector<1x1xf32>
    %cst_440 = arith.constant 0.000000e+00 : f32
    %535 = vector.broadcast %cst_440 : f32 to vector<1x1xf32>
    %536 = arith.cmpf oge, %530, %535 : vector<1x1xf32>
    %cst_441 = arith.constant 1.000000e+00 : f32
    %537 = vector.broadcast %cst_441 : f32 to vector<1x1xf32>
    %538 = arith.addf %537, %534 : vector<1x1xf32>
    %cst_442 = arith.constant 1.000000e+00 : f32
    %539 = vector.broadcast %cst_442 : f32 to vector<1x1xf32>
    %540 = arith.divf %539, %538 : vector<1x1xf32>
    %cst_443 = arith.constant 1.000000e+00 : f32
    %541 = vector.broadcast %cst_443 : f32 to vector<1x1xf32>
    %542 = arith.addf %541, %534 : vector<1x1xf32>
    %543 = arith.divf %534, %542 : vector<1x1xf32>
    %544 = arith.select %536, %540, %543 : vector<1x1xi1>, vector<1x1xf32>
    %c1_i32_444 = arith.constant 1 : i32
    %545 = vector.broadcast %c1_i32_444 : i32 to vector<1x2xi32>
    %546 = arith.cmpi eq, %496, %545 : vector<1x2xi32>
    %cst_445 = arith.constant 0.000000e+00 : f32
    %547 = vector.shape_cast %544 : vector<1x1xf32> to vector<1x1xf32>
    %548 = vector.broadcast %547 : vector<1x1xf32> to vector<1x2xf32>
    %549 = vector.broadcast %cst_445 : f32 to vector<1x2xf32>
    %550 = arith.select %546, %548, %549 : vector<1x2xi1>, vector<1x2xf32>
    %551 = arith.addf %524, %550 : vector<1x2xf32>
    %c0_446 = arith.constant 0 : index
    %c0_447 = arith.constant 0 : index
    %552 = vector.load %arg20[%c0_446, %c0_447] : memref<1x2xf32, #tpu.memory_space<vmem>>, vector<1x2xf32>
    tpu.vector_store %arg20[%c0_446, %c0_447], %551 {strides = array<i32>} : memref<1x2xf32, #tpu.memory_space<vmem>>, vector<1x2xf32>,
    return
  }
  func.func @transform_0(%arg0: i32) -> (i32, i32, i32) {
    %c0_i32 = arith.constant 0 : i32
    %c0_i32_0 = arith.constant 0 : i32
    %c0_i32_1 = arith.constant 0 : i32
    %c0_i32_2 = arith.constant 0 : i32
    return %c0_i32, %c0_i32_0, %c0_i32_1 : i32, i32, i32
  }
  func.func @transform_1(%arg0: i32) -> (i32, i32) {
    %c0_i32 = arith.constant 0 : i32
    %c0_i32_0 = arith.constant 0 : i32
    %c0_i32_1 = arith.constant 0 : i32
    return %c0_i32, %c0_i32_0 : i32, i32
  }
  func.func @transform_2(%arg0: i32) -> (i32, i32) {
    %c0_i32 = arith.constant 0 : i32
    %c0_i32_0 = arith.constant 0 : i32
    %c0_i32_1 = arith.constant 0 : i32
    return %c0_i32, %c0_i32_0 : i32, i32
  }
  func.func @transform_3(%arg0: i32) -> (i32, i32) {
    %c0_i32 = arith.constant 0 : i32
    %c0_i32_0 = arith.constant 0 : i32
    %c0_i32_1 = arith.constant 0 : i32
    return %c0_i32, %c0_i32_0 : i32, i32
  }
  func.func @transform_4(%arg0: i32) -> (i32, i32, i32) {
    %c0_i32 = arith.constant 0 : i32
    %c0_i32_0 = arith.constant 0 : i32
    %c0_i32_1 = arith.constant 0 : i32
    %c0_i32_2 = arith.constant 0 : i32
    return %c0_i32, %c0_i32_0, %c0_i32_1 : i32, i32, i32
  }
  func.func @transform_5(%arg0: i32) -> (i32, i32) {
    %c0_i32 = arith.constant 0 : i32
    %c0_i32_0 = arith.constant 0 : i32
    %c0_i32_1 = arith.constant 0 : i32
    return %c0_i32, %c0_i32_0 : i32, i32
  }
  func.func @transform_6(%arg0: i32) -> (i32, i32) {
    %c0_i32 = arith.constant 0 : i32
    %c0_i32_0 = arith.constant 0 : i32
    %c0_i32_1 = arith.constant 0 : i32
    return %c0_i32, %c0_i32_0 : i32, i32
  }
  func.func @transform_7(%arg0: i32) -> (i32, i32) {
    %c0_i32 = arith.constant 0 : i32
    %c0_i32_0 = arith.constant 0 : i32
    %c0_i32_1 = arith.constant 0 : i32
    return %c0_i32, %c0_i32_0 : i32, i32
  }
  func.func @transform_8(%arg0: i32) -> (i32, i32, i32) {
    %c0_i32 = arith.constant 0 : i32
    %c0_i32_0 = arith.constant 0 : i32
    %c0_i32_1 = arith.constant 0 : i32
    %c0_i32_2 = arith.constant 0 : i32
    return %c0_i32, %c0_i32_0, %c0_i32_1 : i32, i32, i32
  }
  func.func @transform_9(%arg0: i32) -> (i32, i32) {
    %c0_i32 = arith.constant 0 : i32
    %c0_i32_0 = arith.constant 0 : i32
    %c0_i32_1 = arith.constant 0 : i32
    return %c0_i32, %c0_i32_0 : i32, i32
  }
  func.func @transform_10(%arg0: i32) -> (i32, i32) {
    %c0_i32 = arith.constant 0 : i32
    %c0_i32_0 = arith.constant 0 : i32
    %c0_i32_1 = arith.constant 0 : i32
    return %c0_i32, %c0_i32_0 : i32, i32
  }
  func.func @transform_11(%arg0: i32) -> (i32, i32) {
    %c0_i32 = arith.constant 0 : i32
    %c0_i32_0 = arith.constant 0 : i32
    %c0_i32_1 = arith.constant 0 : i32
    return %c0_i32, %c0_i32_0 : i32, i32
  }
  func.func @transform_12(%arg0: i32) -> (i32, i32) {
    %c0_i32 = arith.constant 0 : i32
    %c0_i32_0 = arith.constant 0 : i32
    %c0_i32_1 = arith.constant 0 : i32
    return %c0_i32, %c0_i32_0 : i32, i32
  }
  func.func @transform_13(%arg0: i32) -> (i32, i32) {
    %c0_i32 = arith.constant 0 : i32
    %c0_i32_0 = arith.constant 0 : i32
    %c0_i32_1 = arith.constant 0 : i32
    return %c0_i32, %c0_i32_0 : i32, i32
  }
  func.func @transform_14(%arg0: i32) -> (i32, i32, i32) {
    %c0_i32 = arith.constant 0 : i32
    %c0_i32_0 = arith.constant 0 : i32
    %c0_i32_1 = arith.constant 0 : i32
    %c0_i32_2 = arith.constant 0 : i32
    return %c0_i32, %c0_i32_0, %c0_i32_1 : i32, i32, i32
  }
  func.func @transform_15(%arg0: i32) -> (i32, i32) {
    %c0_i32 = arith.constant 0 : i32
    %c0_i32_0 = arith.constant 0 : i32
    %c0_i32_1 = arith.constant 0 : i32
    return %c0_i32, %c0_i32_0 : i32, i32
  }
  func.func @transform_16(%arg0: i32) -> (i32, i32) {
    %c0_i32 = arith.constant 0 : i32
    %c0_i32_0 = arith.constant 0 : i32
    %c0_i32_1 = arith.constant 0 : i32
    return %c0_i32, %c0_i32_0 : i32, i32
  }
  func.func @transform_17(%arg0: i32) -> (i32, i32) {
    %c0_i32 = arith.constant 0 : i32
    %c0_i32_0 = arith.constant 0 : i32
    %c0_i32_1 = arith.constant 0 : i32
    return %c0_i32, %c0_i32_0 : i32, i32
  }
  func.func @transform_18(%arg0: i32) -> (i32, i32) {
    %c0_i32 = arith.constant 0 : i32
    %c0_i32_0 = arith.constant 0 : i32
    %c0_i32_1 = arith.constant 0 : i32
    return %c0_i32, %c0_i32_0 : i32, i32
  }
  func.func @transform_19(%arg0: i32) -> (i32, i32) {
    %c0_i32 = arith.constant 0 : i32
    %c0_i32_0 = arith.constant 0 : i32
    %c0_i32_1 = arith.constant 0 : i32
    return %c0_i32, %c0_i32_0 : i32, i32
  }
}

</mosaic_0001>

<bundles_post_ra>
// kernel: netd_forward.2
= control target key start
LH: loop header
LB: loop body
LE: loop exit
PB: predicated region body
PF: predicated region fallthrough
CT: control target
= control target key end

     0   :  { %s665_s9 = smov 0   ;;  %s757_s0 = inlined_call_operand.vmem [shape: f32[2,48,1024], index: 0, kind: input, shape index: {}]   ;;  %s758_s1 = inlined_call_operand.vmem [shape: f32[8,48], index: 1, kind: input, shape index: {}]   ;;  %s759_s2 = inlined_call_operand.vmem [shape: f32[2,8,1024], index: 2, kind: output, shape index: {}]  }
   0x1 LB: > { %s568_s10 = sadd.s32 4294967295, %s647_s9   ;;  %p572_p0 = scmp.ge.s32.totalorder %s647_s9, 1  ;;  %s647_s9 = sphi %s665_s9, %s12_s9  }
   0x2   : > { %p112_p1 = scmp.lt.s32.totalorder %s647_s9, 3 }
   0x4   : > { %p113_p2 = pnand %p572_p0, %p112_p1 }
   0x5   : > { %p134_p3 = scmp.lt.s32.totalorder (!%p113_p2), %s568_s10, 1  ;;  %v649_v0 = vmov (!%p113_p2), 0.0   ;;  %v144_v51 = vld [vmem:[%s758_s1] sm:$0xff] (!%p113_p2)  ;;  %vm193_vm0 = vcmask (!%p113_p2), 392192  }
   0x6   : > { %116 = sbr.rel (%p113_p2) target bundleno = 264 (0x108), region = 28  ;;  %261 = vmatprep.mubr.f32.mxu0 (!%p113_p2), %v649_v0  ;;  %332 = vmatprep.mubr.f32.mxu1 (!%p113_p2), %v649_v0 }
   0xd   : > { %s761_s10 = smov (!%p134_p3, %s568_s10), 1 }
   0xe   : > { %s631_s11 = smul.u32 384, %s761_s10  ;;  %s582_s17 = sshll.u32 %s761_s10, 6 }
   0xf   : > { %s744_s20 = scalar_lea.vmem %s759_s2, %s582_s17 }
  0x10   : > { %s681_s14 = scalar_lea.vmem %s757_s0, %s631_s11 }
  0x11   : > { %v146_v1 = vld [vmem:[%s681_s14 + $0x8] sm:$0xff]  ;;  %v148_v3 = vld [vmem:[%s681_s14 + $0x18] sm:$0xff]  ;;  %v145_v6 = vld [vmem:[%s681_s14] sm:$0xff] }
  0x12   : > { %v154_v2 = vld [vmem:[%s681_s14 + $0x48] sm:$0xff]  ;;  %v156_v5 = vld [vmem:[%s681_s14 + $0x58] sm:$0xff]  ;;  %v153_v7 = vld [vmem:[%s681_s14 + $0x40] sm:$0xff] }
  0x13   : > { %v583_v4 = vpack.c.bf16 %v154_v2, %v146_v1  ;;  %v595_v8 = vpack.c.bf16 %v156_v5, %v148_v3  ;;  %v585_v9 = vpack.c.bf16 %v153_v7, %v145_v6  ;;  %v147_v10 = vld [vmem:[%s681_s14 + $0x10] sm:$0xff]  ;;  %v162_v12 = vld [vmem:[%s681_s14 + $0x88] sm:$0xff]  ;;  %v164_v15 = vld [vmem:[%s681_s14 + $0x98] sm:$0xff] }
  0x14   : > { %v155_v11 = vld [vmem:[%s681_s14 + $0x50] sm:$0xff]  ;;  %v170_v14 = vld [vmem:[%s681_s14 + $0xc8] sm:$0xff]  ;;  %v172_v16 = vld [vmem:[%s681_s14 + $0xd8] sm:$0xff] }
  0x15   : > { %584 = vmatprep.subr.bf16.mxu0 %v583_v4  ;;  %v597_v13 = vpack.c.bf16 %v155_v11, %v147_v10  ;;  %596 = vmatprep.subr.bf16.mxu1 %v595_v8  ;;  %v587_v17 = vpack.c.bf16 %v170_v14, %v162_v12  ;;  %v599_v18 = vpack.c.bf16 %v172_v16, %v164_v15  ;;  %v161_v19 = vld [vmem:[%s681_s14 + $0x80] sm:$0xff]  ;;  %v163_v21 = vld [vmem:[%s681_s14 + $0x90] sm:$0xff]  ;;  %v178_v24 = vld [vmem:[%s681_s14 + $0x108] sm:$0xff] }
  0x16   : > { %586 = vmatpush1.bf16.msra.mxu0 %v585_v9  ;;  %v169_v20 = vld [vmem:[%s681_s14 + $0xc0] sm:$0xff]  ;;  %v171_v23 = vld [vmem:[%s681_s14 + $0xd0] sm:$0xff]  ;;  %v186_v25 = vld [vmem:[%s681_s14 + $0x148] sm:$0xff] }
  0x17   : > { %598 = vmatpush1.bf16.msra.mxu1 %v597_v13  ;;  %v589_v22 = vpack.c.bf16 %v169_v20, %v161_v19  ;;  %588 = vmatprep.subr.bf16.mxu0 %v587_v17  ;;  %v601_v26 = vpack.c.bf16 %v171_v23, %v163_v21  ;;  %v591_v27 = vpack.c.bf16 %v186_v25, %v178_v24  ;;  %v180_v28 = vld [vmem:[%s681_s14 + $0x118] sm:$0xff]  ;;  %v177_v30 = vld [vmem:[%s681_s14 + $0x100] sm:$0xff]  ;;  %v179_v33 = vld [vmem:[%s681_s14 + $0x110] sm:$0xff] }
  0x18   : > { %600 = vmatprep.subr.bf16.mxu1 %v599_v18  ;;  %v188_v29 = vld [vmem:[%s681_s14 + $0x158] sm:$0xff]  ;;  %v185_v32 = vld [vmem:[%s681_s14 + $0x140] sm:$0xff]  ;;  %v187_v34 = vld [vmem:[%s681_s14 + $0x150] sm:$0xff] }
  0x19   : > { %v603_v31 = vpack.c.bf16 %v188_v29, %v180_v28  ;;  %v593_v35 = vpack.c.bf16 %v185_v32, %v177_v30  ;;  %v150_v36 = vld [vmem:[%s681_s14 + $0x28] sm:$0xff]  ;;  %v152_v38 = vld [vmem:[%s681_s14 + $0x38] sm:$0xff]  ;;  %v605_v39 = vpack.c.bf16 %v187_v34, %v179_v33  ;;  %v149_v42 = vld [vmem:[%s681_s14 + $0x20] sm:$0xff] }
  0x1a   : > { %590 = vmatpush1.bf16.msra.mxu0 %v589_v22  ;;  %v158_v37 = vld [vmem:[%s681_s14 + $0x68] sm:$0xff]  ;;  %v160_v41 = vld [vmem:[%s681_s14 + $0x78] sm:$0xff]  ;;  %v157_v43 = vld [vmem:[%s681_s14 + $0x60] sm:$0xff] }
  0x1b   : > { %602 = vmatpush1.bf16.msra.mxu1 %v601_v26  ;;  %592 = vmatprep.subr.bf16.mxu0 %v591_v27  ;;  %v607_v40 = vpack.c.bf16 %v158_v37, %v150_v36  ;;  %v619_v44 = vpack.c.bf16 %v160_v41, %v152_v38  ;;  %v151_v45 = vld [vmem:[%s681_s14 + $0x30] sm:$0xff]  ;;  %v166_v47 = vld [vmem:[%s681_s14 + $0xa8] sm:$0xff]  ;;  %v168_v49 = vld [vmem:[%s681_s14 + $0xb8] sm:$0xff]  ;;  %v609_v52 = vpack.c.bf16 %v157_v43, %v149_v42 }
  0x1c   : > { %604 = vmatprep.subr.bf16.mxu1 %v603_v31  ;;  %v159_v46 = vld [vmem:[%s681_s14 + $0x70] sm:$0xff]  ;;  %v174_v48 = vld [vmem:[%s681_s14 + $0xe8] sm:$0xff]  ;;  %v176_v50 = vld [vmem:[%s681_s14 + $0xf8] sm:$0xff] }
  0x1d   : > { %v621_v53 = vpack.c.bf16 %v159_v46, %v151_v45  ;;  %v611_v54 = vpack.c.bf16 %v174_v48, %v166_v47  ;;  %v165_v55 = vld [vmem:[%s681_s14 + $0xa0] sm:$0xff]  ;;  %v167_v57 = vld [vmem:[%s681_s14 + $0xb0] sm:$0xff]  ;;  %v623_v58 = vpack.c.bf16 %v176_v50, %v168_v49  ;;  %v182_v60 = vld [vmem:[%s681_s14 + $0x128] sm:$0xff] }
  0x1e   : > { %594 = vmatpush1.bf16.msra.mxu0 %v593_v35  ;;  %v173_v56 = vld [vmem:[%s681_s14 + $0xe0] sm:$0xff]  ;;  %v175_v59 = vld [vmem:[%s681_s14 + $0xf0] sm:$0xff]  ;;  %v190_v61 = vld [vmem:[%s681_s14 + $0x168] sm:$0xff] }
  0x1f   : > { %606 = vmatpush1.bf16.msra.mxu1 %v605_v39  ;;  %608 = vmatprep.subr.bf16.mxu0 %v607_v40  ;;  %v184_v62 = vld [vmem:[%s681_s14 + $0x138] sm:$0xff]  ;;  %v613_v1 = vpack.c.bf16 %v173_v56, %v165_v55  ;;  %v625_v2 = vpack.c.bf16 %v175_v59, %v167_v57  ;;  %v615_v3 = vpack.c.bf16 %v190_v61, %v182_v60  ;;  %v181_v4 = vld [vmem:[%s681_s14 + $0x120] sm:$0xff]  ;;  %v183_v7 = vld [vmem:[%s681_s14 + $0x130] sm:$0xff] }
  0x20   : > { %620 = vmatprep.subr.bf16.mxu1 %v619_v44  ;;  %v192_v63 = vld [vmem:[%s681_s14 + $0x178] sm:$0xff]  ;;  %v189_v5 = vld [vmem:[%s681_s14 + $0x160] sm:$0xff]  ;;  %v191_v8 = vld [vmem:[%s681_s14 + $0x170] sm:$0xff] }
  0x21   : > { %576 = vmatmul.mubr.msk.f32.vlgmr.msra.gmra.mrb[0].mxu0 %vm193_vm0, %v144_v51  ;;  %v627_v6 = vpack.c.bf16 %v192_v63, %v184_v62  ;;  %v617_v9 = vpack.c.bf16 %v189_v5, %v181_v4  ;;  %v629_v10 = vpack.c.bf16 %v191_v8, %v183_v7 }
  0x22   : > { %577 = vmatmul.mubr.msk.f32.vlgmr.msra.gmra.mrb[0].mxu1 %vm193_vm0, %v144_v51  ;;  %610 = vmatpush1.bf16.msra.mxu0 %v609_v52 }
  0x23   : > { %622 = vmatpush1.bf16.msra.mxu1 %v621_v53  ;;  %612 = vmatprep.subr.bf16.mxu0 %v611_v54 }
  0x24   : > { %624 = vmatprep.subr.bf16.mxu1 %v623_v58  ;;  %403 = vmatprep.mubr.f32.mxu0 %v649_v0 }
  0x25   : > { %474 = vmatprep.mubr.f32.mxu1 %v649_v0 }
  0x26   : > { %614 = vmatpush1.bf16.msra.mxu0 %v613_v1 }
  0x27   : > { %626 = vmatpush1.bf16.msra.mxu1 %v625_v2  ;;  %616 = vmatprep.subr.bf16.mxu0 %v615_v3 }
  0x28   : > { %628 = vmatprep.subr.bf16.mxu1 %v627_v6 }
  0x2a   : > { %618 = vmatpush1.bf16.msra.mxu0 %v617_v9 }
  0x2b   : > { %630 = vmatpush1.bf16.msra.mxu1 %v629_v10 }
  0x2d   : > { %578 = vmatmul.mubr.msk.f32.vlgmr.msra.gmra.mrb[2].mxu0 %vm193_vm0, %v144_v51 }
  0x2e   : > { %579 = vmatmul.mubr.msk.f32.vlgmr.msra.gmra.mrb[2].mxu1 %vm193_vm0, %v144_v51 }
  0xf4   : > { %v263_v11 = vpop.f32.mrb[0].mxu0 }
  0xf5   : > { %vm481_vm1 = vcmp.gt.f32.partialorder %v263_v11, 0.0  ;;  %v489_v0 = vmul.f32 0.2, %v263_v11  ;;  %v334_v12 = vpop.f32.mrb[0].mxu1  ;;  %v265_v13 = vpop.f32.mrb[1].mxu0 }
  0xf6   : > { %vm483_vm2 = vcmp.gt.f32.partialorder %v334_v12, 0.0  ;;  %v491_v14 = vmul.f32 0.2, %v334_v12  ;;  %vm482_vm3 = vcmp.gt.f32.partialorder %v265_v13, 0.0  ;;  %v490_v15 = vmul.f32 0.2, %v265_v13 }
  0xf7   : > { %v497_v16 = vsel %vm481_vm1, %v263_v11, %v489_v0  ;;  %v336_v17 = vpop.f32.mrb[1].mxu1 }
  0xf8   : > { %505 = vst [vmem:[%s744_s20] sm:$0xff] %v497_v16  ;;  %v499_v18 = vsel %vm483_vm2, %v334_v12, %v491_v14  ;;  %v498_v19 = vsel %vm482_vm3, %v265_v13, %v490_v15  ;;  %vm484_vm4 = vcmp.gt.f32.partialorder %v336_v17, 0.0  ;;  %v492_v20 = vmul.f32 0.2, %v336_v17 }
  0xf9   : > { %507 = vst [vmem:[%s744_s20 + $0x10] sm:$0xff] %v499_v18  ;;  %506 = vst [vmem:[%s744_s20 + $0x8] sm:$0xff] %v498_v19 }
  0xfa   : > { %v500_v21 = vsel %vm484_vm4, %v336_v17, %v492_v20 }
  0xfb   : > { %508 = vst [vmem:[%s744_s20 + $0x18] sm:$0xff] %v500_v21 }
 0x100   : > { %v405_v22 = vpop.f32.mrb[2].mxu0 }
 0x101   : > { %vm485_vm5 = vcmp.gt.f32.partialorder %v405_v22, 0.0  ;;  %v493_v23 = vmul.f32 0.2, %v405_v22  ;;  %v476_v24 = vpop.f32.mrb[2].mxu1  ;;  %v407_v25 = vpop.f32.mrb[3].mxu0 }
 0x102   : > { %vm487_vm6 = vcmp.gt.f32.partialorder %v476_v24, 0.0  ;;  %v495_v26 = vmul.f32 0.2, %v476_v24  ;;  %vm486_vm7 = vcmp.gt.f32.partialorder %v407_v25, 0.0  ;;  %v494_v27 = vmul.f32 0.2, %v407_v25 }
 0x103   : > { %v501_v28 = vsel %vm485_vm5, %v405_v22, %v493_v23  ;;  %v478_v29 = vpop.f32.mrb[3].mxu1 }
 0x104   : > { %509 = vst [vmem:[%s744_s20 + $0x20] sm:$0xff] %v501_v28  ;;  %v503_v30 = vsel %vm487_vm6, %v476_v24, %v495_v26  ;;  %v502_v31 = vsel %vm486_vm7, %v407_v25, %v494_v27  ;;  %vm488_vm8 = vcmp.gt.f32.partialorder %v478_v29, 0.0  ;;  %v496_v32 = vmul.f32 0.2, %v478_v29 }
 0x105   : > { %511 = vst [vmem:[%s744_s20 + $0x30] sm:$0xff] %v503_v30  ;;  %510 = vst [vmem:[%s744_s20 + $0x28] sm:$0xff] %v502_v31 }
 0x106   : > { %v504_v33 = vsel %vm488_vm8, %v478_v29, %v496_v32 }
 0x107   : > { %512 = vst [vmem:[%s744_s20 + $0x38] sm:$0xff] %v504_v33 }
 0x108 PF: > { %s12_s9 = sadd.s32 1, %s647_s9  }
 0x109   : > { %p9_p4 = scmp.ge.s32.totalorder %s12_s9, 4  }
 0x10b   :  { %11 = sbr.rel (!%p9_p4) target bundleno = 1 (0x1), region = 58 }

// kernel: netd_forward.3
= control target key start
LH: loop header
LB: loop body
LE: loop exit
PB: predicated region body
PF: predicated region fallthrough
CT: control target
= control target key end

     0   :  { %s22846_s0 = inlined_call_operand.vmem [shape: f32[2,128,256], index: 0, kind: input, shape index: {}]   ;;  %s22847_s1 = inlined_call_operand.vmem [shape: f32[16,128], index: 1, kind: input, shape index: {}]   ;;  %s22848_s2 = inlined_call_operand.vmem [shape: f32[16,1], index: 2, kind: input, shape index: {}]   ;;  %s22849_s3 = inlined_call_operand.vmem [shape: f32[16,1], index: 3, kind: input, shape index: {}]   ;;  %s22850_s4 = inlined_call_operand.vmem [shape: f32[16,256,64], index: 4, kind: input, shape index: {}]   ;;  %s22851_s5 = inlined_call_operand.vmem [shape: f32[32,256], index: 5, kind: input, shape index: {}]   ;;  %s22852_s6 = inlined_call_operand.vmem [shape: f32[32,1], index: 6, kind: input, shape index: {}]   ;;  %s22853_s7 = inlined_call_operand.vmem [shape: f32[32,1], index: 7, kind: input, shape index: {}]   ;;  %s22854_s8 = inlined_call_operand.vmem [shape: f32[16,64,16], index: 8, kind: input, shape index: {}]   ;;  %s22855_s9 = inlined_call_operand.vmem [shape: f32[64,512], index: 9, kind: input, shape index: {}]   ;;  %s22856_s10 = inlined_call_operand.vmem [shape: f32[64,1], index: 10, kind: input, shape index: {}]   ;;  %s22857_s11 = inlined_call_operand.vmem [shape: f32[64,1], index: 11, kind: input, shape index: {}]   ;;  %s22858_s12 = inlined_call_operand.vmem [shape: f32[16,32], index: 12, kind: input, shape index: {}]   ;;  %s22859_s13 = inlined_call_operand.vmem [shape: f32[32,2], index: 13, kind: input, shape index: {}]   ;;  %s22860_s14 = inlined_call_operand.vmem [shape: f32[9,16,16], index: 14, kind: input, shape index: {}]   ;;  %s22861_s15 = inlined_call_operand.vmem [shape: f32[16,720], index: 15, kind: input, shape index: {}]   ;;  %s22862_s16 = inlined_call_operand.vmem [shape: f32[16,1], index: 16, kind: input, shape index: {}]   ;;  %s22863_s17 = inlined_call_operand.vmem [shape: f32[16,1], index: 17, kind: input, shape index: {}]   ;;  %s22864_s18 = inlined_call_operand.vmem [shape: f32[16,16], index: 18, kind: input, shape index: {}]   ;;  %s22865_s19 = inlined_call_operand.hbm [shape: f32[1,2], index: 19, kind: output, shape index: {}]  }
   0x1   :  { %23179 = sst [smem:[#allocation223_spill]] %s22846_s0 }
   0x2   :  { %23180 = sst [smem:[#allocation224_spill]] %s22847_s1 }
   0x3   :  { %23181 = sst [smem:[#allocation225_spill]] %s22848_s2 }
   0x4   :  { %23182 = sst [smem:[#allocation226_spill]] %s22849_s3 }
   0x5   :  { %s23183_s20 = sld [smem:[#allocation223_spill]]  ;;  %v16815_v7 = vmov 0.0  }
   0x6   :  { %161 = vmatprep.mubr.f32.mxu0 %v16815_v7  ;;  %271 = vmatprep.mubr.f32.mxu1 %v16815_v7 }
   0xb   :  { %v66_v0 = vld [vmem:[%s23183_s20 + $0x8] sm:$0xff]  ;;  %v68_v1 = vld [vmem:[%s23183_s20 + $0x18] sm:$0xff]  ;;  %v65_v2 = vld [vmem:[%s23183_s20] sm:$0xff] }
   0xc   :  { %v14667_v3 = vpack.c.bf16 %v68_v1, %v66_v0  ;;  %v67_v4 = vld [vmem:[%s23183_s20 + $0x10] sm:$0xff]  ;;  %v10363_v5 = vld [vmem:[%s23183_s20 + $0x108] sm:$0xff]  ;;  %v10365_v6 = vld [vmem:[%s23183_s20 + $0x118] sm:$0xff] }
   0xd   :  { %v14669_v8 = vpack.c.bf16 %v67_v4, %v65_v2  ;;  %v14699_v9 = vpack.c.bf16 %v10365_v6, %v10363_v5  ;;  %v70_v10 = vld [vmem:[%s23183_s20 + $0x28] sm:$0xff]  ;;  %v72_v11 = vld [vmem:[%s23183_s20 + $0x38] sm:$0xff]  ;;  %v10362_v12 = vld [vmem:[%s23183_s20 + $0x100] sm:$0xff] }
   0xe   :  { %14668 = vmatprep.subr.bf16.mxu0 %v14667_v3  ;;  %v14671_v13 = vpack.c.bf16 %v72_v11, %v70_v10  ;;  %v10364_v14 = vld [vmem:[%s23183_s20 + $0x110] sm:$0xff]  ;;  %v69_v15 = vld [vmem:[%s23183_s20 + $0x20] sm:$0xff]  ;;  %v10367_v19 = vld [vmem:[%s23183_s20 + $0x128] sm:$0xff] }
   0xf   :  { %v71_v16 = vld [vmem:[%s23183_s20 + $0x30] sm:$0xff]  ;;  %14670 = vmatpush1.bf16.msra.mxu0 %v14669_v8  ;;  %14700 = vmatprep.subr.bf16.mxu1 %v14699_v9  ;;  %v14701_v17 = vpack.c.bf16 %v10364_v14, %v10362_v12  ;;  %v10369_v20 = vld [vmem:[%s23183_s20 + $0x138] sm:$0xff]  ;;  %v74_v21 = vld [vmem:[%s23183_s20 + $0x48] sm:$0xff] }
  0x10   :  { %v14673_v18 = vpack.c.bf16 %v71_v16, %v69_v15  ;;  %14672 = vmatprep.subr.bf16.mxu0 %v14671_v13  ;;  %v14703_v22 = vpack.c.bf16 %v10369_v20, %v10367_v19  ;;  %v76_v23 = vld [vmem:[%s23183_s20 + $0x58] sm:$0xff]  ;;  %v10366_v24 = vld [vmem:[%s23183_s20 + $0x120] sm:$0xff]  ;;  %v10368_v25 = vld [vmem:[%s23183_s20 + $0x130] sm:$0xff] }
  0x11   :  { %14702 = vmatpush1.bf16.msra.mxu1 %v14701_v17  ;;  %v14675_v26 = vpack.c.bf16 %v76_v23, %v74_v21  ;;  %v14705_v27 = vpack.c.bf16 %v10368_v25, %v10366_v24  ;;  %v73_v28 = vld [vmem:[%s23183_s20 + $0x40] sm:$0xff]  ;;  %v75_v29 = vld [vmem:[%s23183_s20 + $0x50] sm:$0xff]  ;;  %v10371_v30 = vld [vmem:[%s23183_s20 + $0x148] sm:$0xff] }
  0x12   :  { %14704 = vmatprep.subr.bf16.mxu1 %v14703_v22  ;;  %v10373_v31 = vld [vmem:[%s23183_s20 + $0x158] sm:$0xff]  ;;  %v78_v32 = vld [vmem:[%s23183_s20 + $0x68] sm:$0xff]  ;;  %v14677_v34 = vpack.c.bf16 %v75_v29, %v73_v28  ;;  %v10370_v36 = vld [vmem:[%s23183_s20 + $0x140] sm:$0xff] }
  0x13   :  { %v80_v33 = vld [vmem:[%s23183_s20 + $0x78] sm:$0xff]  ;;  %14674 = vmatpush1.bf16.msra.mxu0 %v14673_v18  ;;  %v14707_v35 = vpack.c.bf16 %v10373_v31, %v10371_v30  ;;  %v10372_v37 = vld [vmem:[%s23183_s20 + $0x150] sm:$0xff]  ;;  %v77_v38 = vld [vmem:[%s23183_s20 + $0x60] sm:$0xff] }
  0x14   :  { %14676 = vmatprep.subr.bf16.mxu0 %v14675_v26  ;;  %v14679_v39 = vpack.c.bf16 %v80_v33, %v78_v32  ;;  %v79_v40 = vld [vmem:[%s23183_s20 + $0x70] sm:$0xff]  ;;  %v10375_v41 = vld [vmem:[%s23183_s20 + $0x168] sm:$0xff]  ;;  %v10377_v42 = vld [vmem:[%s23183_s20 + $0x178] sm:$0xff]  ;;  %v14709_v43 = vpack.c.bf16 %v10372_v37, %v10370_v36 }
  0x15   :  { %14706 = vmatpush1.bf16.msra.mxu1 %v14705_v27  ;;  %v82_v44 = vld [vmem:[%s23183_s20 + $0x88] sm:$0xff]  ;;  %v84_v45 = vld [vmem:[%s23183_s20 + $0x98] sm:$0xff]  ;;  %v14711_v46 = vpack.c.bf16 %v10377_v42, %v10375_v41  ;;  %v10374_v47 = vld [vmem:[%s23183_s20 + $0x160] sm:$0xff]  ;;  %v14681_v49 = vpack.c.bf16 %v79_v40, %v77_v38 }
  0x16   :  { %14708 = vmatprep.subr.bf16.mxu1 %v14707_v35  ;;  %v10376_v48 = vld [vmem:[%s23183_s20 + $0x170] sm:$0xff]  ;;  %v10379_v50 = vld [vmem:[%s23183_s20 + $0x188] sm:$0xff]  ;;  %v10381_v51 = vld [vmem:[%s23183_s20 + $0x198] sm:$0xff]  ;;  %v14683_v52 = vpack.c.bf16 %v84_v45, %v82_v44 }
  0x17   :  { %14678 = vmatpush1.bf16.msra.mxu0 %v14677_v34  ;;  %v81_v53 = vld [vmem:[%s23183_s20 + $0x80] sm:$0xff]  ;;  %v83_v54 = vld [vmem:[%s23183_s20 + $0x90] sm:$0xff]  ;;  %v14713_v55 = vpack.c.bf16 %v10376_v48, %v10374_v47  ;;  %v86_v56 = vld [vmem:[%s23183_s20 + $0xa8] sm:$0xff]  ;;  %v14715_v58 = vpack.c.bf16 %v10381_v51, %v10379_v50 }
  0x18   :  { %14680 = vmatprep.subr.bf16.mxu0 %v14679_v39  ;;  %v88_v57 = vld [vmem:[%s23183_s20 + $0xb8] sm:$0xff]  ;;  %v10378_v59 = vld [vmem:[%s23183_s20 + $0x180] sm:$0xff]  ;;  %v10380_v60 = vld [vmem:[%s23183_s20 + $0x190] sm:$0xff]  ;;  %v14685_v61 = vpack.c.bf16 %v83_v54, %v81_v53 }
  0x19   :  { %14710 = vmatpush1.bf16.msra.mxu1 %v14709_v43  ;;  %v10383_v62 = vld [vmem:[%s23183_s20 + $0x1a8] sm:$0xff]  ;;  %v10385_v63 = vld [vmem:[%s23183_s20 + $0x1b8] sm:$0xff]  ;;  %v14687_v0 = vpack.c.bf16 %v88_v57, %v86_v56  ;;  %v85_v1 = vld [vmem:[%s23183_s20 + $0xa0] sm:$0xff]  ;;  %v14717_v3 = vpack.c.bf16 %v10380_v60, %v10378_v59 }
  0x1a   :  { %14712 = vmatprep.subr.bf16.mxu1 %v14711_v46  ;;  %v87_v2 = vld [vmem:[%s23183_s20 + $0xb0] sm:$0xff]  ;;  %v90_v4 = vld [vmem:[%s23183_s20 + $0xc8] sm:$0xff]  ;;  %v92_v5 = vld [vmem:[%s23183_s20 + $0xd8] sm:$0xff]  ;;  %v14719_v6 = vpack.c.bf16 %v10385_v63, %v10383_v62 }
  0x1b   :  { %14682 = vmatpush1.bf16.msra.mxu0 %v14681_v49  ;;  %v10382_v8 = vld [vmem:[%s23183_s20 + $0x1a0] sm:$0xff]  ;;  %v10384_v9 = vld [vmem:[%s23183_s20 + $0x1b0] sm:$0xff]  ;;  %v14689_v10 = vpack.c.bf16 %v87_v2, %v85_v1  ;;  %v10387_v11 = vld [vmem:[%s23183_s20 + $0x1c8] sm:$0xff]  ;;  %v14691_v13 = vpack.c.bf16 %v92_v5, %v90_v4 }
  0x1c   :  { %14684 = vmatprep.subr.bf16.mxu0 %v14683_v52  ;;  %v10389_v12 = vld [vmem:[%s23183_s20 + $0x1d8] sm:$0xff]  ;;  %v89_v14 = vld [vmem:[%s23183_s20 + $0xc0] sm:$0xff]  ;;  %v91_v15 = vld [vmem:[%s23183_s20 + $0xd0] sm:$0xff]  ;;  %v14721_v16 = vpack.c.bf16 %v10384_v9, %v10382_v8 }
  0x1d   :  { %14714 = vmatpush1.bf16.msra.mxu1 %v14713_v55  ;;  %v94_v17 = vld [vmem:[%s23183_s20 + $0xe8] sm:$0xff]  ;;  %v96_v18 = vld [vmem:[%s23183_s20 + $0xf8] sm:$0xff] }
  0x1e   :  { %14716 = vmatprep.subr.bf16.mxu1 %v14715_v58 }
  0x1f   :  { %14686 = vmatpush1.bf16.msra.mxu0 %v14685_v61 }
  0x20   :  { %14688 = vmatprep.subr.bf16.mxu0 %v14687_v0 }
  0x21   :  { %14718 = vmatpush1.bf16.msra.mxu1 %v14717_v3 }
  0x22   :  { %24 = vsyncpa [#allocation3], 0  ;;  %14720 = vmatprep.subr.bf16.mxu1 %v14719_v6  ;;  %v14723_v19 = vpack.c.bf16 %v10389_v12, %v10387_v11  ;;  %v10386_v20 = vld [vmem:[%s23183_s20 + $0x1c0] sm:$0xff]  ;;  %v10388_v21 = vld [vmem:[%s23183_s20 + $0x1d0] sm:$0xff]  ;;  %v14693_v22 = vpack.c.bf16 %v91_v15, %v89_v14  ;;  %v14695_v25 = vpack.c.bf16 %v96_v18, %v94_v17  ;;  %s23184_s22 = sld [smem:[#allocation224_spill]]  ;;  %v16816_v59 = vmov 0  }
  0x23   :  { %14690 = vmatpush1.bf16.msra.mxu0 %v14689_v10  ;;  %v10391_v23 = vld [vmem:[%s23183_s20 + $0x1e8] sm:$0xff]  ;;  %v10393_v24 = vld [vmem:[%s23183_s20 + $0x1f8] sm:$0xff]  ;;  %v93_v26 = vld [vmem:[%s23183_s20 + $0xe0] sm:$0xff]  ;;  %v14725_v28 = vpack.c.bf16 %v10388_v21, %v10386_v20  ;;  %16749 = vset.pattern.permute.xlu0 %v16816_v59  ;;  %s23197_s0 = sld [smem:[#allocation225_spill]]  ;;  %s23198_s1 = sld [smem:[#allocation226_spill]]  ;;  %vm3521_vm8 = vcmask 523264  }
  0x24   :  { %14692 = vmatprep.subr.bf16.mxu0 %v14691_v13  ;;  %v95_v27 = vld [vmem:[%s23183_s20 + $0xf0] sm:$0xff]  ;;  %v14727_v29 = vpack.c.bf16 %v10393_v24, %v10391_v23  ;;  %v10390_v30 = vld [vmem:[%s23183_s20 + $0x1e0] sm:$0xff]  ;;  %16750 = vset.pattern.permute.xlu1 %v16816_v59  ;;  %v433_v61 = vld [vmem:[%s22850_s4 + $0x88] sm:$0xff] }
  0x25   :  { %14722 = vmatpush1.bf16.msra.mxu1 %v14721_v16  ;;  %v10392_v31 = vld [vmem:[%s23183_s20 + $0x1f0] sm:$0xff]  ;;  %v14697_v32 = vpack.c.bf16 %v95_v27, %v93_v26  ;;  %v432_v60 = vld [vmem:[%s22850_s4 + $0x80] sm:$0xff]  ;;  %v10411_v0 = vld [vmem:[%s22850_s4 + $0x188] sm:$0xff] }
  0x26   :  { %14724 = vmatprep.subr.bf16.mxu1 %v14723_v19  ;;  %v14729_v33 = vpack.c.bf16 %v10392_v31, %v10390_v30  ;;  %v10410_v62 = vld [vmem:[%s22850_s4 + $0x180] sm:$0xff]  ;;  %v17170_v63 = vpack.c.bf16 %v433_v61, %v432_v60  ;;  %v417_v2 = vld [vmem:[%s22850_s4 + $0x8] sm:$0xff]  ;;  %v434_v8 = vld [vmem:[%s22850_s4 + $0x90] sm:$0xff] }
  0x27   :  { %14694 = vmatpush1.bf16.msra.mxu0 %v14693_v22  ;;  %v416_v1 = vld [vmem:[%s22850_s4] sm:$0xff]  ;;  %v17181_v3 = vpack.c.bf16 %v10411_v0, %v10410_v62  ;;  %v10395_v6 = vld [vmem:[%s22850_s4 + $0x108] sm:$0xff]  ;;  %v435_v10 = vld [vmem:[%s22850_s4 + $0x98] sm:$0xff] }
  0x28   :  { %14696 = vmatprep.subr.bf16.mxu0 %v14695_v25  ;;  %v63_v34 = vld [vmem:[%s23184_s22] sm:$0xff]  ;;  %v64_v35 = vld [vmem:[%s23184_s22 + $0x8] sm:$0xff]  ;;  %v17183_v4 = vpack.c.bf16 %v417_v2, %v416_v1  ;;  %v10412_v11 = vld [vmem:[%s22850_s4 + $0x190] sm:$0xff]  ;;  %v17208_v13 = vpack.c.bf16 %v435_v10, %v434_v8 }
  0x29   :  { %14726 = vmatpush1.bf16.msra.mxu1 %v14725_v28  ;;  %23185 = vst [vmem:[#allocation5_spill] sm:$0xff] %v17181_v3  ;;  %v10394_v5 = vld [vmem:[%s22850_s4 + $0x100] sm:$0xff]  ;;  %v10413_v12 = vld [vmem:[%s22850_s4 + $0x198] sm:$0xff]  ;;  %v418_v15 = vld [vmem:[%s22850_s4 + $0x10] sm:$0xff] }
  0x2a   :  { %14728 = vmatprep.subr.bf16.mxu1 %v14727_v29  ;;  %v17195_v9 = vpack.c.bf16 %v10395_v6, %v10394_v5  ;;  %v17210_v14 = vpack.c.bf16 %v10413_v12, %v10412_v11  ;;  %v419_v16 = vld [vmem:[%s22850_s4 + $0x18] sm:$0xff]  ;;  %v10396_v17 = vld [vmem:[%s22850_s4 + $0x110] sm:$0xff]  ;;  %v436_v20 = vld [vmem:[%s22850_s4 + $0xa0] sm:$0xff] }
  0x2b   :  { %14698 = vmatpush1.bf16.msra.mxu0 %v14697_v32  ;;  %v17222_v18 = vpack.c.bf16 %v419_v16, %v418_v15  ;;  %v10397_v19 = vld [vmem:[%s22850_s4 + $0x118] sm:$0xff]  ;;  %v437_v21 = vld [vmem:[%s22850_s4 + $0xa8] sm:$0xff]  ;;  %v10414_v24 = vld [vmem:[%s22850_s4 + $0x1a0] sm:$0xff] }
  0x2c   :  { %14732 = vmatprep.subr.bf16.mxu0 %v17170_v63  ;;  %23186 = vst [vmem:[#allocation6_spill] sm:$0xff] %v17195_v9  ;;  %23187 = vst [vmem:[#allocation7_spill] sm:$0xff] %v17210_v14  ;;  %v17235_v22 = vpack.c.bf16 %v10397_v19, %v10396_v17  ;;  %v17237_v23 = vpack.c.bf16 %v437_v21, %v436_v20  ;;  %v10415_v25 = vld [vmem:[%s22850_s4 + $0x1a8] sm:$0xff]  ;;  %v420_v26 = vld [vmem:[%s22850_s4 + $0x20] sm:$0xff] }
  0x2d   :  { %14730 = vmatpush1.bf16.msra.mxu1 %v14729_v33  ;;  %v17248_v27 = vpack.c.bf16 %v10415_v25, %v10414_v24  ;;  %v421_v28 = vld [vmem:[%s22850_s4 + $0x28] sm:$0xff]  ;;  %v10398_v29 = vld [vmem:[%s22850_s4 + $0x120] sm:$0xff]  ;;  %v438_v32 = vld [vmem:[%s22850_s4 + $0xb0] sm:$0xff] }
  0x2e   :  { %162 = vmatmul.mubr.f32.vlgmr.msra.gmra.mrb[0].mxu0 %v63_v34  ;;  %14764 = vmatprep.subr.bf16.mxu1 %v17181_v3  ;;  %23188 = vst [vmem:[#allocation8_spill] sm:$0xff] %v17235_v22  ;;  %v10399_v30 = vld [vmem:[%s22850_s4 + $0x128] sm:$0xff]  ;;  %v17260_v31 = vpack.c.bf16 %v421_v28, %v420_v26  ;;  %v439_v33 = vld [vmem:[%s22850_s4 + $0xb8] sm:$0xff]  ;;  %v10402_v59 = vld [vmem:[%s22850_s4 + $0x140] sm:$0xff] }
  0x2f   :  { %167 = vmatprep.mubr.f32.mxu0 %v16815_v7  ;;  %14734 = vmatpush3.bf16.msra.mxu0 %v17183_v4  ;;  %23189 = vst [vmem:[#allocation9_spill] sm:$0xff] %v17248_v27  ;;  %v10403_v61 = vld [vmem:[%s22850_s4 + $0x148] sm:$0xff]  ;;  %v442_v62 = vld [vmem:[%s22850_s4 + $0xd0] sm:$0xff]  ;;  %v443_v0 = vld [vmem:[%s22850_s4 + $0xd8] sm:$0xff] }
  0x30   :  { %272 = vmatmul.mubr.f32.vlgmr.msra.gmra.mrb[0].mxu1 %v63_v34  ;;  %14736 = vmatprep.subr.bf16.mxu0 %v17208_v13  ;;  %v10416_v34 = vld [vmem:[%s22850_s4 + $0x1b0] sm:$0xff]  ;;  %v10421_v2 = vld [vmem:[%s22850_s4 + $0x1d8] sm:$0xff]  ;;  %v17348_v6 = vpack.c.bf16 %v10403_v61, %v10402_v59  ;;  %v17350_v8 = vpack.c.bf16 %v443_v0, %v442_v62  ;;  %v284_v62 = vld [vmem:[%s23197_s0] sm:$0xff] }
  0x31   :  { %277 = vmatprep.mubr.f32.mxu1 %v16815_v7  ;;  %14766 = vmatpush3.bf16.msra.mxu1 %v17195_v9  ;;  %v10420_v1 = vld [vmem:[%s22850_s4 + $0x1d0] sm:$0xff]  ;;  %v427_v11 = vld [vmem:[%s22850_s4 + $0x58] sm:$0xff] }
  0x32   :  { %168 = vmatmul.mubr.f32.gmra.mrb[2].mxu0 %v64_v35  ;;  %14768 = vmatprep.subr.bf16.mxu1 %v17210_v14  ;;  %23194 = vst [vmem:[#allocation14_spill] sm:$0xff] %v17348_v6  ;;  %v426_v10 = vld [vmem:[%s22850_s4 + $0x50] sm:$0xff]  ;;  %v17359_v12 = vpack.c.bf16 %v10421_v2, %v10420_v1  ;;  %v10405_v16 = vld [vmem:[%s22850_s4 + $0x158] sm:$0xff]  ;;  %v286_v1 = vld [vmem:[%s23198_s1] sm:$0xff] }
  0x33   :  { %14738 = vmatpush3.bf16.msra.mxu0 %v17222_v18  ;;  %v10404_v15 = vld [vmem:[%s22850_s4 + $0x150] sm:$0xff]  ;;  %v17368_v17 = vpack.c.bf16 %v427_v11, %v426_v10  ;;  %v444_v10 = vld [vmem:[%s22850_s4 + $0xe0] sm:$0xff]  ;;  %v445_v11 = vld [vmem:[%s22850_s4 + $0xe8] sm:$0xff] }
  0x34   :  { %278 = vmatmul.mubr.f32.gmra.mrb[2].mxu1 %v64_v35  ;;  %14740 = vmatprep.subr.bf16.mxu0 %v17237_v23  ;;  %v17273_v35 = vpack.c.bf16 %v10399_v30, %v10398_v29  ;;  %23195 = vst [vmem:[#allocation15_spill] sm:$0xff] %v17359_v12  ;;  %v17372_v19 = vpack.c.bf16 %v10405_v16, %v10404_v15  ;;  %v10422_v15 = vld [vmem:[%s22850_s4 + $0x1e0] sm:$0xff] }
  0x35   :  { %14770 = vmatpush3.bf16.msra.mxu1 %v17235_v22  ;;  %v17392_v16 = vpack.c.bf16 %v445_v11, %v444_v10  ;;  %v10443_v10 = vld [vmem:[%s22850_s4 + $0x288] sm:$0xff]  ;;  %v10474_v11 = vld [vmem:[%s22850_s4 + $0x380] sm:$0xff] }
  0x36   :  { %23190 = vst [vmem:[#allocation10_spill] sm:$0xff] %v17273_v35  ;;  %14772 = vmatprep.subr.bf16.mxu1 %v17248_v27  ;;  %23196 = vst [vmem:[#allocation16_spill] sm:$0xff] %v17372_v19 }
  0x37   :  { %14742 = vmatpush3.bf16.msra.mxu0 %v17260_v31 }
  0x39   :  { %14774 = vmatpush3.bf16.msra.mxu1 %v17273_v35  ;;  %v10493_v35 = vld [vmem:[%s22850_s4 + $0x418] sm:$0xff] }
 0x101   :  { %v17121_v36 = vpop.f32.mrb[0].mxu0 }
 0x102   :  { %v17123_v37 = vpop.f32.mrb[1].mxu0  ;;  %v296_v38 = vmul.f32 %v17121_v36, %v17121_v36 }
 0x103   :  { %v17127_v39 = vpop.f32.mrb[0].mxu1  ;;  %v288_v40 = vadd.f32 %v17123_v37, %v17121_v36  ;;  %v297_v41 = vmul.f32 %v17123_v37, %v17123_v37 }
 0x104   :  { %v17133_v42 = vpop.f32.mrb[1].mxu1  ;;  %v316_v7 = vmul.f32 %v17127_v39, %v17127_v39 }
 0x105   :  { %289 = vadd.xlane.f32.xlu0 %v288_v40  ;;  %v300_v43 = vadd.f32 %v297_v41, %v296_v38  ;;  %v308_v44 = vadd.f32 %v17133_v42, %v17127_v39  ;;  %v317_v45 = vmul.f32 %v17133_v42, %v17133_v42  ;;  %v17141_v46 = vpop.f32.mrb[2].mxu0  ;;  %v17275_v38 = vpack.c.bf16 %v439_v33, %v438_v32  ;;  %v10417_v40 = vld [vmem:[%s22850_s4 + $0x1b8] sm:$0xff]  ;;  %v422_v41 = vld [vmem:[%s22850_s4 + $0x30] sm:$0xff] }
 0x106   :  { %v17143_v47 = vpop.f32.mrb[3].mxu0  ;;  %v298_v48 = vmul.f32 %v17141_v46, %v17141_v46 }
 0x107   :  { %301 = vadd.xlane.f32.xlu1 %v300_v43  ;;  %v17147_v49 = vpop.f32.mrb[2].mxu1  ;;  %v320_v50 = vadd.f32 %v317_v45, %v316_v7  ;;  %v291_v51 = vadd.f32 %v17143_v47, %v17141_v46  ;;  %v299_v52 = vmul.f32 %v17143_v47, %v17143_v47  ;;  %v423_v7 = vld [vmem:[%s22850_s4 + $0x38] sm:$0xff]  ;;  %v17287_v43 = vpack.c.bf16 %v10417_v40, %v10416_v34 }
 0x108   :  { %v17153_v53 = vpop.f32.mrb[3].mxu1  ;;  %v318_v54 = vmul.f32 %v17147_v49, %v17147_v49  ;;  %v10401_v45 = vld [vmem:[%s22850_s4 + $0x138] sm:$0xff]  ;;  %14744 = vmatprep.subr.bf16.mxu0 %v17275_v38 }
 0x109   :  { %309 = vadd.xlane.f32.xlu0 %v308_v44  ;;  %v311_v55 = vadd.f32 %v17153_v53, %v17147_v49  ;;  %v319_v56 = vmul.f32 %v17153_v53, %v17153_v53  ;;  %v303_v57 = vadd.f32 %v299_v52, %v298_v48  ;;  %23191 = vst [vmem:[#allocation11_spill] sm:$0xff] %v17287_v43  ;;  %v10400_v44 = vld [vmem:[%s22850_s4 + $0x130] sm:$0xff]  ;;  %v440_v48 = vld [vmem:[%s22850_s4 + $0xc0] sm:$0xff]  ;;  %v10419_v52 = vld [vmem:[%s22850_s4 + $0x1c8] sm:$0xff] }
 0x10a   :  { %14776 = vmatprep.subr.bf16.mxu1 %v17287_v43  ;;  %v10490_v43 = vld [vmem:[%s22850_s4 + $0x400] sm:$0xff] }
 0x10b   :  { %321 = vadd.xlane.f32.xlu1 %v320_v50  ;;  %v323_v58 = vadd.f32 %v319_v56, %v318_v54  ;;  %v441_v50 = vld [vmem:[%s22850_s4 + $0xc8] sm:$0xff]  ;;  %v17308_v54 = vpack.c.bf16 %v423_v7, %v422_v41 }
 0x10c   :  { %v17314_v56 = vpack.c.bf16 %v441_v50, %v440_v48 }
 0x10d   :  { %292 = vadd.xlane.f32.xlu0 %v291_v51  ;;  %v10418_v51 = vld [vmem:[%s22850_s4 + $0x1c0] sm:$0xff]  ;;  %14746 = vmatpush3.bf16.msra.mxu0 %v17308_v54 }
 0x10e   :  { %v17326_v60 = vpack.c.bf16 %v10419_v52, %v10418_v51  ;;  %14748 = vmatprep.subr.bf16.mxu0 %v17314_v56 }
 0x10f   :  { %312 = vadd.xlane.f32.xlu1 %v311_v55  ;;  %v17312_v55 = vpack.c.bf16 %v10401_v45, %v10400_v44 }
 0x110   :  { %23193 = vst [vmem:[#allocation13_spill] sm:$0xff] %v17326_v60 }
 0x111   :  { %304 = vadd.xlane.f32.xlu0 %v303_v57  ;;  %23192 = vst [vmem:[#allocation12_spill] sm:$0xff] %v17312_v55  ;;  %v424_v57 = vld [vmem:[%s22850_s4 + $0x40] sm:$0xff]  ;;  %14778 = vmatpush3.bf16.msra.mxu1 %v17312_v55 }
 0x112   :  { %14780 = vmatprep.subr.bf16.mxu1 %v17326_v60 }
 0x113   :  { %324 = vadd.xlane.f32.xlu1 %v323_v58  ;;  %v425_v58 = vld [vmem:[%s22850_s4 + $0x48] sm:$0xff] }
 0x114   :  { %v17344_v5 = vpack.c.bf16 %v425_v58, %v424_v57 }
 0x115   :  { %14782 = vmatpush3.bf16.msra.mxu1 %v17348_v6 }
 0x116   :  { %14750 = vmatpush3.bf16.msra.mxu0 %v17344_v5  ;;  %14784 = vmatprep.subr.bf16.mxu1 %v17359_v12 }
 0x117   :  { %14752 = vmatprep.subr.bf16.mxu0 %v17350_v8 }
 0x119   :  { %14786 = vmatpush3.bf16.msra.mxu1 %v17372_v19 }
 0x11a   :  { %14754 = vmatpush3.bf16.msra.mxu0 %v17368_v17 }
 0x11b   :  { %14756 = vmatprep.subr.bf16.mxu0 %v17392_v16 }
 0x192   :  { %v290_v20 = vpop.xlane.xlu0 %289 }
 0x194   :  { %v302_v21 = vpop.xlane.xlu1 %301 }
 0x196   :  { %v310_v24 = vpop.xlane.xlu0 %309 }
 0x197   :  { %v314_v25 = vadd.f32 %v310_v24, %v290_v20  ;;  %v10423_v20 = vld [vmem:[%s22850_s4 + $0x1e8] sm:$0xff] }
 0x198   :  { %v322_v26 = vpop.xlane.xlu1 %321  ;;  %v429_v24 = vld [vmem:[%s22850_s4 + $0x68] sm:$0xff] }
 0x199   :  { %v328_v28 = vmul.f32 0.001953125, %v314_v25  ;;  %v326_v29 = vadd.f32 %v322_v26, %v302_v21  ;;  %v428_v21 = vld [vmem:[%s22850_s4 + $0x60] sm:$0xff]  ;;  %v17403_v26 = vpack.c.bf16 %v10423_v20, %v10422_v15 }
 0x19a   :  { %v293_v30 = vpop.xlane.xlu0 %292 }
 0x19b   :  { %v332_v32 = vmul.f32 %v328_v28, %v328_v28  ;;  %v330_v33 = vmul.f32 0.001953125, %v326_v29  ;;  %23199 = vst [vmem:[#allocation17_spill] sm:$0xff] %v17403_v26  ;;  %v17405_v29 = vpack.c.bf16 %v429_v24, %v428_v21  ;;  %14788 = vmatprep.subr.bf16.mxu1 %v17403_v26  ;;  %v10475_v21 = vld [vmem:[%s22850_s4 + $0x388] sm:$0xff] }
 0x19c   :  { %v313_v34 = vpop.xlane.xlu1 %312  ;;  %v17475_v24 = vpack.c.bf16 %v10475_v21, %v10474_v11  ;;  %v10429_v11 = vld [vmem:[%s22850_s4 + $0x218] sm:$0xff] }
 0x19d   :  { %v334_v40 = vsub.f32 %v330_v33, %v332_v32  ;;  %v315_v41 = vadd.f32 %v313_v34, %v293_v30  ;;  %v10406_v30 = vld [vmem:[%s22850_s4 + $0x160] sm:$0xff]  ;;  %v10407_v32 = vld [vmem:[%s22850_s4 + $0x168] sm:$0xff]  ;;  %14758 = vmatpush3.bf16.msra.mxu0 %v17405_v29 }
 0x19e   :  { %v305_v7 = vpop.xlane.xlu0 %304  ;;  %v17414_v33 = vpack.c.bf16 %v10407_v32, %v10406_v30  ;;  %23203 = vst [vmem:[#allocation21_spill] sm:$0xff] %v17475_v24 }
 0x19f   :  { %v336_v44 = vmax.f32 %v334_v40, 0.0  ;;  %v329_v45 = vmul.f32 0.001953125, %v315_v41  ;;  %v446_v40 = vld [vmem:[%s22850_s4 + $0xf0] sm:$0xff]  ;;  %v447_v41 = vld [vmem:[%s22850_s4 + $0xf8] sm:$0xff] }
 0x1a0   :  { %v325_v48 = vpop.xlane.xlu1 %324  ;;  %23200 = vst [vmem:[#allocation18_spill] sm:$0xff] %v17414_v33  ;;  %14790 = vmatpush3.bf16.msra.mxu1 %v17414_v33 }
 0x1a1   :  { %v338_v50 = vadd.f32 1e-05, %v336_v44  ;;  %v333_v51 = vmul.f32 %v329_v45, %v329_v45  ;;  %v327_v52 = vadd.f32 %v325_v48, %v305_v7  ;;  %v10424_v7 = vld [vmem:[%s22850_s4 + $0x1f0] sm:$0xff]  ;;  %v17431_v44 = vpack.c.bf16 %v447_v41, %v446_v40  ;;  %v10425_v48 = vld [vmem:[%s22850_s4 + $0x1f8] sm:$0xff]  ;;  %v10427_v40 = vld [vmem:[%s22850_s4 + $0x208] sm:$0xff] }
 0x1a3   :  { %16751 = vrsqrt.f32 %v338_v50  ;;  %v331_v57 = vmul.f32 0.001953125, %v327_v52  ;;  %v430_v50 = vld [vmem:[%s22850_s4 + $0x70] sm:$0xff]  ;;  %14760 = vmatprep.subr.bf16.mxu0 %v17431_v44 }
 0x1a5   :  { %v335_v58 = vsub.f32 %v331_v57, %v333_v51  ;;  %v431_v51 = vld [vmem:[%s22850_s4 + $0x78] sm:$0xff]  ;;  %v17442_v57 = vpack.c.bf16 %v10425_v48, %v10424_v7  ;;  %v10444_v48 = vld [vmem:[%s22850_s4 + $0x290] sm:$0xff] }
 0x1a7   :  { %v337_v59 = vmax.f32 %v335_v58, 0.0  ;;  %23201 = vst [vmem:[#allocation19_spill] sm:$0xff] %v17442_v57  ;;  %v17444_v58 = vpack.c.bf16 %v431_v51, %v430_v50  ;;  %14792 = vmatprep.subr.bf16.mxu1 %v17442_v57  ;;  %v10445_v50 = vld [vmem:[%s22850_s4 + $0x298] sm:$0xff]  ;;  %v10476_v51 = vld [vmem:[%s22850_s4 + $0x390] sm:$0xff] }
 0x1a9   :  { %v339_v61 = vadd.f32 1e-05, %v337_v59  ;;  %v10408_v59 = vld [vmem:[%s22850_s4 + $0x170] sm:$0xff]  ;;  %14762 = vmatpush3.bf16.msra.mxu0 %v17444_v58 }
 0x1ab   :  { %16753 = vrsqrt.f32 %v339_v61  ;;  %v10409_v61 = vld [vmem:[%s22850_s4 + $0x178] sm:$0xff] }
 0x1ad   :  { %v16752_v0 = vpop.eup %16751 }
 0x1ae   :  { %v342_v2 = vmul.f32 %v16752_v0, %v284_v62  ;;  %v287_v0 = vld [vmem:[%s23198_s1 + $0x8] sm:$0xff] }
 0x1b0   :  { %350 = vperm.xlu0 %16749, %v342_v2   ;;  %v344_v25 = vmul.f32 %v342_v2, %v328_v28  ;;  %v285_v28 = vld [vmem:[%s23197_s0 + $0x8] sm:$0xff]  ;;  %v10442_v2 = vld [vmem:[%s22850_s4 + $0x280] sm:$0xff] }
 0x1b1   :  { %v17470_v20 = vpack.c.bf16 %v10443_v10, %v10442_v2  ;;  %v10428_v10 = vld [vmem:[%s22850_s4 + $0x210] sm:$0xff] }
 0x1b2   :  { %v346_v34 = vsub.f32 %v286_v1, %v344_v25  ;;  %v17456_v1 = vpack.c.bf16 %v10409_v61, %v10408_v59 }
 0x1b3   :  { %14796 = vmatprep.subr.bf16.mxu0 %v17470_v20 }
 0x1b4   :  { %364 = vperm.xlu1 %16750, %v346_v34   ;;  %23202 = vst [vmem:[#allocation20_spill] sm:$0xff] %v17456_v1  ;;  %14794 = vmatpush3.bf16.msra.mxu1 %v17456_v1  ;;  %v10433_v1 = vld [vmem:[%s22850_s4 + $0x238] sm:$0xff] }
 0x1b5   :  { %v16754_v52 = vpop.eup %16753  ;;  %14828 = vmatprep.subr.bf16.mxu1 %v17475_v24  ;;  %v10432_v24 = vld [vmem:[%s22850_s4 + $0x230] sm:$0xff] }
 0x1b6   :  { %v343_v62 = vmul.f32 %v16754_v52, %v285_v28  ;;  %v10426_v28 = vld [vmem:[%s22850_s4 + $0x200] sm:$0xff]  ;;  %v10477_v52 = vld [vmem:[%s22850_s4 + $0x398] sm:$0xff] }
 0x1b8   :  { %355 = vperm.xlu1 %16750, %v343_v62   ;;  %v345_v15 = vmul.f32 %v343_v62, %v329_v45 }
 0x1ba   :  { %v347_v25 = vsub.f32 %v287_v0, %v345_v15  ;;  %v17515_v0 = vpack.c.bf16 %v10427_v40, %v10426_v28  ;;  %v10446_v28 = vld [vmem:[%s22850_s4 + $0x2a0] sm:$0xff]  ;;  %v17542_v40 = vpack.c.bf16 %v10477_v52, %v10476_v51  ;;  %v17563_v51 = vpack.c.bf16 %v10429_v11, %v10428_v10 }
 0x1bb   :  { %v10462_v11 = vld [vmem:[%s22850_s4 + $0x320] sm:$0xff] }
 0x1bc   :  { %369 = vperm.xlu1 %16750, %v347_v25   ;;  %v17529_v25 = vpack.c.bf16 %v10445_v50, %v10444_v48  ;;  %23205 = vst [vmem:[#allocation23_spill] sm:$0xff] %v17542_v40 }
 0x22f   :  { %v17479_v30 = vpop.permute.xlu0 %350 }
 0x230   :  { %v358_v45 = vmul.f32 %v17479_v30, %v17121_v36  ;;  %v359_v32 = vmul.f32 %v17479_v30, %v17123_v37  ;;  %v10458_v36 = vld [vmem:[%s22850_s4 + $0x300] sm:$0xff]  ;;  %v10459_v37 = vld [vmem:[%s22850_s4 + $0x308] sm:$0xff] }
 0x231   :  { %v17517_v2 = vpack.c.bf16 %v10459_v37, %v10458_v36  ;;  %v10479_v36 = vld [vmem:[%s22850_s4 + $0x3a8] sm:$0xff] }
 0x233   :  { %v17485_v34 = vpop.permute.xlu1 %364  ;;  %23204 = vst [vmem:[#allocation22_spill] sm:$0xff] %v17517_v2 }
 0x234   :  { %v372_v41 = vadd.f32 %v17485_v34, %v358_v45  ;;  %v373_v7 = vadd.f32 %v17485_v34, %v359_v32  ;;  %v10460_v45 = vld [vmem:[%s22850_s4 + $0x310] sm:$0xff]  ;;  %v10461_v32 = vld [vmem:[%s22850_s4 + $0x318] sm:$0xff] }
 0x235   :  { %v17565_v52 = vpack.c.bf16 %v10461_v32, %v10460_v45  ;;  %v10463_v45 = vld [vmem:[%s22850_s4 + $0x328] sm:$0xff]  ;;  %v10448_v32 = vld [vmem:[%s22850_s4 + $0x2b0] sm:$0xff] }
 0x236   :  { %vm376_vm0 = vcmp.gt.f32.partialorder %v372_v41, 0.0  ;;  %vm377_vm1 = vcmp.gt.f32.partialorder %v373_v7, 0.0  ;;  %v380_v59 = vmul.f32 0.2, %v372_v41  ;;  %v381_v61 = vmul.f32 0.2, %v373_v7 }
 0x237   :  { %v17513_v62 = vpop.permute.xlu1 %355  ;;  %23206 = vst [vmem:[#allocation24_spill] sm:$0xff] %v17565_v52 }
 0x238   :  { %v17525_v15 = vsel %vm376_vm0, %v372_v41, %v380_v59  ;;  %v17527_v21 = vsel %vm377_vm1, %v373_v7, %v381_v61  ;;  %v10447_v41 = vld [vmem:[%s22850_s4 + $0x2a8] sm:$0xff]  ;;  %v10478_v7 = vld [vmem:[%s22850_s4 + $0x3a0] sm:$0xff]  ;;  %v360_v37 = vmul.f32 %v17513_v62, %v17141_v46  ;;  %v361_v48 = vmul.f32 %v17513_v62, %v17143_v47 }
 0x239   :  { %512 = vmatprep.mubr.f32.mxu0 %v17527_v21  ;;  %620 = vmatprep.mubr.f32.mxu1 %v17527_v21  ;;  %v10430_v59 = vld [vmem:[%s22850_s4 + $0x220] sm:$0xff]  ;;  %v10431_v46 = vld [vmem:[%s22850_s4 + $0x228] sm:$0xff]  ;;  %v17578_v10 = vpack.c.bf16 %v10479_v36, %v10478_v7  ;;  %v10481_v7 = vld [vmem:[%s22850_s4 + $0x3b8] sm:$0xff]  ;;  %vm7069_vm1 = vcmask 130048  }
 0x23a   :  { %513 = vmatmul.mubr.f32.vlgmr.msra.gmra.mrb[4].mxu0 %v17525_v15  ;;  %621 = vmatmul.mubr.f32.vlgmr.msra.gmra.mrb[4].mxu1 %v17525_v15 }
 0x23b   :  { %14798 = vmatpush3.bf16.msra.mxu0 %v17515_v0  ;;  %14830 = vmatpush3.bf16.msra.mxu1 %v17517_v2  ;;  %v17561_v50 = vpop.permute.xlu1 %369  ;;  %v17576_v2 = vpack.c.bf16 %v10447_v41, %v10446_v28  ;;  %23207 = vst [vmem:[#allocation25_spill] sm:$0xff] %v17578_v10  ;;  %v10449_v28 = vld [vmem:[%s22850_s4 + $0x2b8] sm:$0xff]  ;;  %v10480_v41 = vld [vmem:[%s22850_s4 + $0x3b0] sm:$0xff] }
 0x23c   :  { %v374_v47 = vadd.f32 %v17561_v50, %v360_v37  ;;  %v375_v61 = vadd.f32 %v17561_v50, %v361_v48  ;;  %14800 = vmatprep.subr.bf16.mxu0 %v17529_v25  ;;  %14832 = vmatprep.subr.bf16.mxu1 %v17542_v40  ;;  %v17601_v48 = vpack.c.bf16 %v10431_v46, %v10430_v59  ;;  %v10464_v59 = vld [vmem:[%s22850_s4 + $0x330] sm:$0xff]  ;;  %v10465_v46 = vld [vmem:[%s22850_s4 + $0x338] sm:$0xff] }
 0x23d   :  { %v17603_v40 = vpack.c.bf16 %v10463_v45, %v10462_v11  ;;  %v10450_v11 = vld [vmem:[%s22850_s4 + $0x2c0] sm:$0xff]  ;;  %v10451_v45 = vld [vmem:[%s22850_s4 + $0x2c8] sm:$0xff] }
 0x23e   :  { %vm378_vm2 = vcmp.gt.f32.partialorder %v374_v47, 0.0  ;;  %vm379_vm3 = vcmp.gt.f32.partialorder %v375_v61, 0.0  ;;  %v382_v36 = vmul.f32 0.2, %v374_v47  ;;  %v383_v37 = vmul.f32 0.2, %v375_v61 }
 0x23f   :  { %14802 = vmatpush3.bf16.msra.mxu0 %v17563_v51  ;;  %14834 = vmatpush3.bf16.msra.mxu1 %v17565_v52  ;;  %23208 = vst [vmem:[#allocation26_spill] sm:$0xff] %v17603_v40 }
 0x240   :  { %v17611_v57 = vsel %vm378_vm2, %v374_v47, %v382_v36  ;;  %v17613_v33 = vsel %vm379_vm3, %v375_v61, %v383_v37  ;;  %14804 = vmatprep.subr.bf16.mxu0 %v17576_v2  ;;  %14836 = vmatprep.subr.bf16.mxu1 %v17578_v10  ;;  %v17628_v47 = vpack.c.bf16 %v10449_v28, %v10448_v32  ;;  %v10482_v36 = vld [vmem:[%s22850_s4 + $0x3c0] sm:$0xff]  ;;  %v10483_v37 = vld [vmem:[%s22850_s4 + $0x3c8] sm:$0xff]  ;;  %vm7460_vm2 = vcmask 261120  }
 0x241   :  { %517 = vmatprep.mubr.f32.mxu0 %v17613_v33  ;;  %625 = vmatprep.mubr.f32.mxu1 %v17613_v33  ;;  %v17630_v61 = vpack.c.bf16 %v10481_v7, %v10480_v41  ;;  %v17645_v32 = vpack.c.bf16 %v10433_v1, %v10432_v24  ;;  %v17647_v28 = vpack.c.bf16 %v10465_v46, %v10464_v59  ;;  %v10434_v41 = vld [vmem:[%s22850_s4 + $0x240] sm:$0xff]  ;;  %v10435_v7 = vld [vmem:[%s22850_s4 + $0x248] sm:$0xff]  ;;  %v10452_v59 = vld [vmem:[%s22850_s4 + $0x2d0] sm:$0xff] }
 0x242   :  { %518 = vmatmul.mubr.f32.gmra.mrb[6].mxu0 %v17611_v57  ;;  %626 = vmatmul.mubr.f32.gmra.mrb[6].mxu1 %v17611_v57  ;;  %v17657_v10 = vpack.c.bf16 %v10451_v45, %v10450_v11  ;;  %v17659_v52 = vpack.c.bf16 %v10483_v37, %v10482_v36  ;;  %v10466_v1 = vld [vmem:[%s22850_s4 + $0x340] sm:$0xff]  ;;  %v10467_v24 = vld [vmem:[%s22850_s4 + $0x348] sm:$0xff]  ;;  %v10453_v46 = vld [vmem:[%s22850_s4 + $0x2d8] sm:$0xff]  ;;  %v17683_v36 = vpack.c.bf16 %v10435_v7, %v10434_v41 }
 0x243   :  { %23209 = vst [vmem:[#allocation27_spill] sm:$0xff] %v17630_v61  ;;  %14806 = vmatpush3.bf16.msra.mxu0 %v17601_v48  ;;  %14838 = vmatpush3.bf16.msra.mxu1 %v17603_v40  ;;  %23210 = vst [vmem:[#allocation28_spill] sm:$0xff] %v17647_v28  ;;  %v10484_v11 = vld [vmem:[%s22850_s4 + $0x3d0] sm:$0xff]  ;;  %v10485_v45 = vld [vmem:[%s22850_s4 + $0x3d8] sm:$0xff]  ;;  %v17685_v37 = vpack.c.bf16 %v10467_v24, %v10466_v1  ;;  %v17695_v26 = vpack.c.bf16 %v10453_v46, %v10452_v59 }
 0x244   :  { %728 = vmatprep.mubr.f32.mxu0 %v17527_v21  ;;  %836 = vmatprep.mubr.f32.mxu1 %v17527_v21  ;;  %23211 = vst [vmem:[#allocation29_spill] sm:$0xff] %v17659_v52  ;;  %v10437_v40 = vld [vmem:[%s22850_s4 + $0x258] sm:$0xff]  ;;  %v17697_v19 = vpack.c.bf16 %v10485_v45, %v10484_v11  ;;  %v10468_v41 = vld [vmem:[%s22850_s4 + $0x350] sm:$0xff]  ;;  %v10454_v1 = vld [vmem:[%s22850_s4 + $0x2e0] sm:$0xff] }
 0x245   :  { %14808 = vmatprep.subr.bf16.mxu0 %v17628_v47  ;;  %14840 = vmatprep.subr.bf16.mxu1 %v17630_v61  ;;  %23212 = vst [vmem:[#allocation30_spill] sm:$0xff] %v17685_v37  ;;  %v10436_v61 = vld [vmem:[%s22850_s4 + $0x250] sm:$0xff]  ;;  %v10469_v7 = vld [vmem:[%s22850_s4 + $0x358] sm:$0xff]  ;;  %v10455_v24 = vld [vmem:[%s22850_s4 + $0x2e8] sm:$0xff] }
 0x246   :  { %23213 = vst [vmem:[#allocation31_spill] sm:$0xff] %v17697_v19  ;;  %v10486_v59 = vld [vmem:[%s22850_s4 + $0x3e0] sm:$0xff]  ;;  %v10487_v46 = vld [vmem:[%s22850_s4 + $0x3e8] sm:$0xff]  ;;  %v17719_v11 = vpack.c.bf16 %v10437_v40, %v10436_v61  ;;  %v17721_v45 = vpack.c.bf16 %v10469_v7, %v10468_v41  ;;  %v17731_v12 = vpack.c.bf16 %v10455_v24, %v10454_v1  ;;  %v10456_v41 = vld [vmem:[%s22850_s4 + $0x2f0] sm:$0xff] }
 0x247   :  { %14810 = vmatpush3.bf16.msra.mxu0 %v17645_v32  ;;  %14842 = vmatpush3.bf16.msra.mxu1 %v17647_v28  ;;  %v10439_v28 = vld [vmem:[%s22850_s4 + $0x268] sm:$0xff]  ;;  %v17733_v6 = vpack.c.bf16 %v10487_v46, %v10486_v59  ;;  %v10470_v40 = vld [vmem:[%s22850_s4 + $0x360] sm:$0xff]  ;;  %v10457_v7 = vld [vmem:[%s22850_s4 + $0x2f8] sm:$0xff] }
 0x248   :  { %14812 = vmatprep.subr.bf16.mxu0 %v17657_v10  ;;  %14844 = vmatprep.subr.bf16.mxu1 %v17659_v52  ;;  %23214 = vst [vmem:[#allocation32_spill] sm:$0xff] %v17721_v45  ;;  %v10438_v52 = vld [vmem:[%s22850_s4 + $0x260] sm:$0xff]  ;;  %v10471_v61 = vld [vmem:[%s22850_s4 + $0x368] sm:$0xff]  ;;  %v10488_v1 = vld [vmem:[%s22850_s4 + $0x3f0] sm:$0xff]  ;;  %v17767_v60 = vpack.c.bf16 %v10457_v7, %v10456_v41 }
 0x249   :  { %23215 = vst [vmem:[#allocation33_spill] sm:$0xff] %v17733_v6  ;;  %v10489_v24 = vld [vmem:[%s22850_s4 + $0x3f8] sm:$0xff]  ;;  %v17755_v59 = vpack.c.bf16 %v10439_v28, %v10438_v52  ;;  %v17757_v46 = vpack.c.bf16 %v10471_v61, %v10470_v40  ;;  %v10472_v52 = vld [vmem:[%s22850_s4 + $0x370] sm:$0xff]  ;;  %v10506_v40 = vld [vmem:[%s22850_s4 + $0x480] sm:$0xff] }
 0x24a   :  { %v17769_v55 = vpack.c.bf16 %v10489_v24, %v10488_v1  ;;  %v10473_v28 = vld [vmem:[%s22850_s4 + $0x378] sm:$0xff]  ;;  %v10507_v61 = vld [vmem:[%s22850_s4 + $0x488] sm:$0xff]  ;;  %v10538_v41 = vld [vmem:[%s22850_s4 + $0x580] sm:$0xff] }
 0x24b   :  { %14814 = vmatpush3.bf16.msra.mxu0 %v17683_v36  ;;  %14846 = vmatpush3.bf16.msra.mxu1 %v17685_v37  ;;  %23216 = vst [vmem:[#allocation34_spill] sm:$0xff] %v17757_v46  ;;  %v10441_v37 = vld [vmem:[%s22850_s4 + $0x278] sm:$0xff]  ;;  %v10539_v7 = vld [vmem:[%s22850_s4 + $0x588] sm:$0xff]  ;;  %v17793_v24 = vpack.c.bf16 %v10473_v28, %v10472_v52  ;;  %v10508_v52 = vld [vmem:[%s22850_s4 + $0x490] sm:$0xff] }
 0x24c   :  { %14816 = vmatprep.subr.bf16.mxu0 %v17695_v26  ;;  %14848 = vmatprep.subr.bf16.mxu1 %v17697_v19  ;;  %v10440_v19 = vld [vmem:[%s22850_s4 + $0x270] sm:$0xff]  ;;  %23217 = vst [vmem:[#allocation35_spill] sm:$0xff] %v17769_v55  ;;  %v10509_v28 = vld [vmem:[%s22850_s4 + $0x498] sm:$0xff] }
 0x24d   :  { %v17791_v1 = vpack.c.bf16 %v10441_v37, %v10440_v19  ;;  %23219 = vst [vmem:[#allocation37_spill] sm:$0xff] %v17793_v24  ;;  %v10522_v19 = vld [vmem:[%s22850_s4 + $0x500] sm:$0xff]  ;;  %v10523_v37 = vld [vmem:[%s22850_s4 + $0x508] sm:$0xff]  ;;  %v17839_v27 = vpack.c.bf16 %v10509_v28, %v10508_v52 }
 0x24e   :  { %v10543_v52 = vld [vmem:[%s22850_s4 + $0x5a8] sm:$0xff] }
 0x24f   :  { %14818 = vmatpush3.bf16.msra.mxu0 %v17719_v11  ;;  %14850 = vmatpush3.bf16.msra.mxu1 %v17721_v45  ;;  %23218 = vst [vmem:[#allocation36_spill] sm:$0xff] %v17791_v1  ;;  %v17799_v45 = vpack.c.bf16 %v10539_v7, %v10538_v41  ;;  %v17831_v7 = vpack.c.bf16 %v10523_v37, %v10522_v19  ;;  %23224 = vst [vmem:[#allocation42_spill] sm:$0xff] %v17839_v27  ;;  %v10511_v19 = vld [vmem:[%s22850_s4 + $0x4a8] sm:$0xff]  ;;  %v10542_v37 = vld [vmem:[%s22850_s4 + $0x5a0] sm:$0xff] }
 0x250   :  { %14820 = vmatprep.subr.bf16.mxu0 %v17731_v12  ;;  %14852 = vmatprep.subr.bf16.mxu1 %v17733_v6  ;;  %v17797_v6 = vpack.c.bf16 %v10507_v61, %v10506_v40  ;;  %v10540_v40 = vld [vmem:[%s22850_s4 + $0x590] sm:$0xff]  ;;  %v10541_v61 = vld [vmem:[%s22850_s4 + $0x598] sm:$0xff]  ;;  %v17881_v9 = vpack.c.bf16 %v10543_v52, %v10542_v37 }
 0x251   :  { %23221 = vst [vmem:[#allocation39_spill] sm:$0xff] %v17799_v45  ;;  %23223 = vst [vmem:[#allocation41_spill] sm:$0xff] %v17831_v7  ;;  %v17841_v22 = vpack.c.bf16 %v10541_v61, %v10540_v40  ;;  %v10494_v61 = vld [vmem:[%s22850_s4 + $0x420] sm:$0xff] }
 0x252   :  { %23220 = vst [vmem:[#allocation38_spill] sm:$0xff] %v17797_v6  ;;  %23229 = vst [vmem:[#allocation47_spill] sm:$0xff] %v17881_v9 }
 0x253   :  { %14822 = vmatpush3.bf16.msra.mxu0 %v17755_v59  ;;  %14854 = vmatpush3.bf16.msra.mxu1 %v17757_v46  ;;  %v10491_v46 = vld [vmem:[%s22850_s4 + $0x408] sm:$0xff]  ;;  %23225 = vst [vmem:[#allocation43_spill] sm:$0xff] %v17841_v22 }
 0x254   :  { %14824 = vmatprep.subr.bf16.mxu0 %v17767_v60  ;;  %14856 = vmatprep.subr.bf16.mxu1 %v17769_v55  ;;  %v17829_v41 = vpack.c.bf16 %v10491_v46, %v10490_v43  ;;  %v10492_v55 = vld [vmem:[%s22850_s4 + $0x410] sm:$0xff]  ;;  %v10525_v43 = vld [vmem:[%s22850_s4 + $0x518] sm:$0xff]  ;;  %v10510_v46 = vld [vmem:[%s22850_s4 + $0x4a0] sm:$0xff] }
 0x255   :  { %v17867_v28 = vpack.c.bf16 %v10493_v35, %v10492_v55  ;;  %v17879_v14 = vpack.c.bf16 %v10511_v19, %v10510_v46  ;;  %v10526_v35 = vld [vmem:[%s22850_s4 + $0x520] sm:$0xff]  ;;  %v10527_v55 = vld [vmem:[%s22850_s4 + $0x528] sm:$0xff]  ;;  %v10544_v46 = vld [vmem:[%s22850_s4 + $0x5b0] sm:$0xff] }
 0x256   :  { %23222 = vst [vmem:[#allocation40_spill] sm:$0xff] %v17829_v41  ;;  %v10545_v19 = vld [vmem:[%s22850_s4 + $0x5b8] sm:$0xff]  ;;  %v17909_v52 = vpack.c.bf16 %v10527_v55, %v10526_v35  ;;  %v10514_v35 = vld [vmem:[%s22850_s4 + $0x4c0] sm:$0xff]  ;;  %v10515_v55 = vld [vmem:[%s22850_s4 + $0x4c8] sm:$0xff] }
 0x257   :  { %14826 = vmatpush3.bf16.msra.mxu0 %v17791_v1  ;;  %14858 = vmatpush3.bf16.msra.mxu1 %v17793_v24  ;;  %23226 = vst [vmem:[#allocation44_spill] sm:$0xff] %v17867_v28  ;;  %v10495_v24 = vld [vmem:[%s22850_s4 + $0x428] sm:$0xff]  ;;  %23228 = vst [vmem:[#allocation46_spill] sm:$0xff] %v17879_v14 }
 0x258   :  { %14860 = vmatprep.subr.bf16.mxu0 %v17797_v6  ;;  %14892 = vmatprep.subr.bf16.mxu1 %v17799_v45  ;;  %v10524_v45 = vld [vmem:[%s22850_s4 + $0x510] sm:$0xff]  ;;  %v17907_v37 = vpack.c.bf16 %v10495_v24, %v10494_v61  ;;  %23231 = vst [vmem:[#allocation49_spill] sm:$0xff] %v17909_v52  ;;  %v10529_v61 = vld [vmem:[%s22850_s4 + $0x538] sm:$0xff] }
 0x259   :  { %v17869_v40 = vpack.c.bf16 %v10525_v43, %v10524_v45  ;;  %v10512_v45 = vld [vmem:[%s22850_s4 + $0x4b0] sm:$0xff]  ;;  %v10513_v43 = vld [vmem:[%s22850_s4 + $0x4b8] sm:$0xff] }
 0x25a   :  { %729 = vmatmul.mubr.f32.vlgmr.msra.gmra.mrb[8].mxu0 %v17525_v15  ;;  %837 = vmatmul.mubr.f32.vlgmr.msra.gmra.mrb[8].mxu1 %v17525_v15  ;;  %23230 = vst [vmem:[#allocation48_spill] sm:$0xff] %v17907_v37  ;;  %v17919_v3 = vpack.c.bf16 %v10513_v43, %v10512_v45  ;;  %v10528_v24 = vld [vmem:[%s22850_s4 + $0x530] sm:$0xff]  ;;  %v10546_v45 = vld [vmem:[%s22850_s4 + $0x5c0] sm:$0xff]  ;;  %v10547_v43 = vld [vmem:[%s22850_s4 + $0x5c8] sm:$0xff] }
 0x25b   :  { %733 = vmatprep.mubr.f32.mxu0 %v17613_v33  ;;  %841 = vmatprep.mubr.f32.mxu1 %v17613_v33  ;;  %23227 = vst [vmem:[#allocation45_spill] sm:$0xff] %v17869_v40 }
 0x25c   :  { %14862 = vmatpush3.bf16.msra.mxu0 %v17829_v41  ;;  %14894 = vmatpush3.bf16.msra.mxu1 %v17831_v7  ;;  %v10497_v7 = vld [vmem:[%s22850_s4 + $0x438] sm:$0xff]  ;;  %23232 = vst [vmem:[#allocation50_spill] sm:$0xff] %v17919_v3 }
 0x25d   :  { %14864 = vmatprep.subr.bf16.mxu0 %v17839_v27  ;;  %14896 = vmatprep.subr.bf16.mxu1 %v17841_v22  ;;  %v10496_v22 = vld [vmem:[%s22850_s4 + $0x430] sm:$0xff]  ;;  %v10825_v41 = vld [vmem:[%s22850_s4 + $0xe78] sm:$0xff] }
 0x25e   :  { %734 = vmatmul.mubr.f32.gmra.mrb[10].mxu0 %v17611_v57  ;;  %842 = vmatmul.mubr.f32.gmra.mrb[10].mxu1 %v17611_v57 }
 0x25f   :  { %944 = vmatprep.mubr.f32.mxu0 %v17527_v21  ;;  %1052 = vmatprep.mubr.f32.mxu1 %v17527_v21 }
 0x260   :  { %14866 = vmatpush3.bf16.msra.mxu0 %v17867_v28  ;;  %14898 = vmatpush3.bf16.msra.mxu1 %v17869_v40  ;;  %v17921_v28 = vpack.c.bf16 %v10545_v19, %v10544_v46  ;;  %v17943_v46 = vpack.c.bf16 %v10497_v7, %v10496_v22  ;;  %v17945_v19 = vpack.c.bf16 %v10529_v61, %v10528_v24  ;;  %v10499_v40 = vld [vmem:[%s22850_s4 + $0x448] sm:$0xff]  ;;  %v10530_v22 = vld [vmem:[%s22850_s4 + $0x540] sm:$0xff]  ;;  %v10516_v24 = vld [vmem:[%s22850_s4 + $0x4d0] sm:$0xff] }
 0x261   :  { %14868 = vmatprep.subr.bf16.mxu0 %v17879_v14  ;;  %14900 = vmatprep.subr.bf16.mxu1 %v17881_v9  ;;  %v10498_v9 = vld [vmem:[%s22850_s4 + $0x440] sm:$0xff]  ;;  %v17955_v14 = vpack.c.bf16 %v10515_v55, %v10514_v35  ;;  %v10531_v7 = vld [vmem:[%s22850_s4 + $0x548] sm:$0xff]  ;;  %v10517_v61 = vld [vmem:[%s22850_s4 + $0x4d8] sm:$0xff] }
 0x262   :  { %23233 = vst [vmem:[#allocation51_spill] sm:$0xff] %v17921_v28  ;;  %23234 = vst [vmem:[#allocation52_spill] sm:$0xff] %v17943_v46  ;;  %v10548_v35 = vld [vmem:[%s22850_s4 + $0x5d0] sm:$0xff]  ;;  %v10549_v55 = vld [vmem:[%s22850_s4 + $0x5d8] sm:$0xff] }
 0x263   :  { %23235 = vst [vmem:[#allocation53_spill] sm:$0xff] %v17945_v19  ;;  %23236 = vst [vmem:[#allocation54_spill] sm:$0xff] %v17955_v14 }
 0x264   :  { %14870 = vmatpush3.bf16.msra.mxu0 %v17907_v37  ;;  %14902 = vmatpush3.bf16.msra.mxu1 %v17909_v52  ;;  %v17957_v37 = vpack.c.bf16 %v10547_v43, %v10546_v45  ;;  %v17979_v45 = vpack.c.bf16 %v10499_v40, %v10498_v9  ;;  %v17981_v43 = vpack.c.bf16 %v10531_v7, %v10530_v22  ;;  %v10501_v52 = vld [vmem:[%s22850_s4 + $0x458] sm:$0xff]  ;;  %v10532_v9 = vld [vmem:[%s22850_s4 + $0x550] sm:$0xff]  ;;  %v10518_v22 = vld [vmem:[%s22850_s4 + $0x4e0] sm:$0xff] }
 0x265   :  { %14872 = vmatprep.subr.bf16.mxu0 %v17919_v3  ;;  %14904 = vmatprep.subr.bf16.mxu1 %v17921_v28  ;;  %v10500_v28 = vld [vmem:[%s22850_s4 + $0x450] sm:$0xff]  ;;  %v17991_v3 = vpack.c.bf16 %v10517_v61, %v10516_v24  ;;  %v10533_v40 = vld [vmem:[%s22850_s4 + $0x558] sm:$0xff]  ;;  %v10519_v7 = vld [vmem:[%s22850_s4 + $0x4e8] sm:$0xff] }
 0x266   :  { %23237 = vst [vmem:[#allocation55_spill] sm:$0xff] %v17957_v37  ;;  %23238 = vst [vmem:[#allocation56_spill] sm:$0xff] %v17979_v45  ;;  %v10550_v24 = vld [vmem:[%s22850_s4 + $0x5e0] sm:$0xff]  ;;  %v10551_v61 = vld [vmem:[%s22850_s4 + $0x5e8] sm:$0xff] }
 0x267   :  { %23239 = vst [vmem:[#allocation57_spill] sm:$0xff] %v17981_v43  ;;  %23240 = vst [vmem:[#allocation58_spill] sm:$0xff] %v17991_v3 }
 0x268   :  { %14874 = vmatpush3.bf16.msra.mxu0 %v17943_v46  ;;  %14906 = vmatpush3.bf16.msra.mxu1 %v17945_v19  ;;  %v17993_v46 = vpack.c.bf16 %v10549_v55, %v10548_v35  ;;  %v18015_v35 = vpack.c.bf16 %v10501_v52, %v10500_v28  ;;  %v18017_v55 = vpack.c.bf16 %v10533_v40, %v10532_v9  ;;  %v10503_v19 = vld [vmem:[%s22850_s4 + $0x468] sm:$0xff]  ;;  %v10534_v28 = vld [vmem:[%s22850_s4 + $0x560] sm:$0xff]  ;;  %v10520_v9 = vld [vmem:[%s22850_s4 + $0x4f0] sm:$0xff] }
 0x269   :  { %14876 = vmatprep.subr.bf16.mxu0 %v17955_v14  ;;  %14908 = vmatprep.subr.bf16.mxu1 %v17957_v37  ;;  %v10502_v37 = vld [vmem:[%s22850_s4 + $0x460] sm:$0xff]  ;;  %v18027_v14 = vpack.c.bf16 %v10519_v7, %v10518_v22  ;;  %v10535_v52 = vld [vmem:[%s22850_s4 + $0x568] sm:$0xff]  ;;  %v10521_v40 = vld [vmem:[%s22850_s4 + $0x4f8] sm:$0xff] }
 0x26a   :  { %23241 = vst [vmem:[#allocation59_spill] sm:$0xff] %v17993_v46  ;;  %23242 = vst [vmem:[#allocation60_spill] sm:$0xff] %v18015_v35  ;;  %v10552_v22 = vld [vmem:[%s22850_s4 + $0x5f0] sm:$0xff]  ;;  %v10553_v7 = vld [vmem:[%s22850_s4 + $0x5f8] sm:$0xff] }
 0x26b   :  { %23243 = vst [vmem:[#allocation61_spill] sm:$0xff] %v18017_v55  ;;  %23244 = vst [vmem:[#allocation62_spill] sm:$0xff] %v18027_v14 }
 0x26c   :  { %14878 = vmatpush3.bf16.msra.mxu0 %v17979_v45  ;;  %14910 = vmatpush3.bf16.msra.mxu1 %v17981_v43  ;;  %v18029_v45 = vpack.c.bf16 %v10551_v61, %v10550_v24  ;;  %v18051_v24 = vpack.c.bf16 %v10503_v19, %v10502_v37  ;;  %v18053_v61 = vpack.c.bf16 %v10535_v52, %v10534_v28  ;;  %v10505_v43 = vld [vmem:[%s22850_s4 + $0x478] sm:$0xff]  ;;  %v10536_v37 = vld [vmem:[%s22850_s4 + $0x570] sm:$0xff]  ;;  %v10570_v28 = vld [vmem:[%s22850_s4 + $0x680] sm:$0xff] }
 0x26d   :  { %14880 = vmatprep.subr.bf16.mxu0 %v17991_v3  ;;  %14912 = vmatprep.subr.bf16.mxu1 %v17993_v46  ;;  %v10504_v46 = vld [vmem:[%s22850_s4 + $0x470] sm:$0xff]  ;;  %v18063_v3 = vpack.c.bf16 %v10521_v40, %v10520_v9  ;;  %v10537_v19 = vld [vmem:[%s22850_s4 + $0x578] sm:$0xff]  ;;  %v10571_v52 = vld [vmem:[%s22850_s4 + $0x688] sm:$0xff] }
 0x26e   :  { %23245 = vst [vmem:[#allocation63_spill] sm:$0xff] %v18029_v45  ;;  %23246 = vst [vmem:[#allocation64_spill] sm:$0xff] %v18051_v24  ;;  %v10602_v9 = vld [vmem:[%s22850_s4 + $0x780] sm:$0xff]  ;;  %v10603_v40 = vld [vmem:[%s22850_s4 + $0x788] sm:$0xff] }
 0x26f   :  { %23247 = vst [vmem:[#allocation65_spill] sm:$0xff] %v18053_v61  ;;  %23248 = vst [vmem:[#allocation66_spill] sm:$0xff] %v18063_v3 }
 0x270   :  { %14882 = vmatpush3.bf16.msra.mxu0 %v18015_v35  ;;  %14914 = vmatpush3.bf16.msra.mxu1 %v18017_v55  ;;  %v18065_v35 = vpack.c.bf16 %v10553_v7, %v10552_v22  ;;  %v18087_v22 = vpack.c.bf16 %v10505_v43, %v10504_v46  ;;  %v18089_v7 = vpack.c.bf16 %v10537_v19, %v10536_v37  ;;  %v10586_v46 = vld [vmem:[%s22850_s4 + $0x700] sm:$0xff]  ;;  %v10587_v43 = vld [vmem:[%s22850_s4 + $0x708] sm:$0xff]  ;;  %v10572_v37 = vld [vmem:[%s22850_s4 + $0x690] sm:$0xff] }
 0x271   :  { %14884 = vmatprep.subr.bf16.mxu0 %v18027_v14  ;;  %14916 = vmatprep.subr.bf16.mxu1 %v18029_v45  ;;  %v18093_v45 = vpack.c.bf16 %v10571_v52, %v10570_v28  ;;  %v18095_v55 = vpack.c.bf16 %v10603_v40, %v10602_v9  ;;  %v10554_v14 = vld [vmem:[%s22850_s4 + $0x600] sm:$0xff]  ;;  %v10573_v19 = vld [vmem:[%s22850_s4 + $0x698] sm:$0xff]  ;;  %v10604_v28 = vld [vmem:[%s22850_s4 + $0x790] sm:$0xff]  ;;  %v18127_v40 = vpack.c.bf16 %v10587_v43, %v10586_v46 }
 0x272   :  { %23249 = vst [vmem:[#allocation67_spill] sm:$0xff] %v18065_v35  ;;  %23250 = vst [vmem:[#allocation68_spill] sm:$0xff] %v18087_v22  ;;  %v10605_v52 = vld [vmem:[%s22850_s4 + $0x798] sm:$0xff]  ;;  %v10575_v46 = vld [vmem:[%s22850_s4 + $0x6a8] sm:$0xff] }
 0x273   :  { %23251 = vst [vmem:[#allocation69_spill] sm:$0xff] %v18089_v7  ;;  %23252 = vst [vmem:[#allocation70_spill] sm:$0xff] %v18093_v45  ;;  %v10606_v43 = vld [vmem:[%s22850_s4 + $0x7a0] sm:$0xff] }
 0x274   :  { %14886 = vmatpush3.bf16.msra.mxu0 %v18051_v24  ;;  %14918 = vmatpush3.bf16.msra.mxu1 %v18053_v61  ;;  %23253 = vst [vmem:[#allocation71_spill] sm:$0xff] %v18095_v55  ;;  %v10555_v61 = vld [vmem:[%s22850_s4 + $0x608] sm:$0xff]  ;;  %23255 = vst [vmem:[#allocation73_spill] sm:$0xff] %v18127_v40  ;;  %v18135_v24 = vpack.c.bf16 %v10573_v19, %v10572_v37 }
 0x275   :  { %14888 = vmatprep.subr.bf16.mxu0 %v18063_v3  ;;  %14920 = vmatprep.subr.bf16.mxu1 %v18065_v35  ;;  %v18125_v9 = vpack.c.bf16 %v10555_v61, %v10554_v14  ;;  %v10556_v35 = vld [vmem:[%s22850_s4 + $0x610] sm:$0xff]  ;;  %v10557_v3 = vld [vmem:[%s22850_s4 + $0x618] sm:$0xff]  ;;  %v10574_v61 = vld [vmem:[%s22850_s4 + $0x6a0] sm:$0xff] }
 0x276   :  { %23256 = vst [vmem:[#allocation74_spill] sm:$0xff] %v18135_v24  ;;  %v10589_v14 = vld [vmem:[%s22850_s4 + $0x718] sm:$0xff]  ;;  %v10607_v37 = vld [vmem:[%s22850_s4 + $0x7a8] sm:$0xff]  ;;  %v18163_v19 = vpack.c.bf16 %v10557_v3, %v10556_v35  ;;  %v10590_v3 = vld [vmem:[%s22850_s4 + $0x720] sm:$0xff] }
 0x277   :  { %23254 = vst [vmem:[#allocation72_spill] sm:$0xff] %v18125_v9  ;;  %v10591_v35 = vld [vmem:[%s22850_s4 + $0x728] sm:$0xff] }
 0x278   :  { %14890 = vmatpush3.bf16.msra.mxu0 %v18087_v22  ;;  %14922 = vmatpush3.bf16.msra.mxu1 %v18089_v7  ;;  %v18137_v22 = vpack.c.bf16 %v10605_v52, %v10604_v28  ;;  %23258 = vst [vmem:[#allocation76_spill] sm:$0xff] %v18163_v19  ;;  %v10558_v52 = vld [vmem:[%s22850_s4 + $0x620] sm:$0xff]  ;;  %v10559_v7 = vld [vmem:[%s22850_s4 + $0x628] sm:$0xff] }
 0x279   :  { %14924 = vmatprep.subr.bf16.mxu0 %v18093_v45  ;;  %14956 = vmatprep.subr.bf16.mxu1 %v18095_v55  ;;  %v10588_v55 = vld [vmem:[%s22850_s4 + $0x710] sm:$0xff]  ;;  %v18175_v45 = vpack.c.bf16 %v10575_v46, %v10574_v61  ;;  %v10609_v46 = vld [vmem:[%s22850_s4 + $0x7b8] sm:$0xff] }
 0x27a   :  { %23257 = vst [vmem:[#allocation75_spill] sm:$0xff] %v18137_v22  ;;  %v18165_v28 = vpack.c.bf16 %v10589_v14, %v10588_v55  ;;  %v10576_v55 = vld [vmem:[%s22850_s4 + $0x6b0] sm:$0xff]  ;;  %v10577_v14 = vld [vmem:[%s22850_s4 + $0x6b8] sm:$0xff] }
 0x27b   :  { %945 = vmatmul.mubr.f32.vlgmr.msra.gmra.mrb[12].mxu0 %v17525_v15  ;;  %1053 = vmatmul.mubr.f32.vlgmr.msra.gmra.mrb[12].mxu1 %v17525_v15  ;;  %23260 = vst [vmem:[#allocation78_spill] sm:$0xff] %v18175_v45  ;;  %v10608_v61 = vld [vmem:[%s22850_s4 + $0x7b0] sm:$0xff] }
 0x27c   :  { %949 = vmatprep.mubr.f32.mxu0 %v17613_v33  ;;  %1057 = vmatprep.mubr.f32.mxu1 %v17613_v33  ;;  %23259 = vst [vmem:[#allocation77_spill] sm:$0xff] %v18165_v28 }
 0x27d   :  { %14926 = vmatpush3.bf16.msra.mxu0 %v18125_v9  ;;  %14958 = vmatpush3.bf16.msra.mxu1 %v18127_v40  ;;  %v18177_v9 = vpack.c.bf16 %v10607_v37, %v10606_v43  ;;  %v18203_v43 = vpack.c.bf16 %v10559_v7, %v10558_v52  ;;  %v18205_v37 = vpack.c.bf16 %v10591_v35, %v10590_v3  ;;  %v10561_v40 = vld [vmem:[%s22850_s4 + $0x638] sm:$0xff]  ;;  %v10592_v7 = vld [vmem:[%s22850_s4 + $0x730] sm:$0xff]  ;;  %v10578_v3 = vld [vmem:[%s22850_s4 + $0x6c0] sm:$0xff] }
 0x27e   :  { %14928 = vmatprep.subr.bf16.mxu0 %v18135_v24  ;;  %14960 = vmatprep.subr.bf16.mxu1 %v18137_v22  ;;  %v10560_v22 = vld [vmem:[%s22850_s4 + $0x630] sm:$0xff]  ;;  %v18215_v24 = vpack.c.bf16 %v10577_v14, %v10576_v55  ;;  %v10593_v52 = vld [vmem:[%s22850_s4 + $0x738] sm:$0xff]  ;;  %v10579_v35 = vld [vmem:[%s22850_s4 + $0x6c8] sm:$0xff] }
 0x27f   :  { %23261 = vst [vmem:[#allocation79_spill] sm:$0xff] %v18177_v9  ;;  %950 = vmatmul.mubr.f32.gmra.mrb[14].mxu0 %v17611_v57  ;;  %1058 = vmatmul.mubr.f32.gmra.mrb[14].mxu1 %v17611_v57  ;;  %23262 = vst [vmem:[#allocation80_spill] sm:$0xff] %v18203_v43  ;;  %v10610_v55 = vld [vmem:[%s22850_s4 + $0x7c0] sm:$0xff]  ;;  %v10611_v14 = vld [vmem:[%s22850_s4 + $0x7c8] sm:$0xff] }
 0x280   :  { %1160 = vmatprep.mubr.f32.mxu0 %v17527_v21  ;;  %1268 = vmatprep.mubr.f32.mxu1 %v17527_v21  ;;  %23263 = vst [vmem:[#allocation81_spill] sm:$0xff] %v18205_v37  ;;  %23264 = vst [vmem:[#allocation82_spill] sm:$0xff] %v18215_v24 }
 0x281   :  { %14930 = vmatpush3.bf16.msra.mxu0 %v18163_v19  ;;  %14962 = vmatpush3.bf16.msra.mxu1 %v18165_v28  ;;  %v18217_v19 = vpack.c.bf16 %v10609_v46, %v10608_v61  ;;  %v18239_v61 = vpack.c.bf16 %v10561_v40, %v10560_v22  ;;  %v18241_v46 = vpack.c.bf16 %v10593_v52, %v10592_v7  ;;  %v10563_v28 = vld [vmem:[%s22850_s4 + $0x648] sm:$0xff]  ;;  %v10594_v22 = vld [vmem:[%s22850_s4 + $0x740] sm:$0xff]  ;;  %v10580_v7 = vld [vmem:[%s22850_s4 + $0x6d0] sm:$0xff] }
 0x282   :  { %14932 = vmatprep.subr.bf16.mxu0 %v18175_v45  ;;  %14964 = vmatprep.subr.bf16.mxu1 %v18177_v9  ;;  %v10562_v9 = vld [vmem:[%s22850_s4 + $0x640] sm:$0xff]  ;;  %v18251_v45 = vpack.c.bf16 %v10579_v35, %v10578_v3  ;;  %v10595_v40 = vld [vmem:[%s22850_s4 + $0x748] sm:$0xff]  ;;  %v10581_v52 = vld [vmem:[%s22850_s4 + $0x6d8] sm:$0xff] }
 0x283   :  { %23265 = vst [vmem:[#allocation83_spill] sm:$0xff] %v18217_v19  ;;  %23266 = vst [vmem:[#allocation84_spill] sm:$0xff] %v18239_v61  ;;  %v10612_v3 = vld [vmem:[%s22850_s4 + $0x7d0] sm:$0xff]  ;;  %v10613_v35 = vld [vmem:[%s22850_s4 + $0x7d8] sm:$0xff] }
 0x284   :  { %23267 = vst [vmem:[#allocation85_spill] sm:$0xff] %v18241_v46  ;;  %23268 = vst [vmem:[#allocation86_spill] sm:$0xff] %v18251_v45 }
 0x285   :  { %14934 = vmatpush3.bf16.msra.mxu0 %v18203_v43  ;;  %14966 = vmatpush3.bf16.msra.mxu1 %v18205_v37  ;;  %v18253_v43 = vpack.c.bf16 %v10611_v14, %v10610_v55  ;;  %v18275_v55 = vpack.c.bf16 %v10563_v28, %v10562_v9  ;;  %v18277_v14 = vpack.c.bf16 %v10595_v40, %v10594_v22  ;;  %v10565_v37 = vld [vmem:[%s22850_s4 + $0x658] sm:$0xff]  ;;  %v10596_v9 = vld [vmem:[%s22850_s4 + $0x750] sm:$0xff]  ;;  %v10582_v22 = vld [vmem:[%s22850_s4 + $0x6e0] sm:$0xff] }
 0x286   :  { %14936 = vmatprep.subr.bf16.mxu0 %v18215_v24  ;;  %14968 = vmatprep.subr.bf16.mxu1 %v18217_v19  ;;  %v10564_v19 = vld [vmem:[%s22850_s4 + $0x650] sm:$0xff]  ;;  %v18287_v24 = vpack.c.bf16 %v10581_v52, %v10580_v7  ;;  %v10597_v28 = vld [vmem:[%s22850_s4 + $0x758] sm:$0xff]  ;;  %v10583_v40 = vld [vmem:[%s22850_s4 + $0x6e8] sm:$0xff] }
 0x287   :  { %23269 = vst [vmem:[#allocation87_spill] sm:$0xff] %v18253_v43  ;;  %23270 = vst [vmem:[#allocation88_spill] sm:$0xff] %v18275_v55  ;;  %v10614_v7 = vld [vmem:[%s22850_s4 + $0x7e0] sm:$0xff]  ;;  %v10615_v52 = vld [vmem:[%s22850_s4 + $0x7e8] sm:$0xff] }
 0x288   :  { %23271 = vst [vmem:[#allocation89_spill] sm:$0xff] %v18277_v14  ;;  %23272 = vst [vmem:[#allocation90_spill] sm:$0xff] %v18287_v24 }
 0x289   :  { %14938 = vmatpush3.bf16.msra.mxu0 %v18239_v61  ;;  %14970 = vmatpush3.bf16.msra.mxu1 %v18241_v46  ;;  %v18289_v61 = vpack.c.bf16 %v10613_v35, %v10612_v3  ;;  %v18311_v3 = vpack.c.bf16 %v10565_v37, %v10564_v19  ;;  %v18313_v35 = vpack.c.bf16 %v10597_v28, %v10596_v9  ;;  %v10567_v46 = vld [vmem:[%s22850_s4 + $0x668] sm:$0xff]  ;;  %v10598_v19 = vld [vmem:[%s22850_s4 + $0x760] sm:$0xff]  ;;  %v10584_v9 = vld [vmem:[%s22850_s4 + $0x6f0] sm:$0xff] }
 0x28a   :  { %14940 = vmatprep.subr.bf16.mxu0 %v18251_v45  ;;  %14972 = vmatprep.subr.bf16.mxu1 %v18253_v43  ;;  %v10566_v43 = vld [vmem:[%s22850_s4 + $0x660] sm:$0xff]  ;;  %v18323_v45 = vpack.c.bf16 %v10583_v40, %v10582_v22  ;;  %v10599_v37 = vld [vmem:[%s22850_s4 + $0x768] sm:$0xff]  ;;  %v10585_v28 = vld [vmem:[%s22850_s4 + $0x6f8] sm:$0xff] }
 0x28b   :  { %23273 = vst [vmem:[#allocation91_spill] sm:$0xff] %v18289_v61  ;;  %23274 = vst [vmem:[#allocation92_spill] sm:$0xff] %v18311_v3  ;;  %v10616_v22 = vld [vmem:[%s22850_s4 + $0x7f0] sm:$0xff]  ;;  %v10617_v40 = vld [vmem:[%s22850_s4 + $0x7f8] sm:$0xff] }
 0x28c   :  { %23275 = vst [vmem:[#allocation93_spill] sm:$0xff] %v18313_v35  ;;  %23276 = vst [vmem:[#allocation94_spill] sm:$0xff] %v18323_v45 }
 0x28d   :  { %14942 = vmatpush3.bf16.msra.mxu0 %v18275_v55  ;;  %14974 = vmatpush3.bf16.msra.mxu1 %v18277_v14  ;;  %v18325_v55 = vpack.c.bf16 %v10615_v52, %v10614_v7  ;;  %v18347_v7 = vpack.c.bf16 %v10567_v46, %v10566_v43  ;;  %v18349_v52 = vpack.c.bf16 %v10599_v37, %v10598_v19  ;;  %v10569_v14 = vld [vmem:[%s22850_s4 + $0x678] sm:$0xff]  ;;  %v10600_v43 = vld [vmem:[%s22850_s4 + $0x770] sm:$0xff]  ;;  %v10634_v19 = vld [vmem:[%s22850_s4 + $0x880] sm:$0xff] }
 0x28e   :  { %14944 = vmatprep.subr.bf16.mxu0 %v18287_v24  ;;  %14976 = vmatprep.subr.bf16.mxu1 %v18289_v61  ;;  %v10568_v61 = vld [vmem:[%s22850_s4 + $0x670] sm:$0xff]  ;;  %v18359_v24 = vpack.c.bf16 %v10585_v28, %v10584_v9  ;;  %v10601_v46 = vld [vmem:[%s22850_s4 + $0x778] sm:$0xff]  ;;  %v10635_v37 = vld [vmem:[%s22850_s4 + $0x888] sm:$0xff] }
 0x28f   :  { %23277 = vst [vmem:[#allocation95_spill] sm:$0xff] %v18325_v55  ;;  %23278 = vst [vmem:[#allocation96_spill] sm:$0xff] %v18347_v7  ;;  %v10666_v9 = vld [vmem:[%s22850_s4 + $0x980] sm:$0xff]  ;;  %v10667_v28 = vld [vmem:[%s22850_s4 + $0x988] sm:$0xff] }
 0x290   :  { %23279 = vst [vmem:[#allocation97_spill] sm:$0xff] %v18349_v52  ;;  %23280 = vst [vmem:[#allocation98_spill] sm:$0xff] %v18359_v24 }
 0x291   :  { %14946 = vmatpush3.bf16.msra.mxu0 %v18311_v3  ;;  %14978 = vmatpush3.bf16.msra.mxu1 %v18313_v35  ;;  %v18361_v3 = vpack.c.bf16 %v10617_v40, %v10616_v22  ;;  %v18383_v22 = vpack.c.bf16 %v10569_v14, %v10568_v61  ;;  %v18385_v40 = vpack.c.bf16 %v10601_v46, %v10600_v43  ;;  %v10650_v61 = vld [vmem:[%s22850_s4 + $0x900] sm:$0xff]  ;;  %v10651_v14 = vld [vmem:[%s22850_s4 + $0x908] sm:$0xff]  ;;  %v10636_v43 = vld [vmem:[%s22850_s4 + $0x890] sm:$0xff] }
 0x292   :  { %14948 = vmatprep.subr.bf16.mxu0 %v18323_v45  ;;  %14980 = vmatprep.subr.bf16.mxu1 %v18325_v55  ;;  %v18389_v55 = vpack.c.bf16 %v10635_v37, %v10634_v19  ;;  %v18391_v35 = vpack.c.bf16 %v10667_v28, %v10666_v9  ;;  %v10618_v45 = vld [vmem:[%s22850_s4 + $0x800] sm:$0xff]  ;;  %v10637_v46 = vld [vmem:[%s22850_s4 + $0x898] sm:$0xff]  ;;  %v10668_v19 = vld [vmem:[%s22850_s4 + $0x990] sm:$0xff]  ;;  %v18423_v28 = vpack.c.bf16 %v10651_v14, %v10650_v61 }
 0x293   :  { %23281 = vst [vmem:[#allocation99_spill] sm:$0xff] %v18361_v3  ;;  %23282 = vst [vmem:[#allocation100_spill] sm:$0xff] %v18383_v22  ;;  %v10669_v37 = vld [vmem:[%s22850_s4 + $0x998] sm:$0xff]  ;;  %v10639_v61 = vld [vmem:[%s22850_s4 + $0x8a8] sm:$0xff] }
 0x294   :  { %23283 = vst [vmem:[#allocation101_spill] sm:$0xff] %v18385_v40  ;;  %23284 = vst [vmem:[#allocation102_spill] sm:$0xff] %v18389_v55  ;;  %v10670_v14 = vld [vmem:[%s22850_s4 + $0x9a0] sm:$0xff] }
 0x295   :  { %14950 = vmatpush3.bf16.msra.mxu0 %v18347_v7  ;;  %14982 = vmatpush3.bf16.msra.mxu1 %v18349_v52  ;;  %23285 = vst [vmem:[#allocation103_spill] sm:$0xff] %v18391_v35  ;;  %v10619_v52 = vld [vmem:[%s22850_s4 + $0x808] sm:$0xff]  ;;  %23287 = vst [vmem:[#allocation105_spill] sm:$0xff] %v18423_v28  ;;  %v18431_v7 = vpack.c.bf16 %v10637_v46, %v10636_v43 }
 0x296   :  { %14952 = vmatprep.subr.bf16.mxu0 %v18359_v24  ;;  %14984 = vmatprep.subr.bf16.mxu1 %v18361_v3  ;;  %v18421_v9 = vpack.c.bf16 %v10619_v52, %v10618_v45  ;;  %v10620_v3 = vld [vmem:[%s22850_s4 + $0x810] sm:$0xff]  ;;  %v10621_v24 = vld [vmem:[%s22850_s4 + $0x818] sm:$0xff]  ;;  %v10638_v52 = vld [vmem:[%s22850_s4 + $0x8a0] sm:$0xff] }
 0x297   :  { %23288 = vst [vmem:[#allocation106_spill] sm:$0xff] %v18431_v7  ;;  %v10653_v45 = vld [vmem:[%s22850_s4 + $0x918] sm:$0xff]  ;;  %v10671_v43 = vld [vmem:[%s22850_s4 + $0x9a8] sm:$0xff]  ;;  %v18459_v46 = vpack.c.bf16 %v10621_v24, %v10620_v3  ;;  %v10654_v24 = vld [vmem:[%s22850_s4 + $0x920] sm:$0xff] }
 0x298   :  { %23286 = vst [vmem:[#allocation104_spill] sm:$0xff] %v18421_v9  ;;  %v10655_v3 = vld [vmem:[%s22850_s4 + $0x928] sm:$0xff] }
 0x299   :  { %14954 = vmatpush3.bf16.msra.mxu0 %v18383_v22  ;;  %14986 = vmatpush3.bf16.msra.mxu1 %v18385_v40  ;;  %v18433_v22 = vpack.c.bf16 %v10669_v37, %v10668_v19  ;;  %23290 = vst [vmem:[#allocation108_spill] sm:$0xff] %v18459_v46  ;;  %v10622_v37 = vld [vmem:[%s22850_s4 + $0x820] sm:$0xff]  ;;  %v10623_v40 = vld [vmem:[%s22850_s4 + $0x828] sm:$0xff] }
 0x29a   :  { %14988 = vmatprep.subr.bf16.mxu0 %v18389_v55  ;;  %15020 = vmatprep.subr.bf16.mxu1 %v18391_v35  ;;  %v10652_v35 = vld [vmem:[%s22850_s4 + $0x910] sm:$0xff]  ;;  %v18471_v55 = vpack.c.bf16 %v10639_v61, %v10638_v52  ;;  %v10673_v61 = vld [vmem:[%s22850_s4 + $0x9b8] sm:$0xff] }
 0x29b   :  { %23289 = vst [vmem:[#allocation107_spill] sm:$0xff] %v18433_v22  ;;  %v18461_v19 = vpack.c.bf16 %v10653_v45, %v10652_v35  ;;  %v10640_v35 = vld [vmem:[%s22850_s4 + $0x8b0] sm:$0xff]  ;;  %v10641_v45 = vld [vmem:[%s22850_s4 + $0x8b8] sm:$0xff] }
 0x29c   :  { %1161 = vmatmul.mubr.f32.vlgmr.msra.gmra.mrb[16].mxu0 %v17525_v15  ;;  %1269 = vmatmul.mubr.f32.vlgmr.msra.gmra.mrb[16].mxu1 %v17525_v15  ;;  %23292 = vst [vmem:[#allocation110_spill] sm:$0xff] %v18471_v55  ;;  %v10672_v52 = vld [vmem:[%s22850_s4 + $0x9b0] sm:$0xff] }
 0x29d   :  { %1165 = vmatprep.mubr.f32.mxu0 %v17613_v33  ;;  %1273 = vmatprep.mubr.f32.mxu1 %v17613_v33  ;;  %23291 = vst [vmem:[#allocation109_spill] sm:$0xff] %v18461_v19 }
 0x29e   :  { %14990 = vmatpush3.bf16.msra.mxu0 %v18421_v9  ;;  %15022 = vmatpush3.bf16.msra.mxu1 %v18423_v28  ;;  %v18473_v9 = vpack.c.bf16 %v10671_v43, %v10670_v14  ;;  %v18499_v14 = vpack.c.bf16 %v10623_v40, %v10622_v37  ;;  %v18501_v43 = vpack.c.bf16 %v10655_v3, %v10654_v24  ;;  %v10625_v28 = vld [vmem:[%s22850_s4 + $0x838] sm:$0xff]  ;;  %v10656_v40 = vld [vmem:[%s22850_s4 + $0x930] sm:$0xff]  ;;  %v10642_v24 = vld [vmem:[%s22850_s4 + $0x8c0] sm:$0xff] }
 0x29f   :  { %14992 = vmatprep.subr.bf16.mxu0 %v18431_v7  ;;  %15024 = vmatprep.subr.bf16.mxu1 %v18433_v22  ;;  %v10624_v22 = vld [vmem:[%s22850_s4 + $0x830] sm:$0xff]  ;;  %v18511_v7 = vpack.c.bf16 %v10641_v45, %v10640_v35  ;;  %v10657_v37 = vld [vmem:[%s22850_s4 + $0x938] sm:$0xff]  ;;  %v10643_v3 = vld [vmem:[%s22850_s4 + $0x8c8] sm:$0xff] }
 0x2a0   :  { %23293 = vst [vmem:[#allocation111_spill] sm:$0xff] %v18473_v9  ;;  %1166 = vmatmul.mubr.f32.gmra.mrb[18].mxu0 %v17611_v57  ;;  %1274 = vmatmul.mubr.f32.gmra.mrb[18].mxu1 %v17611_v57  ;;  %23294 = vst [vmem:[#allocation112_spill] sm:$0xff] %v18499_v14  ;;  %v10674_v35 = vld [vmem:[%s22850_s4 + $0x9c0] sm:$0xff]  ;;  %v10675_v45 = vld [vmem:[%s22850_s4 + $0x9c8] sm:$0xff] }
 0x2a1   :  { %1376 = vmatprep.mubr.f32.mxu0 %v17527_v21  ;;  %1484 = vmatprep.mubr.f32.mxu1 %v17527_v21  ;;  %23295 = vst [vmem:[#allocation113_spill] sm:$0xff] %v18501_v43  ;;  %23296 = vst [vmem:[#allocation114_spill] sm:$0xff] %v18511_v7 }
 0x2a2   :  { %14994 = vmatpush3.bf16.msra.mxu0 %v18459_v46  ;;  %15026 = vmatpush3.bf16.msra.mxu1 %v18461_v19  ;;  %v18513_v46 = vpack.c.bf16 %v10673_v61, %v10672_v52  ;;  %v18535_v52 = vpack.c.bf16 %v10625_v28, %v10624_v22  ;;  %v18537_v61 = vpack.c.bf16 %v10657_v37, %v10656_v40  ;;  %v10627_v19 = vld [vmem:[%s22850_s4 + $0x848] sm:$0xff]  ;;  %v10658_v22 = vld [vmem:[%s22850_s4 + $0x940] sm:$0xff]  ;;  %v10644_v40 = vld [vmem:[%s22850_s4 + $0x8d0] sm:$0xff] }
 0x2a3   :  { %14996 = vmatprep.subr.bf16.mxu0 %v18471_v55  ;;  %15028 = vmatprep.subr.bf16.mxu1 %v18473_v9  ;;  %v10626_v9 = vld [vmem:[%s22850_s4 + $0x840] sm:$0xff]  ;;  %v18547_v55 = vpack.c.bf16 %v10643_v3, %v10642_v24  ;;  %v10659_v28 = vld [vmem:[%s22850_s4 + $0x948] sm:$0xff]  ;;  %v10645_v37 = vld [vmem:[%s22850_s4 + $0x8d8] sm:$0xff] }
 0x2a4   :  { %23297 = vst [vmem:[#allocation115_spill] sm:$0xff] %v18513_v46  ;;  %23298 = vst [vmem:[#allocation116_spill] sm:$0xff] %v18535_v52  ;;  %v10676_v24 = vld [vmem:[%s22850_s4 + $0x9d0] sm:$0xff]  ;;  %v10677_v3 = vld [vmem:[%s22850_s4 + $0x9d8] sm:$0xff] }
 0x2a5   :  { %23299 = vst [vmem:[#allocation117_spill] sm:$0xff] %v18537_v61  ;;  %23300 = vst [vmem:[#allocation118_spill] sm:$0xff] %v18547_v55 }
 0x2a6   :  { %14998 = vmatpush3.bf16.msra.mxu0 %v18499_v14  ;;  %15030 = vmatpush3.bf16.msra.mxu1 %v18501_v43  ;;  %v18549_v14 = vpack.c.bf16 %v10675_v45, %v10674_v35  ;;  %v18571_v35 = vpack.c.bf16 %v10627_v19, %v10626_v9  ;;  %v18573_v45 = vpack.c.bf16 %v10659_v28, %v10658_v22  ;;  %v10629_v43 = vld [vmem:[%s22850_s4 + $0x858] sm:$0xff]  ;;  %v10660_v9 = vld [vmem:[%s22850_s4 + $0x950] sm:$0xff]  ;;  %v10646_v22 = vld [vmem:[%s22850_s4 + $0x8e0] sm:$0xff] }
 0x2a7   :  { %15000 = vmatprep.subr.bf16.mxu0 %v18511_v7  ;;  %15032 = vmatprep.subr.bf16.mxu1 %v18513_v46  ;;  %v10628_v46 = vld [vmem:[%s22850_s4 + $0x850] sm:$0xff]  ;;  %v18583_v7 = vpack.c.bf16 %v10645_v37, %v10644_v40  ;;  %v10661_v19 = vld [vmem:[%s22850_s4 + $0x958] sm:$0xff]  ;;  %v10647_v28 = vld [vmem:[%s22850_s4 + $0x8e8] sm:$0xff] }
 0x2a8   :  { %23301 = vst [vmem:[#allocation119_spill] sm:$0xff] %v18549_v14  ;;  %23302 = vst [vmem:[#allocation120_spill] sm:$0xff] %v18571_v35  ;;  %v10678_v40 = vld [vmem:[%s22850_s4 + $0x9e0] sm:$0xff]  ;;  %v10679_v37 = vld [vmem:[%s22850_s4 + $0x9e8] sm:$0xff] }
 0x2a9   :  { %23303 = vst [vmem:[#allocation121_spill] sm:$0xff] %v18573_v45  ;;  %23304 = vst [vmem:[#allocation122_spill] sm:$0xff] %v18583_v7 }
 0x2aa   :  { %15002 = vmatpush3.bf16.msra.mxu0 %v18535_v52  ;;  %15034 = vmatpush3.bf16.msra.mxu1 %v18537_v61  ;;  %v18585_v52 = vpack.c.bf16 %v10677_v3, %v10676_v24  ;;  %v18607_v24 = vpack.c.bf16 %v10629_v43, %v10628_v46  ;;  %v18609_v3 = vpack.c.bf16 %v10661_v19, %v10660_v9  ;;  %v10631_v61 = vld [vmem:[%s22850_s4 + $0x868] sm:$0xff]  ;;  %v10662_v46 = vld [vmem:[%s22850_s4 + $0x960] sm:$0xff]  ;;  %v10648_v9 = vld [vmem:[%s22850_s4 + $0x8f0] sm:$0xff] }
 0x2ab   :  { %15004 = vmatprep.subr.bf16.mxu0 %v18547_v55  ;;  %15036 = vmatprep.subr.bf16.mxu1 %v18549_v14  ;;  %v10630_v14 = vld [vmem:[%s22850_s4 + $0x860] sm:$0xff]  ;;  %v18619_v55 = vpack.c.bf16 %v10647_v28, %v10646_v22  ;;  %v10663_v43 = vld [vmem:[%s22850_s4 + $0x968] sm:$0xff]  ;;  %v10649_v19 = vld [vmem:[%s22850_s4 + $0x8f8] sm:$0xff] }
 0x2ac   :  { %23305 = vst [vmem:[#allocation123_spill] sm:$0xff] %v18585_v52  ;;  %23306 = vst [vmem:[#allocation124_spill] sm:$0xff] %v18607_v24  ;;  %v10680_v22 = vld [vmem:[%s22850_s4 + $0x9f0] sm:$0xff]  ;;  %v10681_v28 = vld [vmem:[%s22850_s4 + $0x9f8] sm:$0xff] }
 0x2ad   :  { %23307 = vst [vmem:[#allocation125_spill] sm:$0xff] %v18609_v3  ;;  %23308 = vst [vmem:[#allocation126_spill] sm:$0xff] %v18619_v55 }
 0x2ae   :  { %15006 = vmatpush3.bf16.msra.mxu0 %v18571_v35  ;;  %15038 = vmatpush3.bf16.msra.mxu1 %v18573_v45  ;;  %v18621_v35 = vpack.c.bf16 %v10679_v37, %v10678_v40  ;;  %v18643_v40 = vpack.c.bf16 %v10631_v61, %v10630_v14  ;;  %v18645_v37 = vpack.c.bf16 %v10663_v43, %v10662_v46  ;;  %v10633_v45 = vld [vmem:[%s22850_s4 + $0x878] sm:$0xff]  ;;  %v10664_v14 = vld [vmem:[%s22850_s4 + $0x970] sm:$0xff]  ;;  %v10698_v46 = vld [vmem:[%s22850_s4 + $0xa80] sm:$0xff] }
 0x2af   :  { %15008 = vmatprep.subr.bf16.mxu0 %v18583_v7  ;;  %15040 = vmatprep.subr.bf16.mxu1 %v18585_v52  ;;  %v10632_v52 = vld [vmem:[%s22850_s4 + $0x870] sm:$0xff]  ;;  %v18655_v7 = vpack.c.bf16 %v10649_v19, %v10648_v9  ;;  %v10665_v61 = vld [vmem:[%s22850_s4 + $0x978] sm:$0xff]  ;;  %v10699_v43 = vld [vmem:[%s22850_s4 + $0xa88] sm:$0xff] }
 0x2b0   :  { %23309 = vst [vmem:[#allocation127_spill] sm:$0xff] %v18621_v35  ;;  %23310 = vst [vmem:[#allocation128_spill] sm:$0xff] %v18643_v40  ;;  %v10730_v9 = vld [vmem:[%s22850_s4 + $0xb80] sm:$0xff]  ;;  %v10731_v19 = vld [vmem:[%s22850_s4 + $0xb88] sm:$0xff] }
 0x2b1   :  { %23311 = vst [vmem:[#allocation129_spill] sm:$0xff] %v18645_v37  ;;  %23312 = vst [vmem:[#allocation130_spill] sm:$0xff] %v18655_v7 }
 0x2b2   :  { %15010 = vmatpush3.bf16.msra.mxu0 %v18607_v24  ;;  %15042 = vmatpush3.bf16.msra.mxu1 %v18609_v3  ;;  %v18657_v24 = vpack.c.bf16 %v10681_v28, %v10680_v22  ;;  %v18679_v22 = vpack.c.bf16 %v10633_v45, %v10632_v52  ;;  %v18681_v28 = vpack.c.bf16 %v10665_v61, %v10664_v14  ;;  %v10714_v52 = vld [vmem:[%s22850_s4 + $0xb00] sm:$0xff]  ;;  %v10715_v45 = vld [vmem:[%s22850_s4 + $0xb08] sm:$0xff]  ;;  %v10700_v14 = vld [vmem:[%s22850_s4 + $0xa90] sm:$0xff] }
 0x2b3   :  { %15012 = vmatprep.subr.bf16.mxu0 %v18619_v55  ;;  %15044 = vmatprep.subr.bf16.mxu1 %v18621_v35  ;;  %v18685_v35 = vpack.c.bf16 %v10699_v43, %v10698_v46  ;;  %v18687_v3 = vpack.c.bf16 %v10731_v19, %v10730_v9  ;;  %v10682_v55 = vld [vmem:[%s22850_s4 + $0xa00] sm:$0xff]  ;;  %v10701_v61 = vld [vmem:[%s22850_s4 + $0xa98] sm:$0xff]  ;;  %v10732_v46 = vld [vmem:[%s22850_s4 + $0xb90] sm:$0xff]  ;;  %v18719_v19 = vpack.c.bf16 %v10715_v45, %v10714_v52 }
 0x2b4   :  { %23313 = vst [vmem:[#allocation131_spill] sm:$0xff] %v18657_v24  ;;  %23314 = vst [vmem:[#allocation132_spill] sm:$0xff] %v18679_v22  ;;  %v10733_v43 = vld [vmem:[%s22850_s4 + $0xb98] sm:$0xff]  ;;  %v10703_v52 = vld [vmem:[%s22850_s4 + $0xaa8] sm:$0xff] }
 0x2b5   :  { %23315 = vst [vmem:[#allocation133_spill] sm:$0xff] %v18681_v28  ;;  %23316 = vst [vmem:[#allocation134_spill] sm:$0xff] %v18685_v35  ;;  %v10734_v45 = vld [vmem:[%s22850_s4 + $0xba0] sm:$0xff] }
 0x2b6   :  { %15014 = vmatpush3.bf16.msra.mxu0 %v18643_v40  ;;  %15046 = vmatpush3.bf16.msra.mxu1 %v18645_v37  ;;  %23317 = vst [vmem:[#allocation135_spill] sm:$0xff] %v18687_v3  ;;  %v10683_v37 = vld [vmem:[%s22850_s4 + $0xa08] sm:$0xff]  ;;  %23319 = vst [vmem:[#allocation137_spill] sm:$0xff] %v18719_v19  ;;  %v18727_v40 = vpack.c.bf16 %v10701_v61, %v10700_v14 }
 0x2b7   :  { %15016 = vmatprep.subr.bf16.mxu0 %v18655_v7  ;;  %15048 = vmatprep.subr.bf16.mxu1 %v18657_v24  ;;  %v18717_v9 = vpack.c.bf16 %v10683_v37, %v10682_v55  ;;  %v10684_v24 = vld [vmem:[%s22850_s4 + $0xa10] sm:$0xff]  ;;  %v10685_v7 = vld [vmem:[%s22850_s4 + $0xa18] sm:$0xff]  ;;  %v10702_v37 = vld [vmem:[%s22850_s4 + $0xaa0] sm:$0xff] }
 0x2b8   :  { %23320 = vst [vmem:[#allocation138_spill] sm:$0xff] %v18727_v40  ;;  %v10717_v55 = vld [vmem:[%s22850_s4 + $0xb18] sm:$0xff]  ;;  %v10735_v14 = vld [vmem:[%s22850_s4 + $0xba8] sm:$0xff]  ;;  %v18755_v61 = vpack.c.bf16 %v10685_v7, %v10684_v24  ;;  %v10718_v7 = vld [vmem:[%s22850_s4 + $0xb20] sm:$0xff] }
 0x2b9   :  { %23318 = vst [vmem:[#allocation136_spill] sm:$0xff] %v18717_v9  ;;  %v10719_v24 = vld [vmem:[%s22850_s4 + $0xb28] sm:$0xff] }
 0x2ba   :  { %15018 = vmatpush3.bf16.msra.mxu0 %v18679_v22  ;;  %15050 = vmatpush3.bf16.msra.mxu1 %v18681_v28  ;;  %v18729_v22 = vpack.c.bf16 %v10733_v43, %v10732_v46  ;;  %23322 = vst [vmem:[#allocation140_spill] sm:$0xff] %v18755_v61  ;;  %v10686_v43 = vld [vmem:[%s22850_s4 + $0xa20] sm:$0xff]  ;;  %v10687_v28 = vld [vmem:[%s22850_s4 + $0xa28] sm:$0xff] }
 0x2bb   :  { %15052 = vmatprep.subr.bf16.mxu0 %v18685_v35  ;;  %15084 = vmatprep.subr.bf16.mxu1 %v18687_v3  ;;  %v10716_v3 = vld [vmem:[%s22850_s4 + $0xb10] sm:$0xff]  ;;  %v18767_v35 = vpack.c.bf16 %v10703_v52, %v10702_v37  ;;  %v10737_v52 = vld [vmem:[%s22850_s4 + $0xbb8] sm:$0xff] }
 0x2bc   :  { %23321 = vst [vmem:[#allocation139_spill] sm:$0xff] %v18729_v22  ;;  %v18757_v46 = vpack.c.bf16 %v10717_v55, %v10716_v3  ;;  %v10704_v3 = vld [vmem:[%s22850_s4 + $0xab0] sm:$0xff]  ;;  %v10705_v55 = vld [vmem:[%s22850_s4 + $0xab8] sm:$0xff] }
 0x2bd   :  { %1377 = vmatmul.mubr.f32.vlgmr.msra.gmra.mrb[20].mxu0 %v17525_v15  ;;  %1485 = vmatmul.mubr.f32.vlgmr.msra.gmra.mrb[20].mxu1 %v17525_v15  ;;  %23324 = vst [vmem:[#allocation142_spill] sm:$0xff] %v18767_v35  ;;  %v10736_v37 = vld [vmem:[%s22850_s4 + $0xbb0] sm:$0xff] }
 0x2be   :  { %1381 = vmatprep.mubr.f32.mxu0 %v17613_v33  ;;  %1489 = vmatprep.mubr.f32.mxu1 %v17613_v33  ;;  %23323 = vst [vmem:[#allocation141_spill] sm:$0xff] %v18757_v46 }
 0x2bf   :  { %15054 = vmatpush3.bf16.msra.mxu0 %v18717_v9  ;;  %15086 = vmatpush3.bf16.msra.mxu1 %v18719_v19  ;;  %v18769_v9 = vpack.c.bf16 %v10735_v14, %v10734_v45  ;;  %v18795_v45 = vpack.c.bf16 %v10687_v28, %v10686_v43  ;;  %v18797_v14 = vpack.c.bf16 %v10719_v24, %v10718_v7  ;;  %v10689_v19 = vld [vmem:[%s22850_s4 + $0xa38] sm:$0xff]  ;;  %v10720_v28 = vld [vmem:[%s22850_s4 + $0xb30] sm:$0xff]  ;;  %v10706_v7 = vld [vmem:[%s22850_s4 + $0xac0] sm:$0xff] }
 0x2c0   :  { %15056 = vmatprep.subr.bf16.mxu0 %v18727_v40  ;;  %15088 = vmatprep.subr.bf16.mxu1 %v18729_v22  ;;  %v10688_v22 = vld [vmem:[%s22850_s4 + $0xa30] sm:$0xff]  ;;  %v18807_v40 = vpack.c.bf16 %v10705_v55, %v10704_v3  ;;  %v10721_v43 = vld [vmem:[%s22850_s4 + $0xb38] sm:$0xff]  ;;  %v10707_v24 = vld [vmem:[%s22850_s4 + $0xac8] sm:$0xff] }
 0x2c1   :  { %23325 = vst [vmem:[#allocation143_spill] sm:$0xff] %v18769_v9  ;;  %1382 = vmatmul.mubr.f32.gmra.mrb[22].mxu0 %v17611_v57  ;;  %1490 = vmatmul.mubr.f32.gmra.mrb[22].mxu1 %v17611_v57  ;;  %23326 = vst [vmem:[#allocation144_spill] sm:$0xff] %v18795_v45  ;;  %v10738_v3 = vld [vmem:[%s22850_s4 + $0xbc0] sm:$0xff]  ;;  %v10739_v55 = vld [vmem:[%s22850_s4 + $0xbc8] sm:$0xff] }
 0x2c2   :  { %1592 = vmatprep.mubr.f32.mxu0 %v17527_v21  ;;  %1700 = vmatprep.mubr.f32.mxu1 %v17527_v21  ;;  %23327 = vst [vmem:[#allocation145_spill] sm:$0xff] %v18797_v14  ;;  %23328 = vst [vmem:[#allocation146_spill] sm:$0xff] %v18807_v40 }
 0x2c3   :  { %15058 = vmatpush3.bf16.msra.mxu0 %v18755_v61  ;;  %15090 = vmatpush3.bf16.msra.mxu1 %v18757_v46  ;;  %v18809_v61 = vpack.c.bf16 %v10737_v52, %v10736_v37  ;;  %v18831_v37 = vpack.c.bf16 %v10689_v19, %v10688_v22  ;;  %v18833_v52 = vpack.c.bf16 %v10721_v43, %v10720_v28  ;;  %v10691_v46 = vld [vmem:[%s22850_s4 + $0xa48] sm:$0xff]  ;;  %v10722_v22 = vld [vmem:[%s22850_s4 + $0xb40] sm:$0xff]  ;;  %v10708_v28 = vld [vmem:[%s22850_s4 + $0xad0] sm:$0xff] }
 0x2c4   :  { %15060 = vmatprep.subr.bf16.mxu0 %v18767_v35  ;;  %15092 = vmatprep.subr.bf16.mxu1 %v18769_v9  ;;  %v10690_v9 = vld [vmem:[%s22850_s4 + $0xa40] sm:$0xff]  ;;  %v18843_v35 = vpack.c.bf16 %v10707_v24, %v10706_v7  ;;  %v10723_v19 = vld [vmem:[%s22850_s4 + $0xb48] sm:$0xff]  ;;  %v10709_v43 = vld [vmem:[%s22850_s4 + $0xad8] sm:$0xff] }
 0x2c5   :  { %23329 = vst [vmem:[#allocation147_spill] sm:$0xff] %v18809_v61  ;;  %23330 = vst [vmem:[#allocation148_spill] sm:$0xff] %v18831_v37  ;;  %v10740_v7 = vld [vmem:[%s22850_s4 + $0xbd0] sm:$0xff]  ;;  %v10741_v24 = vld [vmem:[%s22850_s4 + $0xbd8] sm:$0xff] }
 0x2c6   :  { %23331 = vst [vmem:[#allocation149_spill] sm:$0xff] %v18833_v52  ;;  %23332 = vst [vmem:[#allocation150_spill] sm:$0xff] %v18843_v35 }
 0x2c7   :  { %15062 = vmatpush3.bf16.msra.mxu0 %v18795_v45  ;;  %15094 = vmatpush3.bf16.msra.mxu1 %v18797_v14  ;;  %v18845_v45 = vpack.c.bf16 %v10739_v55, %v10738_v3  ;;  %v18867_v3 = vpack.c.bf16 %v10691_v46, %v10690_v9  ;;  %v18869_v55 = vpack.c.bf16 %v10723_v19, %v10722_v22  ;;  %v10693_v14 = vld [vmem:[%s22850_s4 + $0xa58] sm:$0xff]  ;;  %v10724_v9 = vld [vmem:[%s22850_s4 + $0xb50] sm:$0xff]  ;;  %v10710_v22 = vld [vmem:[%s22850_s4 + $0xae0] sm:$0xff] }
 0x2c8   :  { %15064 = vmatprep.subr.bf16.mxu0 %v18807_v40  ;;  %15096 = vmatprep.subr.bf16.mxu1 %v18809_v61  ;;  %v10692_v61 = vld [vmem:[%s22850_s4 + $0xa50] sm:$0xff]  ;;  %v18879_v40 = vpack.c.bf16 %v10709_v43, %v10708_v28  ;;  %v10725_v46 = vld [vmem:[%s22850_s4 + $0xb58] sm:$0xff]  ;;  %v10711_v19 = vld [vmem:[%s22850_s4 + $0xae8] sm:$0xff] }
 0x2c9   :  { %23333 = vst [vmem:[#allocation151_spill] sm:$0xff] %v18845_v45  ;;  %23334 = vst [vmem:[#allocation152_spill] sm:$0xff] %v18867_v3  ;;  %v10742_v28 = vld [vmem:[%s22850_s4 + $0xbe0] sm:$0xff]  ;;  %v10743_v43 = vld [vmem:[%s22850_s4 + $0xbe8] sm:$0xff] }
 0x2ca   :  { %23335 = vst [vmem:[#allocation153_spill] sm:$0xff] %v18869_v55  ;;  %23336 = vst [vmem:[#allocation154_spill] sm:$0xff] %v18879_v40 }
 0x2cb   :  { %15066 = vmatpush3.bf16.msra.mxu0 %v18831_v37  ;;  %15098 = vmatpush3.bf16.msra.mxu1 %v18833_v52  ;;  %v18881_v37 = vpack.c.bf16 %v10741_v24, %v10740_v7  ;;  %v18903_v7 = vpack.c.bf16 %v10693_v14, %v10692_v61  ;;  %v18905_v24 = vpack.c.bf16 %v10725_v46, %v10724_v9  ;;  %v10695_v52 = vld [vmem:[%s22850_s4 + $0xa68] sm:$0xff]  ;;  %v10726_v61 = vld [vmem:[%s22850_s4 + $0xb60] sm:$0xff]  ;;  %v10712_v9 = vld [vmem:[%s22850_s4 + $0xaf0] sm:$0xff] }
 0x2cc   :  { %15068 = vmatprep.subr.bf16.mxu0 %v18843_v35  ;;  %15100 = vmatprep.subr.bf16.mxu1 %v18845_v45  ;;  %v10694_v45 = vld [vmem:[%s22850_s4 + $0xa60] sm:$0xff]  ;;  %v18915_v35 = vpack.c.bf16 %v10711_v19, %v10710_v22  ;;  %v10727_v14 = vld [vmem:[%s22850_s4 + $0xb68] sm:$0xff]  ;;  %v10713_v46 = vld [vmem:[%s22850_s4 + $0xaf8] sm:$0xff] }
 0x2cd   :  { %23337 = vst [vmem:[#allocation155_spill] sm:$0xff] %v18881_v37  ;;  %23338 = vst [vmem:[#allocation156_spill] sm:$0xff] %v18903_v7  ;;  %v10744_v22 = vld [vmem:[%s22850_s4 + $0xbf0] sm:$0xff]  ;;  %v10745_v19 = vld [vmem:[%s22850_s4 + $0xbf8] sm:$0xff] }
 0x2ce   :  { %23339 = vst [vmem:[#allocation157_spill] sm:$0xff] %v18905_v24  ;;  %23340 = vst [vmem:[#allocation158_spill] sm:$0xff] %v18915_v35 }
 0x2cf   :  { %15070 = vmatpush3.bf16.msra.mxu0 %v18867_v3  ;;  %15102 = vmatpush3.bf16.msra.mxu1 %v18869_v55  ;;  %v18917_v3 = vpack.c.bf16 %v10743_v43, %v10742_v28  ;;  %v18939_v28 = vpack.c.bf16 %v10695_v52, %v10694_v45  ;;  %v18941_v43 = vpack.c.bf16 %v10727_v14, %v10726_v61  ;;  %v10697_v55 = vld [vmem:[%s22850_s4 + $0xa78] sm:$0xff]  ;;  %v10728_v45 = vld [vmem:[%s22850_s4 + $0xb70] sm:$0xff]  ;;  %v10762_v61 = vld [vmem:[%s22850_s4 + $0xc80] sm:$0xff] }
 0x2d0   :  { %15072 = vmatprep.subr.bf16.mxu0 %v18879_v40  ;;  %15104 = vmatprep.subr.bf16.mxu1 %v18881_v37  ;;  %v10696_v37 = vld [vmem:[%s22850_s4 + $0xa70] sm:$0xff]  ;;  %v18951_v40 = vpack.c.bf16 %v10713_v46, %v10712_v9  ;;  %v10729_v52 = vld [vmem:[%s22850_s4 + $0xb78] sm:$0xff]  ;;  %v10763_v14 = vld [vmem:[%s22850_s4 + $0xc88] sm:$0xff] }
 0x2d1   :  { %23341 = vst [vmem:[#allocation159_spill] sm:$0xff] %v18917_v3  ;;  %23342 = vst [vmem:[#allocation160_spill] sm:$0xff] %v18939_v28  ;;  %v10794_v9 = vld [vmem:[%s22850_s4 + $0xd80] sm:$0xff]  ;;  %v10795_v46 = vld [vmem:[%s22850_s4 + $0xd88] sm:$0xff] }
 0x2d2   :  { %23343 = vst [vmem:[#allocation161_spill] sm:$0xff] %v18941_v43  ;;  %23344 = vst [vmem:[#allocation162_spill] sm:$0xff] %v18951_v40 }
 0x2d3   :  { %15074 = vmatpush3.bf16.msra.mxu0 %v18903_v7  ;;  %15106 = vmatpush3.bf16.msra.mxu1 %v18905_v24  ;;  %v18953_v7 = vpack.c.bf16 %v10745_v19, %v10744_v22  ;;  %v18975_v22 = vpack.c.bf16 %v10697_v55, %v10696_v37  ;;  %v18977_v19 = vpack.c.bf16 %v10729_v52, %v10728_v45  ;;  %v10778_v37 = vld [vmem:[%s22850_s4 + $0xd00] sm:$0xff]  ;;  %v10779_v55 = vld [vmem:[%s22850_s4 + $0xd08] sm:$0xff]  ;;  %v10764_v45 = vld [vmem:[%s22850_s4 + $0xc90] sm:$0xff] }
 0x2d4   :  { %15076 = vmatprep.subr.bf16.mxu0 %v18915_v35  ;;  %15108 = vmatprep.subr.bf16.mxu1 %v18917_v3  ;;  %v18981_v3 = vpack.c.bf16 %v10763_v14, %v10762_v61  ;;  %v18983_v24 = vpack.c.bf16 %v10795_v46, %v10794_v9  ;;  %v10746_v35 = vld [vmem:[%s22850_s4 + $0xc00] sm:$0xff]  ;;  %v10765_v52 = vld [vmem:[%s22850_s4 + $0xc98] sm:$0xff]  ;;  %v10796_v61 = vld [vmem:[%s22850_s4 + $0xd90] sm:$0xff]  ;;  %v19015_v46 = vpack.c.bf16 %v10779_v55, %v10778_v37 }
 0x2d5   :  { %23345 = vst [vmem:[#allocation163_spill] sm:$0xff] %v18953_v7  ;;  %23346 = vst [vmem:[#allocation164_spill] sm:$0xff] %v18975_v22  ;;  %v10797_v14 = vld [vmem:[%s22850_s4 + $0xd98] sm:$0xff]  ;;  %v10767_v37 = vld [vmem:[%s22850_s4 + $0xca8] sm:$0xff] }
 0x2d6   :  { %23347 = vst [vmem:[#allocation165_spill] sm:$0xff] %v18977_v19  ;;  %23348 = vst [vmem:[#allocation166_spill] sm:$0xff] %v18981_v3  ;;  %v10798_v55 = vld [vmem:[%s22850_s4 + $0xda0] sm:$0xff] }
 0x2d7   :  { %15078 = vmatpush3.bf16.msra.mxu0 %v18939_v28  ;;  %15110 = vmatpush3.bf16.msra.mxu1 %v18941_v43  ;;  %23349 = vst [vmem:[#allocation167_spill] sm:$0xff] %v18983_v24  ;;  %v10747_v43 = vld [vmem:[%s22850_s4 + $0xc08] sm:$0xff]  ;;  %23351 = vst [vmem:[#allocation169_spill] sm:$0xff] %v19015_v46  ;;  %v19023_v28 = vpack.c.bf16 %v10765_v52, %v10764_v45 }
 0x2d8   :  { %15080 = vmatprep.subr.bf16.mxu0 %v18951_v40  ;;  %15112 = vmatprep.subr.bf16.mxu1 %v18953_v7  ;;  %v19013_v9 = vpack.c.bf16 %v10747_v43, %v10746_v35  ;;  %v10748_v7 = vld [vmem:[%s22850_s4 + $0xc10] sm:$0xff]  ;;  %v10749_v40 = vld [vmem:[%s22850_s4 + $0xc18] sm:$0xff]  ;;  %v10766_v43 = vld [vmem:[%s22850_s4 + $0xca0] sm:$0xff] }
 0x2d9   :  { %23352 = vst [vmem:[#allocation170_spill] sm:$0xff] %v19023_v28  ;;  %v10781_v35 = vld [vmem:[%s22850_s4 + $0xd18] sm:$0xff]  ;;  %v10799_v45 = vld [vmem:[%s22850_s4 + $0xda8] sm:$0xff]  ;;  %v19051_v52 = vpack.c.bf16 %v10749_v40, %v10748_v7  ;;  %v10782_v40 = vld [vmem:[%s22850_s4 + $0xd20] sm:$0xff] }
 0x2da   :  { %23350 = vst [vmem:[#allocation168_spill] sm:$0xff] %v19013_v9  ;;  %v10783_v7 = vld [vmem:[%s22850_s4 + $0xd28] sm:$0xff] }
 0x2db   :  { %15082 = vmatpush3.bf16.msra.mxu0 %v18975_v22  ;;  %15114 = vmatpush3.bf16.msra.mxu1 %v18977_v19  ;;  %v19025_v22 = vpack.c.bf16 %v10797_v14, %v10796_v61  ;;  %23354 = vst [vmem:[#allocation172_spill] sm:$0xff] %v19051_v52  ;;  %v10750_v14 = vld [vmem:[%s22850_s4 + $0xc20] sm:$0xff]  ;;  %v10751_v19 = vld [vmem:[%s22850_s4 + $0xc28] sm:$0xff] }
 0x2dc   :  { %15116 = vmatprep.subr.bf16.mxu0 %v18981_v3  ;;  %15148 = vmatprep.subr.bf16.mxu1 %v18983_v24  ;;  %v10780_v24 = vld [vmem:[%s22850_s4 + $0xd10] sm:$0xff]  ;;  %v19063_v3 = vpack.c.bf16 %v10767_v37, %v10766_v43  ;;  %v10801_v37 = vld [vmem:[%s22850_s4 + $0xdb8] sm:$0xff] }
 0x2dd   :  { %23353 = vst [vmem:[#allocation171_spill] sm:$0xff] %v19025_v22  ;;  %v19053_v61 = vpack.c.bf16 %v10781_v35, %v10780_v24  ;;  %v10768_v24 = vld [vmem:[%s22850_s4 + $0xcb0] sm:$0xff]  ;;  %v10769_v35 = vld [vmem:[%s22850_s4 + $0xcb8] sm:$0xff] }
 0x2de   :  { %1593 = vmatmul.mubr.f32.vlgmr.msra.gmra.mrb[24].mxu0 %v17525_v15  ;;  %1701 = vmatmul.mubr.f32.vlgmr.msra.gmra.mrb[24].mxu1 %v17525_v15  ;;  %23356 = vst [vmem:[#allocation174_spill] sm:$0xff] %v19063_v3  ;;  %v10800_v43 = vld [vmem:[%s22850_s4 + $0xdb0] sm:$0xff] }
 0x2df   :  { %1597 = vmatprep.mubr.f32.mxu0 %v17613_v33  ;;  %1705 = vmatprep.mubr.f32.mxu1 %v17613_v33  ;;  %23355 = vst [vmem:[#allocation173_spill] sm:$0xff] %v19053_v61 }
 0x2e0   :  { %15118 = vmatpush3.bf16.msra.mxu0 %v19013_v9  ;;  %15150 = vmatpush3.bf16.msra.mxu1 %v19015_v46  ;;  %v19065_v9 = vpack.c.bf16 %v10799_v45, %v10798_v55  ;;  %v19091_v55 = vpack.c.bf16 %v10751_v19, %v10750_v14  ;;  %v19093_v45 = vpack.c.bf16 %v10783_v7, %v10782_v40  ;;  %v10753_v46 = vld [vmem:[%s22850_s4 + $0xc38] sm:$0xff]  ;;  %v10784_v19 = vld [vmem:[%s22850_s4 + $0xd30] sm:$0xff]  ;;  %v10770_v40 = vld [vmem:[%s22850_s4 + $0xcc0] sm:$0xff] }
 0x2e1   :  { %15120 = vmatprep.subr.bf16.mxu0 %v19023_v28  ;;  %15152 = vmatprep.subr.bf16.mxu1 %v19025_v22  ;;  %v10752_v22 = vld [vmem:[%s22850_s4 + $0xc30] sm:$0xff]  ;;  %v19103_v28 = vpack.c.bf16 %v10769_v35, %v10768_v24  ;;  %v10785_v14 = vld [vmem:[%s22850_s4 + $0xd38] sm:$0xff]  ;;  %v10771_v7 = vld [vmem:[%s22850_s4 + $0xcc8] sm:$0xff] }
 0x2e2   :  { %23357 = vst [vmem:[#allocation175_spill] sm:$0xff] %v19065_v9  ;;  %1598 = vmatmul.mubr.f32.gmra.mrb[26].mxu0 %v17611_v57  ;;  %1706 = vmatmul.mubr.f32.gmra.mrb[26].mxu1 %v17611_v57  ;;  %23358 = vst [vmem:[#allocation176_spill] sm:$0xff] %v19091_v55  ;;  %v10802_v24 = vld [vmem:[%s22850_s4 + $0xdc0] sm:$0xff]  ;;  %v10803_v35 = vld [vmem:[%s22850_s4 + $0xdc8] sm:$0xff] }
 0x2e3   :  { %1808 = vmatprep.mubr.f32.mxu0 %v17527_v21  ;;  %1916 = vmatprep.mubr.f32.mxu1 %v17527_v21  ;;  %23359 = vst [vmem:[#allocation177_spill] sm:$0xff] %v19093_v45  ;;  %23360 = vst [vmem:[#allocation178_spill] sm:$0xff] %v19103_v28 }
 0x2e4   :  { %15122 = vmatpush3.bf16.msra.mxu0 %v19051_v52  ;;  %15154 = vmatpush3.bf16.msra.mxu1 %v19053_v61  ;;  %v19105_v52 = vpack.c.bf16 %v10801_v37, %v10800_v43  ;;  %v19127_v43 = vpack.c.bf16 %v10753_v46, %v10752_v22  ;;  %v19129_v37 = vpack.c.bf16 %v10785_v14, %v10784_v19  ;;  %v10755_v61 = vld [vmem:[%s22850_s4 + $0xc48] sm:$0xff]  ;;  %v10786_v22 = vld [vmem:[%s22850_s4 + $0xd40] sm:$0xff]  ;;  %v10772_v19 = vld [vmem:[%s22850_s4 + $0xcd0] sm:$0xff] }
 0x2e5   :  { %15124 = vmatprep.subr.bf16.mxu0 %v19063_v3  ;;  %15156 = vmatprep.subr.bf16.mxu1 %v19065_v9  ;;  %v10754_v9 = vld [vmem:[%s22850_s4 + $0xc40] sm:$0xff]  ;;  %v19139_v3 = vpack.c.bf16 %v10771_v7, %v10770_v40  ;;  %v10787_v46 = vld [vmem:[%s22850_s4 + $0xd48] sm:$0xff]  ;;  %v10773_v14 = vld [vmem:[%s22850_s4 + $0xcd8] sm:$0xff] }
 0x2e6   :  { %23361 = vst [vmem:[#allocation179_spill] sm:$0xff] %v19105_v52  ;;  %23362 = vst [vmem:[#allocation180_spill] sm:$0xff] %v19127_v43  ;;  %v10804_v40 = vld [vmem:[%s22850_s4 + $0xdd0] sm:$0xff]  ;;  %v10805_v7 = vld [vmem:[%s22850_s4 + $0xdd8] sm:$0xff] }
 0x2e7   :  { %23363 = vst [vmem:[#allocation181_spill] sm:$0xff] %v19129_v37  ;;  %23364 = vst [vmem:[#allocation182_spill] sm:$0xff] %v19139_v3 }
 0x2e8   :  { %15126 = vmatpush3.bf16.msra.mxu0 %v19091_v55  ;;  %15158 = vmatpush3.bf16.msra.mxu1 %v19093_v45  ;;  %v19141_v55 = vpack.c.bf16 %v10803_v35, %v10802_v24  ;;  %v19163_v24 = vpack.c.bf16 %v10755_v61, %v10754_v9  ;;  %v19165_v35 = vpack.c.bf16 %v10787_v46, %v10786_v22  ;;  %v10757_v45 = vld [vmem:[%s22850_s4 + $0xc58] sm:$0xff]  ;;  %v10788_v9 = vld [vmem:[%s22850_s4 + $0xd50] sm:$0xff]  ;;  %v10774_v22 = vld [vmem:[%s22850_s4 + $0xce0] sm:$0xff] }
 0x2e9   :  { %15128 = vmatprep.subr.bf16.mxu0 %v19103_v28  ;;  %15160 = vmatprep.subr.bf16.mxu1 %v19105_v52  ;;  %v10756_v52 = vld [vmem:[%s22850_s4 + $0xc50] sm:$0xff]  ;;  %v19175_v28 = vpack.c.bf16 %v10773_v14, %v10772_v19  ;;  %v10789_v61 = vld [vmem:[%s22850_s4 + $0xd58] sm:$0xff]  ;;  %v10775_v46 = vld [vmem:[%s22850_s4 + $0xce8] sm:$0xff] }
 0x2ea   :  { %23365 = vst [vmem:[#allocation183_spill] sm:$0xff] %v19141_v55  ;;  %23366 = vst [vmem:[#allocation184_spill] sm:$0xff] %v19163_v24  ;;  %v10806_v19 = vld [vmem:[%s22850_s4 + $0xde0] sm:$0xff]  ;;  %v10807_v14 = vld [vmem:[%s22850_s4 + $0xde8] sm:$0xff] }
 0x2eb   :  { %23367 = vst [vmem:[#allocation185_spill] sm:$0xff] %v19165_v35  ;;  %23368 = vst [vmem:[#allocation186_spill] sm:$0xff] %v19175_v28 }
 0x2ec   :  { %15130 = vmatpush3.bf16.msra.mxu0 %v19127_v43  ;;  %15162 = vmatpush3.bf16.msra.mxu1 %v19129_v37  ;;  %v19177_v43 = vpack.c.bf16 %v10805_v7, %v10804_v40  ;;  %v19199_v40 = vpack.c.bf16 %v10757_v45, %v10756_v52  ;;  %v19201_v7 = vpack.c.bf16 %v10789_v61, %v10788_v9  ;;  %v10759_v37 = vld [vmem:[%s22850_s4 + $0xc68] sm:$0xff]  ;;  %v10790_v52 = vld [vmem:[%s22850_s4 + $0xd60] sm:$0xff]  ;;  %v10776_v9 = vld [vmem:[%s22850_s4 + $0xcf0] sm:$0xff] }
 0x2ed   :  { %15132 = vmatprep.subr.bf16.mxu0 %v19139_v3  ;;  %15164 = vmatprep.subr.bf16.mxu1 %v19141_v55  ;;  %v10758_v55 = vld [vmem:[%s22850_s4 + $0xc60] sm:$0xff]  ;;  %v19211_v3 = vpack.c.bf16 %v10775_v46, %v10774_v22  ;;  %v10791_v45 = vld [vmem:[%s22850_s4 + $0xd68] sm:$0xff]  ;;  %v10777_v61 = vld [vmem:[%s22850_s4 + $0xcf8] sm:$0xff] }
 0x2ee   :  { %23369 = vst [vmem:[#allocation187_spill] sm:$0xff] %v19177_v43  ;;  %23370 = vst [vmem:[#allocation188_spill] sm:$0xff] %v19199_v40  ;;  %v10808_v22 = vld [vmem:[%s22850_s4 + $0xdf0] sm:$0xff]  ;;  %v10809_v46 = vld [vmem:[%s22850_s4 + $0xdf8] sm:$0xff] }
 0x2ef   :  { %23371 = vst [vmem:[#allocation189_spill] sm:$0xff] %v19201_v7  ;;  %23372 = vst [vmem:[#allocation190_spill] sm:$0xff] %v19211_v3 }
 0x2f0   :  { %15134 = vmatpush3.bf16.msra.mxu0 %v19163_v24  ;;  %15166 = vmatpush3.bf16.msra.mxu1 %v19165_v35  ;;  %v19213_v24 = vpack.c.bf16 %v10807_v14, %v10806_v19  ;;  %v19235_v19 = vpack.c.bf16 %v10759_v37, %v10758_v55  ;;  %v19237_v14 = vpack.c.bf16 %v10791_v45, %v10790_v52  ;;  %v10761_v35 = vld [vmem:[%s22850_s4 + $0xc78] sm:$0xff]  ;;  %v10792_v55 = vld [vmem:[%s22850_s4 + $0xd70] sm:$0xff]  ;;  %v10826_v52 = vld [vmem:[%s22850_s4 + $0xe80] sm:$0xff] }
 0x2f1   :  { %15136 = vmatprep.subr.bf16.mxu0 %v19175_v28  ;;  %15168 = vmatprep.subr.bf16.mxu1 %v19177_v43  ;;  %v10760_v43 = vld [vmem:[%s22850_s4 + $0xc70] sm:$0xff]  ;;  %v19247_v28 = vpack.c.bf16 %v10777_v61, %v10776_v9  ;;  %v10793_v37 = vld [vmem:[%s22850_s4 + $0xd78] sm:$0xff]  ;;  %v10827_v45 = vld [vmem:[%s22850_s4 + $0xe88] sm:$0xff] }
 0x2f2   :  { %23373 = vst [vmem:[#allocation191_spill] sm:$0xff] %v19213_v24  ;;  %23374 = vst [vmem:[#allocation192_spill] sm:$0xff] %v19235_v19  ;;  %v10858_v9 = vld [vmem:[%s22850_s4 + $0xf80] sm:$0xff]  ;;  %v10859_v61 = vld [vmem:[%s22850_s4 + $0xf88] sm:$0xff] }
 0x2f3   :  { %23375 = vst [vmem:[#allocation193_spill] sm:$0xff] %v19237_v14  ;;  %23376 = vst [vmem:[#allocation194_spill] sm:$0xff] %v19247_v28 }
 0x2f4   :  { %15138 = vmatpush3.bf16.msra.mxu0 %v19199_v40  ;;  %15170 = vmatpush3.bf16.msra.mxu1 %v19201_v7  ;;  %v19249_v40 = vpack.c.bf16 %v10809_v46, %v10808_v22  ;;  %v19271_v22 = vpack.c.bf16 %v10761_v35, %v10760_v43  ;;  %v19273_v46 = vpack.c.bf16 %v10793_v37, %v10792_v55  ;;  %v10842_v43 = vld [vmem:[%s22850_s4 + $0xf00] sm:$0xff]  ;;  %v10843_v35 = vld [vmem:[%s22850_s4 + $0xf08] sm:$0xff]  ;;  %v10828_v55 = vld [vmem:[%s22850_s4 + $0xe90] sm:$0xff] }
 0x2f5   :  { %15140 = vmatprep.subr.bf16.mxu0 %v19211_v3  ;;  %15172 = vmatprep.subr.bf16.mxu1 %v19213_v24  ;;  %v19277_v24 = vpack.c.bf16 %v10827_v45, %v10826_v52  ;;  %v19279_v7 = vpack.c.bf16 %v10859_v61, %v10858_v9  ;;  %v10810_v3 = vld [vmem:[%s22850_s4 + $0xe00] sm:$0xff]  ;;  %v10829_v37 = vld [vmem:[%s22850_s4 + $0xe98] sm:$0xff]  ;;  %v10860_v52 = vld [vmem:[%s22850_s4 + $0xf90] sm:$0xff]  ;;  %v19311_v61 = vpack.c.bf16 %v10843_v35, %v10842_v43 }
 0x2f6   :  { %23377 = vst [vmem:[#allocation195_spill] sm:$0xff] %v19249_v40  ;;  %23378 = vst [vmem:[#allocation196_spill] sm:$0xff] %v19271_v22  ;;  %v10861_v45 = vld [vmem:[%s22850_s4 + $0xf98] sm:$0xff]  ;;  %v10831_v43 = vld [vmem:[%s22850_s4 + $0xea8] sm:$0xff] }
 0x2f7   :  { %23379 = vst [vmem:[#allocation197_spill] sm:$0xff] %v19273_v46  ;;  %23380 = vst [vmem:[#allocation198_spill] sm:$0xff] %v19277_v24  ;;  %v10862_v35 = vld [vmem:[%s22850_s4 + $0xfa0] sm:$0xff] }
 0x2f8   :  { %15142 = vmatpush3.bf16.msra.mxu0 %v19235_v19  ;;  %15174 = vmatpush3.bf16.msra.mxu1 %v19237_v14  ;;  %23381 = vst [vmem:[#allocation199_spill] sm:$0xff] %v19279_v7  ;;  %v10811_v14 = vld [vmem:[%s22850_s4 + $0xe08] sm:$0xff]  ;;  %23383 = vst [vmem:[#allocation201_spill] sm:$0xff] %v19311_v61  ;;  %v19319_v19 = vpack.c.bf16 %v10829_v37, %v10828_v55 }
 0x2f9   :  { %15144 = vmatprep.subr.bf16.mxu0 %v19247_v28  ;;  %15176 = vmatprep.subr.bf16.mxu1 %v19249_v40  ;;  %v19309_v9 = vpack.c.bf16 %v10811_v14, %v10810_v3  ;;  %v10812_v40 = vld [vmem:[%s22850_s4 + $0xe10] sm:$0xff]  ;;  %v10813_v28 = vld [vmem:[%s22850_s4 + $0xe18] sm:$0xff]  ;;  %v10830_v14 = vld [vmem:[%s22850_s4 + $0xea0] sm:$0xff] }
 0x2fa   :  { %23384 = vst [vmem:[#allocation202_spill] sm:$0xff] %v19319_v19  ;;  %v10845_v3 = vld [vmem:[%s22850_s4 + $0xf18] sm:$0xff]  ;;  %v10863_v55 = vld [vmem:[%s22850_s4 + $0xfa8] sm:$0xff]  ;;  %v19347_v37 = vpack.c.bf16 %v10813_v28, %v10812_v40  ;;  %v10846_v28 = vld [vmem:[%s22850_s4 + $0xf20] sm:$0xff] }
 0x2fb   :  { %23382 = vst [vmem:[#allocation200_spill] sm:$0xff] %v19309_v9  ;;  %v10847_v40 = vld [vmem:[%s22850_s4 + $0xf28] sm:$0xff] }
 0x2fc   :  { %15146 = vmatpush3.bf16.msra.mxu0 %v19271_v22  ;;  %15178 = vmatpush3.bf16.msra.mxu1 %v19273_v46  ;;  %v19321_v22 = vpack.c.bf16 %v10861_v45, %v10860_v52  ;;  %23386 = vst [vmem:[#allocation204_spill] sm:$0xff] %v19347_v37  ;;  %v10814_v45 = vld [vmem:[%s22850_s4 + $0xe20] sm:$0xff]  ;;  %v10815_v46 = vld [vmem:[%s22850_s4 + $0xe28] sm:$0xff] }
 0x2fd   :  { %15180 = vmatprep.subr.bf16.mxu0 %v19277_v24  ;;  %15212 = vmatprep.subr.bf16.mxu1 %v19279_v7  ;;  %v10844_v7 = vld [vmem:[%s22850_s4 + $0xf10] sm:$0xff]  ;;  %v19359_v24 = vpack.c.bf16 %v10831_v43, %v10830_v14  ;;  %v10865_v43 = vld [vmem:[%s22850_s4 + $0xfb8] sm:$0xff] }
 0x2fe   :  { %23385 = vst [vmem:[#allocation203_spill] sm:$0xff] %v19321_v22  ;;  %v19349_v52 = vpack.c.bf16 %v10845_v3, %v10844_v7  ;;  %v10832_v7 = vld [vmem:[%s22850_s4 + $0xeb0] sm:$0xff]  ;;  %v10833_v3 = vld [vmem:[%s22850_s4 + $0xeb8] sm:$0xff] }
 0x2ff   :  { %1809 = vmatmul.mubr.f32.vlgmr.msra.gmra.mrb[28].mxu0 %v17525_v15  ;;  %1917 = vmatmul.mubr.f32.vlgmr.msra.gmra.mrb[28].mxu1 %v17525_v15  ;;  %23388 = vst [vmem:[#allocation206_spill] sm:$0xff] %v19359_v24  ;;  %v10864_v14 = vld [vmem:[%s22850_s4 + $0xfb0] sm:$0xff] }
 0x300   :  { %1813 = vmatprep.mubr.f32.mxu0 %v17613_v33  ;;  %1921 = vmatprep.mubr.f32.mxu1 %v17613_v33  ;;  %23387 = vst [vmem:[#allocation205_spill] sm:$0xff] %v19349_v52 }
 0x301   :  { %15182 = vmatpush3.bf16.msra.mxu0 %v19309_v9  ;;  %15214 = vmatpush3.bf16.msra.mxu1 %v19311_v61  ;;  %v19361_v9 = vpack.c.bf16 %v10863_v55, %v10862_v35  ;;  %v19387_v35 = vpack.c.bf16 %v10815_v46, %v10814_v45  ;;  %v19389_v55 = vpack.c.bf16 %v10847_v40, %v10846_v28  ;;  %v10817_v61 = vld [vmem:[%s22850_s4 + $0xe38] sm:$0xff]  ;;  %v10848_v46 = vld [vmem:[%s22850_s4 + $0xf30] sm:$0xff]  ;;  %v10834_v28 = vld [vmem:[%s22850_s4 + $0xec0] sm:$0xff] }
 0x302   :  { %15184 = vmatprep.subr.bf16.mxu0 %v19319_v19  ;;  %15216 = vmatprep.subr.bf16.mxu1 %v19321_v22  ;;  %v10816_v22 = vld [vmem:[%s22850_s4 + $0xe30] sm:$0xff]  ;;  %v10849_v45 = vld [vmem:[%s22850_s4 + $0xf38] sm:$0xff]  ;;  %v10835_v40 = vld [vmem:[%s22850_s4 + $0xec8] sm:$0xff] }
 0x303   :  { %23389 = vst [vmem:[#allocation207_spill] sm:$0xff] %v19361_v9  ;;  %1814 = vmatmul.mubr.f32.gmra.mrb[30].mxu0 %v17611_v57  ;;  %1922 = vmatmul.mubr.f32.gmra.mrb[30].mxu1 %v17611_v57  ;;  %23390 = vst [vmem:[#allocation208_spill] sm:$0xff] %v19387_v35  ;;  %v10821_v19 = vld [vmem:[%s22850_s4 + $0xe58] sm:$0xff] }
 0x304   :  { %2024 = vmatprep.mubr.f32.mxu0 %v17527_v21  ;;  %2132 = vmatprep.mubr.f32.mxu1 %v17527_v21  ;;  %23391 = vst [vmem:[#allocation209_spill] sm:$0xff] %v19389_v55  ;;  %v19399_v21 = vpack.c.bf16 %v10833_v3, %v10832_v7  ;;  %v10866_v7 = vld [vmem:[%s22850_s4 + $0xfc0] sm:$0xff]  ;;  %v10867_v3 = vld [vmem:[%s22850_s4 + $0xfc8] sm:$0xff] }
 0x305   :  { %15186 = vmatpush3.bf16.msra.mxu0 %v19347_v37  ;;  %15218 = vmatpush3.bf16.msra.mxu1 %v19349_v52  ;;  %v19401_v37 = vpack.c.bf16 %v10865_v43, %v10864_v14  ;;  %v19423_v14 = vpack.c.bf16 %v10817_v61, %v10816_v22  ;;  %v19425_v43 = vpack.c.bf16 %v10849_v45, %v10848_v46  ;;  %v10819_v52 = vld [vmem:[%s22850_s4 + $0xe48] sm:$0xff]  ;;  %v10850_v22 = vld [vmem:[%s22850_s4 + $0xf40] sm:$0xff]  ;;  %v10836_v46 = vld [vmem:[%s22850_s4 + $0xed0] sm:$0xff] }
 0x306   :  { %15188 = vmatprep.subr.bf16.mxu0 %v19359_v24  ;;  %15220 = vmatprep.subr.bf16.mxu1 %v19361_v9  ;;  %23392 = vst [vmem:[#allocation210_spill] sm:$0xff] %v19399_v21  ;;  %v10818_v9 = vld [vmem:[%s22850_s4 + $0xe40] sm:$0xff]  ;;  %v19435_v24 = vpack.c.bf16 %v10835_v40, %v10834_v28  ;;  %v10851_v61 = vld [vmem:[%s22850_s4 + $0xf48] sm:$0xff]  ;;  %v10837_v45 = vld [vmem:[%s22850_s4 + $0xed8] sm:$0xff] }
 0x307   :  { %23393 = vst [vmem:[#allocation211_spill] sm:$0xff] %v19401_v37  ;;  %23394 = vst [vmem:[#allocation212_spill] sm:$0xff] %v19423_v14  ;;  %v10868_v28 = vld [vmem:[%s22850_s4 + $0xfd0] sm:$0xff]  ;;  %v10869_v40 = vld [vmem:[%s22850_s4 + $0xfd8] sm:$0xff] }
 0x308   :  { %23395 = vst [vmem:[#allocation213_spill] sm:$0xff] %v19425_v43  ;;  %23396 = vst [vmem:[#allocation214_spill] sm:$0xff] %v19435_v24 }
 0x309   :  { %15190 = vmatpush3.bf16.msra.mxu0 %v19387_v35  ;;  %15222 = vmatpush3.bf16.msra.mxu1 %v19389_v55  ;;  %v19437_v35 = vpack.c.bf16 %v10867_v3, %v10866_v7  ;;  %v19459_v7 = vpack.c.bf16 %v10819_v52, %v10818_v9  ;;  %v19461_v3 = vpack.c.bf16 %v10851_v61, %v10850_v22  ;;  %v10852_v61 = vld [vmem:[%s22850_s4 + $0xf50] sm:$0xff] }
 0x30a   :  { %15192 = vmatprep.subr.bf16.mxu0 %v19399_v21  ;;  %15224 = vmatprep.subr.bf16.mxu1 %v19401_v37  ;;  %v10820_v21 = vld [vmem:[%s22850_s4 + $0xe50] sm:$0xff]  ;;  %v19473_v9 = vpack.c.bf16 %v10869_v40, %v10868_v28  ;;  %v10870_v28 = vld [vmem:[%s22850_s4 + $0xfe0] sm:$0xff]  ;;  %v10871_v40 = vld [vmem:[%s22850_s4 + $0xfe8] sm:$0xff] }
 0x30b   :  { %23397 = vst [vmem:[#allocation215_spill] sm:$0xff] %v19437_v35  ;;  %23398 = vst [vmem:[#allocation216_spill] sm:$0xff] %v19459_v7 }
 0x30c   :  { %23399 = vst [vmem:[#allocation217_spill] sm:$0xff] %v19461_v3  ;;  %23401 = vst [vmem:[#allocation219_spill] sm:$0xff] %v19473_v9 }
 0x30d   :  { %15194 = vmatpush3.bf16.msra.mxu0 %v19423_v14  ;;  %15226 = vmatpush3.bf16.msra.mxu1 %v19425_v43  ;;  %v11356_v37 = vpop.f32.mrb[4].mxu0  ;;  %v11394_v55 = vpop.f32.mrb[4].mxu1  ;;  %v19471_v14 = vpack.c.bf16 %v10837_v45, %v10836_v46  ;;  %v10853_v43 = vld [vmem:[%s22850_s4 + $0xf58] sm:$0xff]  ;;  %v10839_v45 = vld [vmem:[%s22850_s4 + $0xee8] sm:$0xff] }
 0x30e   :  { %15196 = vmatprep.subr.bf16.mxu0 %v19435_v24  ;;  %15228 = vmatprep.subr.bf16.mxu1 %v19437_v35  ;;  %v11357_v52 = vpop.f32.mrb[5].mxu0  ;;  %v11395_v22 = vpop.f32.mrb[5].mxu1  ;;  %v10838_v24 = vld [vmem:[%s22850_s4 + $0xee0] sm:$0xff] }
 0x30f   :  { %23400 = vst [vmem:[#allocation218_spill] sm:$0xff] %v19471_v14  ;;  %v19484_v27 = vadd.f32 %v11357_v52, %v11356_v37  ;;  %v19486_v46 = vadd.f32 %v11395_v22, %v11394_v55  ;;  %v19499_v37 = vpack.c.bf16 %v10821_v19, %v10820_v21  ;;  %v19501_v55 = vpack.c.bf16 %v10853_v43, %v10852_v61  ;;  %v10822_v52 = vld [vmem:[%s22850_s4 + $0xe60] sm:$0xff]  ;;  %v10823_v22 = vld [vmem:[%s22850_s4 + $0xe68] sm:$0xff]  ;;  %v10840_v43 = vld [vmem:[%s22850_s4 + $0xef0] sm:$0xff] }
 0x310   :  { %v19511_v35 = vpack.c.bf16 %v10839_v45, %v10838_v24  ;;  %v10854_v19 = vld [vmem:[%s22850_s4 + $0xf60] sm:$0xff]  ;;  %v10855_v21 = vld [vmem:[%s22850_s4 + $0xf68] sm:$0xff]  ;;  %v10841_v61 = vld [vmem:[%s22850_s4 + $0xef8] sm:$0xff] }
 0x311   :  { %15198 = vmatpush3.bf16.msra.mxu0 %v19459_v7  ;;  %15230 = vmatpush3.bf16.msra.mxu1 %v19461_v3  ;;  %23402 = vst [vmem:[#allocation220_spill] sm:$0xff] %v19499_v37  ;;  %23403 = vst [vmem:[#allocation221_spill] sm:$0xff] %v19501_v55  ;;  %v19513_v7 = vpack.c.bf16 %v10871_v40, %v10870_v28  ;;  %v10872_v24 = vld [vmem:[%s22850_s4 + $0xff0] sm:$0xff]  ;;  %v10873_v45 = vld [vmem:[%s22850_s4 + $0xff8] sm:$0xff]  ;;  %v19535_v28 = vpack.c.bf16 %v10823_v22, %v10822_v52 }
 0x312   :  { %15200 = vmatprep.subr.bf16.mxu0 %v19471_v14  ;;  %15232 = vmatprep.subr.bf16.mxu1 %v19473_v9  ;;  %23404 = vst [vmem:[#allocation222_spill] sm:$0xff] %v19511_v35  ;;  %v19537_v40 = vpack.c.bf16 %v10855_v21, %v10854_v19  ;;  %v10824_v14 = vld [vmem:[%s22850_s4 + $0xe70] sm:$0xff]  ;;  %v19549_v52 = vpack.c.bf16 %v10873_v45, %v10872_v24 }
 0x313   :  { %v10856_v21 = vld [vmem:[%s22850_s4 + $0xf70] sm:$0xff]  ;;  %v388_v45 = vmul.f32 %v17479_v30, %v17127_v39 }
 0x315   :  { %15202 = vmatpush3.bf16.msra.mxu0 %v19499_v37  ;;  %15234 = vmatpush3.bf16.msra.mxu1 %v19501_v55  ;;  %v11359_v9 = vpop.f32.mrb[6].mxu0  ;;  %v11397_v3 = vpop.f32.mrb[6].mxu1  ;;  %v19547_v37 = vpack.c.bf16 %v10841_v61, %v10840_v43  ;;  %v10857_v55 = vld [vmem:[%s22850_s4 + $0xf78] sm:$0xff] }
 0x316   :  { %15204 = vmatprep.subr.bf16.mxu0 %v19511_v35  ;;  %15236 = vmatprep.subr.bf16.mxu1 %v19513_v7  ;;  %v11360_v22 = vpop.f32.mrb[7].mxu0  ;;  %v11398_v19 = vpop.f32.mrb[7].mxu1  ;;  %v19561_v35 = vpack.c.bf16 %v10825_v41, %v10824_v14  ;;  %v19569_v24 = vpack.c.bf16 %v10857_v55, %v10856_v21 }
 0x317   :  { %v19557_v6 = vadd.f32 %v11360_v22, %v11359_v9  ;;  %v19559_v1 = vadd.f32 %v11398_v19, %v11397_v3  ;;  %v389_v9 = vmul.f32 %v17479_v30, %v17133_v42  ;;  %v390_v19 = vmul.f32 %v17513_v62, %v17147_v49 }
 0x319   :  { %15206 = vmatpush3.bf16.msra.mxu0 %v19535_v28  ;;  %15238 = vmatpush3.bf16.msra.mxu1 %v19537_v40  ;;  %v15245_v43 = vpack.c.bf16 %v19557_v6, %v19484_v27  ;;  %v15249_v61 = vpack.c.bf16 %v19559_v1, %v19486_v46  ;;  %v393_v41 = vadd.f32 %v389_v9, %v17485_v34  ;;  %v23409_v9 = vld [vmem:[#allocation44_spill] sm:$0xff]  ;;  %v23442_v6 = vld [vmem:[#allocation110_spill] sm:$0xff] }
 0x31a   :  { %15208 = vmatprep.subr.bf16.mxu0 %v19547_v37  ;;  %15240 = vmatprep.subr.bf16.mxu1 %v19549_v52  ;;  %v394_v39 = vadd.f32 %v390_v19, %v17561_v50  ;;  %v23441_v27 = vld [vmem:[#allocation108_spill] sm:$0xff]  ;;  %v23444_v1 = vld [vmem:[#allocation114_spill] sm:$0xff] }
 0x31b   :  { %v401_v14 = vmul.f32 0.2, %v393_v41  ;;  %vm397_vm4 = vcmp.gt.f32.partialorder %v393_v41, 0.0  ;;  %v23445_v46 = vld [vmem:[#allocation116_spill] sm:$0xff] }
 0x31c   :  { %vm398_vm7 = vcmp.gt.f32.partialorder %v394_v39, 0.0 }
 0x31d   :  { %15210 = vmatpush3.bf16.msra.mxu0 %v19561_v35  ;;  %15242 = vmatpush3.bf16.msra.mxu1 %v19569_v24  ;;  %v19585_v42 = vsel %vm397_vm4, %v393_v41, %v401_v14  ;;  %v23413_v41 = vld [vmem:[#allocation52_spill] sm:$0xff]  ;;  %v23414_v14 = vld [vmem:[#allocation54_spill] sm:$0xff]  ;;  %vm7549_vm4 = vcmask 15360  }
 0x31e   :  { %15276 = vmatprep.subr.bf16.mxu1 %v17170_v63 }
 0x320   :  { %2025 = vmatmul.mubr.f32.vlgmr.msra.gmra.mrb[32].mxu0 %v17525_v15  ;;  %2133 = vmatmul.mubr.f32.vlgmr.msra.gmra.mrb[32].mxu1 %v17525_v15 }
 0x321   :  { %2029 = vmatprep.mubr.f32.mxu0 %v17613_v33  ;;  %2137 = vmatprep.mubr.f32.mxu1 %v17613_v33 }
 0x322   :  { %15278 = vmatpush3.bf16.msra.mxu1 %v17183_v4 }
 0x323   :  { %15280 = vmatprep.subr.bf16.mxu1 %v17208_v13 }
 0x324   :  { %2030 = vmatmul.mubr.f32.gmra.mrb[34].mxu0 %v17611_v57  ;;  %2138 = vmatmul.mubr.f32.gmra.mrb[34].mxu1 %v17611_v57 }
 0x325   :  { %2292 = vmatprep.mubr.f32.mxu1 %v19585_v42 }
 0x326   :  { %15282 = vmatpush3.bf16.msra.mxu1 %v17222_v18 }
 0x327   :  { %15284 = vmatprep.subr.bf16.mxu1 %v17237_v23 }
 0x32a   :  { %15286 = vmatpush3.bf16.msra.mxu1 %v17260_v31 }
 0x32b   :  { %15288 = vmatprep.subr.bf16.mxu1 %v17275_v38 }
 0x32d   :  { %v11432_v63 = vpop.f32.mrb[8].mxu0  ;;  %v11470_v4 = vpop.f32.mrb[8].mxu1 }
 0x32e   :  { %15290 = vmatpush3.bf16.msra.mxu1 %v17308_v54  ;;  %v11433_v13 = vpop.f32.mrb[9].mxu0  ;;  %v11471_v33 = vpop.f32.mrb[9].mxu1 }
 0x32f   :  { %15292 = vmatprep.subr.bf16.mxu1 %v17314_v56  ;;  %v19596_v15 = vadd.f32 %v11433_v13, %v11432_v63  ;;  %v19598_v57 = vadd.f32 %v11471_v33, %v11470_v4 }
 0x331   :  { %v11435_v3 = vpop.f32.mrb[10].mxu0  ;;  %v11473_v18 = vpop.f32.mrb[10].mxu1 }
 0x332   :  { %15294 = vmatpush3.bf16.msra.mxu1 %v17344_v5  ;;  %v11436_v23 = vpop.f32.mrb[11].mxu0  ;;  %v11474_v31 = vpop.f32.mrb[11].mxu1  ;;  %v391_v5 = vmul.f32 %v17513_v62, %v17153_v53 }
 0x333   :  { %15296 = vmatprep.subr.bf16.mxu1 %v17350_v8  ;;  %v19602_v38 = vadd.f32 %v11436_v23, %v11435_v3  ;;  %v19604_v55 = vadd.f32 %v11474_v31, %v11473_v18  ;;  %v392_v8 = vadd.f32 %v388_v45, %v17485_v34  ;;  %v23415_v23 = vld [vmem:[#allocation56_spill] sm:$0xff]  ;;  %v23416_v31 = vld [vmem:[#allocation58_spill] sm:$0xff] }
 0x334   :  { %v395_v22 = vadd.f32 %v391_v5, %v17561_v50 }
 0x335   :  { %v15253_v54 = vpack.c.bf16 %v19602_v38, %v19596_v15  ;;  %v15257_v56 = vpack.c.bf16 %v19604_v55, %v19598_v57  ;;  %v400_v21 = vmul.f32 0.2, %v392_v8  ;;  %vm396_vm5 = vcmp.gt.f32.partialorder %v392_v8, 0.0  ;;  %v23457_v15 = vld [vmem:[#allocation140_spill] sm:$0xff]  ;;  %v23458_v38 = vld [vmem:[#allocation142_spill] sm:$0xff] }
 0x336   :  { %15298 = vmatpush3.bf16.msra.mxu1 %v17368_v17  ;;  %v403_v17 = vmul.f32 0.2, %v395_v22  ;;  %vm399_vm6 = vcmp.gt.f32.partialorder %v395_v22, 0.0  ;;  %v23460_v57 = vld [vmem:[#allocation146_spill] sm:$0xff]  ;;  %v23461_v55 = vld [vmem:[#allocation148_spill] sm:$0xff] }
 0x337   :  { %15300 = vmatprep.subr.bf16.mxu1 %v17392_v16  ;;  %v19625_v53 = vsel %vm396_vm5, %v392_v8, %v400_v21  ;;  %v402_v16 = vmul.f32 0.2, %v394_v39 }
 0x338   :  { %v19627_v30 = vsel %vm399_vm6, %v395_v22, %v403_v17 }
 0x339   :  { %v19633_v49 = vsel %vm398_vm7, %v394_v39, %v402_v16  ;;  %v23417_v39 = vld [vmem:[#allocation60_spill] sm:$0xff] }
 0x33a   :  { %15302 = vmatpush3.bf16.msra.mxu1 %v17405_v29 }
 0x33b   :  { %15304 = vmatprep.subr.bf16.mxu1 %v17431_v44 }
 0x33e   :  { %15306 = vmatpush3.bf16.msra.mxu1 %v17444_v58 }
 0x33f   :  { %15340 = vmatprep.subr.bf16.mxu1 %v17470_v20 }
 0x341   :  { %2293 = vmatmul.mubr.f32.vlgmr.msra.gmra.mrb[36].mxu1 %v19625_v53 }
 0x342   :  { %2297 = vmatprep.mubr.f32.mxu1 %v19627_v30  ;;  %15342 = vmatpush3.bf16.msra.mxu1 %v17515_v0 }
 0x343   :  { %15344 = vmatprep.subr.bf16.mxu1 %v17529_v25 }
 0x345   :  { %2298 = vmatmul.mubr.f32.gmra.mrb[38].mxu1 %v19633_v49 }
 0x346   :  { %15346 = vmatpush3.bf16.msra.mxu1 %v17563_v51  ;;  %2442 = vmatprep.mubr.f32.mxu1 %v19585_v42 }
 0x347   :  { %15348 = vmatprep.subr.bf16.mxu1 %v17576_v2 }
 0x34a   :  { %15350 = vmatpush3.bf16.msra.mxu1 %v17601_v48 }
 0x34b   :  { %15352 = vmatprep.subr.bf16.mxu1 %v17628_v47 }
 0x34e   :  { %15354 = vmatpush3.bf16.msra.mxu1 %v17645_v32  ;;  %v11508_v29 = vpop.f32.mrb[12].mxu0  ;;  %v11546_v44 = vpop.f32.mrb[12].mxu1  ;;  %v23406_v32 = vld [vmem:[#allocation38_spill] sm:$0xff] }
 0x34f   :  { %15356 = vmatprep.subr.bf16.mxu1 %v17657_v10  ;;  %v11509_v58 = vpop.f32.mrb[13].mxu0  ;;  %v11547_v20 = vpop.f32.mrb[13].mxu1 }
 0x350   :  { %v19643_v34 = vadd.f32 %v11509_v58, %v11508_v29  ;;  %v19645_v62 = vadd.f32 %v11547_v20, %v11546_v44  ;;  %v23418_v29 = vld [vmem:[#allocation62_spill] sm:$0xff]  ;;  %v23419_v44 = vld [vmem:[#allocation64_spill] sm:$0xff] }
 0x351   :  { %v23420_v58 = vld [vmem:[#allocation66_spill] sm:$0xff]  ;;  %v23421_v20 = vld [vmem:[#allocation68_spill] sm:$0xff] }
 0x352   :  { %15358 = vmatpush3.bf16.msra.mxu1 %v17683_v36  ;;  %v11511_v0 = vpop.f32.mrb[14].mxu0  ;;  %v11549_v2 = vpop.f32.mrb[14].mxu1  ;;  %v23407_v36 = vld [vmem:[#allocation40_spill] sm:$0xff] }
 0x353   :  { %15360 = vmatprep.subr.bf16.mxu1 %v17695_v26  ;;  %v11512_v25 = vpop.f32.mrb[15].mxu0  ;;  %v11550_v50 = vpop.f32.mrb[15].mxu1  ;;  %v23405_v26 = vld [vmem:[#allocation36_spill] sm:$0xff] }
 0x354   :  { %v19649_v51 = vadd.f32 %v11512_v25, %v11511_v0  ;;  %v19651_v48 = vadd.f32 %v11550_v50, %v11549_v2  ;;  %v23422_v0 = vld [vmem:[#allocation70_spill] sm:$0xff]  ;;  %v23423_v2 = vld [vmem:[#allocation72_spill] sm:$0xff] }
 0x355   :  { %v23424_v25 = vld [vmem:[#allocation74_spill] sm:$0xff] }
 0x356   :  { %15362 = vmatpush3.bf16.msra.mxu1 %v17719_v11  ;;  %v15261_v10 = vpack.c.bf16 %v19649_v51, %v19643_v34  ;;  %v15265_v47 = vpack.c.bf16 %v19651_v48, %v19645_v62  ;;  %v23408_v11 = vld [vmem:[#allocation42_spill] sm:$0xff]  ;;  %v23473_v34 = vld [vmem:[#allocation172_spill] sm:$0xff] }
 0x357   :  { %15364 = vmatprep.subr.bf16.mxu1 %v17731_v12  ;;  %v23410_v12 = vld [vmem:[#allocation46_spill] sm:$0xff]  ;;  %v23477_v62 = vld [vmem:[#allocation180_spill] sm:$0xff] }
 0x358   :  { %v19702_v50 = vld [vmem:[%s22851_s5 + $0x8] sm:$0xff] }
 0x359   :  { %2207 = vmatprep.mubr.f32.mxu0 %v19702_v50  ;;  %v23474_v51 = vld [vmem:[#allocation174_spill] sm:$0xff] }
 0x35a   :  { %15366 = vmatpush3.bf16.msra.mxu1 %v17755_v59  ;;  %v23412_v59 = vld [vmem:[#allocation50_spill] sm:$0xff] }
 0x35b   :  { %15368 = vmatprep.subr.bf16.mxu1 %v17767_v60  ;;  %v23411_v60 = vld [vmem:[#allocation48_spill] sm:$0xff]  ;;  %v23478_v48 = vld [vmem:[#allocation182_spill] sm:$0xff] }
 0x35e   :  { %15370 = vmatpush3.bf16.msra.mxu1 %v23405_v26  ;;  %v23425_v26 = vld [vmem:[#allocation76_spill] sm:$0xff] }
 0x35f   :  { %15404 = vmatprep.subr.bf16.mxu1 %v23406_v32  ;;  %v23426_v32 = vld [vmem:[#allocation78_spill] sm:$0xff] }
 0x361   :  { %2443 = vmatmul.mubr.f32.vlgmr.msra.gmra.mrb[40].mxu1 %v19625_v53 }
 0x362   :  { %2447 = vmatprep.mubr.f32.mxu1 %v19627_v30  ;;  %15406 = vmatpush3.bf16.msra.mxu1 %v23407_v36  ;;  %v23427_v36 = vld [vmem:[#allocation80_spill] sm:$0xff] }
 0x363   :  { %15408 = vmatprep.subr.bf16.mxu1 %v23408_v11  ;;  %v23428_v11 = vld [vmem:[#allocation82_spill] sm:$0xff] }
 0x365   :  { %2448 = vmatmul.mubr.f32.gmra.mrb[42].mxu1 %v19633_v49 }
 0x366   :  { %15410 = vmatpush3.bf16.msra.mxu1 %v23409_v9  ;;  %2592 = vmatprep.mubr.f32.mxu1 %v19585_v42  ;;  %v23429_v9 = vld [vmem:[#allocation84_spill] sm:$0xff] }
 0x367   :  { %15412 = vmatprep.subr.bf16.mxu1 %v23410_v12  ;;  %v23430_v12 = vld [vmem:[#allocation86_spill] sm:$0xff] }
 0x36a   :  { %15414 = vmatpush3.bf16.msra.mxu1 %v23411_v60 }
 0x36b   :  { %15416 = vmatprep.subr.bf16.mxu1 %v23412_v59 }
 0x36e   :  { %15418 = vmatpush3.bf16.msra.mxu1 %v23413_v41 }
 0x36f   :  { %15420 = vmatprep.subr.bf16.mxu1 %v23414_v14  ;;  %v11584_v63 = vpop.f32.mrb[16].mxu0  ;;  %v11622_v4 = vpop.f32.mrb[16].mxu1 }
 0x370   :  { %v11585_v13 = vpop.f32.mrb[17].mxu0  ;;  %v11623_v33 = vpop.f32.mrb[17].mxu1 }
 0x371   :  { %v19675_v3 = vadd.f32 %v11585_v13, %v11584_v63  ;;  %v19677_v18 = vadd.f32 %v11623_v33, %v11622_v4  ;;  %v23431_v63 = vld [vmem:[#allocation88_spill] sm:$0xff]  ;;  %v23432_v33 = vld [vmem:[#allocation90_spill] sm:$0xff] }
 0x372   :  { %15422 = vmatpush3.bf16.msra.mxu1 %v23415_v23 }
 0x373   :  { %15424 = vmatprep.subr.bf16.mxu1 %v23416_v31  ;;  %v11587_v45 = vpop.f32.mrb[18].mxu0  ;;  %v11625_v5 = vpop.f32.mrb[18].mxu1 }
 0x374   :  { %v11588_v8 = vpop.f32.mrb[19].mxu0  ;;  %v11626_v22 = vpop.f32.mrb[19].mxu1 }
 0x375   :  { %v19681_v19 = vadd.f32 %v11588_v8, %v11587_v45  ;;  %v19683_v21 = vadd.f32 %v11626_v22, %v11625_v5  ;;  %v23433_v8 = vld [vmem:[#allocation92_spill] sm:$0xff] }
 0x376   :  { %15426 = vmatpush3.bf16.msra.mxu1 %v23417_v39 }
 0x377   :  { %v15269_v17 = vpack.c.bf16 %v19681_v19, %v19675_v3  ;;  %v15273_v16 = vpack.c.bf16 %v19683_v21, %v19677_v18  ;;  %15428 = vmatprep.subr.bf16.mxu1 %v23418_v29  ;;  %v23434_v29 = vld [vmem:[#allocation94_spill] sm:$0xff]  ;;  %v19812_v3 = vld [vmem:[%s22851_s5] sm:$0xff] }
 0x378   :  { %v23489_v19 = vld [vmem:[#allocation5_spill] sm:$0xff]  ;;  %v23490_v18 = vld [vmem:[#allocation204_spill] sm:$0xff]  ;;  %v23491_v21 = vld [vmem:[#allocation6_spill] sm:$0xff] }
 0x37a   :  { %15430 = vmatpush3.bf16.msra.mxu1 %v23419_v44 }
 0x37b   :  { %15432 = vmatprep.subr.bf16.mxu1 %v23420_v58 }
 0x37e   :  { %15434 = vmatpush3.bf16.msra.mxu1 %v23421_v20  ;;  %v23435_v20 = vld [vmem:[#allocation96_spill] sm:$0xff] }
 0x37f   :  { %15468 = vmatprep.subr.bf16.mxu1 %v23422_v0  ;;  %v23436_v0 = vld [vmem:[#allocation98_spill] sm:$0xff] }
 0x381   :  { %2593 = vmatmul.mubr.f32.vlgmr.msra.gmra.mrb[44].mxu1 %v19625_v53 }
 0x382   :  { %2597 = vmatprep.mubr.f32.mxu1 %v19627_v30  ;;  %15470 = vmatpush3.bf16.msra.mxu1 %v23423_v2  ;;  %v23437_v2 = vld [vmem:[#allocation100_spill] sm:$0xff] }
 0x383   :  { %15472 = vmatprep.subr.bf16.mxu1 %v23424_v25  ;;  %v23438_v25 = vld [vmem:[#allocation102_spill] sm:$0xff] }
 0x385   :  { %2598 = vmatmul.mubr.f32.gmra.mrb[46].mxu1 %v19633_v49 }
 0x386   :  { %15474 = vmatpush3.bf16.msra.mxu1 %v23425_v26  ;;  %2742 = vmatprep.mubr.f32.mxu1 %v19585_v42  ;;  %v23439_v26 = vld [vmem:[#allocation104_spill] sm:$0xff] }
 0x387   :  { %15476 = vmatprep.subr.bf16.mxu1 %v23426_v32  ;;  %v23440_v32 = vld [vmem:[#allocation106_spill] sm:$0xff] }
 0x38a   :  { %15478 = vmatpush3.bf16.msra.mxu1 %v23427_v36 }
 0x38b   :  { %15480 = vmatprep.subr.bf16.mxu1 %v23428_v11 }
 0x38e   :  { %15482 = vmatpush3.bf16.msra.mxu1 %v23429_v9  ;;  %v23447_v9 = vld [vmem:[#allocation120_spill] sm:$0xff] }
 0x38f   :  { %15484 = vmatprep.subr.bf16.mxu1 %v23430_v12 }
 0x390   :  { %v11660_v60 = vpop.f32.mrb[20].mxu0  ;;  %v11698_v59 = vpop.f32.mrb[20].mxu1 }
 0x391   :  { %v11661_v41 = vpop.f32.mrb[21].mxu0  ;;  %v11699_v14 = vpop.f32.mrb[21].mxu1 }
 0x392   :  { %15486 = vmatpush3.bf16.msra.mxu1 %v23431_v63  ;;  %v11662_v4 = vadd.f32 %v11661_v41, %v11660_v60  ;;  %v11700_v13 = vadd.f32 %v11699_v14, %v11698_v59  ;;  %v23448_v14 = vld [vmem:[#allocation122_spill] sm:$0xff] }
 0x393   :  { %15488 = vmatprep.subr.bf16.mxu1 %v23432_v33 }
 0x394   :  { %v11663_v23 = vpop.f32.mrb[22].mxu0  ;;  %v11701_v31 = vpop.f32.mrb[22].mxu1 }
 0x395   :  { %v11664_v45 = vpop.f32.mrb[23].mxu0  ;;  %v11702_v5 = vpop.f32.mrb[23].mxu1 }
 0x396   :  { %15490 = vmatpush3.bf16.msra.mxu1 %v23433_v8  ;;  %v11665_v22 = vadd.f32 %v11664_v45, %v11663_v23  ;;  %v11703_v39 = vadd.f32 %v11702_v5, %v11701_v31  ;;  %v23450_v5 = vld [vmem:[#allocation126_spill] sm:$0xff] }
 0x397   :  { %15492 = vmatprep.subr.bf16.mxu1 %v23434_v29  ;;  %v23452_v29 = vld [vmem:[#allocation130_spill] sm:$0xff] }
 0x398   :  { %v15243_v44 = vpack.c.bf16 %v11665_v22, %v11662_v4  ;;  %v15247_v58 = vpack.c.bf16 %v11703_v39, %v11700_v13  ;;  %v23449_v13 = vld [vmem:[#allocation124_spill] sm:$0xff] }
 0x399   :  { %v23451_v39 = vld [vmem:[#allocation128_spill] sm:$0xff] }
 0x39a   :  { %15494 = vmatpush3.bf16.msra.mxu1 %v23435_v20  ;;  %15244 = vmatprep.subr.bf16.mxu0 %v15243_v44  ;;  %v23453_v44 = vld [vmem:[#allocation132_spill] sm:$0xff] }
 0x39b   :  { %15496 = vmatprep.subr.bf16.mxu1 %v23436_v0  ;;  %15246 = vmatpush3.bf16.msra.mxu0 %v15245_v43  ;;  %v23443_v43 = vld [vmem:[#allocation112_spill] sm:$0xff]  ;;  %v23456_v0 = vld [vmem:[#allocation138_spill] sm:$0xff] }
 0x39c   :  { %15248 = vmatprep.subr.bf16.mxu0 %v15247_v58  ;;  %v23454_v58 = vld [vmem:[#allocation134_spill] sm:$0xff]  ;;  %v23455_v20 = vld [vmem:[#allocation136_spill] sm:$0xff] }
 0x39e   :  { %15498 = vmatpush3.bf16.msra.mxu1 %v23437_v2  ;;  %v23463_v2 = vld [vmem:[#allocation152_spill] sm:$0xff] }
 0x39f   :  { %15532 = vmatprep.subr.bf16.mxu1 %v23438_v25  ;;  %15250 = vmatpush3.bf16.msra.mxu0 %v15249_v61  ;;  %v23446_v61 = vld [vmem:[#allocation118_spill] sm:$0xff] }
 0x3a1   :  { %2743 = vmatmul.mubr.f32.vlgmr.msra.gmra.mrb[48].mxu1 %v19625_v53 }
 0x3a2   :  { %2747 = vmatprep.mubr.f32.mxu1 %v19627_v30  ;;  %15534 = vmatpush3.bf16.msra.mxu1 %v23439_v26 }
 0x3a3   :  { %15536 = vmatprep.subr.bf16.mxu1 %v23440_v32 }
 0x3a5   :  { %2748 = vmatmul.mubr.f32.gmra.mrb[50].mxu1 %v19633_v49 }
 0x3a6   :  { %15538 = vmatpush3.bf16.msra.mxu1 %v23441_v27  ;;  %2892 = vmatprep.mubr.f32.mxu1 %v19585_v42 }
 0x3a7   :  { %15540 = vmatprep.subr.bf16.mxu1 %v23442_v6  ;;  %v23464_v6 = vld [vmem:[#allocation154_spill] sm:$0xff] }
 0x3aa   :  { %15542 = vmatpush3.bf16.msra.mxu1 %v23443_v43 }
 0x3ab   :  { %15544 = vmatprep.subr.bf16.mxu1 %v23444_v1 }
 0x3ae   :  { %15546 = vmatpush3.bf16.msra.mxu1 %v23445_v46  ;;  %v23465_v46 = vld [vmem:[#allocation156_spill] sm:$0xff] }
 0x3af   :  { %15548 = vmatprep.subr.bf16.mxu1 %v23446_v61 }
 0x3b1   :  { %v11736_v36 = vpop.f32.mrb[24].mxu0  ;;  %v11774_v11 = vpop.f32.mrb[24].mxu1 }
 0x3b2   :  { %15550 = vmatpush3.bf16.msra.mxu1 %v23447_v9  ;;  %v11737_v12 = vpop.f32.mrb[25].mxu0  ;;  %v11775_v60 = vpop.f32.mrb[25].mxu1 }
 0x3b3   :  { %v11738_v59 = vadd.f32 %v11737_v12, %v11736_v36  ;;  %v11776_v41 = vadd.f32 %v11775_v60, %v11774_v11  ;;  %15552 = vmatprep.subr.bf16.mxu1 %v23448_v14  ;;  %v23466_v12 = vld [vmem:[#allocation158_spill] sm:$0xff] }
 0x3b5   :  { %v11739_v63 = vpop.f32.mrb[26].mxu0  ;;  %v11777_v4 = vpop.f32.mrb[26].mxu1 }
 0x3b6   :  { %15554 = vmatpush3.bf16.msra.mxu1 %v23449_v13  ;;  %v11740_v33 = vpop.f32.mrb[27].mxu0  ;;  %v11778_v23 = vpop.f32.mrb[27].mxu1  ;;  %v23469_v13 = vld [vmem:[#allocation164_spill] sm:$0xff] }
 0x3b7   :  { %v11741_v31 = vadd.f32 %v11740_v33, %v11739_v63  ;;  %v11779_v45 = vadd.f32 %v11778_v23, %v11777_v4  ;;  %15556 = vmatprep.subr.bf16.mxu1 %v23450_v5  ;;  %v23467_v63 = vld [vmem:[#allocation160_spill] sm:$0xff]  ;;  %v23468_v4 = vld [vmem:[#allocation162_spill] sm:$0xff] }
 0x3b8   :  { %v23470_v33 = vld [vmem:[#allocation166_spill] sm:$0xff]  ;;  %v23471_v23 = vld [vmem:[#allocation168_spill] sm:$0xff] }
 0x3b9   :  { %v15251_v8 = vpack.c.bf16 %v11741_v31, %v11738_v59  ;;  %v15255_v22 = vpack.c.bf16 %v11779_v45, %v11776_v41  ;;  %v23472_v31 = vld [vmem:[#allocation170_spill] sm:$0xff] }
 0x3ba   :  { %15558 = vmatpush3.bf16.msra.mxu1 %v23451_v39  ;;  %v23476_v45 = vld [vmem:[#allocation178_spill] sm:$0xff] }
 0x3bb   :  { %15560 = vmatprep.subr.bf16.mxu1 %v23452_v29  ;;  %15252 = vmatprep.subr.bf16.mxu0 %v15251_v8 }
 0x3bc   :  { %15254 = vmatpush3.bf16.msra.mxu0 %v15253_v54  ;;  %v23459_v54 = vld [vmem:[#allocation144_spill] sm:$0xff] }
 0x3bd   :  { %15256 = vmatprep.subr.bf16.mxu0 %v15255_v22  ;;  %v23480_v22 = vld [vmem:[#allocation186_spill] sm:$0xff] }
 0x3be   :  { %15562 = vmatpush3.bf16.msra.mxu1 %v23453_v44 }
 0x3bf   :  { %15596 = vmatprep.subr.bf16.mxu1 %v23454_v58 }
 0x3c0   :  { %15258 = vmatpush3.bf16.msra.mxu0 %v15257_v56  ;;  %v23462_v56 = vld [vmem:[#allocation150_spill] sm:$0xff] }
 0x3c1   :  { %2893 = vmatmul.mubr.f32.vlgmr.msra.gmra.mrb[52].mxu1 %v19625_v53 }
 0x3c2   :  { %2897 = vmatprep.mubr.f32.mxu1 %v19627_v30  ;;  %15598 = vmatpush3.bf16.msra.mxu1 %v23455_v20  ;;  %v23481_v20 = vld [vmem:[#allocation188_spill] sm:$0xff] }
 0x3c3   :  { %15600 = vmatprep.subr.bf16.mxu1 %v23456_v0 }
 0x3c5   :  { %2898 = vmatmul.mubr.f32.gmra.mrb[54].mxu1 %v19633_v49 }
 0x3c6   :  { %15602 = vmatpush3.bf16.msra.mxu1 %v23457_v15  ;;  %3042 = vmatprep.mubr.f32.mxu1 %v19585_v42 }
 0x3c7   :  { %15604 = vmatprep.subr.bf16.mxu1 %v23458_v38  ;;  %v23482_v38 = vld [vmem:[#allocation190_spill] sm:$0xff] }
 0x3ca   :  { %15606 = vmatpush3.bf16.msra.mxu1 %v23459_v54 }
 0x3cb   :  { %15608 = vmatprep.subr.bf16.mxu1 %v23460_v57 }
 0x3ce   :  { %15610 = vmatpush3.bf16.msra.mxu1 %v23461_v55 }
 0x3cf   :  { %15612 = vmatprep.subr.bf16.mxu1 %v23462_v56 }
 0x3d2   :  { %15614 = vmatpush3.bf16.msra.mxu1 %v23463_v2  ;;  %v11812_v25 = vpop.f32.mrb[28].mxu0  ;;  %v11850_v26 = vpop.f32.mrb[28].mxu1  ;;  %v23483_v2 = vld [vmem:[#allocation192_spill] sm:$0xff] }
 0x3d3   :  { %v11813_v32 = vpop.f32.mrb[29].mxu0  ;;  %v11851_v27 = vpop.f32.mrb[29].mxu1  ;;  %15616 = vmatprep.subr.bf16.mxu1 %v23464_v6  ;;  %v23486_v6 = vld [vmem:[#allocation198_spill] sm:$0xff] }
 0x3d4   :  { %v11814_v43 = vadd.f32 %v11813_v32, %v11812_v25  ;;  %v11852_v1 = vadd.f32 %v11851_v27, %v11850_v26  ;;  %v23484_v32 = vld [vmem:[#allocation194_spill] sm:$0xff]  ;;  %v23485_v27 = vld [vmem:[#allocation196_spill] sm:$0xff] }
 0x3d6   :  { %15618 = vmatpush3.bf16.msra.mxu1 %v23465_v46  ;;  %v11815_v61 = vpop.f32.mrb[30].mxu0  ;;  %v11853_v36 = vpop.f32.mrb[30].mxu1  ;;  %v23492_v46 = vld [vmem:[#allocation206_spill] sm:$0xff] }
 0x3d7   :  { %v11816_v11 = vpop.f32.mrb[31].mxu0  ;;  %v11854_v9 = vpop.f32.mrb[31].mxu1  ;;  %15620 = vmatprep.subr.bf16.mxu1 %v23466_v12  ;;  %v19845_v12 = vld [vmem:[%s22851_s5 + $0x20] sm:$0xff] }
 0x3d8   :  { %v11817_v60 = vadd.f32 %v11816_v11, %v11815_v61  ;;  %v11855_v59 = vadd.f32 %v11854_v9, %v11853_v36  ;;  %v19835_v61 = vld [vmem:[%s22851_s5 + $0x28] sm:$0xff]  ;;  %v23493_v36 = vld [vmem:[#allocation7_spill] sm:$0xff]  ;;  %v23494_v11 = vld [vmem:[#allocation208_spill] sm:$0xff] }
 0x3d9   :  { %v23495_v9 = vld [vmem:[#allocation8_spill] sm:$0xff] }
 0x3da   :  { %v15259_v41 = vpack.c.bf16 %v11817_v60, %v11814_v43  ;;  %v15263_v14 = vpack.c.bf16 %v11855_v59, %v11852_v1  ;;  %15622 = vmatpush3.bf16.msra.mxu1 %v23467_v63  ;;  %v23487_v43 = vld [vmem:[#allocation200_spill] sm:$0xff]  ;;  %v23488_v1 = vld [vmem:[#allocation202_spill] sm:$0xff]  ;;  %v23497_v59 = vld [vmem:[#allocation9_spill] sm:$0xff] }
 0x3db   :  { %15624 = vmatprep.subr.bf16.mxu1 %v23468_v4  ;;  %v23496_v60 = vld [vmem:[#allocation210_spill] sm:$0xff] }
 0x3dc   :  { %15260 = vmatprep.subr.bf16.mxu0 %v15259_v41  ;;  %v19852_v41 = vld [vmem:[%s22851_s5 + $0x38] sm:$0xff]  ;;  %v23499_v63 = vld [vmem:[#allocation10_spill] sm:$0xff] }
 0x3dd   :  { %15262 = vmatpush3.bf16.msra.mxu0 %v15261_v10  ;;  %v23475_v10 = vld [vmem:[#allocation176_spill] sm:$0xff]  ;;  %v19861_v4 = vld [vmem:[%s22851_s5 + $0x30] sm:$0xff] }
 0x3de   :  { %15626 = vmatpush3.bf16.msra.mxu1 %v23469_v13  ;;  %15264 = vmatprep.subr.bf16.mxu0 %v15263_v14  ;;  %v23498_v14 = vld [vmem:[#allocation212_spill] sm:$0xff]  ;;  %v23500_v13 = vld [vmem:[#allocation214_spill] sm:$0xff] }
 0x3df   :  { %15660 = vmatprep.subr.bf16.mxu1 %v23470_v33  ;;  %v23501_v33 = vld [vmem:[#allocation11_spill] sm:$0xff] }
 0x3e1   :  { %3043 = vmatmul.mubr.f32.vlgmr.msra.gmra.mrb[56].mxu1 %v19625_v53  ;;  %15266 = vmatpush3.bf16.msra.mxu0 %v15265_v47  ;;  %v23479_v47 = vld [vmem:[#allocation184_spill] sm:$0xff] }
 0x3e2   :  { %3047 = vmatprep.mubr.f32.mxu1 %v19627_v30  ;;  %15662 = vmatpush3.bf16.msra.mxu1 %v23471_v23  ;;  %v23502_v23 = vld [vmem:[#allocation216_spill] sm:$0xff] }
 0x3e3   :  { %15664 = vmatprep.subr.bf16.mxu1 %v23472_v31  ;;  %v23503_v31 = vld [vmem:[#allocation12_spill] sm:$0xff] }
 0x3e5   :  { %3048 = vmatmul.mubr.f32.gmra.mrb[58].mxu1 %v19633_v49 }
 0x3e6   :  { %15666 = vmatpush3.bf16.msra.mxu1 %v23473_v34  ;;  %3192 = vmatprep.mubr.f32.mxu1 %v19585_v42 }
 0x3e7   :  { %15668 = vmatprep.subr.bf16.mxu1 %v23474_v51  ;;  %v23504_v51 = vld [vmem:[#allocation218_spill] sm:$0xff] }
 0x3ea   :  { %15670 = vmatpush3.bf16.msra.mxu1 %v23475_v10  ;;  %v23505_v10 = vld [vmem:[#allocation13_spill] sm:$0xff] }
 0x3eb   :  { %15672 = vmatprep.subr.bf16.mxu1 %v23476_v45 }
 0x3ee   :  { %15674 = vmatpush3.bf16.msra.mxu1 %v23477_v62 }
 0x3ef   :  { %15676 = vmatprep.subr.bf16.mxu1 %v23478_v48  ;;  %v23506_v48 = vld [vmem:[#allocation220_spill] sm:$0xff] }
 0x3f2   :  { %15678 = vmatpush3.bf16.msra.mxu1 %v23479_v47  ;;  %v23507_v47 = vld [vmem:[#allocation14_spill] sm:$0xff] }
 0x3f3   :  { %v11888_v5 = vpop.f32.mrb[32].mxu0  ;;  %v11926_v8 = vpop.f32.mrb[32].mxu1  ;;  %15680 = vmatprep.subr.bf16.mxu1 %v23480_v22  ;;  %v23509_v22 = vld [vmem:[#allocation15_spill] sm:$0xff] }
 0x3f4   :  { %v11889_v39 = vpop.f32.mrb[33].mxu0  ;;  %v11927_v29 = vpop.f32.mrb[33].mxu1 }
 0x3f5   :  { %v11890_v44 = vadd.f32 %v11889_v39, %v11888_v5  ;;  %v11928_v58 = vadd.f32 %v11927_v29, %v11926_v8  ;;  %v23508_v5 = vld [vmem:[#allocation222_spill] sm:$0xff] }
 0x3f6   :  { %15682 = vmatpush3.bf16.msra.mxu1 %v23481_v20  ;;  %v23511_v20 = vld [vmem:[#allocation17_spill] sm:$0xff] }
 0x3f7   :  { %v11891_v0 = vpop.f32.mrb[34].mxu0  ;;  %v11929_v15 = vpop.f32.mrb[34].mxu1  ;;  %15684 = vmatprep.subr.bf16.mxu1 %v23482_v38  ;;  %v23515_v38 = vld [vmem:[#allocation21_spill] sm:$0xff] }
 0x3f8   :  { %v11892_v54 = vpop.f32.mrb[35].mxu0  ;;  %v11930_v57 = vpop.f32.mrb[35].mxu1 }
 0x3f9   :  { %v11893_v55 = vadd.f32 %v11892_v54, %v11891_v0  ;;  %v11931_v56 = vadd.f32 %v11930_v57, %v11929_v15  ;;  %v23512_v0 = vld [vmem:[#allocation18_spill] sm:$0xff]  ;;  %v23513_v15 = vld [vmem:[#allocation19_spill] sm:$0xff]  ;;  %v23518_v54 = vld [vmem:[#allocation24_spill] sm:$0xff] }
 0x3fa   :  { %15686 = vmatpush3.bf16.msra.mxu1 %v23483_v2  ;;  %v23519_v57 = vld [vmem:[#allocation25_spill] sm:$0xff]  ;;  %v23522_v2 = vld [vmem:[#allocation28_spill] sm:$0xff] }
 0x3fb   :  { %v15267_v25 = vpack.c.bf16 %v11893_v55, %v11890_v44  ;;  %v15271_v26 = vpack.c.bf16 %v11931_v56, %v11928_v58  ;;  %15688 = vmatprep.subr.bf16.mxu1 %v23484_v32  ;;  %v23510_v44 = vld [vmem:[#allocation16_spill] sm:$0xff]  ;;  %v23520_v55 = vld [vmem:[#allocation26_spill] sm:$0xff]  ;;  %v23521_v56 = vld [vmem:[#allocation27_spill] sm:$0xff] }
 0x3fd   :  { %15268 = vmatprep.subr.bf16.mxu0 %v15267_v25  ;;  %v23523_v25 = vld [vmem:[#allocation29_spill] sm:$0xff] }
 0x3fe   :  { %15690 = vmatpush3.bf16.msra.mxu1 %v23485_v27  ;;  %15270 = vmatpush3.bf16.msra.mxu0 %v15269_v17  ;;  %v19819_v17 = vld [vmem:[%s22851_s5 + $0x18] sm:$0xff]  ;;  %v23524_v27 = vld [vmem:[#allocation30_spill] sm:$0xff] }
 0x3ff   :  { %15272 = vmatprep.subr.bf16.mxu0 %v15271_v26  ;;  %15724 = vmatprep.subr.bf16.mxu1 %v23486_v6 }
 0x401   :  { %3193 = vmatmul.mubr.f32.vlgmr.msra.gmra.mrb[60].mxu1 %v19625_v53 }
 0x402   :  { %3197 = vmatprep.mubr.f32.mxu1 %v19627_v30  ;;  %15726 = vmatpush3.bf16.msra.mxu1 %v23487_v43  ;;  %v23525_v43 = vld [vmem:[#allocation31_spill] sm:$0xff] }
 0x403   :  { %15274 = vmatpush3.bf16.msra.mxu0 %v15273_v16  ;;  %15728 = vmatprep.subr.bf16.mxu1 %v23488_v1  ;;  %v19828_v16 = vld [vmem:[%s22851_s5 + $0x10] sm:$0xff] }
 0x404   :  { %15308 = vmatprep.subr.bf16.mxu0 %v23489_v19 }
 0x405   :  { %3198 = vmatmul.mubr.f32.gmra.mrb[62].mxu1 %v19633_v49 }
 0x406   :  { %2208 = vmatmul.mubr.f32.vlgmr.msra.gmra.mrb[36].mxu0 %v19812_v3  ;;  %15730 = vmatpush3.bf16.msra.mxu1 %v23490_v18  ;;  %v23526_v18 = vld [vmem:[#allocation32_spill] sm:$0xff] }
 0x407   :  { %3342 = vmatprep.mubr.f32.mxu1 %v19585_v42  ;;  %15310 = vmatpush3.bf16.msra.mxu0 %v23491_v21 }
 0x408   :  { %2212 = vmatprep.mubr.f32.mxu0 %v19819_v17  ;;  %15732 = vmatprep.subr.bf16.mxu1 %v23492_v46  ;;  %v23527_v46 = vld [vmem:[#allocation33_spill] sm:$0xff] }
 0x409   :  { %15312 = vmatprep.subr.bf16.mxu0 %v23493_v36  ;;  %v23528_v36 = vld [vmem:[#allocation34_spill] sm:$0xff] }
 0x40a   :  { %2213 = vmatmul.mubr.f32.gmra.mrb[38].mxu0 %v19828_v16  ;;  %15734 = vmatpush3.bf16.msra.mxu1 %v23494_v11  ;;  %v23529_v11 = vld [vmem:[#allocation35_spill] sm:$0xff] }
 0x40b   :  { %15314 = vmatpush3.bf16.msra.mxu0 %v23495_v9  ;;  %2217 = vmatprep.mubr.f32.mxu0 %v19835_v61  ;;  %v23530_v9 = vld [vmem:[#allocation37_spill] sm:$0xff] }
 0x40c   :  { %15736 = vmatprep.subr.bf16.mxu1 %v23496_v60  ;;  %15316 = vmatprep.subr.bf16.mxu0 %v23497_v59  ;;  %v23531_v60 = vld [vmem:[#allocation39_spill] sm:$0xff]  ;;  %v23532_v59 = vld [vmem:[#allocation41_spill] sm:$0xff] }
 0x40e   :  { %2218 = vmatmul.mubr.f32.gmra.mrb[40].mxu0 %v19845_v12  ;;  %15738 = vmatpush3.bf16.msra.mxu1 %v23498_v14  ;;  %v23533_v14 = vld [vmem:[#allocation43_spill] sm:$0xff] }
 0x40f   :  { %15318 = vmatpush3.bf16.msra.mxu0 %v23499_v63  ;;  %2222 = vmatprep.mubr.f32.mxu0 %v19852_v41  ;;  %v23534_v63 = vld [vmem:[#allocation45_spill] sm:$0xff] }
 0x410   :  { %15740 = vmatprep.subr.bf16.mxu1 %v23500_v13  ;;  %15320 = vmatprep.subr.bf16.mxu0 %v23501_v33  ;;  %v23535_v13 = vld [vmem:[#allocation47_spill] sm:$0xff]  ;;  %v23536_v33 = vld [vmem:[#allocation49_spill] sm:$0xff] }
 0x412   :  { %2223 = vmatmul.mubr.f32.gmra.mrb[42].mxu0 %v19861_v4  ;;  %15742 = vmatpush3.bf16.msra.mxu1 %v23502_v23  ;;  %v23537_v23 = vld [vmem:[#allocation51_spill] sm:$0xff] }
 0x413   :  { %15322 = vmatpush3.bf16.msra.mxu0 %v23503_v31  ;;  %2367 = vmatprep.mubr.f32.mxu0 %v19585_v42  ;;  %v23538_v31 = vld [vmem:[#allocation53_spill] sm:$0xff] }
 0x414   :  { %v12008_v34 = vpop.f32.mrb[36].mxu1  ;;  %15744 = vmatprep.subr.bf16.mxu1 %v23504_v51  ;;  %15324 = vmatprep.subr.bf16.mxu0 %v23505_v10  ;;  %v23539_v51 = vld [vmem:[#allocation55_spill] sm:$0xff] }
 0x415   :  { %v12009_v45 = vpop.f32.mrb[37].mxu1 }
 0x416   :  { %v19871_v62 = vadd.f32 %v12009_v45, %v12008_v34  ;;  %15746 = vmatpush3.bf16.msra.mxu1 %v23506_v48  ;;  %v23540_v48 = vld [vmem:[#allocation57_spill] sm:$0xff] }
 0x417   :  { %15326 = vmatpush3.bf16.msra.mxu0 %v23507_v47  ;;  %15748 = vmatprep.subr.bf16.mxu1 %v23508_v5  ;;  %v23541_v5 = vld [vmem:[#allocation59_spill] sm:$0xff] }
 0x418   :  { %v12011_v8 = vpop.f32.mrb[38].mxu1  ;;  %15328 = vmatprep.subr.bf16.mxu0 %v23509_v22 }
 0x419   :  { %v12012_v39 = vpop.f32.mrb[39].mxu1 }
 0x41a   :  { %v19877_v29 = vadd.f32 %v12012_v39, %v12011_v8  ;;  %15750 = vmatpush3.bf16.msra.mxu1 %v19535_v28  ;;  %v23514_v28 = vld [vmem:[#allocation20_spill] sm:$0xff]  ;;  %v23542_v39 = vld [vmem:[#allocation61_spill] sm:$0xff] }
 0x41b   :  { %15330 = vmatpush3.bf16.msra.mxu0 %v23510_v44  ;;  %15752 = vmatprep.subr.bf16.mxu1 %v19547_v37  ;;  %v23517_v37 = vld [vmem:[#allocation23_spill] sm:$0xff] }
 0x41c   :  { %v15789_v58 = vpack.c.bf16 %v19877_v29, %v19871_v62  ;;  %15332 = vmatprep.subr.bf16.mxu0 %v23511_v20  ;;  %v23543_v20 = vld [vmem:[#allocation63_spill] sm:$0xff]  ;;  %v23584_v29 = vld [vmem:[#allocation145_spill] sm:$0xff] }
 0x41d   :  { %v23583_v62 = vld [vmem:[#allocation143_spill] sm:$0xff] }
 0x41e   :  { %15754 = vmatpush3.bf16.msra.mxu1 %v19561_v35  ;;  %v23516_v35 = vld [vmem:[#allocation22_spill] sm:$0xff] }
 0x41f   :  { %15334 = vmatpush3.bf16.msra.mxu0 %v23512_v0  ;;  %v23544_v0 = vld [vmem:[#allocation65_spill] sm:$0xff] }
 0x420   :  { %15336 = vmatprep.subr.bf16.mxu0 %v23513_v15  ;;  %v23545_v15 = vld [vmem:[#allocation67_spill] sm:$0xff] }
 0x421   :  { %3343 = vmatmul.mubr.f32.vlgmr.msra.gmra.mrb[64].mxu1 %v19625_v53 }
 0x422   :  { %3347 = vmatprep.mubr.f32.mxu1 %v19627_v30 }
 0x423   :  { %15338 = vmatpush3.bf16.msra.mxu0 %v23514_v28  ;;  %v23546_v28 = vld [vmem:[#allocation69_spill] sm:$0xff] }
 0x424   :  { %15372 = vmatprep.subr.bf16.mxu0 %v23515_v38  ;;  %v23547_v38 = vld [vmem:[#allocation71_spill] sm:$0xff] }
 0x425   :  { %3348 = vmatmul.mubr.f32.gmra.mrb[66].mxu1 %v19633_v49 }
 0x426   :  { %2368 = vmatmul.mubr.f32.vlgmr.msra.gmra.mrb[44].mxu0 %v19625_v53  ;;  %3492 = vmatprep.mubr.f32.mxu1 %v19702_v50 }
 0x427   :  { %2372 = vmatprep.mubr.f32.mxu0 %v19627_v30  ;;  %15374 = vmatpush3.bf16.msra.mxu0 %v23516_v35  ;;  %v23548_v35 = vld [vmem:[#allocation73_spill] sm:$0xff] }
 0x428   :  { %15376 = vmatprep.subr.bf16.mxu0 %v23517_v37  ;;  %v23549_v37 = vld [vmem:[#allocation75_spill] sm:$0xff] }
 0x42a   :  { %2373 = vmatmul.mubr.f32.gmra.mrb[46].mxu0 %v19633_v49 }
 0x42b   :  { %15378 = vmatpush3.bf16.msra.mxu0 %v23518_v54  ;;  %2517 = vmatprep.mubr.f32.mxu0 %v19585_v42  ;;  %v23550_v54 = vld [vmem:[#allocation77_spill] sm:$0xff] }
 0x42c   :  { %15380 = vmatprep.subr.bf16.mxu0 %v23519_v57  ;;  %v23551_v57 = vld [vmem:[#allocation79_spill] sm:$0xff] }
 0x42f   :  { %15382 = vmatpush3.bf16.msra.mxu0 %v23520_v55  ;;  %v23552_v55 = vld [vmem:[#allocation81_spill] sm:$0xff] }
 0x430   :  { %15384 = vmatprep.subr.bf16.mxu0 %v23521_v56  ;;  %v23553_v56 = vld [vmem:[#allocation83_spill] sm:$0xff] }
 0x433   :  { %15386 = vmatpush3.bf16.msra.mxu0 %v23522_v2  ;;  %v23554_v2 = vld [vmem:[#allocation85_spill] sm:$0xff] }
 0x434   :  { %v12084_v50 = vpop.f32.mrb[40].mxu1  ;;  %15388 = vmatprep.subr.bf16.mxu0 %v23523_v25  ;;  %v23555_v25 = vld [vmem:[#allocation87_spill] sm:$0xff] }
 0x435   :  { %v12085_v26 = vpop.f32.mrb[41].mxu1 }
 0x436   :  { %v19906_v32 = vadd.f32 %v12085_v26, %v12084_v50 }
 0x437   :  { %15390 = vmatpush3.bf16.msra.mxu0 %v23524_v27 }
 0x438   :  { %v12087_v6 = vpop.f32.mrb[42].mxu1  ;;  %15392 = vmatprep.subr.bf16.mxu0 %v23525_v43 }
 0x439   :  { %v12088_v1 = vpop.f32.mrb[43].mxu1 }
 0x43a   :  { %v19910_v19 = vadd.f32 %v12088_v1, %v12087_v6  ;;  %v23556_v6 = vld [vmem:[#allocation89_spill] sm:$0xff]  ;;  %v23557_v1 = vld [vmem:[#allocation91_spill] sm:$0xff] }
 0x43b   :  { %15394 = vmatpush3.bf16.msra.mxu0 %v23526_v18 }
 0x43c   :  { %v15797_v21 = vpack.c.bf16 %v19910_v19, %v19906_v32  ;;  %15396 = vmatprep.subr.bf16.mxu0 %v23527_v46 }
 0x43f   :  { %15398 = vmatpush3.bf16.msra.mxu0 %v23528_v36  ;;  %v23558_v36 = vld [vmem:[#allocation93_spill] sm:$0xff] }
 0x440   :  { %15400 = vmatprep.subr.bf16.mxu0 %v23529_v11 }
 0x443   :  { %15402 = vmatpush3.bf16.msra.mxu0 %v23530_v9  ;;  %v23559_v9 = vld [vmem:[#allocation95_spill] sm:$0xff] }
 0x444   :  { %15436 = vmatprep.subr.bf16.mxu0 %v23531_v60  ;;  %v23560_v60 = vld [vmem:[#allocation97_spill] sm:$0xff] }
 0x446   :  { %2518 = vmatmul.mubr.f32.vlgmr.msra.gmra.mrb[48].mxu0 %v19625_v53 }
 0x447   :  { %2522 = vmatprep.mubr.f32.mxu0 %v19627_v30  ;;  %15438 = vmatpush3.bf16.msra.mxu0 %v23532_v59  ;;  %v23561_v59 = vld [vmem:[#allocation99_spill] sm:$0xff] }
 0x448   :  { %15440 = vmatprep.subr.bf16.mxu0 %v23533_v14  ;;  %v23562_v14 = vld [vmem:[#allocation101_spill] sm:$0xff] }
 0x44a   :  { %2523 = vmatmul.mubr.f32.gmra.mrb[50].mxu0 %v19633_v49 }
 0x44b   :  { %15442 = vmatpush3.bf16.msra.mxu0 %v23534_v63  ;;  %2667 = vmatprep.mubr.f32.mxu0 %v19585_v42  ;;  %v23563_v63 = vld [vmem:[#allocation103_spill] sm:$0xff] }
 0x44c   :  { %15444 = vmatprep.subr.bf16.mxu0 %v23535_v13  ;;  %v23564_v13 = vld [vmem:[#allocation105_spill] sm:$0xff] }
 0x44f   :  { %15446 = vmatpush3.bf16.msra.mxu0 %v23536_v33  ;;  %v23565_v33 = vld [vmem:[#allocation107_spill] sm:$0xff] }
 0x450   :  { %15448 = vmatprep.subr.bf16.mxu0 %v23537_v23  ;;  %v23566_v23 = vld [vmem:[#allocation109_spill] sm:$0xff] }
 0x453   :  { %15450 = vmatpush3.bf16.msra.mxu0 %v23538_v31  ;;  %v23567_v31 = vld [vmem:[#allocation111_spill] sm:$0xff] }
 0x454   :  { %v12160_v34 = vpop.f32.mrb[44].mxu1  ;;  %15452 = vmatprep.subr.bf16.mxu0 %v23539_v51  ;;  %v23569_v51 = vld [vmem:[#allocation115_spill] sm:$0xff] }
 0x455   :  { %v12161_v10 = vpop.f32.mrb[45].mxu1 }
 0x456   :  { %v19932_v45 = vadd.f32 %v12161_v10, %v12160_v34  ;;  %v23568_v34 = vld [vmem:[#allocation113_spill] sm:$0xff] }
 0x457   :  { %15454 = vmatpush3.bf16.msra.mxu0 %v23540_v48  ;;  %v23570_v10 = vld [vmem:[#allocation117_spill] sm:$0xff] }
 0x458   :  { %v12163_v47 = vpop.f32.mrb[46].mxu1  ;;  %15456 = vmatprep.subr.bf16.mxu0 %v23541_v5 }
 0x459   :  { %v12164_v8 = vpop.f32.mrb[47].mxu1 }
 0x45a   :  { %v19936_v22 = vadd.f32 %v12164_v8, %v12163_v47  ;;  %v23571_v47 = vld [vmem:[#allocation119_spill] sm:$0xff] }
 0x45b   :  { %15458 = vmatpush3.bf16.msra.mxu0 %v23542_v39  ;;  %v23572_v39 = vld [vmem:[#allocation121_spill] sm:$0xff] }
 0x45c   :  { %v15805_v44 = vpack.c.bf16 %v19936_v22, %v19932_v45  ;;  %15460 = vmatprep.subr.bf16.mxu0 %v23543_v20 }
 0x45f   :  { %15462 = vmatpush3.bf16.msra.mxu0 %v23544_v0  ;;  %v23573_v0 = vld [vmem:[#allocation123_spill] sm:$0xff] }
 0x460   :  { %15464 = vmatprep.subr.bf16.mxu0 %v23545_v15 }
 0x463   :  { %15466 = vmatpush3.bf16.msra.mxu0 %v23546_v28 }
 0x464   :  { %15500 = vmatprep.subr.bf16.mxu0 %v23547_v38  ;;  %v23574_v38 = vld [vmem:[#allocation125_spill] sm:$0xff] }
 0x466   :  { %2668 = vmatmul.mubr.f32.vlgmr.msra.gmra.mrb[52].mxu0 %v19625_v53 }
 0x467   :  { %2672 = vmatprep.mubr.f32.mxu0 %v19627_v30  ;;  %15502 = vmatpush3.bf16.msra.mxu0 %v23548_v35 }
 0x468   :  { %15504 = vmatprep.subr.bf16.mxu0 %v23549_v37  ;;  %v23575_v37 = vld [vmem:[#allocation127_spill] sm:$0xff] }
 0x46a   :  { %2673 = vmatmul.mubr.f32.gmra.mrb[54].mxu0 %v19633_v49 }
 0x46b   :  { %15506 = vmatpush3.bf16.msra.mxu0 %v23550_v54  ;;  %2817 = vmatprep.mubr.f32.mxu0 %v19585_v42  ;;  %v23576_v54 = vld [vmem:[#allocation129_spill] sm:$0xff] }
 0x46c   :  { %15508 = vmatprep.subr.bf16.mxu0 %v23551_v57  ;;  %v23577_v57 = vld [vmem:[#allocation131_spill] sm:$0xff] }
 0x46f   :  { %15510 = vmatpush3.bf16.msra.mxu0 %v23552_v55  ;;  %v23578_v55 = vld [vmem:[#allocation133_spill] sm:$0xff] }
 0x470   :  { %15512 = vmatprep.subr.bf16.mxu0 %v23553_v56  ;;  %v23579_v56 = vld [vmem:[#allocation135_spill] sm:$0xff] }
 0x473   :  { %15514 = vmatpush3.bf16.msra.mxu0 %v23554_v2  ;;  %v23580_v2 = vld [vmem:[#allocation137_spill] sm:$0xff] }
 0x474   :  { %v12236_v50 = vpop.f32.mrb[48].mxu1  ;;  %15516 = vmatprep.subr.bf16.mxu0 %v23555_v25  ;;  %v23582_v25 = vld [vmem:[#allocation141_spill] sm:$0xff] }
 0x475   :  { %v12237_v26 = vpop.f32.mrb[49].mxu1 }
 0x476   :  { %v19958_v27 = vadd.f32 %v12237_v26, %v12236_v50  ;;  %v23581_v50 = vld [vmem:[#allocation139_spill] sm:$0xff]  ;;  %v23586_v26 = vld [vmem:[#allocation149_spill] sm:$0xff] }
 0x477   :  { %15518 = vmatpush3.bf16.msra.mxu0 %v23556_v6 }
 0x478   :  { %v12239_v43 = vpop.f32.mrb[50].mxu1  ;;  %15520 = vmatprep.subr.bf16.mxu0 %v23557_v1 }
 0x479   :  { %v12240_v18 = vpop.f32.mrb[51].mxu1 }
 0x47a   :  { %v19962_v46 = vadd.f32 %v12240_v18, %v12239_v43  ;;  %v23587_v43 = vld [vmem:[#allocation151_spill] sm:$0xff] }
 0x47b   :  { %15522 = vmatpush3.bf16.msra.mxu0 %v23558_v36  ;;  %v23588_v36 = vld [vmem:[#allocation153_spill] sm:$0xff] }
 0x47c   :  { %v15813_v11 = vpack.c.bf16 %v19962_v46, %v19958_v27  ;;  %15524 = vmatprep.subr.bf16.mxu0 %v23559_v9 }
 0x47f   :  { %15526 = vmatpush3.bf16.msra.mxu0 %v23560_v60  ;;  %v23589_v60 = vld [vmem:[#allocation155_spill] sm:$0xff] }
 0x480   :  { %15528 = vmatprep.subr.bf16.mxu0 %v23561_v59 }
 0x483   :  { %15530 = vmatpush3.bf16.msra.mxu0 %v23562_v14 }
 0x484   :  { %15564 = vmatprep.subr.bf16.mxu0 %v23563_v63  ;;  %v23590_v63 = vld [vmem:[#allocation157_spill] sm:$0xff] }
 0x486   :  { %2818 = vmatmul.mubr.f32.vlgmr.msra.gmra.mrb[56].mxu0 %v19625_v53 }
 0x487   :  { %2822 = vmatprep.mubr.f32.mxu0 %v19627_v30  ;;  %15566 = vmatpush3.bf16.msra.mxu0 %v23564_v13 }
 0x488   :  { %15568 = vmatprep.subr.bf16.mxu0 %v23565_v33  ;;  %v23591_v33 = vld [vmem:[#allocation159_spill] sm:$0xff] }
 0x48a   :  { %2823 = vmatmul.mubr.f32.gmra.mrb[58].mxu0 %v19633_v49 }
 0x48b   :  { %15570 = vmatpush3.bf16.msra.mxu0 %v23566_v23  ;;  %2967 = vmatprep.mubr.f32.mxu0 %v19585_v42  ;;  %v23592_v23 = vld [vmem:[#allocation161_spill] sm:$0xff] }
 0x48c   :  { %15572 = vmatprep.subr.bf16.mxu0 %v23567_v31  ;;  %v23593_v31 = vld [vmem:[#allocation163_spill] sm:$0xff] }
 0x48f   :  { %15574 = vmatpush3.bf16.msra.mxu0 %v23568_v34  ;;  %v23594_v34 = vld [vmem:[#allocation165_spill] sm:$0xff] }
 0x490   :  { %15576 = vmatprep.subr.bf16.mxu0 %v23569_v51  ;;  %v23595_v51 = vld [vmem:[#allocation167_spill] sm:$0xff] }
 0x493   :  { %15578 = vmatpush3.bf16.msra.mxu0 %v23570_v10  ;;  %v23596_v10 = vld [vmem:[#allocation169_spill] sm:$0xff] }
 0x494   :  { %v12312_v48 = vpop.f32.mrb[52].mxu1  ;;  %15580 = vmatprep.subr.bf16.mxu0 %v23571_v47  ;;  %v23598_v47 = vld [vmem:[#allocation173_spill] sm:$0xff] }
 0x495   :  { %v12313_v5 = vpop.f32.mrb[53].mxu1 }
 0x496   :  { %v12314_v8 = vadd.f32 %v12313_v5, %v12312_v48  ;;  %v23597_v48 = vld [vmem:[#allocation171_spill] sm:$0xff] }
 0x497   :  { %15582 = vmatpush3.bf16.msra.mxu0 %v23572_v39  ;;  %v23599_v5 = vld [vmem:[#allocation175_spill] sm:$0xff] }
 0x498   :  { %v12315_v20 = vpop.f32.mrb[54].mxu1  ;;  %15584 = vmatprep.subr.bf16.mxu0 %v23573_v0  ;;  %v23601_v39 = vld [vmem:[#allocation179_spill] sm:$0xff] }
 0x499   :  { %v12316_v15 = vpop.f32.mrb[55].mxu1 }
 0x49a   :  { %v12317_v28 = vadd.f32 %v12316_v15, %v12315_v20  ;;  %v23602_v20 = vld [vmem:[#allocation181_spill] sm:$0xff]  ;;  %v23603_v15 = vld [vmem:[#allocation183_spill] sm:$0xff] }
 0x49b   :  { %15586 = vmatpush3.bf16.msra.mxu0 %v23574_v38 }
 0x49c   :  { %v15787_v35 = vpack.c.bf16 %v12317_v28, %v12314_v8  ;;  %15588 = vmatprep.subr.bf16.mxu0 %v23575_v37  ;;  %v23600_v8 = vld [vmem:[#allocation177_spill] sm:$0xff] }
 0x49e   :  { %15788 = vmatprep.subr.bf16.mxu1 %v15787_v35  ;;  %v23604_v35 = vld [vmem:[#allocation185_spill] sm:$0xff] }
 0x49f   :  { %15590 = vmatpush3.bf16.msra.mxu0 %v23576_v54  ;;  %15790 = vmatpush3.bf16.msra.mxu1 %v15789_v58  ;;  %v23585_v58 = vld [vmem:[#allocation147_spill] sm:$0xff] }
 0x4a0   :  { %15592 = vmatprep.subr.bf16.mxu0 %v23577_v57  ;;  %v23605_v54 = vld [vmem:[#allocation187_spill] sm:$0xff] }
 0x4a3   :  { %15594 = vmatpush3.bf16.msra.mxu0 %v23578_v55 }
 0x4a4   :  { %15628 = vmatprep.subr.bf16.mxu0 %v23579_v56 }
 0x4a6   :  { %2968 = vmatmul.mubr.f32.vlgmr.msra.gmra.mrb[60].mxu0 %v19625_v53 }
 0x4a7   :  { %2972 = vmatprep.mubr.f32.mxu0 %v19627_v30  ;;  %15630 = vmatpush3.bf16.msra.mxu0 %v23580_v2 }
 0x4a8   :  { %15632 = vmatprep.subr.bf16.mxu0 %v23581_v50 }
 0x4aa   :  { %2973 = vmatmul.mubr.f32.gmra.mrb[62].mxu0 %v19633_v49 }
 0x4ab   :  { %15634 = vmatpush3.bf16.msra.mxu0 %v23582_v25  ;;  %3117 = vmatprep.mubr.f32.mxu0 %v19585_v42  ;;  %v23606_v25 = vld [vmem:[#allocation189_spill] sm:$0xff] }
 0x4ac   :  { %15636 = vmatprep.subr.bf16.mxu0 %v23583_v62 }
 0x4af   :  { %15638 = vmatpush3.bf16.msra.mxu0 %v23584_v29  ;;  %v23607_v29 = vld [vmem:[#allocation191_spill] sm:$0xff] }
 0x4b0   :  { %15640 = vmatprep.subr.bf16.mxu0 %v23585_v58 }
 0x4b3   :  { %15642 = vmatpush3.bf16.msra.mxu0 %v23586_v26 }
 0x4b4   :  { %v12388_v6 = vpop.f32.mrb[56].mxu1  ;;  %15644 = vmatprep.subr.bf16.mxu0 %v23587_v43 }
 0x4b5   :  { %v12389_v1 = vpop.f32.mrb[57].mxu1 }
 0x4b6   :  { %v20007_v18 = vadd.f32 %v12389_v1, %v12388_v6  ;;  %v23608_v1 = vld [vmem:[#allocation193_spill] sm:$0xff] }
 0x4b7   :  { %15646 = vmatpush3.bf16.msra.mxu0 %v23588_v36 }
 0x4b8   :  { %v12391_v9 = vpop.f32.mrb[58].mxu1  ;;  %15648 = vmatprep.subr.bf16.mxu0 %v23589_v60 }
 0x4b9   :  { %v12392_v59 = vpop.f32.mrb[59].mxu1 }
 0x4ba   :  { %v20011_v14 = vadd.f32 %v12392_v59, %v12391_v9  ;;  %v23609_v9 = vld [vmem:[#allocation195_spill] sm:$0xff] }
 0x4bb   :  { %15650 = vmatpush3.bf16.msra.mxu0 %v23590_v63 }
 0x4bc   :  { %v15795_v13 = vpack.c.bf16 %v20011_v14, %v20007_v18  ;;  %15652 = vmatprep.subr.bf16.mxu0 %v23591_v33 }
 0x4bf   :  { %15654 = vmatpush3.bf16.msra.mxu0 %v23592_v23  ;;  %v23610_v23 = vld [vmem:[#allocation197_spill] sm:$0xff] }
 0x4c0   :  { %15656 = vmatprep.subr.bf16.mxu0 %v23593_v31 }
 0x4c3   :  { %15658 = vmatpush3.bf16.msra.mxu0 %v23594_v34 }
 0x4c4   :  { %15692 = vmatprep.subr.bf16.mxu0 %v23595_v51 }
 0x4c6   :  { %3118 = vmatmul.mubr.f32.vlgmr.msra.gmra.mrb[64].mxu0 %v19625_v53 }
 0x4c7   :  { %3122 = vmatprep.mubr.f32.mxu0 %v19627_v30  ;;  %15694 = vmatpush3.bf16.msra.mxu0 %v23596_v10  ;;  %v23611_v10 = vld [vmem:[#allocation199_spill] sm:$0xff] }
 0x4c8   :  { %15696 = vmatprep.subr.bf16.mxu0 %v23597_v48 }
 0x4ca   :  { %3123 = vmatmul.mubr.f32.gmra.mrb[66].mxu0 %v19633_v49 }
 0x4cb   :  { %15698 = vmatpush3.bf16.msra.mxu0 %v23598_v47  ;;  %3267 = vmatprep.mubr.f32.mxu0 %v19585_v42 }
 0x4cc   :  { %15700 = vmatprep.subr.bf16.mxu0 %v23599_v5  ;;  %v23612_v5 = vld [vmem:[#allocation201_spill] sm:$0xff] }
 0x4cf   :  { %15702 = vmatpush3.bf16.msra.mxu0 %v23600_v8 }
 0x4d0   :  { %15704 = vmatprep.subr.bf16.mxu0 %v23601_v39  ;;  %v23613_v39 = vld [vmem:[#allocation203_spill] sm:$0xff] }
 0x4d3   :  { %15706 = vmatpush3.bf16.msra.mxu0 %v23602_v20  ;;  %v23614_v20 = vld [vmem:[#allocation205_spill] sm:$0xff] }
 0x4d4   :  { %v12464_v0 = vpop.f32.mrb[60].mxu1  ;;  %15708 = vmatprep.subr.bf16.mxu0 %v23603_v15  ;;  %v23616_v15 = vld [vmem:[#allocation209_spill] sm:$0xff] }
 0x4d5   :  { %v12465_v28 = vpop.f32.mrb[61].mxu1 }
 0x4d6   :  { %v20033_v38 = vadd.f32 %v12465_v28, %v12464_v0  ;;  %v23615_v0 = vld [vmem:[#allocation207_spill] sm:$0xff] }
 0x4d7   :  { %15710 = vmatpush3.bf16.msra.mxu0 %v23604_v35  ;;  %v23617_v28 = vld [vmem:[#allocation211_spill] sm:$0xff]  ;;  %v23618_v35 = vld [vmem:[#allocation213_spill] sm:$0xff] }
 0x4d8   :  { %v12467_v37 = vpop.f32.mrb[62].mxu1  ;;  %15712 = vmatprep.subr.bf16.mxu0 %v23605_v54  ;;  %v23619_v54 = vld [vmem:[#allocation215_spill] sm:$0xff] }
 0x4d9   :  { %v11964_v57 = vpop.f32.mrb[36].mxu0  ;;  %v12468_v55 = vpop.f32.mrb[63].mxu1 }
 0x4da   :  { %v20037_v56 = vadd.f32 %v12468_v55, %v12467_v37  ;;  %v11965_v2 = vpop.f32.mrb[37].mxu0 }
 0x4db   :  { %v20039_v50 = vadd.f32 %v11965_v2, %v11964_v57  ;;  %15714 = vmatpush3.bf16.msra.mxu0 %v23606_v25  ;;  %v23620_v2 = vld [vmem:[#allocation217_spill] sm:$0xff] }
 0x4dc   :  { %v15803_v62 = vpack.c.bf16 %v20037_v56, %v20033_v38  ;;  %15716 = vmatprep.subr.bf16.mxu0 %v23607_v29  ;;  %v23621_v29 = vld [vmem:[#allocation219_spill] sm:$0xff] }
 0x4dd   :  { %v3522_v58 = vsel %vm3521_vm8, %v20039_v50, 0.0  ;;  %v3538_v26 = vmul.f32 %v20039_v50, %v20039_v50  ;;  %v11967_v6 = vpop.f32.mrb[38].mxu0 }
 0x4de   :  { %3523 = vadd.xlane.f32.xlu1 %v3522_v58  ;;  %v11968_v43 = vpop.f32.mrb[39].mxu0 }
 0x4df   :  { %15718 = vmatpush3.bf16.msra.mxu0 %v23608_v1  ;;  %v20050_v36 = vadd.f32 %v11968_v43, %v11967_v6  ;;  %v3542_v60 = vsel %vm3521_vm8, %v3538_v26, 0.0  ;;  %v23622_v1 = vld [vmem:[#allocation221_spill] sm:$0xff] }
 0x4e0   :  { %15720 = vmatprep.subr.bf16.mxu0 %v23609_v9 }
 0x4e1   :  { %v11970_v59 = vpop.f32.mrb[40].mxu0  ;;  %v3539_v63 = vmul.f32 %v20050_v36, %v20050_v36  ;;  %v3525_v34 = vsel %vm3521_vm8, %v20050_v36, 0.0 }
 0x4e2   :  { %3543 = vadd.xlane.f32.xlu1 %v3542_v60  ;;  %v11971_v33 = vpop.f32.mrb[41].mxu0 }
 0x4e3   :  { %15722 = vmatpush3.bf16.msra.mxu0 %v23610_v23  ;;  %v20057_v31 = vadd.f32 %v11971_v33, %v11970_v59  ;;  %v3545_v51 = vsel %vm3521_vm8, %v3539_v63, 0.0 }
 0x4e4   :  { %15756 = vmatprep.subr.bf16.mxu0 %v23611_v10  ;;  %3546 = vadd.xlane.f32.xlu0 %v3545_v51 }
 0x4e5   :  { %v11973_v48 = vpop.f32.mrb[42].mxu0 }
 0x4e6   :  { %3268 = vmatmul.mubr.f32.vlgmr.msra.gmra.mrb[68].mxu0 %v19625_v53  ;;  %3526 = vadd.xlane.f32.xlu1 %v3525_v34  ;;  %v11974_v47 = vpop.f32.mrb[43].mxu0 }
 0x4e7   :  { %3272 = vmatprep.mubr.f32.mxu0 %v19627_v30  ;;  %15758 = vmatpush3.bf16.msra.mxu0 %v23612_v5  ;;  %v20066_v8 = vadd.f32 %v11974_v47, %v11973_v48 }
 0x4e8   :  { %15760 = vmatprep.subr.bf16.mxu0 %v23613_v39 }
 0x4ea   :  { %3273 = vmatmul.mubr.f32.gmra.mrb[70].mxu0 %v19633_v49 }
 0x4eb   :  { %15762 = vmatpush3.bf16.msra.mxu0 %v23614_v20  ;;  %3417 = vmatprep.mubr.f32.mxu0 %v19585_v42 }
 0x4ec   :  { %15764 = vmatprep.subr.bf16.mxu0 %v23615_v0 }
 0x4ef   :  { %15766 = vmatpush3.bf16.msra.mxu0 %v23616_v15 }
 0x4f0   :  { %15768 = vmatprep.subr.bf16.mxu0 %v23617_v28 }
 0x4f3   :  { %15770 = vmatpush3.bf16.msra.mxu0 %v23618_v35 }
 0x4f4   :  { %v12540_v37 = vpop.f32.mrb[64].mxu1  ;;  %15772 = vmatprep.subr.bf16.mxu0 %v23619_v54 }
 0x4f5   :  { %v12541_v57 = vpop.f32.mrb[65].mxu1 }
 0x4f6   :  { %v20077_v55 = vadd.f32 %v12541_v57, %v12540_v37 }
 0x4f7   :  { %15774 = vmatpush3.bf16.msra.mxu0 %v23620_v2 }
 0x4f8   :  { %v12543_v25 = vpop.f32.mrb[66].mxu1  ;;  %15776 = vmatprep.subr.bf16.mxu0 %v23621_v29 }
 0x4f9   :  { %v12046_v42 = vpop.f32.mrb[44].mxu0  ;;  %v12544_v58 = vpop.f32.mrb[67].mxu1 }
 0x4fa   :  { %v20081_v26 = vadd.f32 %v12544_v58, %v12543_v25  ;;  %v12047_v6 = vpop.f32.mrb[45].mxu0 }
 0x4fb   :  { %v12048_v43 = vadd.f32 %v12047_v6, %v12046_v42  ;;  %15778 = vmatpush3.bf16.msra.mxu0 %v23622_v1 }
 0x4fc   :  { %v15811_v9 = vpack.c.bf16 %v20081_v26, %v20077_v55  ;;  %15780 = vmatprep.subr.bf16.mxu0 %v19513_v7 }
 0x4fd   :  { %v12049_v60 = vpop.f32.mrb[46].mxu0 }
 0x4fe   :  { %v12050_v59 = vpop.f32.mrb[47].mxu0 }
 0x4ff   :  { %v12051_v63 = vadd.f32 %v12050_v59, %v12049_v60  ;;  %15782 = vmatpush3.bf16.msra.mxu0 %v19537_v40 }
 0x500   :  { %15784 = vmatprep.subr.bf16.mxu0 %v19549_v52 }
 0x501   :  { %v15793_v33 = vpack.c.bf16 %v12051_v63, %v12048_v43 }
 0x503   :  { %15786 = vmatpush3.bf16.msra.mxu0 %v19569_v24 }
 0x506   :  { %3418 = vmatmul.mubr.f32.vlgmr.msra.gmra.mrb[72].mxu0 %v19625_v53 }
 0x507   :  { %3422 = vmatprep.mubr.f32.mxu0 %v19627_v30 }
 0x50a   :  { %3423 = vmatmul.mubr.f32.gmra.mrb[74].mxu0 %v19633_v49 }
 0x519   :  { %v12122_v23 = vpop.f32.mrb[48].mxu0 }
 0x51a   :  { %v12123_v34 = vpop.f32.mrb[49].mxu0 }
 0x51b   :  { %v12124_v51 = vadd.f32 %v12123_v34, %v12122_v23 }
 0x51d   :  { %v12125_v7 = vpop.f32.mrb[50].mxu0 }
 0x51e   :  { %v12126_v10 = vpop.f32.mrb[51].mxu0 }
 0x51f   :  { %v12127_v48 = vadd.f32 %v12126_v10, %v12125_v7  ;;  %v3531_v10 = vsel %vm3521_vm8, %v20066_v8, 0.0 }
 0x521   :  { %v15801_v47 = vpack.c.bf16 %v12127_v48, %v12124_v51  ;;  %v3540_v48 = vmul.f32 %v20057_v31, %v20057_v31 }
 0x539   :  { %v12198_v5 = vpop.f32.mrb[52].mxu0 }
 0x53a   :  { %v12199_v40 = vpop.f32.mrb[53].mxu0 }
 0x53b   :  { %v12200_v39 = vadd.f32 %v12199_v40, %v12198_v5 }
 0x53d   :  { %v12201_v52 = vpop.f32.mrb[54].mxu0 }
 0x53e   :  { %v12202_v20 = vpop.f32.mrb[55].mxu0 }
 0x53f   :  { %v12203_v0 = vadd.f32 %v12202_v20, %v12201_v52  ;;  %v3548_v52 = vsel %vm3521_vm8, %v3540_v48, 0.0 }
 0x541   :  { %v15809_v24 = vpack.c.bf16 %v12203_v0, %v12200_v39  ;;  %v3541_v0 = vmul.f32 %v20066_v8, %v20066_v8 }
 0x559   :  { %v12274_v15 = vpop.f32.mrb[56].mxu0 }
 0x55a   :  { %v12275_v53 = vpop.f32.mrb[57].mxu0 }
 0x55b   :  { %v12276_v28 = vadd.f32 %v12275_v53, %v12274_v15  ;;  %v3551_v15 = vsel %vm3521_vm8, %v3541_v0, 0.0 }
 0x55d   :  { %v12277_v30 = vpop.f32.mrb[58].mxu0 }
 0x55e   :  { %v12278_v35 = vpop.f32.mrb[59].mxu0 }
 0x55f   :  { %v12279_v49 = vadd.f32 %v12278_v35, %v12277_v30 }
 0x561   :  { %v15817_v37 = vpack.c.bf16 %v12279_v49, %v12276_v28 }
 0x56b   :  { %v3524_v49 = vpop.xlane.xlu1 %3523 }
 0x579   :  { %v12350_v54 = vpop.f32.mrb[60].mxu0 }
 0x57a   :  { %v12351_v57 = vpop.f32.mrb[61].mxu0 }
 0x57b   :  { %v12352_v2 = vadd.f32 %v12351_v57, %v12350_v54  ;;  %v3547_v54 = vpop.xlane.xlu0 %3546 }
 0x57d   :  { %v12353_v25 = vpop.f32.mrb[62].mxu0 }
 0x57e   :  { %v12354_v29 = vpop.f32.mrb[63].mxu0 }
 0x57f   :  { %v12355_v42 = vadd.f32 %v12354_v29, %v12353_v25 }
 0x581   :  { %v15791_v58 = vpack.c.bf16 %v12355_v42, %v12352_v2 }
 0x583   :  { %15792 = vmatprep.subr.bf16.mxu1 %v15791_v58 }
 0x584   :  { %15794 = vmatpush3.bf16.msra.mxu1 %v15793_v33 }
 0x585   :  { %15796 = vmatprep.subr.bf16.mxu1 %v15795_v13 }
 0x588   :  { %15798 = vmatpush3.bf16.msra.mxu1 %v15797_v21 }
 0x599   :  { %v12426_v6 = vpop.f32.mrb[64].mxu0 }
 0x59a   :  { %v12427_v43 = vpop.f32.mrb[65].mxu0 }
 0x59b   :  { %v12428_v1 = vadd.f32 %v12427_v43, %v12426_v6 }
 0x59d   :  { %v12429_v60 = vpop.f32.mrb[66].mxu0 }
 0x59e   :  { %v12430_v59 = vpop.f32.mrb[67].mxu0 }
 0x59f   :  { %v12431_v63 = vadd.f32 %v12430_v59, %v12429_v60 }
 0x5a1   :  { %v15799_v23 = vpack.c.bf16 %v12431_v63, %v12428_v1 }
 0x5a3   :  { %15800 = vmatprep.subr.bf16.mxu1 %v15799_v23 }
 0x5a4   :  { %15802 = vmatpush3.bf16.msra.mxu1 %v15801_v47 }
 0x5a5   :  { %15804 = vmatprep.subr.bf16.mxu1 %v15803_v62 }
 0x5a8   :  { %15806 = vmatpush3.bf16.msra.mxu1 %v15805_v44 }
 0x5b9   :  { %v12502_v18 = vpop.f32.mrb[68].mxu0 }
 0x5ba   :  { %v12503_v32 = vpop.f32.mrb[69].mxu0 }
 0x5bb   :  { %v12504_v19 = vadd.f32 %v12503_v32, %v12502_v18 }
 0x5bd   :  { %v12505_v21 = vpop.f32.mrb[70].mxu0 }
 0x5be   :  { %v12506_v14 = vpop.f32.mrb[71].mxu0 }
 0x5bf   :  { %v12507_v13 = vadd.f32 %v12506_v14, %v12505_v21 }
 0x5c1   :  { %v15807_v33 = vpack.c.bf16 %v12507_v13, %v12504_v19 }
 0x5c3   :  { %15808 = vmatprep.subr.bf16.mxu1 %v15807_v33 }
 0x5c4   :  { %15810 = vmatpush3.bf16.msra.mxu1 %v15809_v24 }
 0x5c5   :  { %15812 = vmatprep.subr.bf16.mxu1 %v15811_v9 }
 0x5c8   :  { %15814 = vmatpush3.bf16.msra.mxu1 %v15813_v11 }
 0x5d9   :  { %v12578_v38 = vpop.f32.mrb[72].mxu0 }
 0x5da   :  { %v12579_v45 = vpop.f32.mrb[73].mxu0 }
 0x5db   :  { %v12580_v22 = vadd.f32 %v12579_v45, %v12578_v38 }
 0x5dd   :  { %v12581_v44 = vpop.f32.mrb[74].mxu0 }
 0x5de   :  { %v12582_v56 = vpop.f32.mrb[75].mxu0 }
 0x5df   :  { %v12583_v62 = vadd.f32 %v12582_v56, %v12581_v44 }
 0x5e1   :  { %v15815_v34 = vpack.c.bf16 %v12583_v62, %v12580_v22 }
 0x5e3   :  { %15816 = vmatprep.subr.bf16.mxu1 %v15815_v34 }
 0x5e4   :  { %15818 = vmatpush3.bf16.msra.mxu1 %v15817_v37  ;;  %v3544_v37 = vpop.xlane.xlu1 %3543 }
 0x5e7   :  { %3493 = vmatmul.mubr.f32.vlgmr.msra.gmra.mrb[68].mxu1 %v19812_v3 }
 0x5e8   :  { %3497 = vmatprep.mubr.f32.mxu1 %v19819_v17  ;;  %v3527_v57 = vpop.xlane.xlu1 %3526 }
 0x5eb   :  { %3498 = vmatmul.mubr.f32.gmra.mrb[70].mxu1 %v19828_v16 }
 0x5ec   :  { %3502 = vmatprep.mubr.f32.mxu1 %v19835_v61 }
 0x5ef   :  { %3503 = vmatmul.mubr.f32.gmra.mrb[72].mxu1 %v19845_v12 }
 0x5f0   :  { %3507 = vmatprep.mubr.f32.mxu1 %v19852_v41  ;;  %v3528_v41 = vsel %vm3521_vm8, %v20057_v31, 0.0 }
 0x5f3   :  { %3508 = vmatmul.mubr.f32.gmra.mrb[74].mxu1 %v19861_v4 }
 0x6ba   :  { %v12616_v27 = vpop.f32.mrb[68].mxu1 }
 0x6bb   :  { %v12617_v46 = vpop.f32.mrb[69].mxu1 }
 0x6bc   :  { %v20118_v11 = vadd.f32 %v12617_v46, %v12616_v27 }
 0x6be   :  { %v12619_v55 = vpop.f32.mrb[70].mxu1  ;;  %v3558_v3 = vsel %vm3521_vm8, %v20118_v11, 0.0  ;;  %v3574_v17 = vmul.f32 %v20118_v11, %v20118_v11 }
 0x6bf   :  { %3559 = vadd.xlane.f32.xlu0 %v3558_v3  ;;  %v12620_v16 = vpop.f32.mrb[71].mxu1 }
 0x6c0   :  { %v20124_v61 = vadd.f32 %v12620_v16, %v12619_v55  ;;  %v3578_v12 = vsel %vm3521_vm8, %v3574_v17, 0.0  ;;  %v3513_v17 = vld [vmem:[%s22852_s6] sm:$0xff] }
 0x6c1   :  { %3579 = vadd.xlane.f32.xlu1 %v3578_v12 }
 0x6c2   :  { %v3561_v4 = vsel %vm3521_vm8, %v20124_v61, 0.0  ;;  %v12622_v26 = vpop.f32.mrb[72].mxu1  ;;  %v3575_v7 = vmul.f32 %v20124_v61, %v20124_v61 }
 0x6c3   :  { %3529 = vadd.xlane.f32.xlu0 %v3528_v41  ;;  %v12623_v9 = vpop.f32.mrb[73].mxu1 }
 0x6c4   :  { %v20131_v51 = vadd.f32 %v12623_v9, %v12622_v26  ;;  %v3581_v40 = vsel %vm3521_vm8, %v3575_v7, 0.0 }
 0x6c5   :  { %3562 = vadd.xlane.f32.xlu1 %v3561_v4 }
 0x6c6   :  { %v12625_v47 = vpop.f32.mrb[74].mxu1  ;;  %v3564_v20 = vsel %vm3521_vm8, %v20131_v51, 0.0  ;;  %v3576_v24 = vmul.f32 %v20131_v51, %v20131_v51 }
 0x6c7   :  { %3532 = vadd.xlane.f32.xlu0 %v3531_v10  ;;  %v12626_v5 = vpop.f32.mrb[75].mxu1 }
 0x6c8   :  { %v20140_v39 = vadd.f32 %v12626_v5, %v12625_v47  ;;  %v3584_v53 = vsel %vm3521_vm8, %v3576_v24, 0.0  ;;  %v3746_v47 = vld [vmem:[%s22854_s8] sm:$0xff]  ;;  %v3747_v5 = vld [vmem:[%s22854_s8 + $0x8] sm:$0xff] }
 0x6c9   :  { %3582 = vadd.xlane.f32.xlu1 %v3581_v40  ;;  %v10902_v40 = vld [vmem:[%s22854_s8 + $0xc0] sm:$0xff]  ;;  %v20182_v0 = vpack.c.bf16 %v3747_v5, %v3746_v47  ;;  %v10903_v24 = vld [vmem:[%s22854_s8 + $0xc8] sm:$0xff]  ;;  %v3520_v47 = vld [vmem:[%s22853_s7 + $0x18] sm:$0xff] }
 0x6ca   :  { %v3567_v28 = vsel %vm3521_vm8, %v20140_v39, 0.0  ;;  %v3577_v30 = vmul.f32 %v20140_v39, %v20140_v39 }
 0x6cb   :  { %3549 = vadd.xlane.f32.xlu0 %v3548_v52  ;;  %15820 = vmatprep.subr.bf16.mxu0 %v20182_v0 }
 0x6cc   :  { %v3587_v35 = vsel %vm3521_vm8, %v3577_v30, 0.0  ;;  %15822 = vmatpush3.bf16.msra.mxu0 %v20182_v0 }
 0x6cd   :  { %3565 = vadd.xlane.f32.xlu1 %v3564_v20 }
 0x6cf   :  { %3552 = vadd.xlane.f32.xlu0 %v3551_v15  ;;  %v3748_v15 = vld [vmem:[%s22854_s8 + $0x10] sm:$0xff] }
 0x6d1   :  { %3585 = vadd.xlane.f32.xlu1 %v3584_v53  ;;  %v3749_v53 = vld [vmem:[%s22854_s8 + $0x18] sm:$0xff] }
 0x6d2   :  { %v20195_v30 = vpack.c.bf16 %v3749_v53, %v3748_v15 }
 0x6d4   :  { %15824 = vmatprep.subr.bf16.mxu0 %v20195_v30 }
 0x6d5   :  { %3568 = vadd.xlane.f32.xlu1 %v3567_v28  ;;  %v20193_v28 = vpack.c.bf16 %v10903_v24, %v10902_v40  ;;  %15826 = vmatpush3.bf16.msra.mxu0 %v20195_v30 }
 0x6d7   :  { %15868 = vmatprep.subr.bf16.mxu1 %v20193_v28 }
 0x6d8   :  { %15870 = vmatpush3.bf16.msra.mxu1 %v20193_v28 }
 0x6d9   :  { %3588 = vadd.xlane.f32.xlu1 %v3587_v35  ;;  %v10904_v35 = vld [vmem:[%s22854_s8 + $0xd0] sm:$0xff] }
 0x74c   :  { %v3560_v2 = vpop.xlane.xlu0 %3559 }
 0x74d   :  { %v3570_v25 = vadd.f32 %v3560_v2, %v3524_v49  ;;  %v10905_v49 = vld [vmem:[%s22854_s8 + $0xd8] sm:$0xff] }
 0x74e   :  { %v3580_v29 = vpop.xlane.xlu1 %3579  ;;  %v20209_v2 = vpack.c.bf16 %v10905_v49, %v10904_v35 }
 0x74f   :  { %v20156_v42 = vmul.f32 0.0078125, %v3570_v25  ;;  %v3590_v58 = vadd.f32 %v3580_v29, %v3544_v37 }
 0x750   :  { %v3530_v1 = vpop.xlane.xlu0 %3529  ;;  %23623 = vst [vmem:[#allocation36_spill] sm:$0xff] %v20209_v2  ;;  %15872 = vmatprep.subr.bf16.mxu1 %v20209_v2 }
 0x751   :  { %v3602_v6 = vmul.f32 %v20156_v42, %v20156_v42  ;;  %v3598_v43 = vmul.f32 0.0078125, %v3590_v58  ;;  %15874 = vmatpush3.bf16.msra.mxu1 %v20209_v2 }
 0x752   :  { %v3563_v60 = vpop.xlane.xlu1 %3562 }
 0x753   :  { %v3606_v59 = vsub.f32 %v3598_v43, %v3602_v6  ;;  %v3571_v63 = vadd.f32 %v3563_v60, %v3527_v57  ;;  %v3514_v57 = vld [vmem:[%s22852_s6 + $0x8] sm:$0xff] }
 0x754   :  { %v3533_v14 = vpop.xlane.xlu0 %3532  ;;  %v3518_v60 = vld [vmem:[%s22853_s7 + $0x8] sm:$0xff] }
 0x755   :  { %v3610_v23 = vmax.f32 %v3606_v59, 0.0  ;;  %v20160_v18 = vmul.f32 0.0078125, %v3571_v63  ;;  %v3751_v63 = vld [vmem:[%s22854_s8 + $0x28] sm:$0xff] }
 0x756   :  { %v3583_v32 = vpop.xlane.xlu1 %3582 }
 0x757   :  { %v3614_v19 = vadd.f32 1e-05, %v3610_v23  ;;  %v3591_v21 = vadd.f32 %v3583_v32, %v3547_v54  ;;  %v3603_v13 = vmul.f32 %v20160_v18, %v20160_v18  ;;  %v10906_v23 = vld [vmem:[%s22854_s8 + $0xe0] sm:$0xff] }
 0x758   :  { %v3550_v62 = vpop.xlane.xlu0 %3549 }
 0x759   :  { %16755 = vrsqrt.f32 %v3614_v19  ;;  %v3599_v33 = vmul.f32 0.0078125, %v3591_v21 }
 0x75a   :  { %v3566_v38 = vpop.xlane.xlu1 %3565 }
 0x75b   :  { %v3607_v45 = vsub.f32 %v3599_v33, %v3603_v13  ;;  %v3572_v22 = vadd.f32 %v3566_v38, %v3530_v1  ;;  %v3517_v1 = vld [vmem:[%s22853_s7] sm:$0xff]  ;;  %v3515_v33 = vld [vmem:[%s22852_s6 + $0x10] sm:$0xff] }
 0x75c   :  { %v3553_v10 = vpop.xlane.xlu0 %3552  ;;  %v3752_v38 = vld [vmem:[%s22854_s8 + $0x30] sm:$0xff] }
 0x75d   :  { %v3611_v44 = vmax.f32 %v3607_v45, 0.0  ;;  %v20164_v56 = vmul.f32 0.0078125, %v3572_v22  ;;  %v3753_v45 = vld [vmem:[%s22854_s8 + $0x38] sm:$0xff]  ;;  %v10908_v22 = vld [vmem:[%s22854_s8 + $0xf0] sm:$0xff] }
 0x75e   :  { %v3586_v34 = vpop.xlane.xlu1 %3585 }
 0x75f   :  { %v3615_v27 = vadd.f32 1e-05, %v3611_v44  ;;  %v3592_v46 = vadd.f32 %v3586_v34, %v3550_v62  ;;  %v3604_v55 = vmul.f32 %v20164_v56, %v20164_v56  ;;  %v20257_v62 = vpack.c.bf16 %v3753_v45, %v3752_v38  ;;  %v10909_v34 = vld [vmem:[%s22854_s8 + $0xf8] sm:$0xff]  ;;  %v10884_v38 = vld [vmem:[%s22854_s8 + $0x70] sm:$0xff] }
 0x760   :  { %v10885_v45 = vld [vmem:[%s22854_s8 + $0x78] sm:$0xff] }
 0x761   :  { %16757 = vrsqrt.f32 %v3615_v27  ;;  %v3600_v3 = vmul.f32 0.0078125, %v3592_v46  ;;  %v20263_v46 = vpack.c.bf16 %v10909_v34, %v10908_v22 }
 0x762   :  { %v3569_v16 = vpop.xlane.xlu1 %3568 }
 0x763   :  { %v16756_v12 = vpop.eup %16755  ;;  %v3608_v41 = vsub.f32 %v3600_v3, %v3604_v55  ;;  %v3573_v4 = vadd.f32 %v3569_v16, %v3533_v14  ;;  %23625 = vst [vmem:[#allocation40_spill] sm:$0xff] %v20263_v46  ;;  %v3519_v55 = vld [vmem:[%s22853_s7 + $0x10] sm:$0xff]  ;;  %v10878_v16 = vld [vmem:[%s22854_s8 + $0x40] sm:$0xff] }
 0x764   :  { %v3622_v26 = vmul.f32 %v16756_v12, %v3513_v17  ;;  %v10879_v12 = vld [vmem:[%s22854_s8 + $0x48] sm:$0xff] }
 0x765   :  { %v3612_v9 = vmax.f32 %v3608_v41, 0.0  ;;  %v20171_v7 = vmul.f32 0.0078125, %v3573_v4  ;;  %v10926_v41 = vld [vmem:[%s22854_s8 + $0x140] sm:$0xff]  ;;  %v20285_v4 = vpack.c.bf16 %v10879_v12, %v10878_v16 }
 0x766   :  { %3636 = vperm.xlu0 %16749, %v3622_v26   ;;  %v3589_v48 = vpop.xlane.xlu1 %3588  ;;  %v3626_v6 = vmul.f32 %v3622_v26, %v20156_v42  ;;  %v3750_v42 = vld [vmem:[%s22854_s8 + $0x20] sm:$0xff]  ;;  %v10927_v26 = vld [vmem:[%s22854_s8 + $0x148] sm:$0xff] }
 0x767   :  { %v3616_v52 = vadd.f32 1e-05, %v3612_v9  ;;  %v3593_v20 = vadd.f32 %v3589_v48, %v3553_v10  ;;  %v3605_v37 = vmul.f32 %v20171_v7, %v20171_v7  ;;  %v20235_v19 = vpack.c.bf16 %v3751_v63, %v3750_v42 }
 0x768   :  { %v3630_v21 = vsub.f32 %v3517_v1, %v3626_v6  ;;  %v20290_v9 = vpack.c.bf16 %v10927_v26, %v10926_v41  ;;  %v10950_v26 = vld [vmem:[%s22854_s8 + $0x1c0] sm:$0xff] }
 0x769   :  { %16759 = vrsqrt.f32 %v3616_v52  ;;  %v3601_v54 = vmul.f32 0.0078125, %v3593_v20  ;;  %15828 = vmatprep.subr.bf16.mxu0 %v20235_v19 }
 0x76a   :  { %15830 = vmatpush3.bf16.msra.mxu0 %v20235_v19  ;;  %23626 = vst [vmem:[#allocation42_spill] sm:$0xff] %v20290_v9 }
 0x76b   :  { %v16758_v25 = vpop.eup %16757  ;;  %v3609_v29 = vsub.f32 %v3601_v54, %v3605_v37  ;;  %15832 = vmatprep.subr.bf16.mxu0 %v20257_v62 }
 0x76c   :  { %v3623_v58 = vmul.f32 %v16758_v25, %v3514_v57 }
 0x76d   :  { %v3613_v43 = vmax.f32 %v3609_v29, 0.0 }
 0x76e   :  { %3641 = vperm.xlu1 %16750, %v3623_v58   ;;  %v3627_v59 = vmul.f32 %v3623_v58, %v20160_v18  ;;  %v10907_v18 = vld [vmem:[%s22854_s8 + $0xe8] sm:$0xff]  ;;  %15834 = vmatpush3.bf16.msra.mxu0 %v20257_v62 }
 0x76f   :  { %v3617_v32 = vadd.f32 1e-05, %v3613_v43  ;;  %v20240_v13 = vpack.c.bf16 %v10907_v18, %v10906_v23  ;;  %15836 = vmatprep.subr.bf16.mxu0 %v20285_v4  ;;  %v10882_v23 = vld [vmem:[%s22854_s8 + $0x60] sm:$0xff] }
 0x770   :  { %v3631_v14 = vsub.f32 %v3518_v60, %v3627_v59  ;;  %v10930_v18 = vld [vmem:[%s22854_s8 + $0x160] sm:$0xff] }
 0x771   :  { %23624 = vst [vmem:[#allocation38_spill] sm:$0xff] %v20240_v13  ;;  %16761 = vrsqrt.f32 %v3617_v32  ;;  %15876 = vmatprep.subr.bf16.mxu1 %v20240_v13 }
 0x772   :  { %3660 = vperm.xlu1 %16750, %v3630_v21   ;;  %3665 = vperm.xlu0 %16749, %v3631_v14   ;;  %v10931_v21 = vld [vmem:[%s22854_s8 + $0x168] sm:$0xff] }
 0x773   :  { %v16760_v44 = vpop.eup %16759  ;;  %15878 = vmatpush3.bf16.msra.mxu1 %v20240_v13 }
 0x774   :  { %v3624_v27 = vmul.f32 %v16760_v44, %v3515_v33  ;;  %15880 = vmatprep.subr.bf16.mxu1 %v20263_v46  ;;  %v20367_v44 = vpack.c.bf16 %v10931_v21, %v10930_v18  ;;  %v10974_v18 = vld [vmem:[%s22854_s8 + $0x240] sm:$0xff]  ;;  %v10975_v21 = vld [vmem:[%s22854_s8 + $0x248] sm:$0xff] }
 0x776   :  { %3646 = vperm.xlu1 %16750, %v3624_v27   ;;  %v3628_v3 = vmul.f32 %v3624_v27, %v20164_v56  ;;  %v3516_v56 = vld [vmem:[%s22852_s6 + $0x18] sm:$0xff]  ;;  %23628 = vst [vmem:[#allocation46_spill] sm:$0xff] %v20367_v44  ;;  %v10932_v27 = vld [vmem:[%s22854_s8 + $0x170] sm:$0xff] }
 0x777   :  { %15882 = vmatpush3.bf16.msra.mxu1 %v20263_v46 }
 0x778   :  { %v3632_v17 = vsub.f32 %v3519_v55, %v3628_v3  ;;  %15900 = vmatprep.subr.bf16.mxu1 %v20290_v9  ;;  %v10933_v55 = vld [vmem:[%s22854_s8 + $0x178] sm:$0xff]  ;;  %v20382_v3 = vpack.c.bf16 %v10885_v45, %v10884_v38  ;;  %v20518_v38 = vpack.c.bf16 %v10975_v21, %v10974_v18  ;;  %v10916_v45 = vld [vmem:[%s22854_s8 + $0x110] sm:$0xff] }
 0x779   :  { %v20391_v12 = vpack.c.bf16 %v10933_v55, %v10932_v27  ;;  %v10917_v27 = vld [vmem:[%s22854_s8 + $0x118] sm:$0xff]  ;;  %v10976_v55 = vld [vmem:[%s22854_s8 + $0x250] sm:$0xff] }
 0x77a   :  { %3670 = vperm.xlu1 %16750, %v3632_v17   ;;  %23634 = vst [vmem:[#allocation58_spill] sm:$0xff] %v20518_v38  ;;  %v10940_v18 = vld [vmem:[%s22854_s8 + $0x190] sm:$0xff]  ;;  %v10941_v21 = vld [vmem:[%s22854_s8 + $0x198] sm:$0xff] }
 0x77b   :  { %v16762_v10 = vpop.eup %16761  ;;  %23629 = vst [vmem:[#allocation48_spill] sm:$0xff] %v20391_v12 }
 0x77c   :  { %v3625_v48 = vmul.f32 %v16762_v10, %v3516_v56  ;;  %v10890_v56 = vld [vmem:[%s22854_s8 + $0x80] sm:$0xff]  ;;  %v10951_v10 = vld [vmem:[%s22854_s8 + $0x1c8] sm:$0xff] }
 0x77e   :  { %3651 = vperm.xlu0 %16749, %v3625_v48   ;;  %v3629_v5 = vmul.f32 %v3625_v48, %v20171_v7  ;;  %v10880_v7 = vld [vmem:[%s22854_s8 + $0x50] sm:$0xff] }
 0x780   :  { %v3633_v40 = vsub.f32 %v3520_v47, %v3629_v5 }
 0x782   :  { %3675 = vperm.xlu0 %16749, %v3633_v40   ;;  %v20415_v40 = vpack.c.bf16 %v10951_v10, %v10950_v26  ;;  %v10919_v26 = vld [vmem:[%s22854_s8 + $0x128] sm:$0xff]  ;;  %v10978_v10 = vld [vmem:[%s22854_s8 + $0x260] sm:$0xff] }
 0x784   :  { %23630 = vst [vmem:[#allocation50_spill] sm:$0xff] %v20415_v40 }
 0x7e5   :  { %v3637_v52 = vpop.permute.xlu0 %3636 }
 0x7e6   :  { %v3654_v24 = vmul.f32 %v20039_v50, %v3637_v52  ;;  %v3694_v15 = vmul.f32 %v20118_v11, %v3637_v52  ;;  %v10928_v11 = vld [vmem:[%s22854_s8 + $0x150] sm:$0xff] }
 0x7e7   :  { %v10892_v52 = vld [vmem:[%s22854_s8 + $0x90] sm:$0xff] }
 0x7ed   :  { %v3642_v20 = vpop.permute.xlu1 %3641 }
 0x7ee   :  { %v3655_v53 = vmul.f32 %v20050_v36, %v3642_v20  ;;  %v3695_v35 = vmul.f32 %v20124_v61, %v3642_v20  ;;  %v10881_v36 = vld [vmem:[%s22854_s8 + $0x58] sm:$0xff] }
 0x7ef   :  { %v10929_v61 = vld [vmem:[%s22854_s8 + $0x158] sm:$0xff]  ;;  %v20324_v60 = vpack.c.bf16 %v10881_v36, %v10880_v7  ;;  %v10896_v7 = vld [vmem:[%s22854_s8 + $0xb0] sm:$0xff] }
 0x7f0   :  { %v20326_v59 = vpack.c.bf16 %v10929_v61, %v10928_v11  ;;  %v10893_v20 = vld [vmem:[%s22854_s8 + $0x98] sm:$0xff]  ;;  %v10956_v61 = vld [vmem:[%s22854_s8 + $0x1f0] sm:$0xff] }
 0x7f1   :  { %v3666_v49 = vpop.permute.xlu0 %3665  ;;  %v3661_v37 = vpop.permute.xlu1 %3660  ;;  %v10897_v11 = vld [vmem:[%s22854_s8 + $0xb8] sm:$0xff] }
 0x7f2   :  { %v3679_v54 = vadd.f32 %v3666_v49, %v3655_v53  ;;  %v20302_v57 = vadd.f32 %v3695_v35, %v3666_v49  ;;  %v3678_v25 = vadd.f32 %v3661_v37, %v3654_v24  ;;  %v20304_v29 = vadd.f32 %v3694_v15, %v3661_v37  ;;  %23627 = vst [vmem:[#allocation44_spill] sm:$0xff] %v20326_v59  ;;  %v10952_v24 = vld [vmem:[%s22854_s8 + $0x1d0] sm:$0xff]  ;;  %v10953_v15 = vld [vmem:[%s22854_s8 + $0x1d8] sm:$0xff]  ;;  %v10894_v49 = vld [vmem:[%s22854_s8 + $0xa0] sm:$0xff] }
 0x7f3   :  { %v20440_v53 = vpack.c.bf16 %v10893_v20, %v10892_v52  ;;  %v20442_v35 = vpack.c.bf16 %v10953_v15, %v10952_v24  ;;  %v10895_v37 = vld [vmem:[%s22854_s8 + $0xa8] sm:$0xff]  ;;  %v10920_v24 = vld [vmem:[%s22854_s8 + $0x130] sm:$0xff]  ;;  %v10921_v15 = vld [vmem:[%s22854_s8 + $0x138] sm:$0xff] }
 0x7f4   :  { %vm3683_vm9 = vcmp.gt.f32.partialorder %v3679_v54, 0.0  ;;  %v3687_v50 = vmul.f32 0.2, %v3679_v54  ;;  %vm3682_vm10 = vcmp.gt.f32.partialorder %v3678_v25, 0.0  ;;  %v3686_v58 = vmul.f32 0.2, %v3678_v25 }
 0x7f5   :  { %v20318_v6 = vpop.permute.xlu1 %3646  ;;  %23631 = vst [vmem:[#allocation52_spill] sm:$0xff] %v20442_v35  ;;  %vm3702_vm13 = vcmp.gt.f32.partialorder %v20304_v29, 0.0  ;;  %vm3703_vm14 = vcmp.gt.f32.partialorder %v20302_v57, 0.0 }
 0x7f6   :  { %v20320_v43 = vsel %vm3683_vm9, %v3679_v54, %v3687_v50  ;;  %v20322_v1 = vsel %vm3682_vm10, %v3678_v25, %v3686_v58  ;;  %v3656_v42 = vmul.f32 %v20057_v31, %v20318_v6  ;;  %v10883_v31 = vld [vmem:[%s22854_s8 + $0x68] sm:$0xff]  ;;  %v10954_v54 = vld [vmem:[%s22854_s8 + $0x1e0] sm:$0xff]  ;;  %v20471_v50 = vpack.c.bf16 %v10895_v37, %v10894_v49  ;;  %v10957_v58 = vld [vmem:[%s22854_s8 + $0x1f8] sm:$0xff] }
 0x7f7   :  { %13626 = vmatprep.mubr.msk.f32.mxu0 %vm3521_vm8, %v20322_v1  ;;  %13692 = vmatprep.mubr.msk.f32.mxu1 %vm3521_vm8, %v20322_v1  ;;  %v20357_v33 = vpack.c.bf16 %v10883_v31, %v10882_v23  ;;  %v10955_v25 = vld [vmem:[%s22854_s8 + $0x1e8] sm:$0xff]  ;;  %v20496_v23 = vpack.c.bf16 %v10957_v58, %v10956_v61  ;;  %v10914_v31 = vld [vmem:[%s22854_s8 + $0x100] sm:$0xff]  ;;  %v10980_v49 = vld [vmem:[%s22854_s8 + $0x270] sm:$0xff] }
 0x7f8   :  { %13627 = vmatmul.mubr.msk.f32.vlgmr.msra.gmra.mrb[76].mxu0 %vm3521_vm8, %v20320_v43  ;;  %13693 = vmatmul.mubr.msk.f32.vlgmr.msra.gmra.mrb[76].mxu1 %vm3521_vm8, %v20320_v43  ;;  %v20473_v36 = vpack.c.bf16 %v10955_v25, %v10954_v54  ;;  %v10981_v37 = vld [vmem:[%s22854_s8 + $0x278] sm:$0xff]  ;;  %v20590_v54 = vpack.c.bf16 %v10921_v15, %v10920_v24  ;;  %v10998_v61 = vld [vmem:[%s22854_s8 + $0x2c0] sm:$0xff]  ;;  %v10999_v58 = vld [vmem:[%s22854_s8 + $0x2c8] sm:$0xff] }
 0x7f9   :  { %v20338_v63 = vpop.permute.xlu1 %3670  ;;  %15838 = vmatpush3.bf16.msra.mxu0 %v20285_v4  ;;  %15902 = vmatpush3.bf16.msra.mxu1 %v20290_v9  ;;  %23633 = vst [vmem:[#allocation56_spill] sm:$0xff] %v20496_v23  ;;  %v20594_v25 = vpack.c.bf16 %v10981_v37, %v10980_v49  ;;  %v10944_v49 = vld [vmem:[%s22854_s8 + $0x1b0] sm:$0xff]  ;;  %v10945_v37 = vld [vmem:[%s22854_s8 + $0x1b8] sm:$0xff] }
 0x7fa   :  { %v3680_v32 = vadd.f32 %v20338_v63, %v3656_v42  ;;  %15840 = vmatprep.subr.bf16.mxu0 %v20324_v60  ;;  %15904 = vmatprep.subr.bf16.mxu1 %v20326_v59  ;;  %23632 = vst [vmem:[#allocation54_spill] sm:$0xff] %v20473_v36  ;;  %v20494_v42 = vpack.c.bf16 %v10897_v11, %v10896_v7  ;;  %v10938_v7 = vld [vmem:[%s22854_s8 + $0x180] sm:$0xff]  ;;  %v10939_v11 = vld [vmem:[%s22854_s8 + $0x188] sm:$0xff] }
 0x7fb   :  { %23637 = vst [vmem:[#allocation64_spill] sm:$0xff] %v20594_v25 }
 0x7fc   :  { %vm3684_vm11 = vcmp.gt.f32.partialorder %v3680_v32, 0.0  ;;  %v3688_v14 = vmul.f32 0.2, %v3680_v32 }
 0x7fd   :  { %v20365_v22 = vpop.permute.xlu0 %3651  ;;  %15842 = vmatpush3.bf16.msra.mxu0 %v20324_v60  ;;  %15906 = vmatpush3.bf16.msra.mxu1 %v20326_v59 }
 0x7fe   :  { %v20369_v34 = vsel %vm3684_vm11, %v3680_v32, %v3688_v14  ;;  %v3657_v17 = vmul.f32 %v20066_v8, %v20365_v22  ;;  %15844 = vmatprep.subr.bf16.mxu0 %v20357_v33  ;;  %15908 = vmatprep.subr.bf16.mxu1 %v20367_v44  ;;  %v10891_v8 = vld [vmem:[%s22854_s8 + $0x88] sm:$0xff] }
 0x7ff   :  { %13629 = vmatprep.mubr.msk.f32.mxu0 %vm3521_vm8, %v20369_v34  ;;  %13695 = vmatprep.mubr.msk.f32.mxu1 %vm3521_vm8, %v20369_v34  ;;  %v20410_v47 = vpack.c.bf16 %v10891_v8, %v10890_v56  ;;  %v10915_v32 = vld [vmem:[%s22854_s8 + $0x108] sm:$0xff]  ;;  %v10918_v8 = vld [vmem:[%s22854_s8 + $0x120] sm:$0xff] }
 0x800   :  { %v20516_v14 = vpack.c.bf16 %v10915_v32, %v10914_v31  ;;  %v20564_v52 = vpack.c.bf16 %v10919_v26, %v10918_v8  ;;  %v20611_v31 = vpack.c.bf16 %v10939_v11, %v10938_v7  ;;  %v20614_v32 = vpack.c.bf16 %v10999_v58, %v10998_v61  ;;  %v10942_v8 = vld [vmem:[%s22854_s8 + $0x1a0] sm:$0xff]  ;;  %v10943_v26 = vld [vmem:[%s22854_s8 + $0x1a8] sm:$0xff]  ;;  %v11004_v7 = vld [vmem:[%s22854_s8 + $0x2f0] sm:$0xff] }
 0x801   :  { %v20388_v16 = vpop.permute.xlu0 %3675  ;;  %15846 = vmatpush3.bf16.msra.mxu0 %v20357_v33  ;;  %15910 = vmatpush3.bf16.msra.mxu1 %v20367_v44  ;;  %v20659_v24 = vpack.c.bf16 %v10943_v26, %v10942_v8  ;;  %v11005_v11 = vld [vmem:[%s22854_s8 + $0x2f8] sm:$0xff]  ;;  %v20687_v61 = vpack.c.bf16 %v10945_v37, %v10944_v49  ;;  %v11024_v49 = vld [vmem:[%s22854_s8 + $0x350] sm:$0xff] }
 0x802   :  { %v3681_v41 = vadd.f32 %v20388_v16, %v3657_v17  ;;  %15848 = vmatprep.subr.bf16.mxu0 %v20382_v3  ;;  %15912 = vmatprep.subr.bf16.mxu1 %v20391_v12  ;;  %v10977_v17 = vld [vmem:[%s22854_s8 + $0x258] sm:$0xff]  ;;  %23638 = vst [vmem:[#allocation66_spill] sm:$0xff] %v20614_v32  ;;  %v20690_v58 = vpack.c.bf16 %v11005_v11, %v11004_v7 }
 0x803   :  { %v20538_v56 = vpack.c.bf16 %v10977_v17, %v10976_v55  ;;  %v20632_v55 = vpack.c.bf16 %v10941_v21, %v10940_v18  ;;  %v10962_v18 = vld [vmem:[%s22854_s8 + $0x200] sm:$0xff]  ;;  %v10963_v21 = vld [vmem:[%s22854_s8 + $0x208] sm:$0xff]  ;;  %v11025_v37 = vld [vmem:[%s22854_s8 + $0x358] sm:$0xff] }
 0x804   :  { %vm3685_vm12 = vcmp.gt.f32.partialorder %v3681_v41, 0.0  ;;  %v3689_v48 = vmul.f32 0.2, %v3681_v41  ;;  %23641 = vst [vmem:[#allocation72_spill] sm:$0xff] %v20690_v58  ;;  %v20707_v8 = vpack.c.bf16 %v10963_v21, %v10962_v18  ;;  %v20732_v11 = vpack.c.bf16 %v11025_v37, %v11024_v49  ;;  %v10966_v18 = vld [vmem:[%s22854_s8 + $0x220] sm:$0xff]  ;;  %v10967_v21 = vld [vmem:[%s22854_s8 + $0x228] sm:$0xff] }
 0x805   :  { %15850 = vmatpush3.bf16.msra.mxu0 %v20382_v3  ;;  %15914 = vmatpush3.bf16.msra.mxu1 %v20391_v12  ;;  %23635 = vst [vmem:[#allocation60_spill] sm:$0xff] %v20538_v56  ;;  %v10968_v49 = vld [vmem:[%s22854_s8 + $0x230] sm:$0xff]  ;;  %v10969_v37 = vld [vmem:[%s22854_s8 + $0x238] sm:$0xff] }
 0x806   :  { %v20412_v5 = vsel %vm3685_vm12, %v3681_v41, %v3689_v48  ;;  %15852 = vmatprep.subr.bf16.mxu0 %v20410_v47  ;;  %15932 = vmatprep.subr.bf16.mxu1 %v20415_v40  ;;  %v20536_v41 = vpack.c.bf16 %v10917_v27, %v10916_v45  ;;  %v10979_v48 = vld [vmem:[%s22854_s8 + $0x268] sm:$0xff]  ;;  %v11000_v45 = vld [vmem:[%s22854_s8 + $0x2d0] sm:$0xff]  ;;  %v11001_v27 = vld [vmem:[%s22854_s8 + $0x2d8] sm:$0xff]  ;;  %23643 = vst [vmem:[#allocation76_spill] sm:$0xff] %v20732_v11 }
 0x807   :  { %13630 = vmatmul.mubr.msk.f32.gmra.mrb[78].mxu0 %vm3521_vm8, %v20412_v5  ;;  %13696 = vmatmul.mubr.msk.f32.gmra.mrb[78].mxu1 %vm3521_vm8, %v20412_v5  ;;  %v20566_v20 = vpack.c.bf16 %v10979_v48, %v10978_v10  ;;  %v20636_v17 = vpack.c.bf16 %v11001_v27, %v11000_v45  ;;  %v11002_v10 = vld [vmem:[%s22854_s8 + $0x2e0] sm:$0xff]  ;;  %v11003_v48 = vld [vmem:[%s22854_s8 + $0x2e8] sm:$0xff] }
 0x808   :  { %13648 = vmatprep.mubr.msk.f32.mxu0 %vm3521_vm8, %v20322_v1  ;;  %13736 = vmatprep.mubr.msk.f32.mxu1 %vm3521_vm8, %v20322_v1  ;;  %v20664_v15 = vpack.c.bf16 %v11003_v48, %v11002_v10  ;;  %v11022_v45 = vld [vmem:[%s22854_s8 + $0x340] sm:$0xff]  ;;  %v11023_v27 = vld [vmem:[%s22854_s8 + $0x348] sm:$0xff]  ;;  %v10964_v10 = vld [vmem:[%s22854_s8 + $0x210] sm:$0xff] }
 0x809   :  { %23636 = vst [vmem:[#allocation62_spill] sm:$0xff] %v20566_v20  ;;  %23639 = vst [vmem:[#allocation68_spill] sm:$0xff] %v20636_v17  ;;  %v20710_v26 = vpack.c.bf16 %v11023_v27, %v11022_v45  ;;  %v10965_v48 = vld [vmem:[%s22854_s8 + $0x218] sm:$0xff]  ;;  %v11026_v45 = vld [vmem:[%s22854_s8 + $0x360] sm:$0xff] }
 0x80a   :  { %23640 = vst [vmem:[#allocation70_spill] sm:$0xff] %v20664_v15  ;;  %v20728_v7 = vpack.c.bf16 %v10965_v48, %v10964_v10  ;;  %v11027_v27 = vld [vmem:[%s22854_s8 + $0x368] sm:$0xff]  ;;  %v20755_v10 = vpack.c.bf16 %v10967_v21, %v10966_v18  ;;  %v11028_v18 = vld [vmem:[%s22854_s8 + $0x370] sm:$0xff]  ;;  %v11029_v21 = vld [vmem:[%s22854_s8 + $0x378] sm:$0xff] }
 0x80b   :  { %13649 = vmatmul.mubr.msk.f32.vlgmr.msra.gmra.mrb[80].mxu0 %vm3521_vm8, %v20320_v43  ;;  %13737 = vmatmul.mubr.msk.f32.vlgmr.msra.gmra.mrb[80].mxu1 %vm3521_vm8, %v20320_v43  ;;  %23642 = vst [vmem:[#allocation74_spill] sm:$0xff] %v20710_v26  ;;  %v20760_v48 = vpack.c.bf16 %v11027_v27, %v11026_v45  ;;  %v20783_v45 = vpack.c.bf16 %v10969_v37, %v10968_v49  ;;  %v11047_v49 = vld [vmem:[%s22854_s8 + $0x3c8] sm:$0xff] }
 0x80c   :  { %15854 = vmatpush3.bf16.msra.mxu0 %v20410_v47  ;;  %15934 = vmatpush3.bf16.msra.mxu1 %v20415_v40  ;;  %v20786_v27 = vpack.c.bf16 %v11029_v21, %v11028_v18  ;;  %v10988_v21 = vld [vmem:[%s22854_s8 + $0x290] sm:$0xff] }
 0x80d   :  { %13651 = vmatprep.mubr.msk.f32.mxu0 %vm3521_vm8, %v20369_v34  ;;  %13739 = vmatprep.mubr.msk.f32.mxu1 %vm3521_vm8, %v20369_v34  ;;  %23644 = vst [vmem:[#allocation78_spill] sm:$0xff] %v20760_v48 }
 0x80e   :  { %15856 = vmatprep.subr.bf16.mxu0 %v20440_v53  ;;  %15936 = vmatprep.subr.bf16.mxu1 %v20442_v35  ;;  %23645 = vst [vmem:[#allocation80_spill] sm:$0xff] %v20786_v27 }
 0x80f   :  { %13652 = vmatmul.mubr.msk.f32.gmra.mrb[82].mxu0 %vm3521_vm8, %v20412_v5  ;;  %13740 = vmatmul.mubr.msk.f32.gmra.mrb[82].mxu1 %vm3521_vm8, %v20412_v5 }
 0x810   :  { %15858 = vmatpush3.bf16.msra.mxu0 %v20440_v53  ;;  %15938 = vmatpush3.bf16.msra.mxu1 %v20442_v35 }
 0x811   :  { %13670 = vmatprep.mubr.msk.f32.mxu0 %vm3521_vm8, %v20322_v1  ;;  %13780 = vmatprep.mubr.msk.f32.mxu1 %vm3521_vm8, %v20322_v1 }
 0x812   :  { %15860 = vmatprep.subr.bf16.mxu0 %v20471_v50  ;;  %15940 = vmatprep.subr.bf16.mxu1 %v20473_v36 }
 0x814   :  { %15862 = vmatpush3.bf16.msra.mxu0 %v20471_v50  ;;  %15942 = vmatpush3.bf16.msra.mxu1 %v20473_v36 }
 0x815   :  { %15864 = vmatprep.subr.bf16.mxu0 %v20494_v42  ;;  %15944 = vmatprep.subr.bf16.mxu1 %v20496_v23 }
 0x818   :  { %15866 = vmatpush3.bf16.msra.mxu0 %v20494_v42  ;;  %15946 = vmatpush3.bf16.msra.mxu1 %v20496_v23 }
 0x819   :  { %15884 = vmatprep.subr.bf16.mxu0 %v20516_v14  ;;  %15964 = vmatprep.subr.bf16.mxu1 %v20518_v38 }
 0x81b   :  { %13671 = vmatmul.mubr.msk.f32.vlgmr.msra.gmra.mrb[84].mxu0 %vm3521_vm8, %v20320_v43  ;;  %13781 = vmatmul.mubr.msk.f32.vlgmr.msra.gmra.mrb[84].mxu1 %vm3521_vm8, %v20320_v43 }
 0x81c   :  { %13673 = vmatprep.mubr.msk.f32.mxu0 %vm3521_vm8, %v20369_v34  ;;  %15886 = vmatpush3.bf16.msra.mxu0 %v20516_v14 }
 0x81d   :  { %13783 = vmatprep.mubr.msk.f32.mxu1 %vm3521_vm8, %v20369_v34  ;;  %15966 = vmatpush3.bf16.msra.mxu1 %v20518_v38 }
 0x81e   :  { %15888 = vmatprep.subr.bf16.mxu0 %v20536_v41  ;;  %15968 = vmatprep.subr.bf16.mxu1 %v20538_v56 }
 0x81f   :  { %13674 = vmatmul.mubr.msk.f32.gmra.mrb[86].mxu0 %vm3521_vm8, %v20412_v5  ;;  %13784 = vmatmul.mubr.msk.f32.gmra.mrb[86].mxu1 %vm3521_vm8, %v20412_v5 }
 0x820   :  { %15890 = vmatpush3.bf16.msra.mxu0 %v20536_v41  ;;  %13714 = vmatprep.mubr.msk.f32.mxu0 %vm3521_vm8, %v20322_v1 }
 0x821   :  { %15970 = vmatpush3.bf16.msra.mxu1 %v20538_v56  ;;  %13824 = vmatprep.mubr.msk.f32.mxu1 %vm3521_vm8, %v20322_v1  ;;  %v11038_v56 = vld [vmem:[%s22854_s8 + $0x3a0] sm:$0xff] }
 0x822   :  { %15892 = vmatprep.subr.bf16.mxu0 %v20564_v52  ;;  %15972 = vmatprep.subr.bf16.mxu1 %v20566_v20 }
 0x824   :  { %15894 = vmatpush3.bf16.msra.mxu0 %v20564_v52 }
 0x825   :  { %15974 = vmatpush3.bf16.msra.mxu1 %v20566_v20  ;;  %15896 = vmatprep.subr.bf16.mxu0 %v20590_v54  ;;  %v11036_v20 = vld [vmem:[%s22854_s8 + $0x390] sm:$0xff] }
 0x826   :  { %15976 = vmatprep.subr.bf16.mxu1 %v20594_v25 }
 0x828   :  { %15898 = vmatpush3.bf16.msra.mxu0 %v20590_v54 }
 0x829   :  { %15978 = vmatpush3.bf16.msra.mxu1 %v20594_v25  ;;  %15916 = vmatprep.subr.bf16.mxu0 %v20611_v31  ;;  %v11011_v25 = vld [vmem:[%s22854_s8 + $0x308] sm:$0xff] }
 0x82a   :  { %15996 = vmatprep.subr.bf16.mxu1 %v20614_v32 }
 0x82b   :  { %13715 = vmatmul.mubr.msk.f32.vlgmr.msra.gmra.mrb[88].mxu0 %vm3521_vm8, %v20320_v43 }
 0x82c   :  { %13825 = vmatmul.mubr.msk.f32.vlgmr.msra.gmra.mrb[88].mxu1 %vm3521_vm8, %v20320_v43  ;;  %13717 = vmatprep.mubr.msk.f32.mxu0 %vm3521_vm8, %v20369_v34 }
 0x82d   :  { %15918 = vmatpush3.bf16.msra.mxu0 %v20611_v31  ;;  %13827 = vmatprep.mubr.msk.f32.mxu1 %vm3521_vm8, %v20369_v34 }
 0x82e   :  { %15998 = vmatpush3.bf16.msra.mxu1 %v20614_v32  ;;  %15920 = vmatprep.subr.bf16.mxu0 %v20632_v55  ;;  %v10993_v32 = vld [vmem:[%s22854_s8 + $0x2b8] sm:$0xff] }
 0x82f   :  { %13718 = vmatmul.mubr.msk.f32.gmra.mrb[90].mxu0 %vm3521_vm8, %v20412_v5  ;;  %16000 = vmatprep.subr.bf16.mxu1 %v20636_v17 }
 0x830   :  { %13828 = vmatmul.mubr.msk.f32.gmra.mrb[90].mxu1 %vm3521_vm8, %v20412_v5  ;;  %13758 = vmatprep.mubr.msk.f32.mxu0 %vm3521_vm8, %v20322_v1 }
 0x831   :  { %15922 = vmatpush3.bf16.msra.mxu0 %v20632_v55  ;;  %13868 = vmatprep.mubr.msk.f32.mxu1 %vm3521_vm8, %v20322_v1 }
 0x832   :  { %16002 = vmatpush3.bf16.msra.mxu1 %v20636_v17  ;;  %15924 = vmatprep.subr.bf16.mxu0 %v20659_v24  ;;  %v10991_v17 = vld [vmem:[%s22854_s8 + $0x2a8] sm:$0xff] }
 0x833   :  { %16004 = vmatprep.subr.bf16.mxu1 %v20664_v15 }
 0x835   :  { %15926 = vmatpush3.bf16.msra.mxu0 %v20659_v24 }
 0x836   :  { %16006 = vmatpush3.bf16.msra.mxu1 %v20664_v15  ;;  %15928 = vmatprep.subr.bf16.mxu0 %v20687_v61  ;;  %v10989_v15 = vld [vmem:[%s22854_s8 + $0x298] sm:$0xff] }
 0x837   :  { %16008 = vmatprep.subr.bf16.mxu1 %v20690_v58 }
 0x839   :  { %15930 = vmatpush3.bf16.msra.mxu0 %v20687_v61 }
 0x83a   :  { %16010 = vmatpush3.bf16.msra.mxu1 %v20690_v58  ;;  %15948 = vmatprep.subr.bf16.mxu0 %v20707_v8  ;;  %v10987_v58 = vld [vmem:[%s22854_s8 + $0x288] sm:$0xff] }
 0x83b   :  { %16028 = vmatprep.subr.bf16.mxu1 %v20710_v26 }
 0x83c   :  { %13759 = vmatmul.mubr.msk.f32.vlgmr.msra.gmra.mrb[92].mxu0 %vm3521_vm8, %v20320_v43 }
 0x83d   :  { %13869 = vmatmul.mubr.msk.f32.vlgmr.msra.gmra.mrb[92].mxu1 %vm3521_vm8, %v20320_v43  ;;  %13761 = vmatprep.mubr.msk.f32.mxu0 %vm3521_vm8, %v20369_v34 }
 0x83e   :  { %15950 = vmatpush3.bf16.msra.mxu0 %v20707_v8  ;;  %13871 = vmatprep.mubr.msk.f32.mxu1 %vm3521_vm8, %v20369_v34 }
 0x83f   :  { %16030 = vmatpush3.bf16.msra.mxu1 %v20710_v26  ;;  %15952 = vmatprep.subr.bf16.mxu0 %v20728_v7  ;;  %v10986_v26 = vld [vmem:[%s22854_s8 + $0x280] sm:$0xff] }
 0x840   :  { %13762 = vmatmul.mubr.msk.f32.gmra.mrb[94].mxu0 %vm3521_vm8, %v20412_v5  ;;  %16032 = vmatprep.subr.bf16.mxu1 %v20732_v11  ;;  %v20803_v37 = vpack.c.bf16 %v10987_v58, %v10986_v26  ;;  %v11049_v58 = vld [vmem:[%s22854_s8 + $0x3d8] sm:$0xff]  ;;  %v20824_v26 = vpack.c.bf16 %v10989_v15, %v10988_v21  ;;  %v11050_v15 = vld [vmem:[%s22854_s8 + $0x3e0] sm:$0xff] }
 0x841   :  { %13872 = vmatmul.mubr.msk.f32.gmra.mrb[94].mxu1 %vm3521_vm8, %v20412_v5  ;;  %13802 = vmatprep.mubr.msk.f32.mxu0 %vm3521_vm8, %v20322_v1 }
 0x842   :  { %15954 = vmatpush3.bf16.msra.mxu0 %v20728_v7  ;;  %13912 = vmatprep.mubr.msk.f32.mxu1 %vm3521_vm8, %v20322_v1  ;;  %23647 = vst [vmem:[#allocation84_spill] sm:$0xff] %v20824_v26 }
 0x843   :  { %16034 = vmatpush3.bf16.msra.mxu1 %v20732_v11  ;;  %15956 = vmatprep.subr.bf16.mxu0 %v20755_v10  ;;  %v11046_v11 = vld [vmem:[%s22854_s8 + $0x3c0] sm:$0xff] }
 0x844   :  { %16036 = vmatprep.subr.bf16.mxu1 %v20760_v48  ;;  %v20806_v18 = vpack.c.bf16 %v11047_v49, %v11046_v11  ;;  %v10990_v49 = vld [vmem:[%s22854_s8 + $0x2a0] sm:$0xff] }
 0x845   :  { %v20851_v21 = vpack.c.bf16 %v10991_v17, %v10990_v49  ;;  %v11052_v17 = vld [vmem:[%s22854_s8 + $0x3f0] sm:$0xff]  ;;  %v11053_v49 = vld [vmem:[%s22854_s8 + $0x3f8] sm:$0xff] }
 0x846   :  { %15958 = vmatpush3.bf16.msra.mxu0 %v20755_v10  ;;  %23646 = vst [vmem:[#allocation82_spill] sm:$0xff] %v20806_v18 }
 0x847   :  { %16038 = vmatpush3.bf16.msra.mxu1 %v20760_v48  ;;  %15960 = vmatprep.subr.bf16.mxu0 %v20783_v45  ;;  %v11048_v48 = vld [vmem:[%s22854_s8 + $0x3d0] sm:$0xff]  ;;  %23649 = vst [vmem:[#allocation88_spill] sm:$0xff] %v20851_v21 }
 0x848   :  { %16040 = vmatprep.subr.bf16.mxu1 %v20786_v27  ;;  %v20828_v11 = vpack.c.bf16 %v11049_v58, %v11048_v48  ;;  %v11051_v48 = vld [vmem:[%s22854_s8 + $0x3e8] sm:$0xff] }
 0x849   :  { %v20856_v58 = vpack.c.bf16 %v11051_v48, %v11050_v15  ;;  %v20882_v48 = vpack.c.bf16 %v11053_v49, %v11052_v17  ;;  %v11013_v17 = vld [vmem:[%s22854_s8 + $0x318] sm:$0xff] }
 0x84a   :  { %15962 = vmatpush3.bf16.msra.mxu0 %v20783_v45  ;;  %23648 = vst [vmem:[#allocation86_spill] sm:$0xff] %v20828_v11 }
 0x84b   :  { %16042 = vmatpush3.bf16.msra.mxu1 %v20786_v27  ;;  %15980 = vmatprep.subr.bf16.mxu0 %v20803_v37  ;;  %23650 = vst [vmem:[#allocation90_spill] sm:$0xff] %v20856_v58  ;;  %v10992_v27 = vld [vmem:[%s22854_s8 + $0x2b0] sm:$0xff]  ;;  %23652 = vst [vmem:[#allocation94_spill] sm:$0xff] %v20882_v48 }
 0x84c   :  { %16060 = vmatprep.subr.bf16.mxu1 %v20806_v18  ;;  %v20879_v15 = vpack.c.bf16 %v10993_v32, %v10992_v27  ;;  %v11012_v27 = vld [vmem:[%s22854_s8 + $0x310] sm:$0xff] }
 0x84d   :  { %13803 = vmatmul.mubr.msk.f32.vlgmr.msra.gmra.mrb[96].mxu0 %vm3521_vm8, %v20320_v43  ;;  %v20905_v49 = vpack.c.bf16 %v11013_v17, %v11012_v27  ;;  %v11016_v17 = vld [vmem:[%s22854_s8 + $0x330] sm:$0xff] }
 0x84e   :  { %13913 = vmatmul.mubr.msk.f32.vlgmr.msra.gmra.mrb[96].mxu1 %vm3521_vm8, %v20320_v43  ;;  %13805 = vmatprep.mubr.msk.f32.mxu0 %vm3521_vm8, %v20369_v34  ;;  %23651 = vst [vmem:[#allocation92_spill] sm:$0xff] %v20879_v15 }
 0x84f   :  { %15982 = vmatpush3.bf16.msra.mxu0 %v20803_v37  ;;  %13915 = vmatprep.mubr.msk.f32.mxu1 %vm3521_vm8, %v20369_v34  ;;  %23654 = vst [vmem:[#allocation98_spill] sm:$0xff] %v20905_v49 }
 0x850   :  { %16062 = vmatpush3.bf16.msra.mxu1 %v20806_v18  ;;  %15984 = vmatprep.subr.bf16.mxu0 %v20824_v26  ;;  %v11010_v18 = vld [vmem:[%s22854_s8 + $0x300] sm:$0xff] }
 0x851   :  { %13806 = vmatmul.mubr.msk.f32.gmra.mrb[98].mxu0 %vm3521_vm8, %v20412_v5  ;;  %16064 = vmatprep.subr.bf16.mxu1 %v20828_v11  ;;  %v20893_v32 = vpack.c.bf16 %v11011_v25, %v11010_v18  ;;  %v11014_v25 = vld [vmem:[%s22854_s8 + $0x320] sm:$0xff]  ;;  %v11015_v18 = vld [vmem:[%s22854_s8 + $0x328] sm:$0xff] }
 0x852   :  { %13916 = vmatmul.mubr.msk.f32.gmra.mrb[98].mxu1 %vm3521_vm8, %v20412_v5  ;;  %13846 = vmatprep.mubr.msk.f32.mxu0 %vm3521_vm8, %v20322_v1  ;;  %v20923_v27 = vpack.c.bf16 %v11015_v18, %v11014_v25  ;;  %v11034_v18 = vld [vmem:[%s22854_s8 + $0x380] sm:$0xff] }
 0x853   :  { %15986 = vmatpush3.bf16.msra.mxu0 %v20824_v26  ;;  %13956 = vmatprep.mubr.msk.f32.mxu1 %vm3521_vm8, %v20322_v1  ;;  %23653 = vst [vmem:[#allocation96_spill] sm:$0xff] %v20893_v32 }
 0x854   :  { %16066 = vmatpush3.bf16.msra.mxu1 %v20828_v11  ;;  %15988 = vmatprep.subr.bf16.mxu0 %v20851_v21  ;;  %23655 = vst [vmem:[#allocation100_spill] sm:$0xff] %v20923_v27 }
 0x855   :  { %16068 = vmatprep.subr.bf16.mxu1 %v20856_v58 }
 0x857   :  { %15990 = vmatpush3.bf16.msra.mxu0 %v20851_v21 }
 0x858   :  { %16070 = vmatpush3.bf16.msra.mxu1 %v20856_v58  ;;  %15992 = vmatprep.subr.bf16.mxu0 %v20879_v15  ;;  %v11035_v58 = vld [vmem:[%s22854_s8 + $0x388] sm:$0xff] }
 0x859   :  { %16072 = vmatprep.subr.bf16.mxu1 %v20882_v48  ;;  %v20949_v11 = vpack.c.bf16 %v11035_v58, %v11034_v18  ;;  %v11039_v58 = vld [vmem:[%s22854_s8 + $0x3a8] sm:$0xff]  ;;  %v11040_v18 = vld [vmem:[%s22854_s8 + $0x3b0] sm:$0xff] }
 0x85b   :  { %15994 = vmatpush3.bf16.msra.mxu0 %v20879_v15  ;;  %23657 = vst [vmem:[#allocation104_spill] sm:$0xff] %v20949_v11 }
 0x85c   :  { %16074 = vmatpush3.bf16.msra.mxu1 %v20882_v48  ;;  %16012 = vmatprep.subr.bf16.mxu0 %v20893_v32  ;;  %v11017_v48 = vld [vmem:[%s22854_s8 + $0x338] sm:$0xff] }
 0x85d   :  { %v20939_v25 = vpack.c.bf16 %v11017_v48, %v11016_v17  ;;  %v11037_v48 = vld [vmem:[%s22854_s8 + $0x398] sm:$0xff] }
 0x85e   :  { %13847 = vmatmul.mubr.msk.f32.vlgmr.msra.gmra.mrb[100].mxu0 %vm3521_vm8, %v20320_v43  ;;  %v20959_v17 = vpack.c.bf16 %v11037_v48, %v11036_v20  ;;  %v20973_v20 = vpack.c.bf16 %v11039_v58, %v11038_v56  ;;  %v11041_v48 = vld [vmem:[%s22854_s8 + $0x3b8] sm:$0xff] }
 0x85f   :  { %13957 = vmatmul.mubr.msk.f32.vlgmr.msra.gmra.mrb[100].mxu1 %vm3521_vm8, %v20320_v43  ;;  %13849 = vmatprep.mubr.msk.f32.mxu0 %vm3521_vm8, %v20369_v34  ;;  %23656 = vst [vmem:[#allocation102_spill] sm:$0xff] %v20939_v25  ;;  %v20987_v56 = vpack.c.bf16 %v11041_v48, %v11040_v18 }
 0x860   :  { %16014 = vmatpush3.bf16.msra.mxu0 %v20893_v32  ;;  %13959 = vmatprep.mubr.msk.f32.mxu1 %vm3521_vm8, %v20369_v34  ;;  %23658 = vst [vmem:[#allocation106_spill] sm:$0xff] %v20959_v17  ;;  %23659 = vst [vmem:[#allocation108_spill] sm:$0xff] %v20973_v20 }
 0x861   :  { %16016 = vmatprep.subr.bf16.mxu0 %v20905_v49  ;;  %23660 = vst [vmem:[#allocation110_spill] sm:$0xff] %v20987_v56 }
 0x862   :  { %13850 = vmatmul.mubr.msk.f32.gmra.mrb[102].mxu0 %vm3521_vm8, %v20412_v5 }
 0x863   :  { %13960 = vmatmul.mubr.msk.f32.gmra.mrb[102].mxu1 %vm3521_vm8, %v20412_v5  ;;  %13890 = vmatprep.mubr.msk.f32.mxu0 %vm3521_vm8, %v20322_v1 }
 0x864   :  { %16018 = vmatpush3.bf16.msra.mxu0 %v20905_v49 }
 0x865   :  { %16020 = vmatprep.subr.bf16.mxu0 %v20923_v27 }
 0x868   :  { %16022 = vmatpush3.bf16.msra.mxu0 %v20923_v27  ;;  %v21019_v27 = vld [vmem:[%s22855_s9 + $0x18] sm:$0xff] }
 0x869   :  { %16024 = vmatprep.subr.bf16.mxu0 %v20939_v25  ;;  %5430 = vmatprep.mubr.f32.mxu1 %v21019_v27 }
 0x86c   :  { %16026 = vmatpush3.bf16.msra.mxu0 %v20939_v25 }
 0x86d   :  { %16044 = vmatprep.subr.bf16.mxu0 %v20949_v11 }
 0x86f   :  { %13891 = vmatmul.mubr.msk.f32.vlgmr.msra.gmra.mrb[104].mxu0 %vm3521_vm8, %v20320_v43 }
 0x870   :  { %13893 = vmatprep.mubr.msk.f32.mxu0 %vm3521_vm8, %v20369_v34  ;;  %16046 = vmatpush3.bf16.msra.mxu0 %v20949_v11 }
 0x871   :  { %16048 = vmatprep.subr.bf16.mxu0 %v20959_v17 }
 0x873   :  { %13894 = vmatmul.mubr.msk.f32.gmra.mrb[106].mxu0 %vm3521_vm8, %v20412_v5 }
 0x874   :  { %16050 = vmatpush3.bf16.msra.mxu0 %v20959_v17  ;;  %13934 = vmatprep.mubr.msk.f32.mxu0 %vm3521_vm8, %v20322_v1  ;;  %v21001_v1 = vld [vmem:[%s22855_s9 + $0x8] sm:$0xff] }
 0x875   :  { %16052 = vmatprep.subr.bf16.mxu0 %v20973_v20  ;;  %23661 = vst [vmem:[#allocation112_spill] sm:$0xff] %v21001_v1 }
 0x878   :  { %16054 = vmatpush3.bf16.msra.mxu0 %v20973_v20 }
 0x879   :  { %16056 = vmatprep.subr.bf16.mxu0 %v20987_v56 }
 0x87c   :  { %16058 = vmatpush3.bf16.msra.mxu0 %v20987_v56 }
 0x87f   :  { %13935 = vmatmul.mubr.msk.f32.vlgmr.msra.gmra.mrb[108].mxu0 %vm3521_vm8, %v20320_v43 }
 0x880   :  { %13937 = vmatprep.mubr.msk.f32.mxu0 %vm3521_vm8, %v20369_v34 }
 0x883   :  { %13938 = vmatmul.mubr.msk.f32.gmra.mrb[110].mxu0 %vm3521_vm8, %v20412_v5 }
 0x884   :  { %5325 = vmatprep.mubr.f32.mxu0 %v21001_v1 }
 0x8cb   :  { %v13628_v58 = vpop.f32.mrb[76].mxu0  ;;  %v21004_v18 = vpop.f32.mrb[76].mxu1 }
 0x8cc   :  { %v3832_v48 = vpop.f32.mrb[77].mxu0  ;;  %v21006_v38 = vpop.f32.mrb[77].mxu1 }
 0x8cd   :  { %v16077_v43 = vpack.c.bf16 %v13628_v58, %v3832_v48 }
 0x8da   :  { %v13631_v23 = vpop.f32.mrb[78].mxu0  ;;  %v21010_v56 = vpop.f32.mrb[78].mxu1 }
 0x8db   :  { %v3842_v5 = vpop.f32.mrb[79].mxu0  ;;  %v21012_v36 = vpop.f32.mrb[79].mxu1 }
 0x8dc   :  { %v16081_v20 = vpack.c.bf16 %v13631_v23, %v3842_v5 }
 0x8de   :  { %v13650_v35 = vpop.f32.mrb[80].mxu0  ;;  %v13738_v17 = vpop.f32.mrb[80].mxu1 }
 0x8df   :  { %v3926_v40 = vpop.f32.mrb[81].mxu0  ;;  %v4302_v11 = vpop.f32.mrb[81].mxu1 }
 0x8e0   :  { %v16085_v12 = vpack.c.bf16 %v13650_v35, %v3926_v40  ;;  %v16083_v25 = vpack.c.bf16 %v13738_v17, %v4302_v11 }
 0x8e2   :  { %v13653_v58 = vpop.f32.mrb[82].mxu0  ;;  %v13741_v48 = vpop.f32.mrb[82].mxu1 }
 0x8e3   :  { %v3936_v44 = vpop.f32.mrb[83].mxu0  ;;  %v4312_v34 = vpop.f32.mrb[83].mxu1 }
 0x8e4   :  { %v16089_v59 = vpack.c.bf16 %v13653_v58, %v3936_v44  ;;  %v16087_v23 = vpack.c.bf16 %v13741_v48, %v4312_v34 }
 0x8ee   :  { %v13672_v5 = vpop.f32.mrb[84].mxu0  ;;  %v13782_v1 = vpop.f32.mrb[84].mxu1 }
 0x8ef   :  { %v4020_v49 = vpop.f32.mrb[85].mxu0  ;;  %v4490_v9 = vpop.f32.mrb[85].mxu1 }
 0x8f0   :  { %v16093_v32 = vpack.c.bf16 %v13672_v5, %v4020_v49  ;;  %v16099_v40 = vpack.c.bf16 %v13782_v1, %v4490_v9 }
 0x8f2   :  { %v13675_v35 = vpop.f32.mrb[86].mxu0  ;;  %v13785_v11 = vpop.f32.mrb[86].mxu1 }
 0x8f3   :  { %v4030_v17 = vpop.f32.mrb[87].mxu0  ;;  %v4500_v46 = vpop.f32.mrb[87].mxu1 }
 0x8f4   :  { %v16097_v15 = vpack.c.bf16 %v13675_v35, %v4030_v17  ;;  %v16103_v13 = vpack.c.bf16 %v13785_v11, %v4500_v46 }
 0x8fe   :  { %v13716_v21 = vpop.f32.mrb[88].mxu0 }
 0x8ff   :  { %v21022_v2 = vpop.f32.mrb[88].mxu1  ;;  %v4208_v26 = vpop.f32.mrb[89].mxu0 }
 0x900   :  { %v16075_v44 = vpack.c.bf16 %v13716_v21, %v4208_v26  ;;  %v21024_v34 = vpop.f32.mrb[89].mxu1 }
 0x902   :  { %v13719_v48 = vpop.f32.mrb[90].mxu0  ;;  %16076 = vmatprep.subr.bf16.mxu0 %v16075_v44 }
 0x903   :  { %v21028_v49 = vpop.f32.mrb[90].mxu1  ;;  %v4218_v9 = vpop.f32.mrb[91].mxu0  ;;  %16078 = vmatpush3.bf16.msra.mxu0 %v16077_v43  ;;  %v21134_v43 = vld [vmem:[%s22855_s9 + $0x80] sm:$0xff] }
 0x904   :  { %v16079_v1 = vpack.c.bf16 %v13719_v48, %v4218_v9  ;;  %v21030_v5 = vpop.f32.mrb[91].mxu1  ;;  %23670 = vst [vmem:[#allocation126_spill] sm:$0xff] %v21134_v43 }
 0x906   :  { %16080 = vmatprep.subr.bf16.mxu0 %v16079_v1  ;;  %v23663_v1 = vpack.c.bf16 %v21010_v56, %v21012_v36  ;;  %v21167_v56 = vld [vmem:[%s22855_s9 + $0xc8] sm:$0xff] }
 0x907   :  { %16082 = vmatpush3.bf16.msra.mxu0 %v16081_v20  ;;  %v23662_v20 = vpack.c.bf16 %v21004_v18, %v21006_v38  ;;  %v21066_v38 = vld [vmem:[%s22855_s9 + $0x28] sm:$0xff]  ;;  %23673 = vst [vmem:[#allocation132_spill] sm:$0xff] %v21167_v56 }
 0x908   :  { %16084 = vmatprep.subr.bf16.mxu0 %v16083_v25 }
 0x90b   :  { %16086 = vmatpush3.bf16.msra.mxu0 %v16085_v12 }
 0x90c   :  { %16088 = vmatprep.subr.bf16.mxu0 %v16087_v23 }
 0x90f   :  { %v13760_v26 = vpop.f32.mrb[92].mxu0  ;;  %16090 = vmatpush3.bf16.msra.mxu0 %v16089_v59  ;;  %v21120_v59 = vld [vmem:[%s22855_s9 + $0x60] sm:$0xff] }
 0x910   :  { %v21034_v21 = vpop.f32.mrb[92].mxu1  ;;  %v4396_v35 = vpop.f32.mrb[93].mxu0  ;;  %23668 = vst [vmem:[#allocation122_spill] sm:$0xff] %v21120_v59 }
 0x911   :  { %v16091_v11 = vpack.c.bf16 %v13760_v26, %v4396_v35  ;;  %v21036_v17 = vpop.f32.mrb[93].mxu1 }
 0x913   :  { %v13763_v44 = vpop.f32.mrb[94].mxu0  ;;  %16092 = vmatprep.subr.bf16.mxu0 %v16091_v11 }
 0x914   :  { %v21040_v48 = vpop.f32.mrb[94].mxu1  ;;  %v4406_v9 = vpop.f32.mrb[95].mxu0  ;;  %16094 = vmatpush3.bf16.msra.mxu0 %v16093_v32  ;;  %v21057_v32 = vld [vmem:[%s22855_s9] sm:$0xff] }
 0x915   :  { %v16095_v25 = vpack.c.bf16 %v13763_v44, %v4406_v9  ;;  %v21042_v12 = vpop.f32.mrb[95].mxu1  ;;  %v21092_v44 = vld [vmem:[%s22855_s9 + $0x48] sm:$0xff] }
 0x916   :  { %23665 = vst [vmem:[#allocation116_spill] sm:$0xff] %v21092_v44 }
 0x917   :  { %16096 = vmatprep.subr.bf16.mxu0 %v16095_v25 }
 0x918   :  { %16098 = vmatpush3.bf16.msra.mxu0 %v16097_v15 }
 0x919   :  { %16100 = vmatprep.subr.bf16.mxu0 %v16099_v40  ;;  %v21082_v40 = vld [vmem:[%s22855_s9 + $0x20] sm:$0xff] }
 0x91a   :  { %23664 = vst [vmem:[#allocation114_spill] sm:$0xff] %v21082_v40 }
 0x91c   :  { %16102 = vmatpush3.bf16.msra.mxu0 %v23662_v20 }
 0x91d   :  { %16104 = vmatprep.subr.bf16.mxu0 %v16103_v13  ;;  %v21160_v13 = vld [vmem:[%s22855_s9 + $0xa0] sm:$0xff] }
 0x91e   :  { %23672 = vst [vmem:[#allocation130_spill] sm:$0xff] %v21160_v13 }
 0x920   :  { %v21049_v23 = vpop.f32.mrb[96].mxu0  ;;  %16106 = vmatpush3.bf16.msra.mxu0 %v23663_v1  ;;  %v21112_v1 = vld [vmem:[%s22855_s9 + $0x68] sm:$0xff] }
 0x921   :  { %v21059_v26 = vpop.f32.mrb[96].mxu1  ;;  %v21061_v15 = vpop.f32.mrb[97].mxu0  ;;  %16140 = vmatprep.subr.bf16.mxu0 %v20182_v0  ;;  %23667 = vst [vmem:[#allocation120_spill] sm:$0xff] %v21112_v1 }
 0x922   :  { %v21071_v36 = vpop.f32.mrb[97].mxu1 }
 0x923   :  { %5326 = vmatmul.mubr.f32.vlgmr.msra.gmra.mrb[112].mxu0 %v21057_v32 }
 0x924   :  { %v21076_v18 = vpop.f32.mrb[98].mxu0  ;;  %5330 = vmatprep.mubr.f32.mxu0 %v21066_v38  ;;  %16142 = vmatpush3.bf16.msra.mxu0 %v20182_v0  ;;  %v21106_v0 = vld [vmem:[%s22855_s9 + $0x40] sm:$0xff] }
 0x925   :  { %v21085_v35 = vpop.f32.mrb[98].mxu1  ;;  %v21087_v11 = vpop.f32.mrb[99].mxu0  ;;  %16144 = vmatprep.subr.bf16.mxu0 %v20195_v30  ;;  %23666 = vst [vmem:[#allocation118_spill] sm:$0xff] %v21106_v0 }
 0x926   :  { %v21097_v25 = vpop.f32.mrb[99].mxu1 }
 0x927   :  { %5331 = vmatmul.mubr.f32.gmra.mrb[114].mxu0 %v21082_v40 }
 0x928   :  { %5335 = vmatprep.mubr.f32.mxu0 %v21092_v44  ;;  %16146 = vmatpush3.bf16.msra.mxu0 %v20195_v30  ;;  %v21126_v30 = vld [vmem:[%s22855_s9 + $0x88] sm:$0xff]  ;;  %v3696_v44 = vmul.f32 %v20131_v51, %v20318_v6  ;;  %v21203_v51 = vld [vmem:[%s22855_s9 + $0xe0] sm:$0xff]  ;;  %v3707_v6 = vmul.f32 0.2, %v20302_v57 }
 0x929   :  { %16148 = vmatprep.subr.bf16.mxu0 %v20235_v19  ;;  %23669 = vst [vmem:[#allocation124_spill] sm:$0xff] %v21126_v30 }
 0x92a   :  { %v3700_v40 = vadd.f32 %v3696_v44, %v20338_v63 }
 0x92b   :  { %5336 = vmatmul.mubr.f32.gmra.mrb[116].mxu0 %v21106_v0  ;;  %v21184_v0 = vld [vmem:[%s22855_s9 + $0xc0] sm:$0xff] }
 0x92c   :  { %5340 = vmatprep.mubr.f32.mxu0 %v21112_v1  ;;  %16150 = vmatpush3.bf16.msra.mxu0 %v20235_v19  ;;  %v21142_v19 = vld [vmem:[%s22855_s9 + $0xa8] sm:$0xff]  ;;  %23674 = vst [vmem:[#allocation134_spill] sm:$0xff] %v21184_v0  ;;  %v3697_v1 = vmul.f32 %v20140_v39, %v20365_v22  ;;  %v3708_v44 = vmul.f32 0.2, %v3700_v40  ;;  %vm3704_vm15 = vcmp.gt.f32.partialorder %v3700_v40, 0.0  ;;  %v21215_v39 = vsel %vm3703_vm14, %v20302_v57, %v3707_v6 }
 0x92d   :  { %16152 = vmatprep.subr.bf16.mxu0 %v20257_v62  ;;  %23671 = vst [vmem:[#allocation128_spill] sm:$0xff] %v21142_v19  ;;  %v23703_v6 = vld [vmem:[#allocation50_spill] sm:$0xff]  ;;  %vm8659_vm14 = vcmask 654336  }
 0x92f   :  { %5341 = vmatmul.mubr.f32.gmra.mrb[118].mxu0 %v21120_v59 }
 0x930   :  { %5345 = vmatprep.mubr.f32.mxu0 %v21126_v30  ;;  %16154 = vmatpush3.bf16.msra.mxu0 %v20257_v62  ;;  %v21191_v62 = vld [vmem:[%s22855_s9 + $0xe8] sm:$0xff] }
 0x931   :  { %v21137_v46 = vpop.f32.mrb[100].mxu0  ;;  %16172 = vmatprep.subr.bf16.mxu0 %v20410_v47  ;;  %23675 = vst [vmem:[#allocation136_spill] sm:$0xff] %v21191_v62 }
 0x932   :  { %v21145_v20 = vpop.f32.mrb[100].mxu1  ;;  %v21147_v58 = vpop.f32.mrb[101].mxu0 }
 0x933   :  { %v21151_v9 = vpop.f32.mrb[101].mxu1  ;;  %5346 = vmatmul.mubr.f32.gmra.mrb[120].mxu0 %v21134_v43 }
 0x934   :  { %5350 = vmatprep.mubr.f32.mxu0 %v21142_v19 }
 0x935   :  { %v21162_v30 = vpop.f32.mrb[102].mxu0 }
 0x936   :  { %v21169_v59 = vpop.f32.mrb[102].mxu1  ;;  %v21171_v43 = vpop.f32.mrb[103].mxu0 }
 0x937   :  { %v21175_v19 = vpop.f32.mrb[103].mxu1  ;;  %5351 = vmatmul.mubr.f32.gmra.mrb[122].mxu0 %v21160_v13  ;;  %v3706_v13 = vmul.f32 0.2, %v20304_v29 }
 0x938   :  { %5355 = vmatprep.mubr.f32.mxu0 %v21167_v56  ;;  %v3701_v56 = vadd.f32 %v3697_v1, %v20388_v16 }
 0x939   :  { %v21209_v63 = vsel %vm3702_vm13, %v20304_v29, %v3706_v13 }
 0x93a   :  { %v3709_v22 = vmul.f32 0.2, %v3701_v56  ;;  %vm3705_vm0 = vcmp.gt.f32.partialorder %v3701_v56, 0.0 }
 0x93b   :  { %5356 = vmatmul.mubr.f32.gmra.mrb[124].mxu0 %v21184_v0  ;;  %v21217_v0 = vsel %vm3704_vm15, %v3700_v40, %v3708_v44  ;;  %v23676_v40 = vpack.c.bf16 %v21049_v23, %v21061_v15  ;;  %v23678_v23 = vpack.c.bf16 %v21059_v26, %v21071_v36  ;;  %v23680_v15 = vpack.c.bf16 %v21085_v35, %v21097_v25  ;;  %v23695_v36 = vld [vmem:[#allocation42_spill] sm:$0xff] }
 0x93c   :  { %5360 = vmatprep.mubr.f32.mxu0 %v21191_v62  ;;  %v21225_v13 = vsel %vm3705_vm0, %v3701_v56, %v3709_v22  ;;  %v23681_v26 = vpack.c.bf16 %v21028_v49, %v21030_v5  ;;  %v23686_v5 = vpack.c.bf16 %v21169_v59, %v21175_v19  ;;  %v23694_v59 = vld [vmem:[#allocation96_spill] sm:$0xff]  ;;  %v23696_v35 = vld [vmem:[#allocation98_spill] sm:$0xff] }
 0x93d   :  { %v23699_v25 = vld [vmem:[#allocation46_spill] sm:$0xff]  ;;  %v23702_v19 = vld [vmem:[#allocation104_spill] sm:$0xff] }
 0x93e   :  { %v23704_v44 = vld [vmem:[#allocation106_spill] sm:$0xff]  ;;  %v23705_v22 = vld [vmem:[#allocation52_spill] sm:$0xff] }
 0x93f   :  { %5361 = vmatmul.mubr.f32.gmra.mrb[126].mxu0 %v21203_v51 }
 0x940   :  { %13978 = vmatprep.mubr.msk.f32.mxu0 %vm3521_vm8, %v21209_v63 }
 0x942   :  { %v13892_v62 = vpop.f32.mrb[104].mxu0 }
 0x943   :  { %v4960_v16 = vpop.f32.mrb[105].mxu0  ;;  %13979 = vmatmul.mubr.msk.f32.vlgmr.msra.gmra.mrb[128].mxu0 %vm3521_vm8, %v21215_v39 }
 0x944   :  { %v16107_v29 = vpack.c.bf16 %v13892_v62, %v4960_v16  ;;  %16174 = vmatpush3.bf16.msra.mxu0 %v20410_v47  ;;  %13981 = vmatprep.mubr.msk.f32.mxu0 %vm3521_vm8, %v21217_v0  ;;  %v23677_v47 = vpack.c.bf16 %v21076_v18, %v21087_v11  ;;  %v23697_v11 = vld [vmem:[#allocation44_spill] sm:$0xff] }
 0x945   :  { %16176 = vmatprep.subr.bf16.mxu0 %v20440_v53  ;;  %v23706_v16 = vld [vmem:[#allocation108_spill] sm:$0xff] }
 0x946   :  { %v13895_v57 = vpop.f32.mrb[106].mxu0  ;;  %16108 = vmatprep.subr.bf16.mxu1 %v16107_v29  ;;  %v23707_v29 = vld [vmem:[#allocation54_spill] sm:$0xff] }
 0x947   :  { %v4970_v1 = vpop.f32.mrb[107].mxu0  ;;  %16110 = vmatpush3.bf16.msra.mxu1 %v23676_v40  ;;  %13982 = vmatmul.mubr.msk.f32.gmra.mrb[130].mxu0 %vm3521_vm8, %v21225_v13  ;;  %v23710_v40 = vld [vmem:[#allocation58_spill] sm:$0xff] }
 0x948   :  { %v16111_v62 = vpack.c.bf16 %v13895_v57, %v4970_v1  ;;  %16178 = vmatpush3.bf16.msra.mxu0 %v20440_v53  ;;  %14022 = vmatprep.mubr.msk.f32.mxu0 %vm3521_vm8, %v21209_v63  ;;  %v23679_v53 = vpack.c.bf16 %v21022_v2, %v21024_v34  ;;  %v23682_v34 = vpack.c.bf16 %v21137_v46, %v21147_v58  ;;  %v23708_v57 = vld [vmem:[#allocation110_spill] sm:$0xff]  ;;  %v23709_v1 = vld [vmem:[#allocation56_spill] sm:$0xff] }
 0x949   :  { %16180 = vmatprep.subr.bf16.mxu0 %v20471_v50  ;;  %v23684_v58 = vpack.c.bf16 %v21145_v20, %v21151_v9  ;;  %v23687_v46 = vpack.c.bf16 %v21040_v48, %v21042_v12  ;;  %v23692_v48 = vld [vmem:[#allocation92_spill] sm:$0xff]  ;;  %v23700_v20 = vld [vmem:[#allocation102_spill] sm:$0xff] }
 0x94a   :  { %16112 = vmatprep.subr.bf16.mxu1 %v16111_v62  ;;  %v23693_v12 = vld [vmem:[#allocation40_spill] sm:$0xff] }
 0x94b   :  { %16114 = vmatpush3.bf16.msra.mxu1 %v23677_v47  ;;  %v23698_v9 = vld [vmem:[#allocation100_spill] sm:$0xff] }
 0x94c   :  { %16116 = vmatprep.subr.bf16.mxu1 %v23678_v23  ;;  %16182 = vmatpush3.bf16.msra.mxu0 %v20471_v50  ;;  %v23711_v62 = vld [vmem:[#allocation60_spill] sm:$0xff]  ;;  %v23713_v23 = vld [vmem:[#allocation62_spill] sm:$0xff] }
 0x94d   :  { %16184 = vmatprep.subr.bf16.mxu0 %v20494_v42  ;;  %v23712_v47 = vld [vmem:[#allocation112_spill] sm:$0xff] }
 0x94f   :  { %16118 = vmatpush3.bf16.msra.mxu1 %v23679_v53  ;;  %v23714_v53 = vld [vmem:[#allocation64_spill] sm:$0xff] }
 0x950   :  { %16120 = vmatprep.subr.bf16.mxu1 %v23680_v15  ;;  %16186 = vmatpush3.bf16.msra.mxu0 %v20494_v42  ;;  %v23715_v15 = vld [vmem:[#allocation66_spill] sm:$0xff] }
 0x951   :  { %16204 = vmatprep.subr.bf16.mxu0 %v20516_v14 }
 0x952   :  { %v13936_v56 = vpop.f32.mrb[108].mxu0 }
 0x953   :  { %v5148_v18 = vpop.f32.mrb[109].mxu0  ;;  %16122 = vmatpush3.bf16.msra.mxu1 %v23681_v26  ;;  %14023 = vmatmul.mubr.msk.f32.vlgmr.msra.gmra.mrb[132].mxu0 %vm3521_vm8, %v21215_v39  ;;  %v23718_v26 = vld [vmem:[#allocation72_spill] sm:$0xff] }
 0x954   :  { %v16123_v50 = vpack.c.bf16 %v13936_v56, %v5148_v18  ;;  %14025 = vmatprep.mubr.msk.f32.mxu0 %vm3521_vm8, %v21217_v0  ;;  %16206 = vmatpush3.bf16.msra.mxu0 %v20516_v14  ;;  %v23683_v14 = vpack.c.bf16 %v21162_v30, %v21171_v43  ;;  %v21406_v43 = vld [vmem:[%s22855_s9 + $0xf8] sm:$0xff]  ;;  %v23717_v18 = vld [vmem:[#allocation70_spill] sm:$0xff] }
 0x955   :  { %16208 = vmatprep.subr.bf16.mxu0 %v20536_v41  ;;  %v23701_v30 = vld [vmem:[#allocation48_spill] sm:$0xff] }
 0x956   :  { %v13939_v2 = vpop.f32.mrb[110].mxu0  ;;  %16124 = vmatprep.subr.bf16.mxu1 %v16123_v50  ;;  %v23716_v56 = vld [vmem:[#allocation68_spill] sm:$0xff]  ;;  %v23719_v50 = vld [vmem:[#allocation74_spill] sm:$0xff] }
 0x957   :  { %v5158_v42 = vpop.f32.mrb[111].mxu0  ;;  %16126 = vmatpush3.bf16.msra.mxu1 %v23682_v34  ;;  %14026 = vmatmul.mubr.msk.f32.gmra.mrb[134].mxu0 %vm3521_vm8, %v21225_v13  ;;  %v23722_v34 = vld [vmem:[#allocation80_spill] sm:$0xff] }
 0x958   :  { %v16127_v49 = vpack.c.bf16 %v13939_v2, %v5158_v42  ;;  %16210 = vmatpush3.bf16.msra.mxu0 %v20536_v41  ;;  %14066 = vmatprep.mubr.msk.f32.mxu0 %vm3521_vm8, %v21209_v63  ;;  %v23685_v41 = vpack.c.bf16 %v21034_v21, %v21036_v17  ;;  %v21312_v21 = vld [vmem:[%s22855_s9 + $0x30] sm:$0xff]  ;;  %v23720_v2 = vld [vmem:[#allocation76_spill] sm:$0xff] }
 0x959   :  { %16212 = vmatprep.subr.bf16.mxu0 %v20564_v52  ;;  %v21347_v17 = vld [vmem:[%s22855_s9 + $0x70] sm:$0xff] }
 0x95a   :  { %16128 = vmatprep.subr.bf16.mxu1 %v16127_v49  ;;  %v23721_v42 = vld [vmem:[#allocation78_spill] sm:$0xff] }
 0x95b   :  { %16130 = vmatpush3.bf16.msra.mxu1 %v23683_v14  ;;  %v23723_v49 = vld [vmem:[#allocation82_spill] sm:$0xff] }
 0x95c   :  { %16132 = vmatprep.subr.bf16.mxu1 %v23684_v58  ;;  %16214 = vmatpush3.bf16.msra.mxu0 %v20564_v52  ;;  %v21294_v52 = vld [vmem:[%s22855_s9 + $0x10] sm:$0xff] }
 0x95d   :  { %16216 = vmatprep.subr.bf16.mxu0 %v20590_v54  ;;  %v23724_v14 = vld [vmem:[#allocation86_spill] sm:$0xff] }
 0x95e   :  { %v23725_v58 = vld [vmem:[#allocation90_spill] sm:$0xff] }
 0x95f   :  { %16134 = vmatpush3.bf16.msra.mxu1 %v23685_v41  ;;  %v23726_v41 = vld [vmem:[#allocation94_spill] sm:$0xff] }
 0x960   :  { %16136 = vmatprep.subr.bf16.mxu1 %v23686_v5  ;;  %16218 = vmatpush3.bf16.msra.mxu0 %v20590_v54  ;;  %v21302_v54 = vld [vmem:[%s22855_s9 + $0x38] sm:$0xff] }
 0x961   :  { %16236 = vmatprep.subr.bf16.mxu0 %v20611_v31 }
 0x963   :  { %16138 = vmatpush3.bf16.msra.mxu1 %v23687_v46  ;;  %14067 = vmatmul.mubr.msk.f32.vlgmr.msra.gmra.mrb[136].mxu0 %vm3521_vm8, %v21215_v39 }
 0x964   :  { %16156 = vmatprep.subr.bf16.mxu1 %v20285_v4  ;;  %14069 = vmatprep.mubr.msk.f32.mxu0 %vm3521_vm8, %v21217_v0 }
 0x965   :  { %16238 = vmatpush3.bf16.msra.mxu0 %v20611_v31  ;;  %v21319_v31 = vld [vmem:[%s22855_s9 + $0x58] sm:$0xff] }
 0x966   :  { %5431 = vmatmul.mubr.f32.vlgmr.msra.gmra.mrb[104].mxu1 %v21294_v52  ;;  %16240 = vmatprep.subr.bf16.mxu0 %v20632_v55 }
 0x967   :  { %16158 = vmatpush3.bf16.msra.mxu1 %v20285_v4  ;;  %5435 = vmatprep.mubr.f32.mxu1 %v21302_v54  ;;  %v21331_v4 = vld [vmem:[%s22855_s9 + $0x50] sm:$0xff] }
 0x968   :  { %14070 = vmatmul.mubr.msk.f32.gmra.mrb[138].mxu0 %vm3521_vm8, %v21225_v13  ;;  %16160 = vmatprep.subr.bf16.mxu1 %v20324_v60 }
 0x969   :  { %16242 = vmatpush3.bf16.msra.mxu0 %v20632_v55  ;;  %14110 = vmatprep.mubr.msk.f32.mxu0 %vm3521_vm8, %v21209_v63  ;;  %v21337_v55 = vld [vmem:[%s22855_s9 + $0x78] sm:$0xff] }
 0x96a   :  { %5436 = vmatmul.mubr.f32.gmra.mrb[106].mxu1 %v21312_v21  ;;  %16244 = vmatprep.subr.bf16.mxu0 %v20659_v24 }
 0x96b   :  { %5440 = vmatprep.mubr.f32.mxu1 %v21319_v31  ;;  %16162 = vmatpush3.bf16.msra.mxu1 %v20324_v60  ;;  %v21353_v60 = vld [vmem:[%s22855_s9 + $0x98] sm:$0xff] }
 0x96c   :  { %16164 = vmatprep.subr.bf16.mxu1 %v20357_v33 }
 0x96d   :  { %16246 = vmatpush3.bf16.msra.mxu0 %v20659_v24  ;;  %v21363_v24 = vld [vmem:[%s22855_s9 + $0x90] sm:$0xff] }
 0x96e   :  { %5441 = vmatmul.mubr.f32.gmra.mrb[108].mxu1 %v21331_v4  ;;  %16248 = vmatprep.subr.bf16.mxu0 %v20687_v61 }
 0x96f   :  { %5445 = vmatprep.mubr.f32.mxu1 %v21337_v55  ;;  %16166 = vmatpush3.bf16.msra.mxu1 %v20357_v33  ;;  %v21371_v33 = vld [vmem:[%s22855_s9 + $0xb8] sm:$0xff] }
 0x970   :  { %16168 = vmatprep.subr.bf16.mxu1 %v20382_v3 }
 0x971   :  { %16250 = vmatpush3.bf16.msra.mxu0 %v20687_v61  ;;  %v21390_v61 = vld [vmem:[%s22855_s9 + $0xd8] sm:$0xff] }
 0x972   :  { %5446 = vmatmul.mubr.f32.gmra.mrb[110].mxu1 %v21347_v17  ;;  %16268 = vmatprep.subr.bf16.mxu0 %v20707_v8 }
 0x973   :  { %5450 = vmatprep.mubr.f32.mxu1 %v21353_v60  ;;  %16170 = vmatpush3.bf16.msra.mxu1 %v20382_v3  ;;  %v21383_v3 = vld [vmem:[%s22855_s9 + $0xb0] sm:$0xff] }
 0x974   :  { %14111 = vmatmul.mubr.msk.f32.vlgmr.msra.gmra.mrb[140].mxu0 %vm3521_vm8, %v21215_v39  ;;  %16188 = vmatprep.subr.bf16.mxu1 %v20193_v28 }
 0x975   :  { %14113 = vmatprep.mubr.msk.f32.mxu0 %vm3521_vm8, %v21217_v0  ;;  %16270 = vmatpush3.bf16.msra.mxu0 %v20707_v8  ;;  %v21401_v8 = vld [vmem:[%s22855_s9 + $0xd0] sm:$0xff] }
 0x976   :  { %5451 = vmatmul.mubr.f32.gmra.mrb[112].mxu1 %v21363_v24  ;;  %16272 = vmatprep.subr.bf16.mxu0 %v20728_v7 }
 0x977   :  { %5455 = vmatprep.mubr.f32.mxu1 %v21371_v33 }
 0x978   :  { %14114 = vmatmul.mubr.msk.f32.gmra.mrb[142].mxu0 %vm3521_vm8, %v21225_v13 }
 0x979   :  { %16274 = vmatpush3.bf16.msra.mxu0 %v20728_v7  ;;  %14154 = vmatprep.mubr.msk.f32.mxu0 %vm3521_vm8, %v21209_v63  ;;  %v21415_v7 = vld [vmem:[%s22855_s9 + $0xf0] sm:$0xff] }
 0x97a   :  { %5456 = vmatmul.mubr.f32.gmra.mrb[114].mxu1 %v21383_v3  ;;  %16276 = vmatprep.subr.bf16.mxu0 %v20755_v10 }
 0x97b   :  { %5460 = vmatprep.mubr.f32.mxu1 %v21390_v61 }
 0x97d   :  { %16278 = vmatpush3.bf16.msra.mxu0 %v20755_v10  ;;  %v23688_v10 = vld [vmem:[#allocation84_spill] sm:$0xff] }
 0x97e   :  { %5461 = vmatmul.mubr.f32.gmra.mrb[116].mxu1 %v21401_v8  ;;  %16280 = vmatprep.subr.bf16.mxu0 %v20783_v45 }
 0x97f   :  { %5465 = vmatprep.mubr.f32.mxu1 %v21406_v43 }
 0x981   :  { %16282 = vmatpush3.bf16.msra.mxu0 %v20783_v45  ;;  %v23689_v45 = vld [vmem:[#allocation36_spill] sm:$0xff] }
 0x982   :  { %5466 = vmatmul.mubr.f32.gmra.mrb[118].mxu1 %v21415_v7  ;;  %16300 = vmatprep.subr.bf16.mxu0 %v20803_v37 }
 0x983   :  { %14000 = vmatprep.mubr.msk.f32.mxu1 %vm3521_vm8, %v21209_v63 }
 0x984   :  { %14155 = vmatmul.mubr.msk.f32.vlgmr.msra.gmra.mrb[144].mxu0 %vm3521_vm8, %v21215_v39 }
 0x985   :  { %14157 = vmatprep.mubr.msk.f32.mxu0 %vm3521_vm8, %v21217_v0  ;;  %16302 = vmatpush3.bf16.msra.mxu0 %v20803_v37  ;;  %v23690_v37 = vld [vmem:[#allocation88_spill] sm:$0xff] }
 0x986   :  { %14001 = vmatmul.mubr.msk.f32.vlgmr.msra.gmra.mrb[120].mxu1 %vm3521_vm8, %v21215_v39  ;;  %16304 = vmatprep.subr.bf16.mxu0 %v23688_v10 }
 0x987   :  { %16190 = vmatpush3.bf16.msra.mxu1 %v20193_v28  ;;  %14003 = vmatprep.mubr.msk.f32.mxu1 %vm3521_vm8, %v21217_v0  ;;  %v23691_v28 = vld [vmem:[#allocation38_spill] sm:$0xff] }
 0x988   :  { %16192 = vmatprep.subr.bf16.mxu1 %v23689_v45  ;;  %14158 = vmatmul.mubr.msk.f32.gmra.mrb[146].mxu0 %vm3521_vm8, %v21225_v13 }
 0x989   :  { %16306 = vmatpush3.bf16.msra.mxu0 %v23688_v10  ;;  %14198 = vmatprep.mubr.msk.f32.mxu0 %vm3521_vm8, %v21209_v63 }
 0x98a   :  { %14004 = vmatmul.mubr.msk.f32.gmra.mrb[122].mxu1 %vm3521_vm8, %v21225_v13  ;;  %16308 = vmatprep.subr.bf16.mxu0 %v23690_v37 }
 0x98b   :  { %16194 = vmatpush3.bf16.msra.mxu1 %v23689_v45  ;;  %14044 = vmatprep.mubr.msk.f32.mxu1 %vm3521_vm8, %v21209_v63 }
 0x98c   :  { %16196 = vmatprep.subr.bf16.mxu1 %v23691_v28 }
 0x98d   :  { %16310 = vmatpush3.bf16.msra.mxu0 %v23690_v37 }
 0x98e   :  { %16312 = vmatprep.subr.bf16.mxu0 %v23692_v48 }
 0x98f   :  { %16198 = vmatpush3.bf16.msra.mxu1 %v23691_v28 }
 0x990   :  { %16200 = vmatprep.subr.bf16.mxu1 %v23693_v12 }
 0x991   :  { %16314 = vmatpush3.bf16.msra.mxu0 %v23692_v48 }
 0x992   :  { %16332 = vmatprep.subr.bf16.mxu0 %v23694_v59 }
 0x993   :  { %16202 = vmatpush3.bf16.msra.mxu1 %v23693_v12 }
 0x994   :  { %16220 = vmatprep.subr.bf16.mxu1 %v23695_v36  ;;  %14199 = vmatmul.mubr.msk.f32.vlgmr.msra.gmra.mrb[148].mxu0 %vm3521_vm8, %v21215_v39 }
 0x995   :  { %14201 = vmatprep.mubr.msk.f32.mxu0 %vm3521_vm8, %v21217_v0  ;;  %16334 = vmatpush3.bf16.msra.mxu0 %v23694_v59 }
 0x996   :  { %14045 = vmatmul.mubr.msk.f32.vlgmr.msra.gmra.mrb[124].mxu1 %vm3521_vm8, %v21215_v39  ;;  %16336 = vmatprep.subr.bf16.mxu0 %v23696_v35 }
 0x997   :  { %14047 = vmatprep.mubr.msk.f32.mxu1 %vm3521_vm8, %v21217_v0  ;;  %16222 = vmatpush3.bf16.msra.mxu1 %v23695_v36 }
 0x998   :  { %16224 = vmatprep.subr.bf16.mxu1 %v23697_v11  ;;  %14202 = vmatmul.mubr.msk.f32.gmra.mrb[150].mxu0 %vm3521_vm8, %v21225_v13 }
 0x999   :  { %16338 = vmatpush3.bf16.msra.mxu0 %v23696_v35  ;;  %14242 = vmatprep.mubr.msk.f32.mxu0 %vm3521_vm8, %v21209_v63 }
 0x99a   :  { %14048 = vmatmul.mubr.msk.f32.gmra.mrb[126].mxu1 %vm3521_vm8, %v21225_v13  ;;  %16340 = vmatprep.subr.bf16.mxu0 %v23698_v9 }
 0x99b   :  { %16226 = vmatpush3.bf16.msra.mxu1 %v23697_v11  ;;  %14088 = vmatprep.mubr.msk.f32.mxu1 %vm3521_vm8, %v21209_v63 }
 0x99c   :  { %16228 = vmatprep.subr.bf16.mxu1 %v23699_v25 }
 0x99d   :  { %16342 = vmatpush3.bf16.msra.mxu0 %v23698_v9 }
 0x99e   :  { %16344 = vmatprep.subr.bf16.mxu0 %v23700_v20 }
 0x99f   :  { %16230 = vmatpush3.bf16.msra.mxu1 %v23699_v25 }
 0x9a0   :  { %16232 = vmatprep.subr.bf16.mxu1 %v23701_v30 }
 0x9a1   :  { %16346 = vmatpush3.bf16.msra.mxu0 %v23700_v20 }
 0x9a2   :  { %16364 = vmatprep.subr.bf16.mxu0 %v23702_v19 }
 0x9a3   :  { %16234 = vmatpush3.bf16.msra.mxu1 %v23701_v30 }
 0x9a4   :  { %16252 = vmatprep.subr.bf16.mxu1 %v23703_v6  ;;  %14243 = vmatmul.mubr.msk.f32.vlgmr.msra.gmra.mrb[152].mxu0 %vm3521_vm8, %v21215_v39 }
 0x9a5   :  { %14245 = vmatprep.mubr.msk.f32.mxu0 %vm3521_vm8, %v21217_v0  ;;  %16366 = vmatpush3.bf16.msra.mxu0 %v23702_v19 }
 0x9a6   :  { %14089 = vmatmul.mubr.msk.f32.vlgmr.msra.gmra.mrb[128].mxu1 %vm3521_vm8, %v21215_v39  ;;  %16368 = vmatprep.subr.bf16.mxu0 %v23704_v44 }
 0x9a7   :  { %14091 = vmatprep.mubr.msk.f32.mxu1 %vm3521_vm8, %v21217_v0  ;;  %16254 = vmatpush3.bf16.msra.mxu1 %v23703_v6 }
 0x9a8   :  { %16256 = vmatprep.subr.bf16.mxu1 %v23705_v22  ;;  %14246 = vmatmul.mubr.msk.f32.gmra.mrb[154].mxu0 %vm3521_vm8, %v21225_v13 }
 0x9a9   :  { %16370 = vmatpush3.bf16.msra.mxu0 %v23704_v44  ;;  %14286 = vmatprep.mubr.msk.f32.mxu0 %vm3521_vm8, %v21209_v63 }
 0x9aa   :  { %14092 = vmatmul.mubr.msk.f32.gmra.mrb[130].mxu1 %vm3521_vm8, %v21225_v13  ;;  %16372 = vmatprep.subr.bf16.mxu0 %v23706_v16 }
 0x9ab   :  { %16258 = vmatpush3.bf16.msra.mxu1 %v23705_v22  ;;  %14132 = vmatprep.mubr.msk.f32.mxu1 %vm3521_vm8, %v21209_v63 }
 0x9ac   :  { %16260 = vmatprep.subr.bf16.mxu1 %v23707_v29 }
 0x9ad   :  { %16374 = vmatpush3.bf16.msra.mxu0 %v23706_v16 }
 0x9ae   :  { %16376 = vmatprep.subr.bf16.mxu0 %v23708_v57 }
 0x9af   :  { %16262 = vmatpush3.bf16.msra.mxu1 %v23707_v29 }
 0x9b0   :  { %16264 = vmatprep.subr.bf16.mxu1 %v23709_v1 }
 0x9b1   :  { %16378 = vmatpush3.bf16.msra.mxu0 %v23708_v57 }
 0x9b3   :  { %16266 = vmatpush3.bf16.msra.mxu1 %v23709_v1 }
 0x9b4   :  { %16284 = vmatprep.subr.bf16.mxu1 %v23710_v40  ;;  %14287 = vmatmul.mubr.msk.f32.vlgmr.msra.gmra.mrb[156].mxu0 %vm3521_vm8, %v21215_v39 }
 0x9b5   :  { %14289 = vmatprep.mubr.msk.f32.mxu0 %vm3521_vm8, %v21217_v0 }
 0x9b6   :  { %14133 = vmatmul.mubr.msk.f32.vlgmr.msra.gmra.mrb[132].mxu1 %vm3521_vm8, %v21215_v39 }
 0x9b7   :  { %14135 = vmatprep.mubr.msk.f32.mxu1 %vm3521_vm8, %v21217_v0  ;;  %16286 = vmatpush3.bf16.msra.mxu1 %v23710_v40 }
 0x9b8   :  { %16288 = vmatprep.subr.bf16.mxu1 %v23711_v62  ;;  %14290 = vmatmul.mubr.msk.f32.gmra.mrb[158].mxu0 %vm3521_vm8, %v21225_v13 }
 0x9b9   :  { %6907 = vmatprep.mubr.f32.mxu0 %v23712_v47 }
 0x9ba   :  { %14136 = vmatmul.mubr.msk.f32.gmra.mrb[134].mxu1 %vm3521_vm8, %v21225_v13 }
 0x9bb   :  { %16290 = vmatpush3.bf16.msra.mxu1 %v23711_v62  ;;  %14176 = vmatprep.mubr.msk.f32.mxu1 %vm3521_vm8, %v21209_v63 }
 0x9bc   :  { %16292 = vmatprep.subr.bf16.mxu1 %v23713_v23 }
 0x9bf   :  { %16294 = vmatpush3.bf16.msra.mxu1 %v23713_v23 }
 0x9c0   :  { %16296 = vmatprep.subr.bf16.mxu1 %v23714_v53 }
 0x9c3   :  { %16298 = vmatpush3.bf16.msra.mxu1 %v23714_v53 }
 0x9c4   :  { %16316 = vmatprep.subr.bf16.mxu1 %v23715_v15 }
 0x9c6   :  { %14177 = vmatmul.mubr.msk.f32.vlgmr.msra.gmra.mrb[136].mxu1 %vm3521_vm8, %v21215_v39 }
 0x9c7   :  { %14179 = vmatprep.mubr.msk.f32.mxu1 %vm3521_vm8, %v21217_v0  ;;  %16318 = vmatpush3.bf16.msra.mxu1 %v23715_v15 }
 0x9c8   :  { %16320 = vmatprep.subr.bf16.mxu1 %v23716_v56 }
 0x9ca   :  { %14180 = vmatmul.mubr.msk.f32.gmra.mrb[138].mxu1 %vm3521_vm8, %v21225_v13 }
 0x9cb   :  { %16322 = vmatpush3.bf16.msra.mxu1 %v23716_v56  ;;  %14220 = vmatprep.mubr.msk.f32.mxu1 %vm3521_vm8, %v21209_v63 }
 0x9cc   :  { %16324 = vmatprep.subr.bf16.mxu1 %v23717_v18 }
 0x9cf   :  { %16326 = vmatpush3.bf16.msra.mxu1 %v23717_v18 }
 0x9d0   :  { %16328 = vmatprep.subr.bf16.mxu1 %v23718_v26 }
 0x9d3   :  { %16330 = vmatpush3.bf16.msra.mxu1 %v23718_v26 }
 0x9d4   :  { %16348 = vmatprep.subr.bf16.mxu1 %v23719_v50 }
 0x9d6   :  { %14221 = vmatmul.mubr.msk.f32.vlgmr.msra.gmra.mrb[140].mxu1 %vm3521_vm8, %v21215_v39 }
 0x9d7   :  { %14223 = vmatprep.mubr.msk.f32.mxu1 %vm3521_vm8, %v21217_v0  ;;  %16350 = vmatpush3.bf16.msra.mxu1 %v23719_v50 }
 0x9d8   :  { %16352 = vmatprep.subr.bf16.mxu1 %v23720_v2 }
 0x9da   :  { %14224 = vmatmul.mubr.msk.f32.gmra.mrb[142].mxu1 %vm3521_vm8, %v21225_v13 }
 0x9db   :  { %16354 = vmatpush3.bf16.msra.mxu1 %v23720_v2  ;;  %14264 = vmatprep.mubr.msk.f32.mxu1 %vm3521_vm8, %v21209_v63 }
 0x9dc   :  { %16356 = vmatprep.subr.bf16.mxu1 %v23721_v42 }
 0x9df   :  { %16358 = vmatpush3.bf16.msra.mxu1 %v23721_v42 }
 0x9e0   :  { %16360 = vmatprep.subr.bf16.mxu1 %v23722_v34 }
 0x9e3   :  { %16362 = vmatpush3.bf16.msra.mxu1 %v23722_v34 }
 0x9e4   :  { %16380 = vmatprep.subr.bf16.mxu1 %v23723_v49 }
 0x9e6   :  { %14265 = vmatmul.mubr.msk.f32.vlgmr.msra.gmra.mrb[144].mxu1 %vm3521_vm8, %v21215_v39 }
 0x9e7   :  { %14267 = vmatprep.mubr.msk.f32.mxu1 %vm3521_vm8, %v21217_v0  ;;  %16382 = vmatpush3.bf16.msra.mxu1 %v23723_v49 }
 0x9e8   :  { %16384 = vmatprep.subr.bf16.mxu1 %v23724_v14 }
 0x9ea   :  { %14268 = vmatmul.mubr.msk.f32.gmra.mrb[146].mxu1 %vm3521_vm8, %v21225_v13 }
 0x9eb   :  { %16386 = vmatpush3.bf16.msra.mxu1 %v23724_v14  ;;  %14308 = vmatprep.mubr.msk.f32.mxu1 %vm3521_vm8, %v21209_v63 }
 0x9ec   :  { %16388 = vmatprep.subr.bf16.mxu1 %v23725_v58 }
 0x9ef   :  { %16390 = vmatpush3.bf16.msra.mxu1 %v23725_v58 }
 0x9f0   :  { %16392 = vmatprep.subr.bf16.mxu1 %v23726_v41 }
 0x9f3   :  { %16394 = vmatpush3.bf16.msra.mxu1 %v23726_v41 }
 0x9f6   :  { %14309 = vmatmul.mubr.msk.f32.vlgmr.msra.gmra.mrb[148].mxu1 %vm3521_vm8, %v21215_v39  ;;  %v12852_v5 = vpop.f32.mrb[112].mxu0 }
 0x9f7   :  { %14311 = vmatprep.mubr.msk.f32.mxu1 %vm3521_vm8, %v21217_v0  ;;  %v12853_v46 = vpop.f32.mrb[113].mxu0 }
 0x9f8   :  { %v12854_v10 = vadd.f32 %v12853_v46, %v12852_v5 }
 0x9fa   :  { %14312 = vmatmul.mubr.msk.f32.gmra.mrb[150].mxu1 %vm3521_vm8, %v21225_v13  ;;  %v12855_v63 = vpop.f32.mrb[114].mxu0 }
 0x9fb   :  { %v12856_v45 = vpop.f32.mrb[115].mxu0  ;;  %7012 = vmatprep.mubr.f32.mxu1 %v21019_v27 }
 0x9fc   :  { %v12857_v37 = vadd.f32 %v12856_v45, %v12855_v63 }
 0x9fe   :  { %v12858_v28 = vpop.f32.mrb[116].mxu0 }
 0x9ff   :  { %v12859_v48 = vpop.f32.mrb[117].mxu0 }
 0xa00   :  { %v12860_v12 = vadd.f32 %v12859_v48, %v12858_v28 }
 0xa02   :  { %v12861_v59 = vpop.f32.mrb[118].mxu0 }
 0xa03   :  { %v12862_v36 = vpop.f32.mrb[119].mxu0 }
 0xa04   :  { %v12863_v39 = vadd.f32 %v12862_v36, %v12861_v59 }
 0xa06   :  { %v12864_v35 = vpop.f32.mrb[120].mxu0 }
 0xa07   :  { %v12865_v11 = vpop.f32.mrb[121].mxu0 }
 0xa08   :  { %v21594_v9 = vadd.f32 %v12865_v11, %v12864_v35 }
 0xa0a   :  { %v12867_v0 = vpop.f32.mrb[122].mxu0 }
 0xa0b   :  { %v12868_v25 = vpop.f32.mrb[123].mxu0 }
 0xa0c   :  { %v21596_v20 = vadd.f32 %v12868_v25, %v12867_v0 }
 0xa0e   :  { %v12870_v13 = vpop.f32.mrb[124].mxu0 }
 0xa0f   :  { %v12871_v30 = vpop.f32.mrb[125].mxu0 }
 0xa10   :  { %v21598_v19 = vadd.f32 %v12871_v30, %v12870_v13 }
 0xa12   :  { %v12873_v27 = vpop.f32.mrb[126].mxu0 }
 0xa13   :  { %v12874_v6 = vpop.f32.mrb[127].mxu0 }
 0xa14   :  { %v21600_v44 = vadd.f32 %v12874_v6, %v12873_v27 }
 0xa16   :  { %v13980_v22 = vpop.f32.mrb[128].mxu0 }
 0xa17   :  { %v5549_v16 = vpop.f32.mrb[129].mxu0 }
 0xa18   :  { %v16397_v29 = vpack.c.bf16 %v13980_v22, %v5549_v16 }
 0xa1a   :  { %v13983_v57 = vpop.f32.mrb[130].mxu0 }
 0xa1b   :  { %v5559_v1 = vpop.f32.mrb[131].mxu0 }
 0xa1c   :  { %v16401_v40 = vpack.c.bf16 %v13983_v57, %v5559_v1 }
 0xa26   :  { %v21602_v62 = vpop.f32.mrb[132].mxu0 }
 0xa27   :  { %v21604_v47 = vpop.f32.mrb[133].mxu0 }
 0xa28   :  { %v16413_v23 = vpack.c.bf16 %v21602_v62, %v21604_v47 }
 0xa2a   :  { %v21608_v53 = vpop.f32.mrb[134].mxu0 }
 0xa2b   :  { %v21610_v15 = vpop.f32.mrb[135].mxu0 }
 0xa2c   :  { %v16417_v56 = vpack.c.bf16 %v21608_v53, %v21610_v15  ;;  %v23728_v15 = vld [vmem:[#allocation116_spill] sm:$0xff] }
 0xa36   :  { %v14068_v18 = vpop.f32.mrb[136].mxu0 }
 0xa37   :  { %v5889_v26 = vpop.f32.mrb[137].mxu0 }
 0xa38   :  { %v16395_v50 = vpack.c.bf16 %v14068_v18, %v5889_v26 }
 0xa39   :  { %v12908_v2 = vpop.f32.mrb[104].mxu1 }
 0xa3a   :  { %v12909_v42 = vpop.f32.mrb[105].mxu1  ;;  %16396 = vmatprep.subr.bf16.mxu0 %v16395_v50 }
 0xa3b   :  { %v12910_v34 = vadd.f32 %v12909_v42, %v12908_v2  ;;  %v14071_v49 = vpop.f32.mrb[138].mxu0  ;;  %16398 = vmatpush3.bf16.msra.mxu0 %v16397_v29 }
 0xa3c   :  { %v5899_v14 = vpop.f32.mrb[139].mxu0 }
 0xa3d   :  { %v21614_v58 = vadd.f32 %v12910_v34, %v12854_v10  ;;  %v12911_v41 = vpop.f32.mrb[106].mxu1  ;;  %v16399_v5 = vpack.c.bf16 %v14071_v49, %v5899_v14 }
 0xa3e   :  { %v12912_v46 = vpop.f32.mrb[107].mxu1 }
 0xa3f   :  { %v12913_v63 = vadd.f32 %v12912_v46, %v12911_v41  ;;  %v7070_v45 = vsel %vm7069_vm1, %v21614_v58, 0.0  ;;  %16400 = vmatprep.subr.bf16.mxu0 %v16399_v5  ;;  %v7102_v28 = vmul.f32 %v21614_v58, %v21614_v58 }
 0xa40   :  { %7071 = vadd.xlane.f32.xlu1 %v7070_v45  ;;  %16402 = vmatpush3.bf16.msra.mxu0 %v16401_v40 }
 0xa41   :  { %v21620_v48 = vadd.f32 %v12913_v63, %v12857_v37  ;;  %v12914_v59 = vpop.f32.mrb[108].mxu1  ;;  %v7110_v36 = vsel %vm7069_vm1, %v7102_v28, 0.0 }
 0xa42   :  { %v12915_v10 = vpop.f32.mrb[109].mxu1  ;;  %7111 = vadd.xlane.f32.xlu0 %v7110_v36 }
 0xa43   :  { %v12916_v35 = vadd.f32 %v12915_v10, %v12914_v59  ;;  %v7073_v25 = vsel %vm7069_vm1, %v21620_v48, 0.0  ;;  %v7103_v13 = vmul.f32 %v21620_v48, %v21620_v48 }
 0xa45   :  { %v21623_v11 = vadd.f32 %v12916_v35, %v12860_v12  ;;  %v12917_v0 = vpop.f32.mrb[110].mxu1  ;;  %v7113_v29 = vsel %vm7069_vm1, %v7103_v13, 0.0 }
 0xa46   :  { %v12918_v30 = vpop.f32.mrb[111].mxu1  ;;  %7074 = vadd.xlane.f32.xlu0 %v7073_v25 }
 0xa47   :  { %v12919_v27 = vadd.f32 %v12918_v30, %v12917_v0  ;;  %v21629_v37 = vpop.f32.mrb[140].mxu0  ;;  %v7076_v2 = vsel %vm7069_vm1, %v21623_v11, 0.0  ;;  %v7104_v42 = vmul.f32 %v21623_v11, %v21623_v11 }
 0xa48   :  { %v21631_v6 = vpop.f32.mrb[141].mxu0 }
 0xa49   :  { %v21633_v22 = vadd.f32 %v12919_v27, %v12863_v39  ;;  %v12920_v16 = vpop.f32.mrb[112].mxu1  ;;  %v16411_v12 = vpack.c.bf16 %v21629_v37, %v21631_v6 }
 0xa4a   :  { %v12921_v57 = vpop.f32.mrb[113].mxu1  ;;  %7114 = vadd.xlane.f32.xlu0 %v7113_v29 }
 0xa4b   :  { %v12922_v1 = vadd.f32 %v12921_v57, %v12920_v16  ;;  %v21638_v40 = vpop.f32.mrb[142].mxu0  ;;  %v7079_v28 = vsel %vm7069_vm1, %v21633_v22, 0.0  ;;  %v7105_v59 = vmul.f32 %v21633_v22, %v21633_v22 }
 0xa4c   :  { %v21640_v18 = vpop.f32.mrb[143].mxu0 }
 0xa4d   :  { %v21643_v26 = vadd.f32 %v12922_v1, %v21594_v9  ;;  %v12923_v50 = vpop.f32.mrb[114].mxu1  ;;  %v16415_v39 = vpack.c.bf16 %v21638_v40, %v21640_v18  ;;  %v7116_v9 = vsel %vm7069_vm1, %v7104_v42, 0.0  ;;  %v23727_v18 = vld [vmem:[#allocation114_spill] sm:$0xff] }
 0xa4e   :  { %v12924_v34 = vpop.f32.mrb[115].mxu1  ;;  %7077 = vadd.xlane.f32.xlu0 %v7076_v2 }
 0xa4f   :  { %v12925_v49 = vadd.f32 %v12924_v34, %v12923_v50  ;;  %v7082_v50 = vsel %vm7069_vm1, %v21643_v26, 0.0  ;;  %v7106_v2 = vmul.f32 %v21643_v26, %v21643_v26 }
 0xa51   :  { %v21652_v14 = vadd.f32 %v12925_v49, %v21596_v20  ;;  %v12926_v41 = vpop.f32.mrb[116].mxu1  ;;  %v7122_v34 = vsel %vm7069_vm1, %v7106_v2, 0.0 }
 0xa52   :  { %v12927_v5 = vpop.f32.mrb[117].mxu1  ;;  %7117 = vadd.xlane.f32.xlu0 %v7116_v9 }
 0xa53   :  { %v12928_v46 = vadd.f32 %v12927_v5, %v12926_v41  ;;  %v7085_v49 = vsel %vm7069_vm1, %v21652_v14, 0.0  ;;  %v7107_v41 = vmul.f32 %v21652_v14, %v21652_v14 }
 0xa55   :  { %v21656_v63 = vadd.f32 %v12928_v46, %v21598_v19  ;;  %v12929_v45 = vpop.f32.mrb[118].mxu1  ;;  %v7119_v19 = vsel %vm7069_vm1, %v7105_v59, 0.0 }
 0xa56   :  { %v12930_v36 = vpop.f32.mrb[119].mxu1  ;;  %7080 = vadd.xlane.f32.xlu0 %v7079_v28  ;;  %v7125_v28 = vsel %vm7069_vm1, %v7107_v41, 0.0 }
 0xa57   :  { %v12931_v20 = vadd.f32 %v12930_v36, %v12929_v45  ;;  %v14156_v10 = vpop.f32.mrb[144].mxu0 }
 0xa58   :  { %v6229_v35 = vpop.f32.mrb[145].mxu0 }
 0xa59   :  { %v21663_v0 = vadd.f32 %v12931_v20, %v21600_v44  ;;  %v14002_v25 = vpop.f32.mrb[120].mxu1  ;;  %v16429_v13 = vpack.c.bf16 %v14156_v10, %v6229_v35 }
 0xa5a   :  { %v5634_v30 = vpop.f32.mrb[121].mxu1  ;;  %7120 = vadd.xlane.f32.xlu0 %v7119_v19 }
 0xa5b   :  { %v16405_v27 = vpack.c.bf16 %v14002_v25, %v5634_v30  ;;  %v14159_v16 = vpop.f32.mrb[146].mxu0 }
 0xa5c   :  { %v6239_v29 = vpop.f32.mrb[147].mxu0 }
 0xa5d   :  { %v14005_v57 = vpop.f32.mrb[122].mxu1  ;;  %v16433_v1 = vpack.c.bf16 %v14159_v16, %v6239_v29 }
 0xa5e   :  { %7083 = vadd.xlane.f32.xlu0 %v7082_v50  ;;  %v5644_v44 = vpop.f32.mrb[123].mxu1 }
 0xa5f   :  { %v16409_v42 = vpack.c.bf16 %v14005_v57, %v5644_v44 }
 0xa62   :  { %7123 = vadd.xlane.f32.xlu0 %v7122_v34 }
 0xa66   :  { %7086 = vadd.xlane.f32.xlu0 %v7085_v49 }
 0xa67   :  { %v21675_v9 = vpop.f32.mrb[148].mxu0 }
 0xa68   :  { %v21677_v5 = vpop.f32.mrb[149].mxu0 }
 0xa69   :  { %v14046_v46 = vpop.f32.mrb[124].mxu1  ;;  %v16445_v45 = vpack.c.bf16 %v21675_v9, %v21677_v5 }
 0xa6a   :  { %v5804_v59 = vpop.f32.mrb[125].mxu1  ;;  %7126 = vadd.xlane.f32.xlu0 %v7125_v28 }
 0xa6b   :  { %v16421_v36 = vpack.c.bf16 %v14046_v46, %v5804_v59  ;;  %v21682_v20 = vpop.f32.mrb[150].mxu0 }
 0xa6c   :  { %v21684_v10 = vpop.f32.mrb[151].mxu0 }
 0xa6d   :  { %v14049_v35 = vpop.f32.mrb[126].mxu1  ;;  %v16449_v25 = vpack.c.bf16 %v21682_v20, %v21684_v10 }
 0xa6e   :  { %v5814_v19 = vpop.f32.mrb[127].mxu1 }
 0xa6f   :  { %v16425_v30 = vpack.c.bf16 %v14049_v35, %v5814_v19 }
 0xa77   :  { %v14244_v16 = vpop.f32.mrb[152].mxu0 }
 0xa78   :  { %v6569_v29 = vpop.f32.mrb[153].mxu0 }
 0xa79   :  { %v14090_v57 = vpop.f32.mrb[128].mxu1  ;;  %v16427_v50 = vpack.c.bf16 %v14244_v16, %v6569_v29 }
 0xa7a   :  { %v5974_v2 = vpop.f32.mrb[129].mxu1 }
 0xa7b   :  { %v16403_v44 = vpack.c.bf16 %v14090_v57, %v5974_v2  ;;  %v14247_v34 = vpop.f32.mrb[154].mxu0  ;;  %16428 = vmatprep.subr.bf16.mxu1 %v16427_v50  ;;  %v23730_v57 = vld [vmem:[#allocation120_spill] sm:$0xff]  ;;  %v23731_v50 = vld [vmem:[#allocation122_spill] sm:$0xff] }
 0xa7c   :  { %v6579_v49 = vpop.f32.mrb[155].mxu0  ;;  %16430 = vmatpush3.bf16.msra.mxu1 %v16429_v13 }
 0xa7d   :  { %v14093_v41 = vpop.f32.mrb[130].mxu1  ;;  %16404 = vmatprep.subr.bf16.mxu0 %v16403_v44  ;;  %v16431_v46 = vpack.c.bf16 %v14247_v34, %v6579_v49  ;;  %v23735_v44 = vld [vmem:[#allocation130_spill] sm:$0xff]  ;;  %v23736_v49 = vld [vmem:[#allocation132_spill] sm:$0xff] }
 0xa7e   :  { %v5984_v28 = vpop.f32.mrb[131].mxu1  ;;  %16406 = vmatpush3.bf16.msra.mxu0 %v16405_v27 }
 0xa7f   :  { %v16407_v59 = vpack.c.bf16 %v14093_v41, %v5984_v28  ;;  %16432 = vmatprep.subr.bf16.mxu1 %v16431_v46  ;;  %v23737_v28 = vld [vmem:[#allocation134_spill] sm:$0xff] }
 0xa80   :  { %16434 = vmatpush3.bf16.msra.mxu1 %v16433_v1 }
 0xa81   :  { %16408 = vmatprep.subr.bf16.mxu0 %v16407_v59 }
 0xa82   :  { %16410 = vmatpush3.bf16.msra.mxu0 %v16409_v42  ;;  %v23729_v42 = vld [vmem:[#allocation118_spill] sm:$0xff] }
 0xa83   :  { %16412 = vmatprep.subr.bf16.mxu0 %v16411_v12 }
 0xa86   :  { %16414 = vmatpush3.bf16.msra.mxu0 %v16413_v23 }
 0xa87   :  { %16416 = vmatprep.subr.bf16.mxu0 %v16415_v39  ;;  %v14288_v13 = vpop.f32.mrb[156].mxu0 }
 0xa88   :  { %v6739_v35 = vpop.f32.mrb[157].mxu0 }
 0xa89   :  { %v14134_v27 = vpop.f32.mrb[132].mxu1  ;;  %v16443_v19 = vpack.c.bf16 %v14288_v13, %v6739_v35  ;;  %v23738_v13 = vld [vmem:[#allocation136_spill] sm:$0xff] }
 0xa8a   :  { %v6144_v16 = vpop.f32.mrb[133].mxu1  ;;  %16418 = vmatpush3.bf16.msra.mxu0 %v16417_v56 }
 0xa8b   :  { %v16419_v1 = vpack.c.bf16 %v14134_v27, %v6144_v16  ;;  %v14291_v37 = vpop.f32.mrb[158].mxu0 }
 0xa8c   :  { %v6749_v6 = vpop.f32.mrb[159].mxu0 }
 0xa8d   :  { %v14137_v12 = vpop.f32.mrb[134].mxu1  ;;  %16420 = vmatprep.subr.bf16.mxu0 %v16419_v1  ;;  %v16447_v62 = vpack.c.bf16 %v14291_v37, %v6749_v6 }
 0xa8e   :  { %v6154_v47 = vpop.f32.mrb[135].mxu1  ;;  %16422 = vmatpush3.bf16.msra.mxu0 %v16421_v36 }
 0xa8f   :  { %v16423_v23 = vpack.c.bf16 %v14137_v12, %v6154_v47 }
 0xa91   :  { %16424 = vmatprep.subr.bf16.mxu0 %v16423_v23 }
 0xa92   :  { %16426 = vmatpush3.bf16.msra.mxu0 %v16425_v30  ;;  %v23732_v30 = vld [vmem:[#allocation124_spill] sm:$0xff] }
 0xa95   :  { %6908 = vmatmul.mubr.f32.vlgmr.msra.gmra.mrb[160].mxu0 %v21057_v32  ;;  %v23733_v32 = vld [vmem:[#allocation126_spill] sm:$0xff] }
 0xa96   :  { %6912 = vmatprep.mubr.f32.mxu0 %v21066_v38  ;;  %v23734_v38 = vld [vmem:[#allocation128_spill] sm:$0xff] }
 0xa99   :  { %v14178_v40 = vpop.f32.mrb[136].mxu1  ;;  %6913 = vmatmul.mubr.f32.gmra.mrb[162].mxu0 %v23727_v18 }
 0xa9a   :  { %v6314_v53 = vpop.f32.mrb[137].mxu1  ;;  %6917 = vmatprep.mubr.f32.mxu0 %v23728_v15 }
 0xa9b   :  { %v16437_v56 = vpack.c.bf16 %v14178_v40, %v6314_v53 }
 0xa9d   :  { %v14181_v39 = vpop.f32.mrb[138].mxu1  ;;  %6918 = vmatmul.mubr.f32.gmra.mrb[164].mxu0 %v23729_v42 }
 0xa9e   :  { %v6324_v29 = vpop.f32.mrb[139].mxu1  ;;  %6922 = vmatprep.mubr.f32.mxu0 %v23730_v57 }
 0xa9f   :  { %v16441_v36 = vpack.c.bf16 %v14181_v39, %v6324_v29 }
 0xaa1   :  { %6923 = vmatmul.mubr.f32.gmra.mrb[166].mxu0 %v23731_v50 }
 0xaa2   :  { %6927 = vmatprep.mubr.f32.mxu0 %v23732_v30 }
 0xaa5   :  { %6928 = vmatmul.mubr.f32.gmra.mrb[168].mxu0 %v23733_v32 }
 0xaa6   :  { %6932 = vmatprep.mubr.f32.mxu0 %v23734_v38 }
 0xaa9   :  { %v14222_v2 = vpop.f32.mrb[140].mxu1  ;;  %6933 = vmatmul.mubr.f32.gmra.mrb[170].mxu0 %v23735_v44 }
 0xaaa   :  { %v6484_v34 = vpop.f32.mrb[141].mxu1  ;;  %6937 = vmatprep.mubr.f32.mxu0 %v23736_v49 }
 0xaab   :  { %v16453_v41 = vpack.c.bf16 %v14222_v2, %v6484_v34 }
 0xaad   :  { %v14225_v46 = vpop.f32.mrb[142].mxu1  ;;  %6938 = vmatmul.mubr.f32.gmra.mrb[172].mxu0 %v23737_v28 }
 0xaae   :  { %v6494_v59 = vpop.f32.mrb[143].mxu1  ;;  %6942 = vmatprep.mubr.f32.mxu0 %v23738_v13 }
 0xaaf   :  { %v16457_v35 = vpack.c.bf16 %v14225_v46, %v6494_v59 }
 0xab1   :  { %6943 = vmatmul.mubr.f32.gmra.mrb[174].mxu0 %v21203_v51 }
 0xab9   :  { %v14266_v27 = vpop.f32.mrb[144].mxu1 }
 0xaba   :  { %v6654_v16 = vpop.f32.mrb[145].mxu1 }
 0xabb   :  { %v16435_v1 = vpack.c.bf16 %v14266_v27, %v6654_v16  ;;  %v7088_v16 = vsel %vm7069_vm1, %v21656_v63, 0.0 }
 0xabd   :  { %v14269_v37 = vpop.f32.mrb[146].mxu1  ;;  %16436 = vmatprep.subr.bf16.mxu1 %v16435_v1 }
 0xabe   :  { %v6664_v6 = vpop.f32.mrb[147].mxu1  ;;  %16438 = vmatpush3.bf16.msra.mxu1 %v16437_v56 }
 0xabf   :  { %v16439_v12 = vpack.c.bf16 %v14269_v37, %v6664_v6 }
 0xac1   :  { %16440 = vmatprep.subr.bf16.mxu1 %v16439_v12 }
 0xac2   :  { %16442 = vmatpush3.bf16.msra.mxu1 %v16441_v36 }
 0xac3   :  { %16444 = vmatprep.subr.bf16.mxu1 %v16443_v19 }
 0xac6   :  { %16446 = vmatpush3.bf16.msra.mxu1 %v16445_v45 }
 0xac7   :  { %16448 = vmatprep.subr.bf16.mxu1 %v16447_v62 }
 0xac9   :  { %v14310_v47 = vpop.f32.mrb[148].mxu1 }
 0xaca   :  { %v6824_v23 = vpop.f32.mrb[149].mxu1  ;;  %16450 = vmatpush3.bf16.msra.mxu1 %v16449_v25 }
 0xacb   :  { %v16451_v51 = vpack.c.bf16 %v14310_v47, %v6824_v23 }
 0xacd   :  { %v14313_v40 = vpop.f32.mrb[150].mxu1  ;;  %16452 = vmatprep.subr.bf16.mxu1 %v16451_v51  ;;  %v7091_v51 = vsel %vm7069_vm1, %v21663_v0, 0.0 }
 0xace   :  { %v6834_v18 = vpop.f32.mrb[151].mxu1  ;;  %16454 = vmatpush3.bf16.msra.mxu1 %v16453_v41 }
 0xacf   :  { %v16455_v53 = vpack.c.bf16 %v14313_v40, %v6834_v18  ;;  %v7108_v40 = vmul.f32 %v21656_v63, %v21656_v63 }
 0xad1   :  { %16456 = vmatprep.subr.bf16.mxu1 %v16455_v53 }
 0xad2   :  { %16458 = vmatpush3.bf16.msra.mxu1 %v16457_v35 }
 0xad5   :  { %7013 = vmatmul.mubr.f32.vlgmr.msra.gmra.mrb[152].mxu1 %v21294_v52  ;;  %v7456_v52 = vld [vmem:[%s22859_s13] sm:$0xff] }
 0xad6   :  { %7017 = vmatprep.mubr.f32.mxu1 %v21302_v54  ;;  %v7457_v54 = vld [vmem:[%s22859_s13 + $0x8] sm:$0xff] }
 0xad9   :  { %7018 = vmatmul.mubr.f32.gmra.mrb[154].mxu1 %v21312_v21  ;;  %v16459_v21 = vpack.c.bf16 %v7457_v54, %v7456_v52 }
 0xada   :  { %7022 = vmatprep.mubr.f32.mxu1 %v21319_v31  ;;  %v7458_v31 = vld [vmem:[%s22859_s13 + $0x10] sm:$0xff] }
 0xadb   :  { %16460 = vmatprep.subr.bf16.mxu0 %v16459_v21 }
 0xadc   :  { %16462 = vmatpush3.bf16.msra.mxu0 %v16459_v21 }
 0xadd   :  { %7023 = vmatmul.mubr.f32.gmra.mrb[156].mxu1 %v21331_v4  ;;  %v7459_v4 = vld [vmem:[%s22859_s13 + $0x18] sm:$0xff] }
 0xade   :  { %7027 = vmatprep.mubr.f32.mxu1 %v21337_v55  ;;  %v16463_v55 = vpack.c.bf16 %v7459_v4, %v7458_v31  ;;  %v7128_v31 = vsel %vm7069_vm1, %v7108_v40, 0.0 }
 0xae0   :  { %16464 = vmatprep.subr.bf16.mxu0 %v16463_v55 }
 0xae1   :  { %7028 = vmatmul.mubr.f32.gmra.mrb[158].mxu1 %v21347_v17  ;;  %16466 = vmatpush3.bf16.msra.mxu0 %v16463_v55  ;;  %v7454_v17 = vld [vmem:[%s22858_s12] sm:$0xff]  ;;  %v7109_v55 = vmul.f32 %v21663_v0, %v21663_v0 }
 0xae2   :  { %7032 = vmatprep.mubr.f32.mxu1 %v21353_v60  ;;  %v7455_v60 = vld [vmem:[%s22858_s12 + $0x8] sm:$0xff]  ;;  %14322 = vmatprep.mubr.msk.f32.mxu0 %vm7460_vm2, %v7454_v17 }
 0xae4   :  { %14323 = vmatmul.mubr.msk.f32.vlgmr.msra.gmra.mrb[176].mxu0 %vm7460_vm2, %v7455_v60 }
 0xae5   :  { %7033 = vmatmul.mubr.f32.gmra.mrb[160].mxu1 %v21363_v24 }
 0xae6   :  { %7037 = vmatprep.mubr.f32.mxu1 %v21371_v33 }
 0xae9   :  { %7038 = vmatmul.mubr.f32.gmra.mrb[162].mxu1 %v21383_v3 }
 0xaea   :  { %7042 = vmatprep.mubr.f32.mxu1 %v21390_v61 }
 0xaed   :  { %7043 = vmatmul.mubr.f32.gmra.mrb[164].mxu1 %v21401_v8 }
 0xaee   :  { %7047 = vmatprep.mubr.f32.mxu1 %v21406_v43 }
 0xaf1   :  { %7048 = vmatmul.mubr.f32.gmra.mrb[166].mxu1 %v21415_v7 }
 0xb68   :  { %v13156_v24 = vpop.f32.mrb[160].mxu0 }
 0xb69   :  { %v13157_v33 = vpop.f32.mrb[161].mxu0 }
 0xb6a   :  { %v13158_v3 = vadd.f32 %v13157_v33, %v13156_v24 }
 0xb6c   :  { %v13159_v61 = vpop.f32.mrb[162].mxu0 }
 0xb6d   :  { %v13160_v8 = vpop.f32.mrb[163].mxu0 }
 0xb6e   :  { %v13161_v43 = vadd.f32 %v13160_v8, %v13159_v61  ;;  %v7131_v61 = vsel %vm7069_vm1, %v7109_v55, 0.0 }
 0xb70   :  { %v13162_v7 = vpop.f32.mrb[164].mxu0 }
 0xb71   :  { %v13163_v9 = vpop.f32.mrb[165].mxu0 }
 0xb72   :  { %v13164_v5 = vadd.f32 %v13163_v9, %v13162_v7 }
 0xb74   :  { %v13165_v45 = vpop.f32.mrb[166].mxu0 }
 0xb75   :  { %v13166_v20 = vpop.f32.mrb[167].mxu0 }
 0xb76   :  { %v13167_v10 = vadd.f32 %v13166_v20, %v13165_v45 }
 0xb78   :  { %v13168_v25 = vpop.f32.mrb[168].mxu0 }
 0xb79   :  { %v13169_v19 = vpop.f32.mrb[169].mxu0 }
 0xb7a   :  { %v13170_v62 = vadd.f32 %v13169_v19, %v13168_v25 }
 0xb7c   :  { %v13171_v15 = vpop.f32.mrb[170].mxu0 }
 0xb7d   :  { %v13172_v56 = vpop.f32.mrb[171].mxu0 }
 0xb7e   :  { %v13173_v39 = vadd.f32 %v13172_v56, %v13171_v15 }
 0xb80   :  { %v13174_v42 = vpop.f32.mrb[172].mxu0 }
 0xb81   :  { %v13175_v29 = vpop.f32.mrb[173].mxu0 }
 0xb82   :  { %v13176_v57 = vadd.f32 %v13175_v29, %v13174_v42 }
 0xb84   :  { %v13177_v36 = vpop.f32.mrb[174].mxu0 }
 0xb85   :  { %v13178_v50 = vpop.f32.mrb[175].mxu0 }
 0xb86   :  { %v13179_v30 = vadd.f32 %v13178_v50, %v13177_v36 }
 0xba8   :  { %v13212_v32 = vpop.f32.mrb[152].mxu1 }
 0xba9   :  { %v13213_v38 = vpop.f32.mrb[153].mxu1 }
 0xbaa   :  { %v13214_v2 = vadd.f32 %v13213_v38, %v13212_v32 }
 0xbac   :  { %v21754_v44 = vadd.f32 %v13214_v2, %v13158_v3  ;;  %v13215_v34 = vpop.f32.mrb[154].mxu1 }
 0xbad   :  { %v13216_v49 = vpop.f32.mrb[155].mxu1 }
 0xbae   :  { %v13217_v41 = vadd.f32 %v13216_v49, %v13215_v34  ;;  %v7142_v46 = vsel %vm7069_vm1, %v21754_v44, 0.0  ;;  %v7174_v28 = vmul.f32 %v21754_v44, %v21754_v44 }
 0xbaf   :  { %7143 = vadd.xlane.f32.xlu0 %v7142_v46  ;;  %v7112_v46 = vpop.xlane.xlu0 %7111 }
 0xbb0   :  { %v21760_v59 = vadd.f32 %v13217_v41, %v13161_v43  ;;  %v7182_v13 = vsel %vm7069_vm1, %v7174_v28, 0.0  ;;  %v13218_v35 = vpop.f32.mrb[156].mxu1 }
 0xbb1   :  { %7183 = vadd.xlane.f32.xlu1 %v7182_v13  ;;  %v13219_v27 = vpop.f32.mrb[157].mxu1 }
 0xbb2   :  { %v7145_v1 = vsel %vm7069_vm1, %v21760_v59, 0.0  ;;  %v13220_v37 = vadd.f32 %v13219_v27, %v13218_v35  ;;  %v7175_v12 = vmul.f32 %v21760_v59, %v21760_v59 }
 0xbb3   :  { %7089 = vadd.xlane.f32.xlu0 %v7088_v16  ;;  %v7075_v28 = vpop.xlane.xlu0 %7074 }
 0xbb4   :  { %v21767_v6 = vadd.f32 %v13220_v37, %v13164_v5  ;;  %v13221_v47 = vpop.f32.mrb[158].mxu1  ;;  %v7185_v53 = vsel %vm7069_vm1, %v7175_v12, 0.0 }
 0xbb5   :  { %7146 = vadd.xlane.f32.xlu1 %v7145_v1  ;;  %v13222_v23 = vpop.f32.mrb[159].mxu1 }
 0xbb6   :  { %v13223_v18 = vadd.f32 %v13222_v23, %v13221_v47  ;;  %v7148_v4 = vsel %vm7069_vm1, %v21767_v6, 0.0  ;;  %v7176_v60 = vmul.f32 %v21767_v6, %v21767_v6 }
 0xbb7   :  { %7092 = vadd.xlane.f32.xlu0 %v7091_v51  ;;  %v7115_v13 = vpop.xlane.xlu0 %7114  ;;  %v21820_v12 = vpop.f32.mrb[176].mxu0 }
 0xbb8   :  { %v21776_v52 = vadd.f32 %v13223_v18, %v13167_v10  ;;  %v13224_v54 = vpop.f32.mrb[160].mxu1  ;;  %v7188_v43 = vsel %vm7069_vm1, %v7176_v60, 0.0  ;;  %v21822_v47 = vpop.f32.mrb[177].mxu0 }
 0xbb9   :  { %7186 = vadd.xlane.f32.xlu1 %v7185_v53  ;;  %v13225_v21 = vpop.f32.mrb[161].mxu1  ;;  %v7072_v18 = vpop.xlane.xlu1 %7071 }
 0xbba   :  { %v13226_v17 = vadd.f32 %v13225_v21, %v13224_v54  ;;  %v7151_v45 = vsel %vm7069_vm1, %v21776_v52, 0.0  ;;  %v7177_v10 = vmul.f32 %v21776_v52, %v21776_v52 }
 0xbbb   :  { %7129 = vadd.xlane.f32.xlu0 %v7128_v31  ;;  %v7078_v35 = vpop.xlane.xlu0 %7077 }
 0xbbc   :  { %v21785_v24 = vadd.f32 %v13226_v17, %v13170_v62  ;;  %v13227_v33 = vpop.f32.mrb[162].mxu1  ;;  %v7191_v56 = vsel %vm7069_vm1, %v7177_v10, 0.0 }
 0xbbd   :  { %7149 = vadd.xlane.f32.xlu1 %v7148_v4  ;;  %v13228_v3 = vpop.f32.mrb[163].mxu1 }
 0xbbe   :  { %v13229_v8 = vadd.f32 %v13228_v3, %v13227_v33  ;;  %v7154_v42 = vsel %vm7069_vm1, %v21785_v24, 0.0  ;;  %v7178_v29 = vmul.f32 %v21785_v24, %v21785_v24 }
 0xbbf   :  { %7132 = vadd.xlane.f32.xlu0 %v7131_v61  ;;  %v7118_v27 = vpop.xlane.xlu0 %7117 }
 0xbc0   :  { %v21789_v7 = vadd.f32 %v13229_v8, %v13173_v39  ;;  %v13230_v9 = vpop.f32.mrb[164].mxu1  ;;  %v7194_v36 = vsel %vm7069_vm1, %v7178_v29, 0.0 }
 0xbc1   :  { %7189 = vadd.xlane.f32.xlu1 %v7188_v43  ;;  %v13231_v5 = vpop.f32.mrb[165].mxu1 }
 0xbc2   :  { %v13232_v20 = vadd.f32 %v13231_v5, %v13230_v9  ;;  %v7179_v50 = vmul.f32 %v21789_v7, %v21789_v7 }
 0xbc3   :  { %v7081_v16 = vpop.xlane.xlu0 %7080 }
 0xbc4   :  { %v21795_v25 = vadd.f32 %v13232_v20, %v13176_v57  ;;  %v13233_v19 = vpop.f32.mrb[166].mxu1  ;;  %v7157_v57 = vsel %vm7069_vm1, %v21789_v7, 0.0 }
 0xbc5   :  { %7152 = vadd.xlane.f32.xlu1 %v7151_v45  ;;  %v13234_v62 = vpop.f32.mrb[167].mxu1 }
 0xbc6   :  { %v13235_v15 = vadd.f32 %v13234_v62, %v13233_v19  ;;  %v7160_v32 = vsel %vm7069_vm1, %v21795_v25, 0.0  ;;  %v7180_v38 = vmul.f32 %v21795_v25, %v21795_v25 }
 0xbc7   :  { %v7121_v1 = vpop.xlane.xlu0 %7120 }
 0xbc8   :  { %v21798_v39 = vadd.f32 %v13235_v15, %v13179_v30  ;;  %v7197_v30 = vsel %vm7069_vm1, %v7179_v50, 0.0  ;;  %v7200_v2 = vsel %vm7069_vm1, %v7180_v38, 0.0 }
 0xbc9   :  { %7192 = vadd.xlane.f32.xlu1 %v7191_v56 }
 0xbca   :  { %v7163_v34 = vsel %vm7069_vm1, %v21798_v39, 0.0  ;;  %v7181_v49 = vmul.f32 %v21798_v39, %v21798_v39 }
 0xbcb   :  { %v7084_v37 = vpop.xlane.xlu0 %7083 }
 0xbcc   :  { %v7203_v41 = vsel %vm7069_vm1, %v7181_v49, 0.0 }
 0xbcd   :  { %7155 = vadd.xlane.f32.xlu1 %v7154_v42 }
 0xbcf   :  { %v21824_v23 = vpop.xlane.xlu0 %7123 }
 0xbd1   :  { %7195 = vadd.xlane.f32.xlu1 %v7194_v36 }
 0xbd3   :  { %v21826_v51 = vpop.xlane.xlu0 %7086 }
 0xbd5   :  { %7158 = vadd.xlane.f32.xlu1 %v7157_v57 }
 0xbd7   :  { %v21828_v40 = vpop.xlane.xlu0 %7126 }
 0xbd9   :  { %7198 = vadd.xlane.f32.xlu1 %v7197_v30  ;;  %v7053_v30 = vld [vmem:[%s22856_s10] sm:$0xff] }
 0xbdd   :  { %7161 = vadd.xlane.f32.xlu1 %v7160_v32 }
 0xbe1   :  { %7201 = vadd.xlane.f32.xlu1 %v7200_v2 }
 0xbe5   :  { %7164 = vadd.xlane.f32.xlu1 %v7163_v34 }
 0xbe9   :  { %7204 = vadd.xlane.f32.xlu1 %v7203_v41 }
 0xc3c   :  { %v7144_v53 = vpop.xlane.xlu0 %7143 }
 0xc3d   :  { %v7166_v54 = vadd.f32 %v7144_v53, %v7072_v18  ;;  %v7054_v53 = vld [vmem:[%s22856_s10 + $0x8] sm:$0xff] }
 0xc3e   :  { %v7184_v21 = vpop.xlane.xlu1 %7183 }
 0xc3f   :  { %v7214_v31 = vmul.f32 0.03125, %v7166_v54  ;;  %v7206_v4 = vadd.f32 %v7184_v21, %v7112_v46 }
 0xc41   :  { %v7230_v55 = vmul.f32 %v7214_v31, %v7214_v31  ;;  %v7222_v17 = vmul.f32 0.03125, %v7206_v4 }
 0xc42   :  { %v7147_v60 = vpop.xlane.xlu1 %7146 }
 0xc43   :  { %v7238_v33 = vsub.f32 %v7222_v17, %v7230_v55  ;;  %v7167_v3 = vadd.f32 %v7147_v60, %v7075_v28 }
 0xc45   :  { %v7246_v61 = vmax.f32 %v7238_v33, 0.0  ;;  %v7215_v8 = vmul.f32 0.03125, %v7167_v3  ;;  %v7061_v3 = vld [vmem:[%s22857_s11] sm:$0xff] }
 0xc46   :  { %v7187_v43 = vpop.xlane.xlu1 %7186 }
 0xc47   :  { %v7254_v9 = vadd.f32 1e-05, %v7246_v61  ;;  %v7207_v5 = vadd.f32 %v7187_v43, %v7115_v13  ;;  %v7231_v45 = vmul.f32 %v7215_v8, %v7215_v8 }
 0xc49   :  { %16763 = vrsqrt.f32 %v7254_v9  ;;  %v7223_v20 = vmul.f32 0.03125, %v7207_v5 }
 0xc4a   :  { %v7150_v10 = vpop.xlane.xlu1 %7149 }
 0xc4b   :  { %v7239_v19 = vsub.f32 %v7223_v20, %v7231_v45  ;;  %v7168_v62 = vadd.f32 %v7150_v10, %v7078_v35  ;;  %v7055_v10 = vld [vmem:[%s22856_s10 + $0x10] sm:$0xff] }
 0xc4d   :  { %v7247_v15 = vmax.f32 %v7239_v19, 0.0  ;;  %v21830_v56 = vmul.f32 0.03125, %v7168_v62  ;;  %v7090_v19 = vpop.xlane.xlu0 %7089 }
 0xc4e   :  { %v7190_v42 = vpop.xlane.xlu1 %7189 }
 0xc4f   :  { %v7255_v29 = vadd.f32 1e-05, %v7247_v15  ;;  %v7208_v36 = vadd.f32 %v7190_v42, %v7118_v27  ;;  %v7232_v57 = vmul.f32 %v21830_v56, %v21830_v56  ;;  %v11134_v15 = vld [vmem:[%s22860_s14 + $0x10] sm:$0xff] }
 0xc51   :  { %16765 = vrsqrt.f32 %v7255_v29  ;;  %v7224_v50 = vmul.f32 0.03125, %v7208_v36 }
 0xc52   :  { %v7153_v32 = vpop.xlane.xlu1 %7152 }
 0xc53   :  { %v16764_v38 = vpop.eup %16763  ;;  %v7240_v2 = vsub.f32 %v7224_v50, %v7232_v57  ;;  %v7169_v34 = vadd.f32 %v7153_v32, %v7081_v16  ;;  %v11135_v50 = vld [vmem:[%s22860_s14 + $0x18] sm:$0xff] }
 0xc54   :  { %v7270_v49 = vmul.f32 %v16764_v38, %v7053_v30  ;;  %v21873_v32 = vpack.c.bf16 %v11135_v50, %v11134_v15 }
 0xc55   :  { %v7248_v41 = vmax.f32 %v7240_v2, 0.0  ;;  %v21837_v46 = vmul.f32 0.03125, %v7169_v34  ;;  %v7063_v34 = vld [vmem:[%s22857_s11 + $0x10] sm:$0xff] }
 0xc56   :  { %v7193_v28 = vpop.xlane.xlu1 %7192  ;;  %7296 = vperm.xlu0 %16749, %v7270_v49   ;;  %v7278_v17 = vmul.f32 %v7270_v49, %v7214_v31  ;;  %16472 = vmatprep.subr.bf16.mxu0 %v21873_v32 }
 0xc57   :  { %v7256_v13 = vadd.f32 1e-05, %v7248_v41  ;;  %v7209_v35 = vadd.f32 %v7193_v28, %v7121_v1  ;;  %v7233_v27 = vmul.f32 %v21837_v46, %v21837_v46  ;;  %v7062_v1 = vld [vmem:[%s22857_s11 + $0x8] sm:$0xff]  ;;  %16474 = vmatpush3.bf16.msra.mxu0 %v21873_v32 }
 0xc58   :  { %v7286_v45 = vsub.f32 %v7061_v3, %v7278_v17  ;;  %v7064_v17 = vld [vmem:[%s22857_s11 + $0x18] sm:$0xff] }
 0xc59   :  { %16767 = vrsqrt.f32 %v7256_v13  ;;  %v7225_v18 = vmul.f32 0.03125, %v7209_v35  ;;  %v7093_v13 = vpop.xlane.xlu0 %7092 }
 0xc5a   :  { %v7156_v54 = vpop.xlane.xlu1 %7155 }
 0xc5b   :  { %v16766_v21 = vpop.eup %16765  ;;  %v7241_v16 = vsub.f32 %v7225_v18, %v7233_v27  ;;  %v7170_v4 = vadd.f32 %v7156_v54, %v7084_v37 }
 0xc5c   :  { %v7271_v55 = vmul.f32 %v16766_v21, %v7054_v53 }
 0xc5d   :  { %v7249_v60 = vmax.f32 %v7241_v16, 0.0  ;;  %v21844_v33 = vmul.f32 0.03125, %v7170_v4 }
 0xc5e   :  { %7301 = vperm.xlu1 %16750, %v7271_v55   ;;  %v7196_v61 = vpop.xlane.xlu1 %7195  ;;  %v7279_v43 = vmul.f32 %v7271_v55, %v7215_v8  ;;  %v7568_v8 = vld [vmem:[%s22860_s14] sm:$0xff] }
 0xc5f   :  { %v7257_v9 = vadd.f32 1e-05, %v7249_v60  ;;  %v7210_v5 = vadd.f32 %v7196_v61, %v21824_v23  ;;  %v7234_v31 = vmul.f32 %v21844_v33, %v21844_v33  ;;  %v7569_v23 = vld [vmem:[%s22860_s14 + $0x8] sm:$0xff]  ;;  %v7130_v60 = vpop.xlane.xlu0 %7129 }
 0xc60   :  { %v7287_v37 = vsub.f32 %v7062_v1, %v7279_v43  ;;  %v21868_v57 = vpack.c.bf16 %v7569_v23, %v7568_v8 }
 0xc61   :  { %16769 = vrsqrt.f32 %v7257_v9  ;;  %v7226_v20 = vmul.f32 0.03125, %v7210_v5 }
 0xc62   :  { %v7159_v62 = vpop.xlane.xlu1 %7158  ;;  %7349 = vperm.xlu0 %16749, %v7287_v37   ;;  %7344 = vperm.xlu1 %16750, %v7286_v45   ;;  %v7057_v45 = vld [vmem:[%s22856_s10 + $0x20] sm:$0xff] }
 0xc63   :  { %v16768_v42 = vpop.eup %16767  ;;  %v7242_v29 = vsub.f32 %v7226_v20, %v7234_v31  ;;  %v7171_v36 = vadd.f32 %v7159_v62, %v21826_v51  ;;  %16468 = vmatprep.subr.bf16.mxu1 %v21868_v57  ;;  %v7133_v15 = vpop.xlane.xlu0 %7132 }
 0xc64   :  { %v7272_v30 = vmul.f32 %v16768_v42, %v7055_v10  ;;  %16470 = vmatpush3.bf16.msra.mxu1 %v21868_v57 }
 0xc65   :  { %v7250_v38 = vmax.f32 %v7242_v29, 0.0  ;;  %v21875_v2 = vmul.f32 0.03125, %v7171_v36 }
 0xc66   :  { %v7199_v49 = vpop.xlane.xlu1 %7198  ;;  %7306 = vperm.xlu1 %16750, %v7272_v30   ;;  %v7280_v51 = vmul.f32 %v7272_v30, %v21830_v56  ;;  %v7056_v56 = vld [vmem:[%s22856_s10 + $0x18] sm:$0xff] }
 0xc67   :  { %v7258_v41 = vadd.f32 1e-05, %v7250_v38  ;;  %v7211_v28 = vadd.f32 %v7199_v49, %v21828_v40  ;;  %v7235_v27 = vmul.f32 %v21875_v2, %v21875_v2  ;;  %v7058_v49 = vld [vmem:[%s22856_s10 + $0x28] sm:$0xff] }
 0xc68   :  { %v7288_v35 = vsub.f32 %v7063_v34, %v7280_v51 }
 0xc69   :  { %16771 = vrsqrt.f32 %v7258_v41  ;;  %v7227_v18 = vmul.f32 0.03125, %v7211_v28 }
 0xc6a   :  { %v7162_v53 = vpop.xlane.xlu1 %7161  ;;  %7354 = vperm.xlu1 %16750, %v7288_v35   ;;  %v7066_v35 = vld [vmem:[%s22857_s11 + $0x28] sm:$0xff] }
 0xc6b   :  { %v16770_v54 = vpop.eup %16769  ;;  %v7243_v21 = vsub.f32 %v7227_v18, %v7235_v27  ;;  %v7172_v40 = vadd.f32 %v7162_v53, %v7090_v19 }
 0xc6c   :  { %v7273_v16 = vmul.f32 %v16770_v54, %v7056_v56  ;;  %v7059_v56 = vld [vmem:[%s22856_s10 + $0x30] sm:$0xff] }
 0xc6d   :  { %v7251_v4 = vmax.f32 %v7243_v21, 0.0  ;;  %v7220_v55 = vmul.f32 0.03125, %v7172_v40  ;;  %v7067_v21 = vld [vmem:[%s22857_s11 + $0x30] sm:$0xff] }
 0xc6e   :  { %v7202_v1 = vpop.xlane.xlu1 %7201  ;;  %7311 = vperm.xlu0 %16749, %v7273_v16   ;;  %v7281_v3 = vmul.f32 %v7273_v16, %v21837_v46  ;;  %v7065_v46 = vld [vmem:[%s22857_s11 + $0x20] sm:$0xff] }
 0xc6f   :  { %v7259_v61 = vadd.f32 1e-05, %v7251_v4  ;;  %v7212_v43 = vadd.f32 %v7202_v1, %v7130_v60  ;;  %v7236_v5 = vmul.f32 %v7220_v55, %v7220_v55  ;;  %v7068_v60 = vld [vmem:[%s22857_s11 + $0x38] sm:$0xff] }
 0xc70   :  { %v7289_v9 = vsub.f32 %v7064_v17, %v7281_v3 }
 0xc71   :  { %16773 = vrsqrt.f32 %v7259_v61  ;;  %v7228_v37 = vmul.f32 0.03125, %v7212_v43  ;;  %v11147_v61 = vld [vmem:[%s22860_s14 + $0x28] sm:$0xff] }
 0xc72   :  { %v7165_v31 = vpop.xlane.xlu1 %7164  ;;  %7359 = vperm.xlu0 %16749, %v7289_v9   ;;  %v7544_v9 = vlaneseq }
 0xc73   :  { %v16772_v20 = vpop.eup %16771  ;;  %v7244_v10 = vsub.f32 %v7228_v37, %v7236_v5  ;;  %v7173_v19 = vadd.f32 %v7165_v31, %v7093_v13  ;;  %v7542_v37 = vmax.f32 %v21822_v47, 0.0  ;;  %v7543_v31 = vmax.f32 %v21820_v12, 0.0  ;;  %v11158_v12 = vld [vmem:[%s22860_s14 + $0x30] sm:$0xff] }
 0xc74   :  { %v7274_v62 = vmul.f32 %v16772_v20, %v7057_v45  ;;  %v21930_v5 = vand.u32 127, %v7544_v9 }
 0xc75   :  { %v7252_v8 = vmax.f32 %v7244_v10, 0.0  ;;  %v7221_v23 = vmul.f32 0.03125, %v7173_v19 }
 0xc76   :  { %v7205_v42 = vpop.xlane.xlu1 %7204  ;;  %7316 = vperm.xlu1 %16750, %v7274_v62   ;;  %v7282_v29 = vmul.f32 %v7274_v62, %v21844_v33  ;;  %vm7546_vm3 = vcmp.eq.s32.totalorder %v21930_v5, 0  ;;  %vm8891_vm5 = vcmp.eq.s32.totalorder %v21930_v5, 1 }
 0xc77   :  { %v7260_v36 = vadd.f32 1e-05, %v7252_v8  ;;  %v7213_v50 = vadd.f32 %v7205_v42, %v7133_v15  ;;  %v7237_v38 = vmul.f32 %v7221_v23, %v7221_v23  ;;  %v7547_v45 = vsel %vm7546_vm3, %v7542_v37, 0.0 }
 0xc78   :  { %v7290_v30 = vsub.f32 %v7065_v46, %v7282_v29  ;;  %v7550_v20 = vsel %vm7549_vm4, %v7547_v45, 0.0  ;;  %v7548_v10 = vsel %vm7546_vm3, %v7543_v31, 0.0  ;;  %v8893_v19 = vsel %vm8891_vm5, %v7543_v31, 0.0  ;;  %v11159_v46 = vld [vmem:[%s22860_s14 + $0x38] sm:$0xff] }
 0xc79   :  { %16775 = vrsqrt.f32 %v7260_v36  ;;  %v7229_v34 = vmul.f32 0.03125, %v7213_v50  ;;  %v7553_v62 = vsel %vm7549_vm4, %v7548_v10, 0.0  ;;  %v8897_v47 = vsel %vm7549_vm4, %v8893_v19, 0.0 }
 0xc7a   :  { %7364 = vperm.xlu1 %16750, %v7290_v30   ;;  %v8892_v8 = vsel %vm8891_vm5, %v7542_v37, 0.0  ;;  %v21950_v15 = vpack.c.bf16 %v11159_v46, %v11158_v12 }
 0xc7b   :  { %v16774_v51 = vpop.eup %16773  ;;  %v7245_v41 = vsub.f32 %v7229_v34, %v7237_v38 }
 0xc7c   :  { %v7275_v28 = vmul.f32 %v16774_v51, %v7058_v49  ;;  %16480 = vmatprep.subr.bf16.mxu0 %v21950_v15 }
 0xc7d   :  { %v7253_v13 = vmax.f32 %v7245_v41, 0.0 }
 0xc7e   :  { %7321 = vperm.xlu0 %16749, %v7275_v28   ;;  %v7283_v33 = vmul.f32 %v7275_v28, %v21875_v2  ;;  %v7060_v2 = vld [vmem:[%s22856_s10 + $0x38] sm:$0xff] }
 0xc7f   :  { %v7261_v27 = vadd.f32 1e-05, %v7253_v13 }
 0xc80   :  { %v7291_v18 = vsub.f32 %v7066_v35, %v7283_v33  ;;  %v11170_v35 = vld [vmem:[%s22860_s14 + $0x40] sm:$0xff] }
 0xc81   :  { %16777 = vrsqrt.f32 %v7261_v27 }
 0xc82   :  { %7369 = vperm.xlu0 %16749, %v7291_v18  }
 0xc83   :  { %v16776_v53 = vpop.eup %16775 }
 0xc84   :  { %v7276_v54 = vmul.f32 %v16776_v53, %v7059_v56 }
 0xc86   :  { %7326 = vperm.xlu1 %16750, %v7276_v54   ;;  %v7284_v40 = vmul.f32 %v7276_v54, %v7220_v55  ;;  %v11146_v55 = vld [vmem:[%s22860_s14 + $0x20] sm:$0xff] }
 0xc87   :  { %v21927_v43 = vpack.c.bf16 %v11147_v61, %v11146_v55 }
 0xc88   :  { %v7292_v16 = vsub.f32 %v7067_v21, %v7284_v40 }
 0xc89   :  { %16476 = vmatprep.subr.bf16.mxu1 %v21927_v43 }
 0xc8a   :  { %7374 = vperm.xlu1 %16750, %v7292_v16  }
 0xc8b   :  { %v16778_v4 = vpop.eup %16777 }
 0xc8c   :  { %v7277_v17 = vmul.f32 %v16778_v4, %v7060_v2 }
 0xc8e   :  { %7331 = vperm.xlu0 %16749, %v7277_v17   ;;  %v7285_v1 = vmul.f32 %v7277_v17, %v7221_v23  ;;  %v8894_v23 = vsel %vm7549_vm4, %v8892_v8, 0.0 }
 0xc90   :  { %v7293_v3 = vsub.f32 %v7068_v60, %v7285_v1 }
 0xc92   :  { %7379 = vperm.xlu0 %16749, %v7293_v3  }
 0xcae   :  { %7551 = vadd.xlane.f32.xlu1 %v7550_v20 }
 0xcb1   :  { %7554 = vadd.xlane.f32.xlu0 %v7553_v62 }
 0xcb2   :  { %8898 = vadd.xlane.f32.xlu1 %v8897_v47 }
 0xcb5   :  { %8895 = vadd.xlane.f32.xlu0 %v8894_v23 }
 0xcd5   :  { %v7297_v42 = vpop.permute.xlu0 %7296 }
 0xcd6   :  { %v7334_v36 = vmul.f32 %v7297_v42, %v21614_v58  ;;  %v7414_v50 = vmul.f32 %v7297_v42, %v21754_v44  ;;  %v11171_v58 = vld [vmem:[%s22860_s14 + $0x48] sm:$0xff]  ;;  %v11183_v44 = vld [vmem:[%s22860_s14 + $0x58] sm:$0xff] }
 0xcd7   :  { %v21975_v56 = vpack.c.bf16 %v11171_v58, %v11170_v35 }
 0xcdd   :  { %v7302_v29 = vpop.permute.xlu1 %7301 }
 0xcde   :  { %v7335_v30 = vmul.f32 %v7302_v29, %v21620_v48  ;;  %v7415_v38 = vmul.f32 %v7302_v29, %v21760_v59  ;;  %v11182_v48 = vld [vmem:[%s22860_s14 + $0x50] sm:$0xff] }
 0xcdf   :  { %v21977_v53 = vpack.c.bf16 %v11183_v44, %v11182_v48 }
 0xce1   :  { %v7345_v34 = vpop.permute.xlu1 %7344  ;;  %v7350_v49 = vpop.permute.xlu0 %7349 }
 0xce2   :  { %v7382_v51 = vadd.f32 %v7345_v34, %v7334_v36  ;;  %v21957_v41 = vadd.f32 %v7414_v50, %v7345_v34  ;;  %v7383_v28 = vadd.f32 %v7350_v49, %v7335_v30  ;;  %v21959_v13 = vadd.f32 %v7415_v38, %v7350_v49 }
 0xce4   :  { %vm7390_vm6 = vcmp.gt.f32.partialorder %v7382_v51, 0.0  ;;  %v7398_v59 = vmul.f32 0.2, %v7382_v51  ;;  %vm7391_vm7 = vcmp.gt.f32.partialorder %v7383_v28, 0.0  ;;  %v7399_v33 = vmul.f32 0.2, %v7383_v28 }
 0xce5   :  { %v7307_v27 = vpop.permute.xlu1 %7306  ;;  %vm7430_vm15 = vcmp.gt.f32.partialorder %v21957_v41, 0.0  ;;  %vm7431_vm0 = vcmp.gt.f32.partialorder %v21959_v13, 0.0 }
 0xce6   :  { %v21973_v18 = vsel %vm7390_vm6, %v7382_v51, %v7398_v59  ;;  %v21979_v54 = vsel %vm7391_vm7, %v7383_v28, %v7399_v33  ;;  %v7336_v21 = vmul.f32 %v7307_v27, %v21623_v11  ;;  %v7416_v40 = vmul.f32 %v7307_v27, %v21767_v6  ;;  %v11195_v59 = vld [vmem:[%s22860_s14 + $0x68] sm:$0xff]  ;;  %v11206_v33 = vld [vmem:[%s22860_s14 + $0x70] sm:$0xff]  ;;  %v11207_v27 = vld [vmem:[%s22860_s14 + $0x78] sm:$0xff] }
 0xce7   :  { %14329 = vmatprep.mubr.msk.f32.mxu1 %vm7069_vm1, %v21973_v18  ;;  %14348 = vmatprep.mubr.msk.f32.mxu0 %vm7069_vm1, %v21973_v18 }
 0xce8   :  { %14330 = vmatmul.mubr.msk.f32.vlgmr.msra.gmra.mrb[168].mxu1 %vm7069_vm1, %v21979_v54  ;;  %14349 = vmatmul.mubr.msk.f32.vlgmr.msra.gmra.mrb[178].mxu0 %vm7069_vm1, %v21979_v54 }
 0xce9   :  { %v7355_v16 = vpop.permute.xlu1 %7354  ;;  %16478 = vmatpush3.bf16.msra.mxu1 %v21927_v43  ;;  %16482 = vmatpush3.bf16.msra.mxu0 %v21950_v15 }
 0xcea   :  { %v7384_v2 = vadd.f32 %v7355_v16, %v7336_v21  ;;  %v21993_v4 = vadd.f32 %v7416_v40, %v7355_v16  ;;  %16484 = vmatprep.subr.bf16.mxu1 %v21975_v56  ;;  %16488 = vmatprep.subr.bf16.mxu0 %v21977_v53  ;;  %v22083_v40 = vpack.c.bf16 %v11207_v27, %v11206_v33  ;;  %v11218_v16 = vld [vmem:[%s22860_s14 + $0x80] sm:$0xff] }
 0xcec   :  { %vm7392_vm8 = vcmp.gt.f32.partialorder %v7384_v2, 0.0  ;;  %v7400_v11 = vmul.f32 0.2, %v7384_v2  ;;  %vm7432_vm2 = vcmp.gt.f32.partialorder %v21993_v4, 0.0 }
 0xced   :  { %v7312_v6 = vpop.permute.xlu0 %7311 }
 0xcee   :  { %v21997_v17 = vsel %vm7392_vm8, %v7384_v2, %v7400_v11  ;;  %v7337_v60 = vmul.f32 %v7312_v6, %v21633_v22  ;;  %v7417_v1 = vmul.f32 %v7312_v6, %v21776_v52  ;;  %v11219_v2 = vld [vmem:[%s22860_s14 + $0x88] sm:$0xff] }
 0xcef   :  { %14332 = vmatprep.mubr.msk.f32.mxu1 %vm7069_vm1, %v21997_v17  ;;  %14351 = vmatprep.mubr.msk.f32.mxu0 %vm7069_vm1, %v21997_v17  ;;  %v22135_v11 = vpack.c.bf16 %v11219_v2, %v11218_v16 }
 0xcf1   :  { %v7360_v3 = vpop.permute.xlu0 %7359 }
 0xcf2   :  { %v7385_v55 = vadd.f32 %v7360_v3, %v7337_v60  ;;  %v22005_v61 = vadd.f32 %v7417_v1, %v7360_v3  ;;  %v22246_v3 = vld [vmem:[%s22861_s15 + $0x8] sm:$0xff] }
 0xcf4   :  { %vm7393_vm9 = vcmp.gt.f32.partialorder %v7385_v55, 0.0  ;;  %v7401_v9 = vmul.f32 0.2, %v7385_v55  ;;  %vm7433_vm4 = vcmp.gt.f32.partialorder %v22005_v61, 0.0 }
 0xcf5   :  { %v7317_v37 = vpop.permute.xlu1 %7316 }
 0xcf6   :  { %v22007_v45 = vsel %vm7393_vm9, %v7385_v55, %v7401_v9  ;;  %v7338_v31 = vmul.f32 %v7317_v37, %v21643_v26  ;;  %v7418_v22 = vmul.f32 %v7317_v37, %v21785_v24 }
 0xcf7   :  { %14333 = vmatmul.mubr.msk.f32.gmra.mrb[170].mxu1 %vm7069_vm1, %v22007_v45  ;;  %14352 = vmatmul.mubr.msk.f32.gmra.mrb[180].mxu0 %vm7069_vm1, %v22007_v45 }
 0xcf9   :  { %v7365_v52 = vpop.permute.xlu1 %7364 }
 0xcfa   :  { %v7386_v20 = vadd.f32 %v7365_v52, %v7338_v31  ;;  %v22015_v10 = vadd.f32 %v7418_v22, %v7365_v52 }
 0xcfc   :  { %vm7394_vm10 = vcmp.gt.f32.partialorder %v7386_v20, 0.0  ;;  %v7402_v19 = vmul.f32 0.2, %v7386_v20  ;;  %vm7434_vm6 = vcmp.gt.f32.partialorder %v22015_v10, 0.0 }
 0xcfd   :  { %v7322_v62 = vpop.permute.xlu0 %7321 }
 0xcfe   :  { %v22017_v47 = vsel %vm7394_vm10, %v7386_v20, %v7402_v19  ;;  %v7339_v8 = vmul.f32 %v7322_v62, %v21652_v14  ;;  %v7419_v26 = vmul.f32 %v7322_v62, %v21789_v7 }
 0xcff   :  { %14335 = vmatprep.mubr.msk.f32.mxu1 %vm7069_vm1, %v22017_v47  ;;  %14354 = vmatprep.mubr.msk.f32.mxu0 %vm7069_vm1, %v22017_v47 }
 0xd01   :  { %v7370_v24 = vpop.permute.xlu0 %7369 }
 0xd02   :  { %v7387_v23 = vadd.f32 %v7370_v24, %v7339_v8  ;;  %v22025_v12 = vadd.f32 %v7419_v26, %v7370_v24  ;;  %v22264_v26 = vld [vmem:[%s22861_s15 + $0x18] sm:$0xff] }
 0xd04   :  { %vm7395_vm11 = vcmp.gt.f32.partialorder %v7387_v23, 0.0  ;;  %v7403_v46 = vmul.f32 0.2, %v7387_v23  ;;  %vm7435_vm7 = vcmp.gt.f32.partialorder %v22025_v12, 0.0 }
 0xd05   :  { %v7327_v42 = vpop.permute.xlu1 %7326 }
 0xd06   :  { %v22027_v29 = vsel %vm7395_vm11, %v7387_v23, %v7403_v46  ;;  %v7340_v36 = vmul.f32 %v7327_v42, %v21656_v63  ;;  %v7420_v14 = vmul.f32 %v7327_v42, %v21795_v25 }
 0xd07   :  { %14336 = vmatmul.mubr.msk.f32.gmra.mrb[172].mxu1 %vm7069_vm1, %v22027_v29  ;;  %14355 = vmatmul.mubr.msk.f32.gmra.mrb[182].mxu0 %vm7069_vm1, %v22027_v29 }
 0xd09   :  { %v7375_v7 = vpop.permute.xlu1 %7374 }
 0xd0a   :  { %v7388_v50 = vadd.f32 %v7375_v7, %v7340_v36  ;;  %v22035_v30 = vadd.f32 %v7420_v14, %v7375_v7 }
 0xd0c   :  { %vm7396_vm12 = vcmp.gt.f32.partialorder %v7388_v50, 0.0  ;;  %v7404_v38 = vmul.f32 0.2, %v7388_v50  ;;  %vm7436_vm8 = vcmp.gt.f32.partialorder %v22035_v30, 0.0 }
 0xd0d   :  { %v7332_v34 = vpop.permute.xlu0 %7331 }
 0xd0e   :  { %v22037_v49 = vsel %vm7396_vm12, %v7388_v50, %v7404_v38  ;;  %v7341_v51 = vmul.f32 %v7332_v34, %v21663_v0  ;;  %v7421_v63 = vmul.f32 %v7332_v34, %v21798_v39  ;;  %v11194_v39 = vld [vmem:[%s22860_s14 + $0x60] sm:$0xff] }
 0xd0f   :  { %14338 = vmatprep.mubr.msk.f32.mxu1 %vm7069_vm1, %v22037_v49  ;;  %14357 = vmatprep.mubr.msk.f32.mxu0 %vm7069_vm1, %v22037_v49  ;;  %v22081_v21 = vpack.c.bf16 %v11195_v59, %v11194_v39 }
 0xd11   :  { %v7380_v25 = vpop.permute.xlu0 %7379 }
 0xd12   :  { %v7389_v28 = vadd.f32 %v7380_v25, %v7341_v51  ;;  %v22045_v35 = vadd.f32 %v7421_v63, %v7380_v25 }
 0xd14   :  { %vm7397_vm13 = vcmp.gt.f32.partialorder %v7389_v28, 0.0  ;;  %v7405_v58 = vmul.f32 0.2, %v7389_v28  ;;  %vm7437_vm9 = vcmp.gt.f32.partialorder %v22045_v35, 0.0 }
 0xd16   :  { %v22047_v48 = vsel %vm7397_vm13, %v7389_v28, %v7405_v58 }
 0xd17   :  { %14339 = vmatmul.mubr.msk.f32.gmra.mrb[174].mxu1 %vm7069_vm1, %v22047_v48  ;;  %14358 = vmatmul.mubr.msk.f32.gmra.mrb[184].mxu0 %vm7069_vm1, %v22047_v48 }
 0xd3b   :  { %v22053_v44 = vpop.xlane.xlu1 %7551 }
 0xd3c   :  { %14341 = vmatprep.mubr.msk.f32.mxu1 %vm7069_vm1, %v22053_v44  ;;  %14360 = vmatprep.mubr.msk.f32.mxu0 %vm7069_vm1, %v22053_v44 }
 0xd3e   :  { %v22059_v0 = vpop.xlane.xlu0 %7554 }
 0xd3f   :  { %14342 = vmatmul.mubr.msk.f32.gmra.mrb[176].mxu1 %vm7069_vm1, %v22059_v0  ;;  %14361 = vmatmul.mubr.msk.f32.gmra.mrb[186].mxu0 %vm7069_vm1, %v22059_v0 }
 0xd40   :  { %14367 = vmatprep.mubr.msk.f32.mxu1 %vm7069_vm1, %v21973_v18  ;;  %14386 = vmatprep.mubr.msk.f32.mxu0 %vm7069_vm1, %v21973_v18 }
 0xd43   :  { %14368 = vmatmul.mubr.msk.f32.vlgmr.msra.gmra.mrb[178].mxu1 %vm7069_vm1, %v21979_v54  ;;  %14387 = vmatmul.mubr.msk.f32.vlgmr.msra.gmra.mrb[188].mxu0 %vm7069_vm1, %v21979_v54 }
 0xd44   :  { %14370 = vmatprep.mubr.msk.f32.mxu1 %vm7069_vm1, %v21997_v17  ;;  %14389 = vmatprep.mubr.msk.f32.mxu0 %vm7069_vm1, %v21997_v17 }
 0xd45   :  { %16486 = vmatpush3.bf16.msra.mxu1 %v21975_v56  ;;  %16490 = vmatpush3.bf16.msra.mxu0 %v21977_v53 }
 0xd46   :  { %16492 = vmatprep.subr.bf16.mxu1 %v22081_v21  ;;  %16496 = vmatprep.subr.bf16.mxu0 %v22083_v40 }
 0xd47   :  { %14371 = vmatmul.mubr.msk.f32.gmra.mrb[180].mxu1 %vm7069_vm1, %v22007_v45  ;;  %14390 = vmatmul.mubr.msk.f32.gmra.mrb[190].mxu0 %vm7069_vm1, %v22007_v45 }
 0xd48   :  { %14373 = vmatprep.mubr.msk.f32.mxu1 %vm7069_vm1, %v22017_v47  ;;  %14392 = vmatprep.mubr.msk.f32.mxu0 %vm7069_vm1, %v22017_v47 }
 0xd4b   :  { %14374 = vmatmul.mubr.msk.f32.gmra.mrb[182].mxu1 %vm7069_vm1, %v22027_v29  ;;  %14393 = vmatmul.mubr.msk.f32.gmra.mrb[192].mxu0 %vm7069_vm1, %v22027_v29 }
 0xd4c   :  { %14376 = vmatprep.mubr.msk.f32.mxu1 %vm7069_vm1, %v22037_v49  ;;  %14395 = vmatprep.mubr.msk.f32.mxu0 %vm7069_vm1, %v22037_v49 }
 0xd4f   :  { %14377 = vmatmul.mubr.msk.f32.gmra.mrb[184].mxu1 %vm7069_vm1, %v22047_v48  ;;  %14396 = vmatmul.mubr.msk.f32.gmra.mrb[194].mxu0 %vm7069_vm1, %v22047_v48 }
 0xd50   :  { %14379 = vmatprep.mubr.msk.f32.mxu1 %vm7069_vm1, %v22053_v44  ;;  %14398 = vmatprep.mubr.msk.f32.mxu0 %vm7069_vm1, %v22053_v44 }
 0xd53   :  { %14380 = vmatmul.mubr.msk.f32.gmra.mrb[186].mxu1 %vm7069_vm1, %v22059_v0  ;;  %14399 = vmatmul.mubr.msk.f32.gmra.mrb[196].mxu0 %vm7069_vm1, %v22059_v0 }
 0xd54   :  { %14405 = vmatprep.mubr.msk.f32.mxu1 %vm7069_vm1, %v21973_v18  ;;  %14424 = vmatprep.mubr.msk.f32.mxu0 %vm7069_vm1, %v21973_v18 }
 0xd57   :  { %14406 = vmatmul.mubr.msk.f32.vlgmr.msra.gmra.mrb[188].mxu1 %vm7069_vm1, %v21979_v54  ;;  %14425 = vmatmul.mubr.msk.f32.vlgmr.msra.gmra.mrb[198].mxu0 %vm7069_vm1, %v21979_v54 }
 0xd58   :  { %14408 = vmatprep.mubr.msk.f32.mxu1 %vm7069_vm1, %v21997_v17  ;;  %14427 = vmatprep.mubr.msk.f32.mxu0 %vm7069_vm1, %v21997_v17 }
 0xd59   :  { %16494 = vmatpush3.bf16.msra.mxu1 %v22081_v21  ;;  %16498 = vmatpush3.bf16.msra.mxu0 %v22083_v40 }
 0xd5a   :  { %16500 = vmatprep.subr.bf16.mxu1 %v22135_v11 }
 0xd5b   :  { %14409 = vmatmul.mubr.msk.f32.gmra.mrb[190].mxu1 %vm7069_vm1, %v22007_v45  ;;  %14428 = vmatmul.mubr.msk.f32.gmra.mrb[200].mxu0 %vm7069_vm1, %v22007_v45 }
 0xd5c   :  { %14411 = vmatprep.mubr.msk.f32.mxu1 %vm7069_vm1, %v22017_v47  ;;  %14430 = vmatprep.mubr.msk.f32.mxu0 %vm7069_vm1, %v22017_v47 }
 0xd5f   :  { %14412 = vmatmul.mubr.msk.f32.gmra.mrb[192].mxu1 %vm7069_vm1, %v22027_v29  ;;  %14431 = vmatmul.mubr.msk.f32.gmra.mrb[202].mxu0 %vm7069_vm1, %v22027_v29 }
 0xd60   :  { %14414 = vmatprep.mubr.msk.f32.mxu1 %vm7069_vm1, %v22037_v49  ;;  %14433 = vmatprep.mubr.msk.f32.mxu0 %vm7069_vm1, %v22037_v49 }
 0xd63   :  { %14415 = vmatmul.mubr.msk.f32.gmra.mrb[194].mxu1 %vm7069_vm1, %v22047_v48  ;;  %14434 = vmatmul.mubr.msk.f32.gmra.mrb[204].mxu0 %vm7069_vm1, %v22047_v48 }
 0xd64   :  { %14417 = vmatprep.mubr.msk.f32.mxu1 %vm7069_vm1, %v22053_v44  ;;  %14436 = vmatprep.mubr.msk.f32.mxu0 %vm7069_vm1, %v22053_v44 }
 0xd67   :  { %14418 = vmatmul.mubr.msk.f32.gmra.mrb[196].mxu1 %vm7069_vm1, %v22059_v0  ;;  %14437 = vmatmul.mubr.msk.f32.gmra.mrb[206].mxu0 %vm7069_vm1, %v22059_v0 }
 0xd68   :  { %14443 = vmatprep.mubr.msk.f32.mxu1 %vm7069_vm1, %v21973_v18  ;;  %14462 = vmatprep.mubr.msk.f32.mxu0 %vm7069_vm1, %v21973_v18 }
 0xd6b   :  { %14444 = vmatmul.mubr.msk.f32.vlgmr.msra.gmra.mrb[198].mxu1 %vm7069_vm1, %v21979_v54  ;;  %14463 = vmatmul.mubr.msk.f32.vlgmr.msra.gmra.mrb[208].mxu0 %vm7069_vm1, %v21979_v54 }
 0xd6c   :  { %14446 = vmatprep.mubr.msk.f32.mxu1 %vm7069_vm1, %v21997_v17  ;;  %14465 = vmatprep.mubr.msk.f32.mxu0 %vm7069_vm1, %v21997_v17 }
 0xd6d   :  { %16502 = vmatpush3.bf16.msra.mxu1 %v22135_v11 }
 0xd6f   :  { %14447 = vmatmul.mubr.msk.f32.gmra.mrb[200].mxu1 %vm7069_vm1, %v22007_v45  ;;  %14466 = vmatmul.mubr.msk.f32.gmra.mrb[210].mxu0 %vm7069_vm1, %v22007_v45 }
 0xd70   :  { %14449 = vmatprep.mubr.msk.f32.mxu1 %vm7069_vm1, %v22017_v47  ;;  %14468 = vmatprep.mubr.msk.f32.mxu0 %vm7069_vm1, %v22017_v47 }
 0xd73   :  { %14450 = vmatmul.mubr.msk.f32.gmra.mrb[202].mxu1 %vm7069_vm1, %v22027_v29  ;;  %14469 = vmatmul.mubr.msk.f32.gmra.mrb[212].mxu0 %vm7069_vm1, %v22027_v29 }
 0xd74   :  { %14452 = vmatprep.mubr.msk.f32.mxu1 %vm7069_vm1, %v22037_v49  ;;  %14471 = vmatprep.mubr.msk.f32.mxu0 %vm7069_vm1, %v22037_v49 }
 0xd77   :  { %14453 = vmatmul.mubr.msk.f32.gmra.mrb[204].mxu1 %vm7069_vm1, %v22047_v48  ;;  %14472 = vmatmul.mubr.msk.f32.gmra.mrb[214].mxu0 %vm7069_vm1, %v22047_v48 }
 0xd78   :  { %14455 = vmatprep.mubr.msk.f32.mxu1 %vm7069_vm1, %v22053_v44  ;;  %14474 = vmatprep.mubr.msk.f32.mxu0 %vm7069_vm1, %v22053_v44 }
 0xd7b   :  { %14456 = vmatmul.mubr.msk.f32.gmra.mrb[206].mxu1 %vm7069_vm1, %v22059_v0  ;;  %14475 = vmatmul.mubr.msk.f32.gmra.mrb[216].mxu0 %vm7069_vm1, %v22059_v0 }
 0xd7c   :  { %14481 = vmatprep.mubr.msk.f32.mxu1 %vm7069_vm1, %v21973_v18  ;;  %8730 = vmatprep.mubr.f32.mxu0 %v22246_v3 }
 0xd7f   :  { %14482 = vmatmul.mubr.msk.f32.vlgmr.msra.gmra.mrb[208].mxu1 %vm7069_vm1, %v21979_v54 }
 0xd80   :  { %14484 = vmatprep.mubr.msk.f32.mxu1 %vm7069_vm1, %v21997_v17 }
 0xd83   :  { %14485 = vmatmul.mubr.msk.f32.gmra.mrb[210].mxu1 %vm7069_vm1, %v22007_v45 }
 0xd84   :  { %14487 = vmatprep.mubr.msk.f32.mxu1 %vm7069_vm1, %v22017_v47 }
 0xd87   :  { %14488 = vmatmul.mubr.msk.f32.gmra.mrb[212].mxu1 %vm7069_vm1, %v22027_v29 }
 0xd88   :  { %14490 = vmatprep.mubr.msk.f32.mxu1 %vm7069_vm1, %v22037_v49 }
 0xd8b   :  { %14491 = vmatmul.mubr.msk.f32.gmra.mrb[214].mxu1 %vm7069_vm1, %v22047_v48 }
 0xd8c   :  { %14493 = vmatprep.mubr.msk.f32.mxu1 %vm7069_vm1, %v22053_v44 }
 0xd8f   :  { %14494 = vmatmul.mubr.msk.f32.gmra.mrb[216].mxu1 %vm7069_vm1, %v22059_v0 }
 0xd90   :  { %8805 = vmatprep.mubr.f32.mxu1 %v22264_v26 }
 0xdbb   :  { %v14331_v18 = vpop.f32.mrb[168].mxu1  ;;  %v22237_v54 = vpop.f32.mrb[178].mxu0 }
 0xdbc   :  { %v7666_v6 = vpop.f32.mrb[169].mxu1  ;;  %v22239_v17 = vpop.f32.mrb[179].mxu0 }
 0xdbd   :  { %v16505_v60 = vpack.c.bf16 %v14331_v18, %v7666_v6  ;;  %v16525_v1 = vpack.c.bf16 %v22237_v54, %v22239_v17 }
 0xdca   :  { %v14334_v55 = vpop.f32.mrb[170].mxu1  ;;  %v22249_v9 = vpop.f32.mrb[180].mxu0 }
 0xdcb   :  { %v7676_v37 = vpop.f32.mrb[171].mxu1  ;;  %v22251_v45 = vpop.f32.mrb[181].mxu0 }
 0xdcc   :  { %v16509_v31 = vpack.c.bf16 %v14334_v55, %v7676_v37  ;;  %v16529_v22 = vpack.c.bf16 %v22249_v9, %v22251_v45  ;;  %v22313_v9 = vld [vmem:[%s22861_s15] sm:$0xff] }
 0xdda   :  { %v14337_v52 = vpop.f32.mrb[172].mxu1  ;;  %v22255_v20 = vpop.f32.mrb[182].mxu0 }
 0xddb   :  { %v7686_v19 = vpop.f32.mrb[173].mxu1  ;;  %v22257_v62 = vpop.f32.mrb[183].mxu0 }
 0xddc   :  { %v16513_v47 = vpack.c.bf16 %v14337_v52, %v7686_v19  ;;  %v16533_v8 = vpack.c.bf16 %v22255_v20, %v22257_v62 }
 0xdea   :  { %v14340_v24 = vpop.f32.mrb[174].mxu1  ;;  %v14359_v23 = vpop.f32.mrb[184].mxu0 }
 0xdeb   :  { %v7696_v46 = vpop.f32.mrb[175].mxu1  ;;  %v7814_v42 = vpop.f32.mrb[185].mxu0 }
 0xdec   :  { %v16517_v29 = vpack.c.bf16 %v14340_v24, %v7696_v46  ;;  %v16503_v36 = vpack.c.bf16 %v14359_v23, %v7814_v42 }
 0xdee   :  { %16504 = vmatprep.subr.bf16.mxu0 %v16503_v36 }
 0xdef   :  { %16506 = vmatpush3.bf16.msra.mxu0 %v16505_v60 }
 0xe12   :  { %v14343_v14 = vpop.f32.mrb[176].mxu1  ;;  %v14362_v7 = vpop.f32.mrb[186].mxu0 }
 0xe13   :  { %v7706_v50 = vpop.f32.mrb[177].mxu1  ;;  %v7824_v38 = vpop.f32.mrb[187].mxu0 }
 0xe14   :  { %v16521_v34 = vpack.c.bf16 %v14343_v14, %v7706_v50  ;;  %v16507_v49 = vpack.c.bf16 %v14362_v7, %v7824_v38 }
 0xe16   :  { %v14369_v51 = vpop.f32.mrb[178].mxu1  ;;  %v14388_v63 = vpop.f32.mrb[188].mxu0  ;;  %16508 = vmatprep.subr.bf16.mxu0 %v16507_v49 }
 0xe17   :  { %v7902_v25 = vpop.f32.mrb[179].mxu1  ;;  %v8020_v28 = vpop.f32.mrb[189].mxu0  ;;  %16510 = vmatpush3.bf16.msra.mxu0 %v16509_v31 }
 0xe18   :  { %v16511_v58 = vpack.c.bf16 %v14369_v51, %v7902_v25  ;;  %v16531_v48 = vpack.c.bf16 %v14388_v63, %v8020_v28  ;;  %v23177_v25 = vmov 0.0|0.0   ;;  %v22321_v28 = vld [vmem:[%s22861_s15 + $0x38] sm:$0xff] }
 0xe1a   :  { %v14372_v44 = vpop.f32.mrb[180].mxu1  ;;  %v22267_v0 = vpop.f32.mrb[190].mxu0  ;;  %16512 = vmatprep.subr.bf16.mxu0 %v16511_v58 }
 0xe1b   :  { %v7912_v39 = vpop.f32.mrb[181].mxu1  ;;  %v22269_v59 = vpop.f32.mrb[191].mxu0  ;;  %16514 = vmatpush3.bf16.msra.mxu0 %v16513_v47 }
 0xe1c   :  { %v16515_v33 = vpack.c.bf16 %v14372_v44, %v7912_v39  ;;  %v16537_v27 = vpack.c.bf16 %v22267_v0, %v22269_v59 }
 0xe1e   :  { %v14375_v16 = vpop.f32.mrb[182].mxu1  ;;  %v22273_v2 = vpop.f32.mrb[192].mxu0  ;;  %16516 = vmatprep.subr.bf16.mxu0 %v16515_v33  ;;  %v22339_v33 = vld [vmem:[%s22861_s15 + $0x28] sm:$0xff] }
 0xe1f   :  { %v7922_v18 = vpop.f32.mrb[183].mxu1  ;;  %v22275_v6 = vpop.f32.mrb[193].mxu0  ;;  %16518 = vmatpush3.bf16.msra.mxu0 %v16517_v29 }
 0xe20   :  { %v16519_v60 = vpack.c.bf16 %v14375_v16, %v7922_v18  ;;  %v16541_v55 = vpack.c.bf16 %v22273_v2, %v22275_v6 }
 0xe22   :  { %v14378_v37 = vpop.f32.mrb[184].mxu1  ;;  %v22279_v31 = vpop.f32.mrb[194].mxu0  ;;  %16520 = vmatprep.subr.bf16.mxu0 %v16519_v60 }
 0xe23   :  { %v7932_v52 = vpop.f32.mrb[185].mxu1  ;;  %v22281_v19 = vpop.f32.mrb[195].mxu0  ;;  %16522 = vmatpush3.bf16.msra.mxu0 %v16521_v34 }
 0xe24   :  { %v16523_v47 = vpack.c.bf16 %v14378_v37, %v7932_v52  ;;  %v16545_v24 = vpack.c.bf16 %v22279_v31, %v22281_v19 }
 0xe26   :  { %v14381_v23 = vpop.f32.mrb[186].mxu1  ;;  %v22285_v46 = vpop.f32.mrb[196].mxu0  ;;  %16524 = vmatprep.subr.bf16.mxu0 %v16523_v47 }
 0xe27   :  { %v7942_v42 = vpop.f32.mrb[187].mxu1  ;;  %v22287_v29 = vpop.f32.mrb[197].mxu0  ;;  %16526 = vmatpush3.bf16.msra.mxu0 %v16525_v1 }
 0xe28   :  { %v16527_v36 = vpack.c.bf16 %v14381_v23, %v7942_v42  ;;  %v23739_v6 = vpack.c.bf16 %v22285_v46, %v22287_v29 }
 0xe2a   :  { %v22294_v7 = vpop.f32.mrb[188].mxu1  ;;  %v14426_v50 = vpop.f32.mrb[198].mxu0  ;;  %16528 = vmatprep.subr.bf16.mxu0 %v16527_v36 }
 0xe2b   :  { %v22296_v38 = vpop.f32.mrb[189].mxu1  ;;  %v8256_v34 = vpop.f32.mrb[199].mxu0  ;;  %16530 = vmatpush3.bf16.msra.mxu0 %v16529_v22 }
 0xe2c   :  { %v16539_v54 = vpack.c.bf16 %v14426_v50, %v8256_v34  ;;  %16532 = vmatprep.subr.bf16.mxu0 %v16531_v48  ;;  %v22332_v48 = vld [vmem:[%s22861_s15 + $0x30] sm:$0xff] }
 0xe2e   :  { %v22303_v17 = vpop.f32.mrb[190].mxu1  ;;  %v14429_v1 = vpop.f32.mrb[200].mxu0 }
 0xe2f   :  { %v22305_v51 = vpop.f32.mrb[191].mxu1  ;;  %v8266_v63 = vpop.f32.mrb[201].mxu0  ;;  %16534 = vmatpush3.bf16.msra.mxu0 %v16533_v8 }
 0xe30   :  { %v16543_v22 = vpack.c.bf16 %v14429_v1, %v8266_v63  ;;  %16567 = vmatprep.subr.bf16.mxu0 %v23177_v25 }
 0xe32   :  { %v22323_v58 = vpop.f32.mrb[192].mxu1  ;;  %v14432_v20 = vpop.f32.mrb[202].mxu0  ;;  %8731 = vmatmul.mubr.f32.vlgmr.msra.gmra.mrb[218].mxu0 %v22313_v9 }
 0xe33   :  { %v22326_v62 = vpop.f32.mrb[193].mxu1  ;;  %v8276_v8 = vpop.f32.mrb[203].mxu0  ;;  %8735 = vmatprep.mubr.f32.mxu0 %v22321_v28 }
 0xe34   :  { %v16547_v39 = vpack.c.bf16 %v14432_v20, %v8276_v8 }
 0xe36   :  { %v22341_v16 = vpop.f32.mrb[194].mxu1  ;;  %v14435_v18 = vpop.f32.mrb[204].mxu0  ;;  %8736 = vmatmul.mubr.f32.gmra.mrb[220].mxu0 %v22332_v48 }
 0xe37   :  { %v22344_v60 = vpop.f32.mrb[195].mxu1  ;;  %v8286_v37 = vpop.f32.mrb[205].mxu0  ;;  %11230 = vmatprep.mubr.msk.f32.mxu0 %vm8659_vm14, %v22339_v33 }
 0xe38   :  { %v16551_v47 = vpack.c.bf16 %v14435_v18, %v8286_v37 }
 0xe3a   :  { %v14419_v23 = vpop.f32.mrb[196].mxu1  ;;  %v14438_v42 = vpop.f32.mrb[206].mxu0 }
 0xe3b   :  { %v8178_v36 = vpop.f32.mrb[197].mxu1  ;;  %v8296_v50 = vpop.f32.mrb[207].mxu0 }
 0xe3c   :  { %v16535_v34 = vpack.c.bf16 %v14419_v23, %v8178_v36  ;;  %v16555_v1 = vpack.c.bf16 %v14438_v42, %v8296_v50 }
 0xe3e   :  { %v14445_v63 = vpop.f32.mrb[198].mxu1  ;;  %v14464_v20 = vpop.f32.mrb[208].mxu0  ;;  %16536 = vmatprep.subr.bf16.mxu1 %v16535_v34 }
 0xe3f   :  { %v8374_v8 = vpop.f32.mrb[199].mxu1  ;;  %v8492_v44 = vpop.f32.mrb[209].mxu0  ;;  %16538 = vmatpush3.bf16.msra.mxu1 %v16537_v27 }
 0xe40   :  { %v16559_v45 = vpack.c.bf16 %v14445_v63, %v8374_v8  ;;  %v16577_v49 = vpack.c.bf16 %v14464_v20, %v8492_v44  ;;  %16540 = vmatprep.subr.bf16.mxu1 %v16539_v54 }
 0xe42   :  { %v14448_v52 = vpop.f32.mrb[200].mxu1  ;;  %v14467_v18 = vpop.f32.mrb[210].mxu0 }
 0xe43   :  { %v8384_v37 = vpop.f32.mrb[201].mxu1  ;;  %v8502_v25 = vpop.f32.mrb[211].mxu0  ;;  %16542 = vmatpush3.bf16.msra.mxu1 %v16541_v55  ;;  %v23740_v55 = vmov 0.0|0.0  }
 0xe44   :  { %v16563_v23 = vpack.c.bf16 %v14448_v52, %v8384_v37  ;;  %v16580_v42 = vpack.c.bf16 %v14467_v18, %v8502_v25  ;;  %16544 = vmatprep.subr.bf16.mxu1 %v16543_v22  ;;  %v22413_v37 = vld [vmem:[%s22861_s15 + $0x40] sm:$0xff] }
 0xe46   :  { %v14451_v36 = vpop.f32.mrb[202].mxu1  ;;  %v14470_v50 = vpop.f32.mrb[212].mxu0 }
 0xe47   :  { %v8394_v34 = vpop.f32.mrb[203].mxu1  ;;  %v8512_v14 = vpop.f32.mrb[213].mxu0  ;;  %16546 = vmatpush3.bf16.msra.mxu1 %v16545_v24 }
 0xe48   :  { %v16568_v0 = vpack.c.bf16 %v14451_v36, %v8394_v34  ;;  %v16583_v59 = vpack.c.bf16 %v14470_v50, %v8512_v14  ;;  %16548 = vmatprep.subr.bf16.mxu1 %v16547_v39  ;;  %v23741_v14 = vpack.c.bf16 %v22294_v7, %v22296_v38  ;;  %v7440_v50 = vmul.f32 0.2, %v21993_v4 }
 0xe4a   :  { %v14454_v27 = vpop.f32.mrb[204].mxu1  ;;  %v14473_v54 = vpop.f32.mrb[214].mxu0  ;;  %16569 = vmatpush1.bf16.msra.mxu0 %v16568_v0 }
 0xe4b   :  { %v8404_v44 = vpop.f32.mrb[205].mxu1  ;;  %v8522_v2 = vpop.f32.mrb[215].mxu0  ;;  %16550 = vmatpush3.bf16.msra.mxu1 %v23739_v6  ;;  %16570 = vmatprep.subr.bf16.mxu0 %v23740_v55 }
 0xe4c   :  { %v16571_v22 = vpack.c.bf16 %v14454_v27, %v8404_v44  ;;  %v16586_v25 = vpack.c.bf16 %v14473_v54, %v8522_v2  ;;  %16552 = vmatprep.subr.bf16.mxu1 %v16551_v47  ;;  %v23742_v47 = vpack.c.bf16 %v22303_v17, %v22305_v51  ;;  %v22433_v27 = vsel %vm7432_vm2, %v21993_v4, %v7440_v50 }
 0xe4d   :  { %v7442_v54 = vmul.f32 0.2, %v22015_v10  ;;  %v7443_v4 = vmul.f32 0.2, %v22025_v12  ;;  %v7444_v2 = vmul.f32 0.2, %v22035_v30 }
 0xe4e   :  { %v14457_v52 = vpop.f32.mrb[206].mxu1  ;;  %v14476_v31 = vpop.f32.mrb[216].mxu0  ;;  %16572 = vmatpush1.bf16.msra.mxu0 %v16571_v22  ;;  %v22503_v22 = vld [vmem:[%s22861_s15 + $0x58] sm:$0xff] }
 0xe4f   :  { %v8414_v19 = vpop.f32.mrb[207].mxu1  ;;  %v8532_v24 = vpop.f32.mrb[217].mxu0  ;;  %16554 = vmatpush3.bf16.msra.mxu1 %v23741_v14  ;;  %16573 = vmatprep.subr.bf16.mxu0 %v23740_v55  ;;  %v22450_v44 = vsel %vm7434_vm6, %v22015_v10, %v7442_v54  ;;  %v22465_v10 = vsel %vm7436_vm8, %v22035_v30, %v7444_v2 }
 0xe50   :  { %v16574_v39 = vpack.c.bf16 %v14457_v52, %v8414_v19  ;;  %v16589_v63 = vpack.c.bf16 %v14476_v31, %v8532_v24  ;;  %16556 = vmatprep.subr.bf16.mxu1 %v16555_v1  ;;  %v23743_v1 = vpack.c.bf16 %v22323_v58, %v22326_v62  ;;  %v22402_v62 = vld [vmem:[%s22861_s15 + $0x48] sm:$0xff]  ;;  %v22483_v30 = vpop.xlane.xlu1 %8898 }
 0xe52   :  { %v22367_v46 = vpop.f32.mrb[208].mxu1  ;;  %16575 = vmatpush1.bf16.msra.mxu0 %v16574_v39 }
 0xe53   :  { %v8610_v29 = vpop.f32.mrb[209].mxu1  ;;  %16558 = vmatpush3.bf16.msra.mxu1 %v23742_v47  ;;  %16576 = vmatprep.subr.bf16.mxu0 %v23740_v55 }
 0xe54   :  { %v16592_v20 = vpack.c.bf16 %v22367_v46, %v8610_v29  ;;  %16560 = vmatprep.subr.bf16.mxu1 %v16559_v45  ;;  %v22395_v45 = vld [vmem:[%s22861_s15 + $0x10] sm:$0xff] }
 0xe56   :  { %v22374_v7 = vpop.f32.mrb[210].mxu1  ;;  %16578 = vmatpush1.bf16.msra.mxu0 %v16577_v49  ;;  %v23744_v49 = vpack.c.bf16 %v22341_v16, %v22344_v60  ;;  %v7438_v16 = vmul.f32 0.2, %v21957_v41 }
 0xe57   :  { %v22376_v38 = vpop.f32.mrb[211].mxu1  ;;  %16562 = vmatpush3.bf16.msra.mxu1 %v23743_v1  ;;  %16579 = vmatprep.subr.bf16.mxu0 %v23740_v55 }
 0xe58   :  { %v16595_v17 = vpack.c.bf16 %v22374_v7, %v22376_v38  ;;  %16564 = vmatprep.subr.bf16.mxu1 %v16563_v23  ;;  %v22419_v36 = vsel %vm7430_vm15, %v21957_v41, %v7438_v16  ;;  %vm10346_vm15 = vcmask 8192  }
 0xe5a   :  { %v22384_v51 = vpop.f32.mrb[212].mxu1  ;;  %16581 = vmatpush1.bf16.msra.mxu0 %v16580_v42  ;;  %v7439_v42 = vmul.f32 0.2, %v21959_v13 }
 0xe5b   :  { %v22386_v8 = vpop.f32.mrb[213].mxu1  ;;  %16566 = vmatpush3.bf16.msra.mxu1 %v23744_v49  ;;  %16582 = vmatprep.subr.bf16.mxu0 %v23740_v55 }
 0xe5c   :  { %v16598_v58 = vpack.c.bf16 %v22384_v51, %v22386_v8  ;;  %16607 = vmatprep.subr.bf16.mxu1 %v21868_v57  ;;  %v22429_v41 = vsel %vm7431_vm0, %v21959_v13, %v7439_v42 }
 0xe5e   :  { %v14492_v60 = vpop.f32.mrb[214].mxu1  ;;  %8806 = vmatmul.mubr.f32.vlgmr.msra.gmra.mrb[218].mxu1 %v22395_v45  ;;  %16584 = vmatpush1.bf16.msra.mxu0 %v16583_v59  ;;  %v7441_v59 = vmul.f32 0.2, %v22005_v61 }
 0xe5f   :  { %v8640_v18 = vpop.f32.mrb[215].mxu1  ;;  %8810 = vmatprep.mubr.f32.mxu1 %v22402_v62  ;;  %16585 = vmatprep.subr.bf16.mxu0 %v23740_v55 }
 0xe60   :  { %v16601_v23 = vpack.c.bf16 %v14492_v60, %v8640_v18  ;;  %16609 = vmatpush3.bf16.msra.mxu1 %v21868_v57  ;;  %v22445_v13 = vsel %vm7433_vm4, %v22005_v61, %v7441_v59  ;;  %v7445_v61 = vmul.f32 0.2, %v22045_v35 }
 0xe61   :  { %16611 = vmatprep.subr.bf16.mxu1 %v21873_v32 }
 0xe62   :  { %v14495_v34 = vpop.f32.mrb[216].mxu1  ;;  %8811 = vmatmul.mubr.f32.gmra.mrb[220].mxu1 %v22413_v37  ;;  %16587 = vmatpush1.bf16.msra.mxu0 %v16586_v25  ;;  %v22474_v6 = vsel %vm7437_vm9, %v22045_v35, %v7445_v61  ;;  %v22495_v35 = vld [vmem:[%s22861_s15 + $0x20] sm:$0xff]  ;;  %v22514_v25 = vld [vmem:[%s22861_s15 + $0x50] sm:$0xff] }
 0xe63   :  { %v8650_v0 = vpop.f32.mrb[217].mxu1  ;;  %14500 = vmatprep.mubr.msk.f32.mxu1 %vm7069_vm1, %v22419_v36  ;;  %16588 = vmatprep.subr.bf16.mxu0 %v23740_v55 }
 0xe64   :  { %v16604_v57 = vpack.c.bf16 %v14495_v34, %v8650_v0 }
 0xe66   :  { %16590 = vmatpush1.bf16.msra.mxu0 %v16589_v63  ;;  %14501 = vmatmul.mubr.msk.f32.vlgmr.msra.gmra.mrb[222].mxu1 %vm7069_vm1, %v22429_v41 }
 0xe67   :  { %14503 = vmatprep.mubr.msk.f32.mxu1 %vm7069_vm1, %v22433_v27  ;;  %16591 = vmatprep.subr.bf16.mxu0 %v23740_v55 }
 0xe68   :  { %16613 = vmatpush3.bf16.msra.mxu1 %v21873_v32  ;;  %v22461_v32 = vsel %vm7435_vm7, %v22025_v12, %v7443_v4  ;;  %v22476_v12 = vpop.xlane.xlu0 %8895 }
 0xe69   :  { %16619 = vmatprep.subr.bf16.mxu1 %v21950_v15 }
 0xe6a   :  { %16593 = vmatpush1.bf16.msra.mxu0 %v16592_v20  ;;  %14504 = vmatmul.mubr.msk.f32.gmra.mrb[224].mxu1 %vm7069_vm1, %v22445_v13 }
 0xe6b   :  { %14506 = vmatprep.mubr.msk.f32.mxu1 %vm7069_vm1, %v22450_v44  ;;  %16594 = vmatprep.subr.bf16.mxu0 %v23740_v55 }
 0xe6e   :  { %16596 = vmatpush1.bf16.msra.mxu0 %v16595_v17  ;;  %14507 = vmatmul.mubr.msk.f32.gmra.mrb[226].mxu1 %vm7069_vm1, %v22461_v32 }
 0xe6f   :  { %14509 = vmatprep.mubr.msk.f32.mxu1 %vm7069_vm1, %v22465_v10  ;;  %16597 = vmatprep.subr.bf16.mxu0 %v23740_v55 }
 0xe72   :  { %16599 = vmatpush1.bf16.msra.mxu0 %v16598_v58  ;;  %14510 = vmatmul.mubr.msk.f32.gmra.mrb[228].mxu1 %vm7069_vm1, %v22474_v6 }
 0xe73   :  { %14512 = vmatprep.mubr.msk.f32.mxu1 %vm7069_vm1, %v22476_v12  ;;  %16600 = vmatprep.subr.bf16.mxu0 %v23740_v55 }
 0xe76   :  { %16602 = vmatpush1.bf16.msra.mxu0 %v16601_v23  ;;  %14513 = vmatmul.mubr.msk.f32.gmra.mrb[230].mxu1 %vm7069_vm1, %v22483_v30 }
 0xe77   :  { %14519 = vmatprep.mubr.msk.f32.mxu1 %vm7069_vm1, %v22419_v36  ;;  %16603 = vmatprep.subr.bf16.mxu0 %v23740_v55 }
 0xe7a   :  { %16605 = vmatpush1.bf16.msra.mxu0 %v16604_v57  ;;  %14520 = vmatmul.mubr.msk.f32.vlgmr.msra.gmra.mrb[232].mxu1 %vm7069_vm1, %v22429_v41 }
 0xe7b   :  { %14522 = vmatprep.mubr.msk.f32.mxu1 %vm7069_vm1, %v22433_v27  ;;  %16615 = vmatprep.subr.bf16.mxu0 %v21927_v43 }
 0xe7c   :  { %16621 = vmatpush3.bf16.msra.mxu1 %v21950_v15 }
 0xe7d   :  { %8881 = vmatmul.mubr.f32.vlgmr.msra.gmra.mrb[222].mxu0 %v22495_v35  ;;  %16627 = vmatprep.subr.bf16.mxu1 %v21977_v53 }
 0xe7e   :  { %14523 = vmatmul.mubr.msk.f32.gmra.mrb[234].mxu1 %vm7069_vm1, %v22445_v13  ;;  %16617 = vmatpush3.bf16.msra.mxu0 %v21927_v43 }
 0xe7f   :  { %14525 = vmatprep.mubr.msk.f32.mxu1 %vm7069_vm1, %v22450_v44  ;;  %11231 = vmatprep.mubr.msk.f32.mxu0 %vm8659_vm14, %v22503_v22 }
 0xe80   :  { %16623 = vmatprep.subr.bf16.mxu0 %v21975_v56 }
 0xe81   :  { %8886 = vmatmul.mubr.f32.gmra.mrb[224].mxu0 %v22514_v25 }
 0xe82   :  { %14526 = vmatmul.mubr.msk.f32.gmra.mrb[236].mxu1 %vm7069_vm1, %v22461_v32  ;;  %14538 = vmatprep.mubr.msk.f32.mxu0 %vm7069_vm1, %v22419_v36 }
 0xe83   :  { %14528 = vmatprep.mubr.msk.f32.mxu1 %vm7069_vm1, %v22465_v10 }
 0xe85   :  { %14539 = vmatmul.mubr.msk.f32.vlgmr.msra.gmra.mrb[226].mxu0 %vm7069_vm1, %v22429_v41 }
 0xe86   :  { %14529 = vmatmul.mubr.msk.f32.gmra.mrb[238].mxu1 %vm7069_vm1, %v22474_v6  ;;  %14541 = vmatprep.mubr.msk.f32.mxu0 %vm7069_vm1, %v22433_v27 }
 0xe87   :  { %16625 = vmatpush3.bf16.msra.mxu0 %v21975_v56  ;;  %14531 = vmatprep.mubr.msk.f32.mxu1 %vm7069_vm1, %v22476_v12 }
 0xe88   :  { %16631 = vmatprep.subr.bf16.mxu0 %v22081_v21 }
 0xe89   :  { %14542 = vmatmul.mubr.msk.f32.gmra.mrb[228].mxu0 %vm7069_vm1, %v22445_v13 }
 0xe8a   :  { %14532 = vmatmul.mubr.msk.f32.gmra.mrb[240].mxu1 %vm7069_vm1, %v22483_v30  ;;  %14544 = vmatprep.mubr.msk.f32.mxu0 %vm7069_vm1, %v22450_v44 }
 0xe8b   :  { %14557 = vmatprep.mubr.msk.f32.mxu1 %vm7069_vm1, %v22419_v36 }
 0xe8d   :  { %14545 = vmatmul.mubr.msk.f32.gmra.mrb[230].mxu0 %vm7069_vm1, %v22461_v32 }
 0xe8e   :  { %14547 = vmatprep.mubr.msk.f32.mxu0 %vm7069_vm1, %v22465_v10  ;;  %14558 = vmatmul.mubr.msk.f32.vlgmr.msra.gmra.mrb[242].mxu1 %vm7069_vm1, %v22429_v41 }
 0xe8f   :  { %14560 = vmatprep.mubr.msk.f32.mxu1 %vm7069_vm1, %v22433_v27  ;;  %16629 = vmatpush3.bf16.msra.mxu1 %v21977_v53 }
 0xe90   :  { %16635 = vmatprep.subr.bf16.mxu1 %v22083_v40 }
 0xe91   :  { %14548 = vmatmul.mubr.msk.f32.gmra.mrb[232].mxu0 %vm7069_vm1, %v22474_v6 }
 0xe92   :  { %14550 = vmatprep.mubr.msk.f32.mxu0 %vm7069_vm1, %v22476_v12  ;;  %14561 = vmatmul.mubr.msk.f32.gmra.mrb[244].mxu1 %vm7069_vm1, %v22445_v13 }
 0xe93   :  { %14563 = vmatprep.mubr.msk.f32.mxu1 %vm7069_vm1, %v22450_v44 }
 0xe95   :  { %14551 = vmatmul.mubr.msk.f32.gmra.mrb[234].mxu0 %vm7069_vm1, %v22483_v30 }
 0xe96   :  { %14564 = vmatmul.mubr.msk.f32.gmra.mrb[246].mxu1 %vm7069_vm1, %v22461_v32  ;;  %14576 = vmatprep.mubr.msk.f32.mxu0 %vm7069_vm1, %v22419_v36 }
 0xe97   :  { %14566 = vmatprep.mubr.msk.f32.mxu1 %vm7069_vm1, %v22465_v10 }
 0xe99   :  { %14577 = vmatmul.mubr.msk.f32.vlgmr.msra.gmra.mrb[236].mxu0 %vm7069_vm1, %v22429_v41 }
 0xe9a   :  { %14567 = vmatmul.mubr.msk.f32.gmra.mrb[248].mxu1 %vm7069_vm1, %v22474_v6  ;;  %14579 = vmatprep.mubr.msk.f32.mxu0 %vm7069_vm1, %v22433_v27 }
 0xe9b   :  { %16633 = vmatpush3.bf16.msra.mxu0 %v22081_v21  ;;  %14569 = vmatprep.mubr.msk.f32.mxu1 %vm7069_vm1, %v22476_v12 }
 0xe9c   :  { %16639 = vmatprep.subr.bf16.mxu0 %v22135_v11 }
 0xe9d   :  { %14580 = vmatmul.mubr.msk.f32.gmra.mrb[238].mxu0 %vm7069_vm1, %v22445_v13 }
 0xe9e   :  { %14570 = vmatmul.mubr.msk.f32.gmra.mrb[250].mxu1 %vm7069_vm1, %v22483_v30  ;;  %14582 = vmatprep.mubr.msk.f32.mxu0 %vm7069_vm1, %v22450_v44 }
 0xe9f   :  { %14595 = vmatprep.mubr.msk.f32.mxu1 %vm7069_vm1, %v22419_v36 }
 0xea1   :  { %14583 = vmatmul.mubr.msk.f32.gmra.mrb[240].mxu0 %vm7069_vm1, %v22461_v32 }
 0xea2   :  { %14585 = vmatprep.mubr.msk.f32.mxu0 %vm7069_vm1, %v22465_v10  ;;  %14596 = vmatmul.mubr.msk.f32.vlgmr.msra.gmra.mrb[252].mxu1 %vm7069_vm1, %v22429_v41 }
 0xea3   :  { %14598 = vmatprep.mubr.msk.f32.mxu1 %vm7069_vm1, %v22433_v27  ;;  %16637 = vmatpush3.bf16.msra.mxu1 %v22083_v40 }
 0xea5   :  { %14586 = vmatmul.mubr.msk.f32.gmra.mrb[242].mxu0 %vm7069_vm1, %v22474_v6 }
 0xea6   :  { %14588 = vmatprep.mubr.msk.f32.mxu0 %vm7069_vm1, %v22476_v12  ;;  %14599 = vmatmul.mubr.msk.f32.gmra.mrb[254].mxu1 %vm7069_vm1, %v22445_v13 }
 0xea7   :  { %14601 = vmatprep.mubr.msk.f32.mxu1 %vm7069_vm1, %v22450_v44 }
 0xea9   :  { %14589 = vmatmul.mubr.msk.f32.gmra.mrb[244].mxu0 %vm7069_vm1, %v22483_v30 }
 0xeaa   :  { %14602 = vmatmul.mubr.msk.f32.gmra.mrb[0].mxu1 %vm7069_vm1, %v22461_v32  ;;  %14614 = vmatprep.mubr.msk.f32.mxu0 %vm7069_vm1, %v22419_v36 }
 0xeab   :  { %14604 = vmatprep.mubr.msk.f32.mxu1 %vm7069_vm1, %v22465_v10 }
 0xead   :  { %14615 = vmatmul.mubr.msk.f32.vlgmr.msra.gmra.mrb[246].mxu0 %vm7069_vm1, %v22429_v41 }
 0xeae   :  { %14605 = vmatmul.mubr.msk.f32.gmra.mrb[2].mxu1 %vm7069_vm1, %v22474_v6  ;;  %14617 = vmatprep.mubr.msk.f32.mxu0 %vm7069_vm1, %v22433_v27 }
 0xeaf   :  { %14607 = vmatprep.mubr.msk.f32.mxu1 %vm7069_vm1, %v22476_v12  ;;  %16641 = vmatpush3.bf16.msra.mxu0 %v22135_v11 }
 0xeb1   :  { %14618 = vmatmul.mubr.msk.f32.gmra.mrb[248].mxu0 %vm7069_vm1, %v22445_v13 }
 0xeb2   :  { %14608 = vmatmul.mubr.msk.f32.gmra.mrb[4].mxu1 %vm7069_vm1, %v22483_v30  ;;  %14620 = vmatprep.mubr.msk.f32.mxu0 %vm7069_vm1, %v22450_v44 }
 0xeb3   :  { %14633 = vmatprep.mubr.msk.f32.mxu1 %vm7069_vm1, %v22419_v36 }
 0xeb5   :  { %14621 = vmatmul.mubr.msk.f32.gmra.mrb[250].mxu0 %vm7069_vm1, %v22461_v32 }
 0xeb6   :  { %14623 = vmatprep.mubr.msk.f32.mxu0 %vm7069_vm1, %v22465_v10  ;;  %14634 = vmatmul.mubr.msk.f32.vlgmr.msra.gmra.mrb[6].mxu1 %vm7069_vm1, %v22429_v41 }
 0xeb7   :  { %14636 = vmatprep.mubr.msk.f32.mxu1 %vm7069_vm1, %v22433_v27 }
 0xeb9   :  { %14624 = vmatmul.mubr.msk.f32.gmra.mrb[252].mxu0 %vm7069_vm1, %v22474_v6 }
 0xeba   :  { %14626 = vmatprep.mubr.msk.f32.mxu0 %vm7069_vm1, %v22476_v12  ;;  %14637 = vmatmul.mubr.msk.f32.gmra.mrb[8].mxu1 %vm7069_vm1, %v22445_v13 }
 0xebb   :  { %14639 = vmatprep.mubr.msk.f32.mxu1 %vm7069_vm1, %v22450_v44 }
 0xebd   :  { %14627 = vmatmul.mubr.msk.f32.gmra.mrb[254].mxu0 %vm7069_vm1, %v22483_v30 }
 0xebe   :  { %14640 = vmatmul.mubr.msk.f32.gmra.mrb[10].mxu1 %vm7069_vm1, %v22461_v32  ;;  %14652 = vmatprep.mubr.msk.f32.mxu0 %vm7069_vm1, %v22419_v36 }
 0xebf   :  { %14642 = vmatprep.mubr.msk.f32.mxu1 %vm7069_vm1, %v22465_v10 }
 0xec1   :  { %14653 = vmatmul.mubr.msk.f32.vlgmr.msra.gmra.mrb[0].mxu0 %vm7069_vm1, %v22429_v41 }
 0xec2   :  { %14643 = vmatmul.mubr.msk.f32.gmra.mrb[12].mxu1 %vm7069_vm1, %v22474_v6  ;;  %14655 = vmatprep.mubr.msk.f32.mxu0 %vm7069_vm1, %v22433_v27 }
 0xec3   :  { %14645 = vmatprep.mubr.msk.f32.mxu1 %vm7069_vm1, %v22476_v12 }
 0xec5   :  { %14656 = vmatmul.mubr.msk.f32.gmra.mrb[2].mxu0 %vm7069_vm1, %v22445_v13 }
 0xec6   :  { %14646 = vmatmul.mubr.msk.f32.gmra.mrb[14].mxu1 %vm7069_vm1, %v22483_v30  ;;  %14658 = vmatprep.mubr.msk.f32.mxu0 %vm7069_vm1, %v22450_v44 }
 0xec7   :  { %10029 = vmatprep.mubr.f32.mxu1 %v22246_v3 }
 0xec9   :  { %14659 = vmatmul.mubr.msk.f32.gmra.mrb[4].mxu0 %vm7069_vm1, %v22461_v32 }
 0xeca   :  { %14661 = vmatprep.mubr.msk.f32.mxu0 %vm7069_vm1, %v22465_v10 }
 0xecd   :  { %14662 = vmatmul.mubr.msk.f32.gmra.mrb[6].mxu0 %vm7069_vm1, %v22474_v6 }
 0xece   :  { %14664 = vmatprep.mubr.msk.f32.mxu0 %vm7069_vm1, %v22476_v12 }
 0xed1   :  { %14665 = vmatmul.mubr.msk.f32.gmra.mrb[8].mxu0 %vm7069_vm1, %v22483_v30 }
 0xed2   :  { %10104 = vmatprep.mubr.f32.mxu0 %v22264_v26 }
 0xf05   :  { %v13382_v43 = vpop.f32.mrb[218].mxu0 }
 0xf06   :  { %v13383_v15 = vpop.f32.mrb[219].mxu0 }
 0xf07   :  { %v13384_v56 = vadd.f32 %v13383_v15, %v13382_v43 }
 0xf09   :  { %v13385_v53 = vpop.f32.mrb[220].mxu0 }
 0xf0a   :  { %v13386_v21 = vpop.f32.mrb[221].mxu0 }
 0xf0b   :  { %v13387_v40 = vadd.f32 %v13386_v21, %v13385_v53 }
 0xf31   :  { %v13420_v11 = vpop.f32.mrb[218].mxu1 }
 0xf32   :  { %v13421_v3 = vpop.f32.mrb[219].mxu1 }
 0xf33   :  { %v13422_v52 = vadd.f32 %v13421_v3, %v13420_v11 }
 0xf35   :  { %v13423_v31 = vpop.f32.mrb[220].mxu1  ;;  %v8808_v19 = vadd.f32 %v13422_v52, %v13384_v56 }
 0xf36   :  { %v13424_v24 = vpop.f32.mrb[221].mxu1 }
 0xf37   :  { %v13425_v14 = vadd.f32 %v13424_v24, %v13423_v31 }
 0xf39   :  { %v14502_v39 = vpop.f32.mrb[222].mxu1  ;;  %v8813_v63 = vadd.f32 %v13425_v14, %v13387_v40 }
 0xf3a   :  { %v8996_v46 = vpop.f32.mrb[223].mxu1 }
 0xf3b   :  { %v16644_v29 = vpack.c.bf16 %v14502_v39, %v8996_v46 }
 0xf3d   :  { %v14505_v47 = vpop.f32.mrb[224].mxu1 }
 0xf3e   :  { %v9006_v20 = vpop.f32.mrb[225].mxu1 }
 0xf3f   :  { %v16648_v26 = vpack.c.bf16 %v14505_v47, %v9006_v20 }
 0xf41   :  { %v14508_v7 = vpop.f32.mrb[226].mxu1 }
 0xf42   :  { %v9016_v38 = vpop.f32.mrb[227].mxu1 }
 0xf43   :  { %v16652_v1 = vpack.c.bf16 %v14508_v7, %v9016_v38 }
 0xf45   :  { %v22682_v17 = vpop.f32.mrb[228].mxu1 }
 0xf46   :  { %v22684_v51 = vpop.f32.mrb[229].mxu1 }
 0xf47   :  { %v16656_v8 = vpack.c.bf16 %v22682_v17, %v22684_v51 }
 0xf49   :  { %v22688_v49 = vpop.f32.mrb[230].mxu1 }
 0xf4a   :  { %v22690_v58 = vpop.f32.mrb[231].mxu1 }
 0xf4b   :  { %v16660_v16 = vpack.c.bf16 %v22688_v49, %v22690_v58 }
 0xf4d   :  { %v22694_v60 = vpop.f32.mrb[232].mxu1 }
 0xf4e   :  { %v22696_v18 = vpop.f32.mrb[233].mxu1 }
 0xf4f   :  { %v16664_v23 = vpack.c.bf16 %v22694_v60, %v22696_v18 }
 0xf50   :  { %v8882_v42 = vpop.f32.mrb[222].mxu0 }
 0xf51   :  { %v22700_v36 = vadd.f32 %v8882_v42, %v8808_v19  ;;  %v8884_v50 = vpop.f32.mrb[223].mxu0  ;;  %v22702_v34 = vpop.f32.mrb[234].mxu1 }
 0xf52   :  { %v22704_v0 = vpop.f32.mrb[235].mxu1 }
 0xf53   :  { %v16668_v57 = vpack.c.bf16 %v22702_v34, %v22704_v0  ;;  %v10194_v41 = vsel %vm7069_vm1, %v22700_v36, 0.0  ;;  %v10202_v59 = vmul.f32 %v22700_v36, %v22700_v36 }
 0xf54   :  { %v8887_v27 = vpop.f32.mrb[224].mxu0  ;;  %10195 = vadd.xlane.f32.xlu0 %v10194_v41 }
 0xf55   :  { %v22712_v54 = vadd.f32 %v8887_v27, %v8813_v63  ;;  %v8889_v13 = vpop.f32.mrb[225].mxu0  ;;  %v22714_v4 = vpop.f32.mrb[236].mxu1  ;;  %v10204_v61 = vsel %vm7069_vm1, %v10202_v59, 0.0 }
 0xf56   :  { %v22716_v44 = vpop.f32.mrb[237].mxu1 }
 0xf57   :  { %v16672_v2 = vpack.c.bf16 %v22714_v4, %v22716_v44  ;;  %v10197_v32 = vsel %vm7069_vm1, %v22712_v54, 0.0  ;;  %v10203_v10 = vmul.f32 %v22712_v54, %v22712_v54 }
 0xf58   :  { %v14540_v6 = vpop.f32.mrb[226].mxu0  ;;  %10198 = vadd.xlane.f32.xlu1 %v10197_v32  ;;  %10205 = vadd.xlane.f32.xlu0 %v10204_v61 }
 0xf59   :  { %v14530_v12 = vpop.f32.mrb[238].mxu1  ;;  %v9226_v30 = vpop.f32.mrb[227].mxu0  ;;  %v10207_v53 = vsel %vm7069_vm1, %v10203_v10, 0.0 }
 0xf5a   :  { %v16650_v43 = vpack.c.bf16 %v14540_v6, %v9226_v30  ;;  %v9141_v15 = vpop.f32.mrb[239].mxu1 }
 0xf5b   :  { %v16642_v56 = vpack.c.bf16 %v14530_v12, %v9141_v15 }
 0xf5c   :  { %v14543_v21 = vpop.f32.mrb[228].mxu0  ;;  %10208 = vadd.xlane.f32.xlu1 %v10207_v53 }
 0xf5d   :  { %v14533_v40 = vpop.f32.mrb[240].mxu1  ;;  %v9236_v11 = vpop.f32.mrb[229].mxu0  ;;  %16643 = vmatprep.subr.bf16.mxu1 %v16642_v56 }
 0xf5e   :  { %v16654_v3 = vpack.c.bf16 %v14543_v21, %v9236_v11  ;;  %v9151_v52 = vpop.f32.mrb[241].mxu1  ;;  %16645 = vmatpush3.bf16.msra.mxu1 %v16644_v29 }
 0xf5f   :  { %v16646_v31 = vpack.c.bf16 %v14533_v40, %v9151_v52 }
 0xf60   :  { %v14546_v19 = vpop.f32.mrb[230].mxu0 }
 0xf61   :  { %v9246_v24 = vpop.f32.mrb[231].mxu0  ;;  %v14559_v14 = vpop.f32.mrb[242].mxu1  ;;  %16647 = vmatprep.subr.bf16.mxu1 %v16646_v31 }
 0xf62   :  { %v16658_v39 = vpack.c.bf16 %v14546_v19, %v9246_v24  ;;  %v9341_v63 = vpop.f32.mrb[243].mxu1  ;;  %16649 = vmatpush3.bf16.msra.mxu1 %v16648_v26 }
 0xf63   :  { %v16670_v46 = vpack.c.bf16 %v14559_v14, %v9341_v63  ;;  %16651 = vmatprep.subr.bf16.mxu1 %v16650_v43 }
 0xf64   :  { %v14549_v47 = vpop.f32.mrb[232].mxu0 }
 0xf65   :  { %v9256_v20 = vpop.f32.mrb[233].mxu0  ;;  %v14562_v7 = vpop.f32.mrb[244].mxu1 }
 0xf66   :  { %v16662_v38 = vpack.c.bf16 %v14549_v47, %v9256_v20  ;;  %v9351_v42 = vpop.f32.mrb[245].mxu1  ;;  %16653 = vmatpush3.bf16.msra.mxu1 %v16652_v1 }
 0xf67   :  { %v16676_v50 = vpack.c.bf16 %v14562_v7, %v9351_v42  ;;  %16655 = vmatprep.subr.bf16.mxu1 %v16654_v3 }
 0xf68   :  { %v14552_v41 = vpop.f32.mrb[234].mxu0 }
 0xf69   :  { %v9266_v29 = vpop.f32.mrb[235].mxu0  ;;  %v14565_v59 = vpop.f32.mrb[246].mxu1 }
 0xf6a   :  { %v16666_v27 = vpack.c.bf16 %v14552_v41, %v9266_v29  ;;  %v9361_v13 = vpop.f32.mrb[247].mxu1  ;;  %16657 = vmatpush3.bf16.msra.mxu1 %v16656_v8 }
 0xf6b   :  { %v16680_v26 = vpack.c.bf16 %v14565_v59, %v9361_v13  ;;  %16659 = vmatprep.subr.bf16.mxu1 %v16658_v39 }
 0xf6c   :  { %v22729_v32 = vpop.f32.mrb[236].mxu0 }
 0xf6d   :  { %v14568_v61 = vpop.f32.mrb[248].mxu1  ;;  %v22731_v10 = vpop.f32.mrb[237].mxu0 }
 0xf6e   :  { %v16692_v1 = vpack.c.bf16 %v22729_v32, %v22731_v10  ;;  %v9371_v6 = vpop.f32.mrb[249].mxu1  ;;  %16661 = vmatpush3.bf16.msra.mxu1 %v16660_v16 }
 0xf6f   :  { %v16684_v12 = vpack.c.bf16 %v14568_v61, %v9371_v6  ;;  %16663 = vmatprep.subr.bf16.mxu1 %v16662_v38 }
 0xf70   :  { %v22738_v30 = vpop.f32.mrb[238].mxu0 }
 0xf71   :  { %v14571_v17 = vpop.f32.mrb[250].mxu1  ;;  %v22740_v51 = vpop.f32.mrb[239].mxu0 }
 0xf72   :  { %v16696_v8 = vpack.c.bf16 %v22738_v30, %v22740_v51  ;;  %v9381_v43 = vpop.f32.mrb[251].mxu1  ;;  %16665 = vmatpush3.bf16.msra.mxu1 %v16664_v23 }
 0xf73   :  { %v16688_v15 = vpack.c.bf16 %v14571_v17, %v9381_v43  ;;  %16667 = vmatprep.subr.bf16.mxu1 %v16666_v27 }
 0xf74   :  { %v22747_v56 = vpop.f32.mrb[240].mxu0 }
 0xf75   :  { %v22749_v49 = vpop.f32.mrb[241].mxu0  ;;  %v14597_v58 = vpop.f32.mrb[252].mxu1 }
 0xf76   :  { %v16700_v16 = vpack.c.bf16 %v22747_v56, %v22749_v49  ;;  %v9571_v53 = vpop.f32.mrb[253].mxu1  ;;  %16669 = vmatpush3.bf16.msra.mxu1 %v16668_v57 }
 0xf77   :  { %v16678_v21 = vpack.c.bf16 %v14597_v58, %v9571_v53  ;;  %16671 = vmatprep.subr.bf16.mxu1 %v16670_v46 }
 0xf78   :  { %v22756_v40 = vpop.f32.mrb[242].mxu0 }
 0xf79   :  { %v22758_v60 = vpop.f32.mrb[243].mxu0  ;;  %v14600_v18 = vpop.f32.mrb[254].mxu1 }
 0xf7a   :  { %v16704_v23 = vpack.c.bf16 %v22756_v40, %v22758_v60  ;;  %v9581_v11 = vpop.f32.mrb[255].mxu1  ;;  %16673 = vmatpush3.bf16.msra.mxu1 %v16672_v2 }
 0xf7b   :  { %v16682_v3 = vpack.c.bf16 %v14600_v18, %v9581_v11  ;;  %16706 = vmatprep.subr.bf16.mxu1 %v23740_v55 }
 0xf7c   :  { %v14590_v34 = vpop.f32.mrb[244].mxu0 }
 0xf7d   :  { %v9496_v0 = vpop.f32.mrb[245].mxu0  ;;  %v14603_v57 = vpop.f32.mrb[0].mxu1  ;;  %10030 = vmatmul.mubr.f32.vlgmr.msra.gmra.mrb[16].mxu1 %v22313_v9 }
 0xf7e   :  { %v16674_v52 = vpack.c.bf16 %v14590_v34, %v9496_v0  ;;  %v9591_v31 = vpop.f32.mrb[1].mxu1  ;;  %10034 = vmatprep.mubr.f32.mxu1 %v22321_v28 }
 0xf7f   :  { %v16686_v19 = vpack.c.bf16 %v14603_v57, %v9591_v31 }
 0xf80   :  { %v14616_v24 = vpop.f32.mrb[246].mxu0  ;;  %16675 = vmatprep.subr.bf16.mxu0 %v16674_v52 }
 0xf81   :  { %v14606_v14 = vpop.f32.mrb[2].mxu1  ;;  %v9686_v39 = vpop.f32.mrb[247].mxu0  ;;  %16677 = vmatpush3.bf16.msra.mxu0 %v16676_v50  ;;  %10035 = vmatmul.mubr.f32.gmra.mrb[18].mxu1 %v22332_v48 }
 0xf82   :  { %v16698_v4 = vpack.c.bf16 %v14616_v24, %v9686_v39  ;;  %v9601_v44 = vpop.f32.mrb[3].mxu1  ;;  %16679 = vmatprep.subr.bf16.mxu0 %v16678_v21  ;;  %11322 = vmatprep.mubr.msk.f32.mxu1 %vm8659_vm14, %v22339_v33 }
 0xf83   :  { %v16690_v2 = vpack.c.bf16 %v14606_v14, %v9601_v44 }
 0xf84   :  { %v14619_v9 = vpop.f32.mrb[248].mxu0 }
 0xf85   :  { %v14609_v63 = vpop.f32.mrb[4].mxu1  ;;  %v9696_v46 = vpop.f32.mrb[249].mxu0  ;;  %16681 = vmatpush3.bf16.msra.mxu0 %v16680_v26 }
 0xf86   :  { %v16702_v28 = vpack.c.bf16 %v14619_v9, %v9696_v46  ;;  %v9611_v47 = vpop.f32.mrb[5].mxu1  ;;  %16683 = vmatprep.subr.bf16.mxu0 %v16682_v3 }
 0xf87   :  { %v16694_v20 = vpack.c.bf16 %v14609_v63, %v9611_v47 }
 0xf88   :  { %v14622_v7 = vpop.f32.mrb[250].mxu0 }
 0xf89   :  { %v9706_v38 = vpop.f32.mrb[251].mxu0  ;;  %v14635_v42 = vpop.f32.mrb[6].mxu1  ;;  %16685 = vmatpush3.bf16.msra.mxu0 %v16684_v12 }
 0xf8a   :  { %v16707_v48 = vpack.c.bf16 %v14622_v7, %v9706_v38  ;;  %v9801_v50 = vpop.f32.mrb[7].mxu1  ;;  %16687 = vmatprep.subr.bf16.mxu0 %v16686_v19 }
 0xf8b   :  { %v16716_v41 = vpack.c.bf16 %v14635_v42, %v9801_v50 }
 0xf8c   :  { %v14625_v29 = vpop.f32.mrb[252].mxu0  ;;  %16708 = vmatpush1.bf16.msra.mxu1 %v16707_v48 }
 0xf8d   :  { %v9716_v33 = vpop.f32.mrb[253].mxu0  ;;  %v14638_v59 = vpop.f32.mrb[8].mxu1  ;;  %16689 = vmatpush3.bf16.msra.mxu0 %v16688_v15  ;;  %16709 = vmatprep.subr.bf16.mxu1 %v23740_v55 }
 0xf8e   :  { %v16710_v27 = vpack.c.bf16 %v14625_v29, %v9716_v33  ;;  %v9811_v13 = vpop.f32.mrb[9].mxu1  ;;  %16691 = vmatprep.subr.bf16.mxu0 %v16690_v2 }
 0xf8f   :  { %v16719_v26 = vpack.c.bf16 %v14638_v59, %v9811_v13 }
 0xf90   :  { %v14628_v61 = vpop.f32.mrb[254].mxu0  ;;  %16711 = vmatpush1.bf16.msra.mxu1 %v16710_v27 }
 0xf91   :  { %v9726_v6 = vpop.f32.mrb[255].mxu0  ;;  %v14641_v17 = vpop.f32.mrb[10].mxu1  ;;  %16693 = vmatpush3.bf16.msra.mxu0 %v16692_v1  ;;  %16712 = vmatprep.subr.bf16.mxu1 %v23740_v55 }
 0xf92   :  { %v16713_v12 = vpack.c.bf16 %v14628_v61, %v9726_v6  ;;  %v9821_v43 = vpop.f32.mrb[11].mxu1  ;;  %16695 = vmatprep.subr.bf16.mxu0 %v16694_v20 }
 0xf93   :  { %v16722_v15 = vpack.c.bf16 %v14641_v17, %v9821_v43 }
 0xf94   :  { %v14654_v58 = vpop.f32.mrb[0].mxu0  ;;  %16714 = vmatpush1.bf16.msra.mxu1 %v16713_v12 }
 0xf95   :  { %v14644_v53 = vpop.f32.mrb[12].mxu1  ;;  %v9916_v21 = vpop.f32.mrb[1].mxu0  ;;  %16697 = vmatpush3.bf16.msra.mxu0 %v16696_v8  ;;  %16715 = vmatprep.subr.bf16.mxu1 %v23740_v55 }
 0xf96   :  { %v16731_v18 = vpack.c.bf16 %v14654_v58, %v9916_v21  ;;  %v9831_v11 = vpop.f32.mrb[13].mxu1  ;;  %16699 = vmatprep.subr.bf16.mxu0 %v16698_v4 }
 0xf97   :  { %v16725_v32 = vpack.c.bf16 %v14644_v53, %v9831_v11 }
 0xf98   :  { %v14657_v10 = vpop.f32.mrb[2].mxu0  ;;  %16717 = vmatpush1.bf16.msra.mxu1 %v16716_v41 }
 0xf99   :  { %v14647_v1 = vpop.f32.mrb[14].mxu1  ;;  %v9926_v3 = vpop.f32.mrb[3].mxu0  ;;  %16701 = vmatpush3.bf16.msra.mxu0 %v16700_v16  ;;  %16718 = vmatprep.subr.bf16.mxu1 %v23740_v55 }
 0xf9a   :  { %v16734_v34 = vpack.c.bf16 %v14657_v10, %v9926_v3  ;;  %v9841_v0 = vpop.f32.mrb[15].mxu1  ;;  %16703 = vmatprep.subr.bf16.mxu0 %v16702_v28 }
 0xf9b   :  { %v16728_v30 = vpack.c.bf16 %v14647_v1, %v9841_v0  ;;  %v10190_v0 = vld [vmem:[%s22862_s16] sm:$0xff] }
 0xf9c   :  { %v14660_v51 = vpop.f32.mrb[4].mxu0  ;;  %16720 = vmatpush1.bf16.msra.mxu1 %v16719_v26 }
 0xf9d   :  { %v9936_v8 = vpop.f32.mrb[5].mxu0  ;;  %16705 = vmatpush3.bf16.msra.mxu0 %v16704_v23  ;;  %16721 = vmatprep.subr.bf16.mxu1 %v23740_v55 }
 0xf9e   :  { %v16737_v57 = vpack.c.bf16 %v14660_v51, %v9936_v8  ;;  %v10191_v8 = vld [vmem:[%s22862_s16 + $0x8] sm:$0xff] }
 0xfa0   :  { %v14663_v52 = vpop.f32.mrb[6].mxu0  ;;  %10105 = vmatmul.mubr.f32.vlgmr.msra.gmra.mrb[10].mxu0 %v22395_v45  ;;  %16723 = vmatpush1.bf16.msra.mxu1 %v16722_v15 }
 0xfa1   :  { %v9946_v56 = vpop.f32.mrb[7].mxu0  ;;  %16724 = vmatprep.subr.bf16.mxu1 %v23740_v55  ;;  %10109 = vmatprep.mubr.f32.mxu0 %v22402_v62 }
 0xfa2   :  { %v16740_v49 = vpack.c.bf16 %v14663_v52, %v9946_v56 }
 0xfa4   :  { %v14666_v16 = vpop.f32.mrb[8].mxu0  ;;  %16726 = vmatpush1.bf16.msra.mxu1 %v16725_v32  ;;  %10110 = vmatmul.mubr.f32.gmra.mrb[12].mxu0 %v22413_v37 }
 0xfa5   :  { %v9956_v31 = vpop.f32.mrb[9].mxu0  ;;  %16727 = vmatprep.subr.bf16.mxu1 %v23740_v55 }
 0xfa6   :  { %v16743_v40 = vpack.c.bf16 %v14666_v16, %v9956_v31  ;;  %v10192_v16 = vld [vmem:[%s22863_s17] sm:$0xff] }
 0xfa8   :  { %16729 = vmatpush1.bf16.msra.mxu1 %v16728_v30 }
 0xfa9   :  { %16730 = vmatprep.subr.bf16.mxu1 %v23740_v55 }
 0xfac   :  { %16732 = vmatpush1.bf16.msra.mxu1 %v16731_v18 }
 0xfad   :  { %16733 = vmatprep.subr.bf16.mxu1 %v23740_v55 }
 0xfb0   :  { %16735 = vmatpush1.bf16.msra.mxu1 %v16734_v34 }
 0xfb1   :  { %16736 = vmatprep.subr.bf16.mxu1 %v23740_v55 }
 0xfb4   :  { %16738 = vmatpush1.bf16.msra.mxu1 %v16737_v57 }
 0xfb5   :  { %16739 = vmatprep.subr.bf16.mxu1 %v23740_v55 }
 0xfb8   :  { %16741 = vmatpush1.bf16.msra.mxu1 %v16740_v49  ;;  %v10193_v49 = vld [vmem:[%s22863_s17 + $0x8] sm:$0xff] }
 0xfb9   :  { %16742 = vmatprep.subr.bf16.mxu1 %v23740_v55 }
 0xfbc   :  { %16744 = vmatpush1.bf16.msra.mxu1 %v16743_v40 }
 0xfbf   :  { %10180 = vmatmul.mubr.f32.vlgmr.msra.gmra.mrb[20].mxu1 %v22495_v35 }
 0xfc0   :  { %11323 = vmatprep.mubr.msk.f32.mxu1 %vm8659_vm14, %v22503_v22 }
 0xfc3   :  { %10185 = vmatmul.mubr.f32.gmra.mrb[22].mxu1 %v22514_v25 }
 0xfe1   :  { %v10196_v50 = vpop.xlane.xlu0 %10195 }
 0xfe5   :  { %v10199_v41 = vpop.xlane.xlu1 %10198  ;;  %v10206_v29 = vpop.xlane.xlu0 %10205 }
 0xfe9   :  { %v10209_v33 = vpop.xlane.xlu1 %10208 }
0x1050   :  { %v13566_v45 = vpop.f32.mrb[16].mxu1 }
0x1051   :  { %v13567_v62 = vpop.f32.mrb[17].mxu1 }
0x1052   :  { %v13568_v37 = vadd.f32 %v13567_v62, %v13566_v45 }
0x1054   :  { %v13569_v60 = vpop.f32.mrb[18].mxu1 }
0x1055   :  { %v13570_v23 = vpop.f32.mrb[19].mxu1 }
0x1056   :  { %v13571_v19 = vadd.f32 %v13570_v23, %v13569_v60 }
0x1073   :  { %v13604_v24 = vpop.f32.mrb[10].mxu0 }
0x1074   :  { %v13605_v14 = vpop.f32.mrb[11].mxu0 }
0x1075   :  { %v13606_v39 = vadd.f32 %v13605_v14, %v13604_v24 }
0x1077   :  { %v13607_v4 = vpop.f32.mrb[12].mxu0  ;;  %v10107_v44 = vadd.f32 %v13606_v39, %v13568_v37 }
0x1078   :  { %v13608_v55 = vpop.f32.mrb[13].mxu0 }
0x1079   :  { %v13609_v2 = vadd.f32 %v13608_v55, %v13607_v4 }
0x107b   :  { %v10112_v9 = vadd.f32 %v13609_v2, %v13571_v19 }
0x1092   :  { %v10181_v35 = vpop.f32.mrb[20].mxu1 }
0x1093   :  { %v10182_v63 = vadd.f32 %v10181_v35, %v10107_v44  ;;  %v10183_v46 = vpop.f32.mrb[21].mxu1  ;;  %v10290_v35 = vld [vmem:[%s22864_s18] sm:$0xff] }
0x1095   :  { %v10212_v22 = vsel %vm7069_vm1, %v10182_v63, 0.0  ;;  %v10220_v25 = vmul.f32 %v10182_v63, %v10182_v63 }
0x1096   :  { %v10186_v28 = vpop.f32.mrb[22].mxu1  ;;  %10213 = vadd.xlane.f32.xlu0 %v10212_v22 }
0x1097   :  { %v10187_v47 = vadd.f32 %v10186_v28, %v10112_v9  ;;  %v10188_v20 = vpop.f32.mrb[23].mxu1  ;;  %v10222_v38 = vsel %vm7069_vm1, %v10220_v25, 0.0  ;;  %v10291_v9 = vld [vmem:[%s22864_s18 + $0x8] sm:$0xff]  ;;  %s16818_s18 = smov [#allocation2]  }
0x1098   :  { %s10354_s13 = sshll.u32 %s16818_s18, 4  ;;  %s10355_s13 = int_to_ptr.vmem [resolvable:$true] %s10354_s13 }
0x1099   :  { %v10215_v7 = vsel %vm7069_vm1, %v10187_v47, 0.0  ;;  %v10221_v42 = vmul.f32 %v10187_v47, %v10187_v47  ;;  %s16791_s27 = scalar_lea.vmem %s10355_s13, 16  ;;  %s16795_s28 = scalar_lea.vmem %s10355_s13, 32 }
0x109a   :  { %10216 = vadd.xlane.f32.xlu1 %v10215_v7  ;;  %10223 = vadd.xlane.f32.xlu0 %v10222_v38  ;;  %p16792_p0 = scmp.ne.s32.totalorder %s10355_s13, %s16791_s27  ;;  %p16796_p1 = scmp.lt.s32.totalorder %s10355_s13, %s10355_s13 }
0x109b   :  { %v10225_v48 = vsel %vm7069_vm1, %v10221_v42, 0.0  ;;  %p16797_p2 = scmp.lt.s32.totalorder %s16795_s28, %s16791_s27 }
0x109d   :  { %p16798_p3 = por %p16797_p2, %p16796_p1 }
0x109e   :  { %10226 = vadd.xlane.f32.xlu1 %v10225_v48 }
0x109f   :  { %p16799_p4 = pnand %p16798_p3, %p16792_p0 }
0x1123   :  { %v10214_v59 = vpop.xlane.xlu0 %10213 }
0x1124   :  { %v10218_v27 = vadd.f32 %v10214_v59, %v10196_v50 }
0x1126   :  { %v10230_v13 = vmul.f32 0.03125, %v10218_v27 }
0x1127   :  { %v10217_v26 = vpop.xlane.xlu1 %10216  ;;  %v10224_v61 = vpop.xlane.xlu0 %10223 }
0x1128   :  { %v10219_v6 = vadd.f32 %v10217_v26, %v10199_v41  ;;  %v10228_v17 = vadd.f32 %v10224_v61, %v10206_v29  ;;  %v10234_v12 = vmul.f32 %v10230_v13, %v10230_v13 }
0x112a   :  { %v10231_v43 = vmul.f32 0.03125, %v10219_v6  ;;  %v10232_v15 = vmul.f32 0.03125, %v10228_v17 }
0x112b   :  { %v10227_v58 = vpop.xlane.xlu1 %10226 }
0x112c   :  { %v10236_v53 = vsub.f32 %v10232_v15, %v10234_v12  ;;  %v10229_v21 = vadd.f32 %v10227_v58, %v10209_v33  ;;  %v10235_v18 = vmul.f32 %v10231_v43, %v10231_v43 }
0x112e   :  { %v10238_v11 = vmax.f32 %v10236_v53, 0.0  ;;  %v10233_v32 = vmul.f32 0.03125, %v10229_v21 }
0x1130   :  { %v10240_v10 = vadd.f32 1e-05, %v10238_v11  ;;  %v10237_v1 = vsub.f32 %v10233_v32, %v10235_v18 }
0x1132   :  { %16779 = vrsqrt.f32 %v10240_v10  ;;  %v10239_v3 = vmax.f32 %v10237_v1, 0.0 }
0x1134   :  { %v10241_v34 = vadd.f32 1e-05, %v10239_v3 }
0x1136   :  { %16781 = vrsqrt.f32 %v10241_v34 }
0x113c   :  { %v16780_v30 = vpop.eup %16779 }
0x113d   :  { %v10244_v51 = vmul.f32 %v16780_v30, %v10190_v0 }
0x113f   :  { %10252 = vperm.xlu0 %16749, %v10244_v51   ;;  %v10246_v52 = vmul.f32 %v10244_v51, %v10230_v13 }
0x1140   :  { %v16782_v57 = vpop.eup %16781 }
0x1141   :  { %v10245_v56 = vmul.f32 %v16782_v57, %v10191_v8  ;;  %v10248_v45 = vsub.f32 %v10192_v16, %v10246_v52 }
0x1143   :  { %10257 = vperm.xlu1 %16750, %v10245_v56   ;;  %v10247_v31 = vmul.f32 %v10245_v56, %v10231_v43 }
0x1145   :  { %v10249_v40 = vsub.f32 %v10193_v49, %v10247_v31 }
0x1147   :  { %10269 = vperm.xlu0 %16749, %v10249_v40   ;;  %10264 = vperm.xlu1 %16750, %v10248_v45  }
0x11be   :  { %v10253_v62 = vpop.permute.xlu0 %10252 }
0x11bf   :  { %v10260_v60 = vmul.f32 %v10253_v62, %v22700_v36  ;;  %v10280_v23 = vmul.f32 %v10253_v62, %v10182_v63 }
0x11c2   :  { %v10258_v37 = vpop.permute.xlu1 %10257 }
0x11c3   :  { %v10261_v19 = vmul.f32 %v10258_v37, %v22712_v54  ;;  %v10281_v24 = vmul.f32 %v10258_v37, %v10187_v47 }
0x11c6   :  { %v10270_v14 = vpop.permute.xlu0 %10269  ;;  %v10265_v39 = vpop.permute.xlu1 %10264 }
0x11c7   :  { %v10273_v4 = vadd.f32 %v10270_v14, %v10261_v19  ;;  %v10283_v44 = vadd.f32 %v10281_v24, %v10270_v14  ;;  %v10272_v55 = vadd.f32 %v10265_v39, %v10260_v60  ;;  %v10282_v2 = vadd.f32 %v10280_v23, %v10265_v39 }
0x11c9   :  { %v10277_v46 = vmul.f32 0.2, %v10273_v4  ;;  %vm10285_vm10 = vcmp.gt.f32.partialorder %v10283_v44, 0.0  ;;  %v10287_v36 = vmul.f32 0.2, %v10283_v44  ;;  %vm10274_vm11 = vcmp.gt.f32.partialorder %v10272_v55, 0.0 }
0x11ca   :  { %v10276_v54 = vmul.f32 0.2, %v10272_v55  ;;  %v10286_v63 = vmul.f32 0.2, %v10282_v2  ;;  %vm10275_vm12 = vcmp.gt.f32.partialorder %v10273_v4, 0.0  ;;  %vm10284_vm13 = vcmp.gt.f32.partialorder %v10282_v2, 0.0 }
0x11cb   :  { %v10279_v22 = vsel %vm10275_vm12, %v10273_v4, %v10277_v46  ;;  %v10289_v47 = vsel %vm10285_vm10, %v10283_v44, %v10287_v36 }
0x11cc   :  { %v10293_v25 = vmul.f32 %v10291_v9, %v10279_v22  ;;  %v10278_v28 = vsel %vm10274_vm11, %v10272_v55, %v10276_v54  ;;  %v10288_v20 = vsel %vm10284_vm13, %v10282_v2, %v10286_v63  ;;  %v10320_v50 = vmul.f32 %v10291_v9, %v10289_v47 }
0x11cd   :  { %v10292_v7 = vmul.f32 %v10290_v35, %v10278_v28  ;;  %v10319_v42 = vmul.f32 %v10290_v35, %v10288_v20 }
0x11ce   :  { %v10297_v38 = vsel %vm7069_vm1, %v10293_v25, 0.0  ;;  %v10324_v29 = vsel %vm7069_vm1, %v10320_v50, 0.0 }
0x11cf   :  { %10298 = vadd.xlane.f32.xlu0 %v10297_v38  ;;  %v10294_v48 = vsel %vm7069_vm1, %v10292_v7, 0.0  ;;  %v10321_v41 = vsel %vm7069_vm1, %v10319_v42, 0.0 }
0x11d0   :  { %10295 = vadd.xlane.f32.xlu1 %v10294_v48 }
0x11d3   :  { %10322 = vadd.xlane.f32.xlu0 %v10321_v41 }
0x11d4   :  { %10325 = vadd.xlane.f32.xlu1 %v10324_v29 }
0x125c   :  { %v10299_v33 = vpop.xlane.xlu0 %10298 }
0x125d   :  { %v10296_v59 = vpop.xlane.xlu1 %10295 }
0x125e   :  { %v10300_v27 = vadd.f32 %v10299_v33, %v10296_v59 }
0x1260   :  { %v10301_v13 = vrot.slane %v10300_v27, 4  ;;  %v10323_v26 = vpop.xlane.xlu0 %10322 }
0x1261   :  { %v10326_v61 = vpop.xlane.xlu1 %10325 }
0x1262   :  { %v10302_v6 = vadd.f32 %v10301_v13, %v10300_v27  ;;  %v10327_v17 = vadd.f32 %v10326_v61, %v10323_v26 }
0x1264   :  { %v10303_v12 = vrot.slane %v10302_v6, 2  ;;  %v10328_v43 = vrot.slane %v10327_v17, 4 }
0x1266   :  { %v10304_v15 = vadd.f32 %v10303_v12, %v10302_v6  ;;  %v10329_v58 = vadd.f32 %v10328_v43, %v10327_v17 }
0x1268   :  { %v10305_v53 = vrot.slane %v10304_v15, 1  ;;  %v10330_v21 = vrot.slane %v10329_v58, 2 }
0x126a   :  { %v10306_v18 = vadd.f32 %v10305_v53, %v10304_v15  ;;  %v10331_v11 = vadd.f32 %v10330_v21, %v10329_v58 }
0x126c   :  { %v10307_v32 = vand.u32 2147483647, %v10306_v18  ;;  %v10332_v10 = vrot.slane %v10331_v11, 1  ;;  %vm10311_vm1 = vcmp.ge.f32.partialorder %v10306_v18, 0.0 }
0x126e   :  { %v10308_v1 = vsub.f32 0.0, %v10307_v32  ;;  %v10333_v3 = vadd.f32 %v10332_v10, %v10331_v11 }
0x1270   :  { %v10309_v34 = vmul.f32 1.442695, %v10308_v1  ;;  %v10334_v0 = vand.u32 2147483647, %v10333_v3  ;;  %vm10338_vm14 = vcmp.ge.f32.partialorder %v10333_v3, 0.0 }
0x1272   :  { %16783 = vpow2.f32 %v10309_v34  ;;  %v10335_v30 = vsub.f32 0.0, %v10334_v0 }
0x1274   :  { %v10336_v51 = vmul.f32 1.442695, %v10335_v30 }
0x1276   :  { %16785 = vpow2.f32 %v10336_v51 }
0x127c   :  { %v16784_v8 = vpop.eup %16783 }
0x127d   :  { %v10312_v57 = vadd.f32 1.0, %v16784_v8 }
0x127f   :  { %16787 = vrcp.f32 %v10312_v57 }
0x1280   :  { %v16786_v52 = vpop.eup %16785 }
0x1281   :  { %v10339_v56 = vadd.f32 1.0, %v16786_v52 }
0x1283   :  { %16789 = vrcp.f32 %v10339_v56 }
0x1289   :  { %v16788_v49 = vpop.eup %16787 }
0x128a   :  { %v10315_v16 = vmul.f32 %v16788_v49, %v16784_v8 }
0x128c   :  { %v10316_v40 = vsel %vm10311_vm1, %v16788_v49, %v10315_v16 }
0x128d   :  { %v16790_v31 = vpop.eup %16789  ;;  %v10317_v37 = vsel %vm7546_vm3, %v10316_v40, 0.0 }
0x128e   :  { %v10342_v45 = vmul.f32 %v16790_v31, %v16786_v52 }
0x1290   :  { %v10343_v62 = vsel %vm10338_vm14, %v16790_v31, %v10342_v45 }
0x1291   :  { %v10344_v60 = vsel %vm8891_vm5, %v10343_v62, 0.0 }
0x1292   :  { %v10345_v23 = vadd.f32 %v10344_v60, %v10317_v37 }
0x1294   :  { %10347 = vst.msk [vmem:[#allocation2] sm:$0x1] %vm10346_vm15, %v10345_v23 }
0x1295   :  { %16802 = shalt.err (!%p16799_p4)
}
0x1296   :  { %s16803_s30 = scalar_lea.hbm %s22865_s19, 16 }
0x1297   :  { %p16804_p5 = scmp.ne.s32.totalorder %s22865_s19, %s16803_s30  ;;  %p16807_p6 = scmp.lt.u32.totalorder %s16803_s30, %s22865_s19 }
0x1299   :  { %p16809_p7 = pnand %p16807_p6, %p16804_p5 }
0x129b   :  { %16812 = shalt.err (!%p16809_p7)
}
0x129c   :  { %10357 = dma.vmem_to_hbm [thread:$0]  %s10355_s13, 16, %s22865_s19, [#allocation3]  }
0x129d   :  { %16813 = dma.done.wait [#allocation3], 16  }
0x129e   :  { %16814 = vsyncadd [#allocation3], 4294967280 }
0x129f   :  { %10361 = vsyncpa [#allocation3], 1 }

</bundles_post_ra>
